<compile_context>
chip_gen: v7x
topology: tpu7x:2x2x1
jax: 0.10.0
libtpu: 0.0.40
codegen_flags: <defaults>
</compile_context>

<pallas_src>
import jax
import jax.numpy as jnp
from jax.experimental import pallas as pl
from jax.experimental.pallas import tpu as pltpu

Z_DIM = 100
NUM_CLASSES = 10
OUT_FEATURES = 256 * 7 * 7          # 12544
K_RAW = Z_DIM + NUM_CLASSES         # 110
K_PAD = 128                         # pad contraction dim to lane-friendly size
BN_EPS = 1e-5


def _pick_num_tiles():
    """1 feature tile on single-TC chips (v5e/v6e), 2 on dual-TC v7x."""
    try:
        kind = jax.devices()[0].device_kind.lower()
    except Exception:
        kind = ""
    return 2 if ("v7" in kind or "7x" in kind) else 1


N_TILES = _pick_num_tiles()
TILE_N = OUT_FEATURES // N_TILES     # 12544 or 6272; both % 128 == 0


def _fc_bn_relu_kernel(x_ref, w_ref, gb_ref, o_ref):
    """Fused Linear (no bias) + BatchNorm1d (batch stats) + ReLU, one feature tile.

    x_ref:  (B, K_PAD)      bf16  padded input, resident every step
    w_ref:  (K_PAD, TILE_N) bf16  weight tile (pre-transposed, pre-padded)
    gb_ref: (2, TILE_N)     f32   row 0 = BN gamma, row 1 = BN beta
    o_ref:  (B, TILE_N)     f32   output tile
    """
    # Linear: bf16 x bf16 on the MXU with f32 accumulate.
    y = jnp.dot(x_ref[...], w_ref[...], preferred_element_type=jnp.float32)

    # BatchNorm1d (training mode), one-pass batch statistics over the batch
    # (biased variance, as PyTorch uses for normalization).  Cross-sublane
    # reduce -> XLU, rsqrt -> EUP; both free slots in this HBM-bound kernel.
    inv_b = 1.0 / y.shape[0]
    mean = jnp.sum(y, axis=0, keepdims=True) * inv_b
    mean_sq = jnp.sum(y * y, axis=0, keepdims=True) * inv_b
    # NOTE: E[y^2] - mean^2 risks cancellation if |mean| >> std; fine for this
    # near-zero-mean random projection.  Clamp at 0 for safety.
    var = jnp.maximum(mean_sq - mean * mean, 0.0)
    inv_std = jax.lax.rsqrt(var + BN_EPS)

    # Fold BN affine into a single fused multiply-add per element.
    gamma = gb_ref[0:1, :]
    beta = gb_ref[1:2, :]
    scale = gamma * inv_std
    shift = beta - mean * scale
    o_ref[...] = jnp.maximum(y * scale + shift, 0.0).astype(o_ref.dtype)


@jax.jit
def client_gen_forward(x, labels, params):
    """Forward pass of ClientGen.

    x:      (B, Z_DIM) float32
    labels: (B,) int32 in [0, NUM_CLASSES)
    returns (B, 256, 7, 7) float32
    """
    emb_table = params["emb"]          # (NUM_CLASSES, NUM_CLASSES) f32
    w_kn = params["w_kn"]              # (K_PAD, OUT_FEATURES) bf16, pre-layouted
    gb = params["gb"]                  # (2, OUT_FEATURES) f32: [gamma; beta]

    B = x.shape[0]

    # --- glue: embedding lookup + concat + K padding + bf16 cast ---------
    # Tiny (B x 128) ops; they fuse into one small XLA fusion ahead of the call.
    label_embed = jnp.take(emb_table, labels, axis=0)          # (B, 10)
    x_cat = jnp.concatenate([x, label_embed], axis=1)          # (B, 110)
    x_pad = jnp.pad(x_cat, ((0, 0), (0, K_PAD - K_RAW)))       # (B, 128)
    x_pad = x_pad.astype(jnp.bfloat16)

    cost = pl.CostEstimate(
        flops=2 * B * K_PAD * OUT_FEATURES,
        transcendentals=OUT_FEATURES,
        bytes_accessed=(w_kn.size * 2            # bf16 weights (dominant stream)
                        + x_pad.size * 2         # bf16 activations
                        + gb.size * 4            # gamma + beta
                        + B * OUT_FEATURES * 4), # f32 output
    )

    grid = (N_TILES,)

    # TODO(synk): optional fp8 (float8_e4m3) weight stream for v7x (halves the
    # dominant HBM stream) is intentionally omitted -- adds quantization error
    # on top of the bf16 deviation and is not portable to v5e/v6e MXUs.
    out_2d = pl.pallas_call(
        _fc_bn_relu_kernel,
        out_shape=jax.ShapeDtypeStruct((B, OUT_FEATURES), jnp.float32),
        grid_spec=pltpu.PrefetchScalarGridSpec(
            num_scalar_prefetch=0,
            grid=grid,
            in_specs=[
                pl.BlockSpec((B, K_PAD), lambda j: (0, 0)),
                pl.BlockSpec((K_PAD, TILE_N), lambda j: (0, j)),
                pl.BlockSpec((2, TILE_N), lambda j: (0, j)),
            ],
            out_specs=pl.BlockSpec((B, TILE_N), lambda j: (0, j)),
        ),
        compiler_params=pltpu.CompilerParams(
            dimension_semantics=("parallel",),
        ),
        cost_estimate=cost,
    )(x_pad, w_kn, gb)

    # --- glue: reshape to NCHW (matches torch .view(-1, 256, 7, 7)) ------
    # Row-major reshape of a lane-dense (B, 12544) slab; kept for semantic
    # fidelity with the module.  If a downstream consumer prefers the 2-D
    # slab, return out_2d directly instead.
    return out_2d.reshape(B, 256, 7, 7)


def init_params(key):
    """Parameter init matching the module's shapes, pre-layouted for the kernel."""
    k_emb, k_w = jax.random.split(key, 2)
    # Embedding ~ N(0,1) (PyTorch default).
    emb = jax.random.normal(k_emb, (NUM_CLASSES, NUM_CLASSES), jnp.float32)
    # Linear weight: Kaiming-uniform-ish bound 1/sqrt(fan_in), PyTorch layout.
    bound = 1.0 / (K_RAW ** 0.5)
    w = jax.random.uniform(k_w, (OUT_FEATURES, K_RAW), jnp.float32, -bound, bound)
    # NOTE: the Linear bias is intentionally omitted -- training-mode BatchNorm
    # subtracts the per-feature mean, so a per-feature bias cancels exactly.
    # (If eval-mode / running-stats BN is ever needed, the bias must return.)
    # Pre-transpose to (K, N), zero-pad K to 128, and store as bf16 once here
    # (hoisted out of the per-call forward; halves the weight HBM stream).
    w_kn = jnp.pad(w.T, ((0, K_PAD - K_RAW), (0, 0))).astype(jnp.bfloat16)
    # BatchNorm1d: weight=1, bias=0 (PyTorch default init), packed as one
    # (2, N) array -> one DMA stream in the kernel.
    gb = jnp.concatenate(
        [jnp.ones((1, OUT_FEATURES), jnp.float32),
         jnp.zeros((1, OUT_FEATURES), jnp.float32)], axis=0)
    return {"emb": emb, "w_kn": w_kn, "gb": gb}


if __name__ == "__main__":
    key = jax.random.PRNGKey(0)
    k_params, k_x, k_lbl = jax.random.split(key, 3)

    params = init_params(k_params)

    B = 8  # small batch, multiple of 8 (sublane) for clean f32 tiling; >1 for BN
    x = jax.random.normal(k_x, (B, Z_DIM), jnp.float32)
    labels = jax.random.randint(k_lbl, (B,), 0, NUM_CLASSES, jnp.int32)

    out = client_gen_forward(x, labels, params)
    jax.block_until_ready(out)

    assert out.shape == (B, 256, 7, 7), out.shape
    assert out.dtype == jnp.float32

    # Sanity check against a pure-JAX reference of the same math
    # (same bf16 weight/activation stream, f32 accumulate + f32 BN).
    emb = jnp.take(params["emb"], labels, axis=0)
    xc = jnp.concatenate([x, emb], axis=1)
    x_ref = jnp.pad(xc, ((0, 0), (0, K_PAD - K_RAW))).astype(jnp.bfloat16)
    x_ref = x_ref.astype(jnp.float32)
    w_ref = params["w_kn"].astype(jnp.float32)
    y = jnp.dot(x_ref, w_ref, precision=jax.lax.Precision.HIGHEST)
    mu = jnp.mean(y, axis=0, keepdims=True)
    var = jnp.mean((y - mu) ** 2, axis=0, keepdims=True)
    gamma = params["gb"][0:1, :]
    beta = params["gb"][1:2, :]
    ref = jnp.maximum(
        gamma * (y - mu) / jnp.sqrt(var + BN_EPS) + beta, 0.0
    ).reshape(B, 256, 7, 7)
    assert jnp.allclose(out, ref, atol=1e-3, rtol=1e-3), (
        float(jnp.max(jnp.abs(out - ref)))
    )

    print("KERNEL_OK")
</pallas_src>

<mosaic_0001>
module attributes {stable_mosaic.version = 11 : i64} {
  func.func @_fc_bn_relu_kernel(%arg0: i32, %arg1: memref<8x128xbf16, #tpu.memory_space<vmem>>, %arg2: memref<128x12544xbf16, #tpu.memory_space<vmem>>, %arg3: memref<2x12544xf32, #tpu.memory_space<vmem>>, %arg4: memref<8x12544xf32, #tpu.memory_space<vmem>>) attributes {dimension_semantics = [#tpu.dimension_semantics<parallel>], iteration_bounds = array<i64: 1>, scalar_prefetch = 0 : i64, scratch_operands = 0 : i64, tpu.core_type = #tpu.core_type<tc>, window_params = [{pipeline_mode = #tpu.pipeline_mode<synchronous>, transform_indices = @transform_0, window_bounds = array<i64: 8, 128>}, {transform_indices = @transform_1, window_bounds = array<i64: 128, 12544>}, {transform_indices = @transform_2, window_bounds = array<i64: 2, 12544>}, {transform_indices = @transform_3, window_bounds = array<i64: 8, 12544>}]} {
    %c0 = arith.constant 0 : index
    %c0_0 = arith.constant 0 : index
    %0 = vector.load %arg1[%c0, %c0_0] : memref<8x128xbf16, #tpu.memory_space<vmem>>, vector<8x128xbf16>
    %c0_1 = arith.constant 0 : index
    %c0_2 = arith.constant 0 : index
    %1 = vector.load %arg2[%c0_1, %c0_2] : memref<128x12544xbf16, #tpu.memory_space<vmem>>, vector<128x12544xbf16>
    %cst = arith.constant dense<0.000000e+00> : vector<8x12544xf32>
    %2 = tpu.matmul %0, %1, %cst {dimension_numbers = #tpu.dot_dimension_numbers<[1], [0], [0], [1], [0, 0, 1, 1], [], []>} : vector<8x128xbf16>, vector<128x12544xbf16>, vector<8x12544xf32> -> vector<8x12544xf32>
    %cst_3 = arith.constant dense<0.000000e+00> : vector<12544xf32>
    %3 = vector.multi_reduction <add>, %2, %cst_3 [0] : vector<8x12544xf32> to vector<12544xf32>
    %4 = vector.shape_cast %3 : vector<12544xf32> to vector<1x12544xf32>
    %cst_4 = arith.constant 1.250000e-01 : f32
    %5 = vector.broadcast %cst_4 : f32 to vector<1x12544xf32>
    %6 = arith.mulf %4, %5 : vector<1x12544xf32>
    %7 = arith.mulf %2, %2 : vector<8x12544xf32>
    %cst_5 = arith.constant dense<0.000000e+00> : vector<12544xf32>
    %8 = vector.multi_reduction <add>, %7, %cst_5 [0] : vector<8x12544xf32> to vector<12544xf32>
    %9 = vector.shape_cast %8 : vector<12544xf32> to vector<1x12544xf32>
    %cst_6 = arith.constant 1.250000e-01 : f32
    %10 = vector.broadcast %cst_6 : f32 to vector<1x12544xf32>
    %11 = arith.mulf %9, %10 : vector<1x12544xf32>
    %12 = arith.mulf %6, %6 : vector<1x12544xf32>
    %13 = arith.subf %11, %12 : vector<1x12544xf32>
    %cst_7 = arith.constant 0.000000e+00 : f32
    %14 = vector.broadcast %cst_7 : f32 to vector<1x12544xf32>
    %15 = arith.maximumf %13, %14 : vector<1x12544xf32>
    %cst_8 = arith.constant 9.99999974E-6 : f32
    %16 = vector.broadcast %cst_8 : f32 to vector<1x12544xf32>
    %17 = arith.addf %15, %16 : vector<1x12544xf32>
    %18 = math.rsqrt %17 : vector<1x12544xf32>
    %c0_9 = arith.constant 0 : index
    %c0_10 = arith.constant 0 : index
    %19 = vector.load %arg3[%c0_9, %c0_10] : memref<2x12544xf32, #tpu.memory_space<vmem>>, vector<1x12544xf32>
    %c1 = arith.constant 1 : index
    %c0_11 = arith.constant 0 : index
    %20 = vector.load %arg3[%c1, %c0_11] : memref<2x12544xf32, #tpu.memory_space<vmem>>, vector<1x12544xf32>
    %21 = arith.mulf %19, %18 : vector<1x12544xf32>
    %22 = arith.mulf %6, %21 : vector<1x12544xf32>
    %23 = arith.subf %20, %22 : vector<1x12544xf32>
    %24 = vector.broadcast %21 : vector<1x12544xf32> to vector<8x12544xf32>
    %25 = arith.mulf %2, %24 : vector<8x12544xf32>
    %26 = vector.broadcast %23 : vector<1x12544xf32> to vector<8x12544xf32>
    %27 = arith.addf %25, %26 : vector<8x12544xf32>
    %cst_12 = arith.constant 0.000000e+00 : f32
    %28 = vector.broadcast %cst_12 : f32 to vector<8x12544xf32>
    %29 = arith.maximumf %27, %28 : vector<8x12544xf32>
    %c0_13 = arith.constant 0 : index
    %c0_14 = arith.constant 0 : index
    %30 = vector.load %arg4[%c0_13, %c0_14] : memref<8x12544xf32, #tpu.memory_space<vmem>>, vector<8x12544xf32>
    tpu.vector_store %arg4[%c0_13, %c0_14], %29 {strides = array<i32>} : memref<8x12544xf32, #tpu.memory_space<vmem>>, vector<8x12544xf32>,
    return
  }
  func.func @transform_0(%arg0: i32) -> (i32, i32) {
    %c0_i32 = arith.constant 0 : i32
    %c0_i32_0 = arith.constant 0 : i32
    %c0_i32_1 = arith.constant 0 : i32
    return %c0_i32, %c0_i32_0 : i32, i32
  }
  func.func @transform_1(%arg0: i32) -> (i32, i32) {
    %c0_i32 = arith.constant 0 : i32
    %c0_i32_0 = arith.constant 0 : i32
    return %c0_i32, %arg0 : i32, i32
  }
  func.func @transform_2(%arg0: i32) -> (i32, i32) {
    %c0_i32 = arith.constant 0 : i32
    %c0_i32_0 = arith.constant 0 : i32
    return %c0_i32, %arg0 : i32, i32
  }
  func.func @transform_3(%arg0: i32) -> (i32, i32) {
    %c0_i32 = arith.constant 0 : i32
    %c0_i32_0 = arith.constant 0 : i32
    return %c0_i32, %arg0 : i32, i32
  }
}

</mosaic_0001>

<bundles_post_ra>
// kernel: client_gen_forward.1
= control target key start
LH: loop header
LB: loop body
LE: loop exit
PB: predicated region body
PF: predicated region fallthrough
CT: control target
= control target key end

     0   :  { %8 = vsyncpa [#allocation3], 0  ;;  %s16649_s0 = inlined_call_operand.vmem [shape: bf16[8,128], index: 0, kind: input, shape index: {}]   ;;  %s16650_s1 = inlined_call_operand.hbm [shape: bf16[128,12544], index: 1, kind: input, shape index: {}]   ;;  %s16651_s2 = inlined_call_operand.hbm [shape: f32[2,12544], index: 2, kind: input, shape index: {}]   ;;  %s16652_s3 = inlined_call_operand.vmem [shape: f32[8,12544], index: 3, kind: output, shape index: {}]  }
   0x1   :  { %9 = vsyncpa [#allocation5], 0  ;;  %s13939_s12 = smov [#allocation2]   ;;  %s13891_s16 = scalar_lea.hbm %s16650_s1, 100352 }
   0x2   :  { %s17_s13 = sshll.u32 %s13939_s12, 4  ;;  %p13892_p0 = scmp.ne.s32.totalorder %s16650_s1, %s13891_s16  ;;  %s18_s13 = int_to_ptr.vmem [resolvable:$true] %s17_s13 }
   0x3   :  { %p13895_p1 = scmp.lt.u32.totalorder %s13891_s16, %s16650_s1 }
   0x5   :  { %p13897_p2 = pnand %p13895_p1, %p13892_p0 }
   0x7   :  { %13900 = shalt.err (!%p13897_p2)
}
   0x8   :  { %s13901_s21 = scalar_lea.vmem %s18_s13, 100352  ;;  %p13906_p4 = scmp.lt.s32.totalorder %s18_s13, %s18_s13 }
   0x9   :  { %p13902_p3 = scmp.ne.s32.totalorder %s18_s13, %s13901_s21  ;;  %p13907_p5 = scmp.lt.s32.totalorder %s13901_s21, %s13901_s21 }
   0xb   :  { %p13908_p6 = por %p13907_p5, %p13906_p4 }
   0xd   :  { %p13909_p7 = pnand %p13908_p6, %p13902_p3 }
   0xf   :  { %13912 = shalt.err (!%p13909_p7)
}
  0x10   :  { %s13940_s22 = smov 6272   ;;  %s13941_s23 = smov 392  }
  0x11   :  { %23 = dma.hbm_to_vmem [thread:$0]  %s16650_s1, 100352, %s18_s13, [#allocation3], %s13940_s22, %s13940_s22, %s13941_s23  }
  0x12   :  { %s13942_s26 = smov [#allocation4]   ;;  %s13913_s30 = scalar_lea.hbm %s16651_s2, 3136 }
  0x13   :  { %s30_s27 = sshll.u32 %s13942_s26, 4  ;;  %p13914_p8 = scmp.ne.s32.totalorder %s16651_s2, %s13913_s30  ;;  %s31_s27 = int_to_ptr.vmem [resolvable:$true] %s30_s27 }
  0x14   :  { %p13917_p9 = scmp.lt.u32.totalorder %s13913_s30, %s16651_s2 }
  0x16   :  { %p13919_p10 = pnand %p13917_p9, %p13914_p8 }
  0x18   :  { %13922 = shalt.err (!%p13919_p10)
}
  0x19   :  { %s13923_s8 = scalar_lea.vmem %s31_s27, 3136  ;;  %p13928_p12 = scmp.lt.s32.totalorder %s31_s27, %s31_s27 }
  0x1a   :  { %p13924_p11 = scmp.ne.s32.totalorder %s31_s27, %s13923_s8  ;;  %p13929_p13 = scmp.lt.s32.totalorder %s13923_s8, %s13923_s8 }
  0x1c   :  { %p13930_p0 = por %p13929_p13, %p13928_p12 }
  0x1e   :  { %p13931_p1 = pnand %p13930_p0, %p13924_p11 }
  0x20   :  { %13934 = shalt.err (!%p13931_p1)
}
  0x21   :  { %33 = dma.hbm_to_vmem [thread:$0]  %s16651_s2, 3136, %s31_s27, [#allocation5]  }
  0x22   :  { %13935 = dma.done.wait [#allocation3], 100352  }
  0x23   :  { %13936 = vsyncadd [#allocation3], 4294866944 }
  0x24   :  { %13937 = dma.done.wait [#allocation5], 3136  }
  0x25   :  { %13938 = vsyncadd [#allocation5], 4294964160  ;;  %v16653_v0 = vmov 0   ;;  %v12512_v1 = vld [vmem:[#allocation2 + $0x4] ss:$392 sps:$4 sm:$0xff]  }
  0x26   :  { %4778 = vmatprep.mubr.bf16.mxu0 %v16653_v0  ;;  %4819 = vmatprep.mubr.bf16.mxu1 %v16653_v0  ;;  %v12514_v2 = vld [vmem:[#allocation2 + $0xc] ss:$392 sps:$4 sm:$0xff]   ;;  %v12516_v3 = vld [vmem:[#allocation2] ss:$392 sps:$4 sm:$0xff]   ;;  %v12520_v6 = vld [vmem:[#allocation2 + $0x31c] ss:$392 sps:$4 sm:$0xff]  }
  0x27   :  { %4746 = vmatprep.subr.bf16.mxu0 %v12512_v1  ;;  %v12517_v4 = vld [vmem:[#allocation2 + $0x8] ss:$392 sps:$4 sm:$0xff]   ;;  %4787 = vmatprep.subr.bf16.mxu1 %v12514_v2  ;;  %v12518_v5 = vld [vmem:[#allocation2 + $0x314] ss:$392 sps:$4 sm:$0xff]   ;;  %v12523_v8 = vld [vmem:[#allocation2 + $0x318] ss:$392 sps:$4 sm:$0xff]  }
  0x28   :  { %4747 = vmatpush1.bf16.msra.mxu0 %v12516_v3  ;;  %4788 = vmatpush1.bf16.msra.mxu1 %v12517_v4  ;;  %v12522_v7 = vld [vmem:[#allocation2 + $0x310] ss:$392 sps:$4 sm:$0xff]   ;;  %v12524_v9 = vld [vmem:[#allocation2 + $0x624] ss:$392 sps:$4 sm:$0xff]   ;;  %v12528_v11 = vld [vmem:[#allocation2 + $0x620] ss:$392 sps:$4 sm:$0xff]  }
  0x29   :  { %4748 = vmatprep.subr.bf16.mxu0 %v12518_v5  ;;  %4789 = vmatprep.subr.bf16.mxu1 %v12520_v6  ;;  %v12526_v10 = vld [vmem:[#allocation2 + $0x62c] ss:$392 sps:$4 sm:$0xff]   ;;  %v12529_v12 = vld [vmem:[#allocation2 + $0x628] ss:$392 sps:$4 sm:$0xff]   ;;  %v12532_v14 = vld [vmem:[#allocation2 + $0x93c] ss:$392 sps:$4 sm:$0xff]  }
  0x2a   :  { %v12530_v13 = vld [vmem:[#allocation2 + $0x934] ss:$392 sps:$4 sm:$0xff]   ;;  %v12534_v15 = vld [vmem:[#allocation2 + $0x930] ss:$392 sps:$4 sm:$0xff]   ;;  %v12536_v17 = vld [vmem:[#allocation2 + $0xc44] ss:$392 sps:$4 sm:$0xff]  }
  0x2b   :  { %v12535_v16 = vld [vmem:[#allocation2 + $0x938] ss:$392 sps:$4 sm:$0xff]   ;;  %v12538_v18 = vld [vmem:[#allocation2 + $0xc4c] ss:$392 sps:$4 sm:$0xff]   ;;  %v12541_v20 = vld [vmem:[#allocation2 + $0xc48] ss:$392 sps:$4 sm:$0xff]  }
  0x2c   :  { %4749 = vmatpush1.bf16.msra.mxu0 %v12522_v7  ;;  %4790 = vmatpush1.bf16.msra.mxu1 %v12523_v8  ;;  %v12540_v19 = vld [vmem:[#allocation2 + $0xc40] ss:$392 sps:$4 sm:$0xff]   ;;  %v12542_v21 = vld [vmem:[#allocation2 + $0xf54] ss:$392 sps:$4 sm:$0xff]   ;;  %v12546_v23 = vld [vmem:[#allocation2 + $0xf50] ss:$392 sps:$4 sm:$0xff]  }
  0x2d   :  { %4750 = vmatprep.subr.bf16.mxu0 %v12524_v9  ;;  %4791 = vmatprep.subr.bf16.mxu1 %v12526_v10  ;;  %v12544_v22 = vld [vmem:[#allocation2 + $0xf5c] ss:$392 sps:$4 sm:$0xff]   ;;  %v12547_v24 = vld [vmem:[#allocation2 + $0xf58] ss:$392 sps:$4 sm:$0xff]   ;;  %v12550_v26 = vld [vmem:[#allocation2 + $0x126c] ss:$392 sps:$4 sm:$0xff]  }
  0x2e   :  { %v12548_v25 = vld [vmem:[#allocation2 + $0x1264] ss:$392 sps:$4 sm:$0xff]   ;;  %v12552_v27 = vld [vmem:[#allocation2 + $0x1260] ss:$392 sps:$4 sm:$0xff]   ;;  %v12554_v29 = vld [vmem:[#allocation2 + $0x1574] ss:$392 sps:$4 sm:$0xff]  }
  0x2f   :  { %v12553_v28 = vld [vmem:[#allocation2 + $0x1268] ss:$392 sps:$4 sm:$0xff]   ;;  %v12556_v30 = vld [vmem:[#allocation2 + $0x157c] ss:$392 sps:$4 sm:$0xff]   ;;  %v12559_v32 = vld [vmem:[#allocation2 + $0x1578] ss:$392 sps:$4 sm:$0xff]  }
  0x30   :  { %4751 = vmatpush1.bf16.msra.mxu0 %v12528_v11  ;;  %4792 = vmatpush1.bf16.msra.mxu1 %v12529_v12  ;;  %v12558_v31 = vld [vmem:[#allocation2 + $0x1570] ss:$392 sps:$4 sm:$0xff]   ;;  %v12562_v33 = vld [vmem:[#allocation2 + $0x14] ss:$392 sps:$4 sm:$0xff]   ;;  %v13994_v35 = vld [vmem:[%s16649_s0] sm:$0xf] }
  0x31   :  { %4752 = vmatprep.subr.bf16.mxu0 %v12530_v13  ;;  %4793 = vmatprep.subr.bf16.mxu1 %v12532_v14  ;;  %v12565_v34 = vld [vmem:[#allocation2 + $0x1c] ss:$392 sps:$4 sm:$0xff]   ;;  %v12560_v36 = vld [vmem:[#allocation2 + $0x10] ss:$392 sps:$4 sm:$0xff]   ;;  %v12571_v39 = vld [vmem:[#allocation2 + $0x32c] ss:$392 sps:$4 sm:$0xff]  }
  0x32   :  { %v12563_v37 = vld [vmem:[#allocation2 + $0x18] ss:$392 sps:$4 sm:$0xff]   ;;  %v12568_v38 = vld [vmem:[#allocation2 + $0x324] ss:$392 sps:$4 sm:$0xff]   ;;  %v12569_v41 = vld [vmem:[#allocation2 + $0x328] ss:$392 sps:$4 sm:$0xff]  }
  0x33   :  { %v12566_v40 = vld [vmem:[#allocation2 + $0x320] ss:$392 sps:$4 sm:$0xff]   ;;  %v12574_v42 = vld [vmem:[#allocation2 + $0x634] ss:$392 sps:$4 sm:$0xff]   ;;  %v12572_v44 = vld [vmem:[#allocation2 + $0x630] ss:$392 sps:$4 sm:$0xff]  }
  0x34   :  { %4753 = vmatpush1.bf16.msra.mxu0 %v12534_v15  ;;  %4794 = vmatpush1.bf16.msra.mxu1 %v12535_v16  ;;  %v12577_v43 = vld [vmem:[#allocation2 + $0x63c] ss:$392 sps:$4 sm:$0xff]   ;;  %v12575_v45 = vld [vmem:[#allocation2 + $0x638] ss:$392 sps:$4 sm:$0xff]   ;;  %v12583_v47 = vld [vmem:[#allocation2 + $0x94c] ss:$392 sps:$4 sm:$0xff]  }
  0x35   :  { %4754 = vmatprep.subr.bf16.mxu0 %v12536_v17  ;;  %4795 = vmatprep.subr.bf16.mxu1 %v12538_v18  ;;  %v12580_v46 = vld [vmem:[#allocation2 + $0x944] ss:$392 sps:$4 sm:$0xff]   ;;  %v12578_v48 = vld [vmem:[#allocation2 + $0x940] ss:$392 sps:$4 sm:$0xff]   ;;  %v12586_v50 = vld [vmem:[#allocation2 + $0xc54] ss:$392 sps:$4 sm:$0xff]  }
  0x36   :  { %v12581_v49 = vld [vmem:[#allocation2 + $0x948] ss:$392 sps:$4 sm:$0xff]   ;;  %v12589_v51 = vld [vmem:[#allocation2 + $0xc5c] ss:$392 sps:$4 sm:$0xff]   ;;  %v12587_v53 = vld [vmem:[#allocation2 + $0xc58] ss:$392 sps:$4 sm:$0xff]  }
  0x37   :  { %v12584_v52 = vld [vmem:[#allocation2 + $0xc50] ss:$392 sps:$4 sm:$0xff]   ;;  %v12592_v54 = vld [vmem:[#allocation2 + $0xf64] ss:$392 sps:$4 sm:$0xff]   ;;  %v12590_v56 = vld [vmem:[#allocation2 + $0xf60] ss:$392 sps:$4 sm:$0xff]  }
  0x38   :  { %4755 = vmatpush1.bf16.msra.mxu0 %v12540_v19  ;;  %4796 = vmatpush1.bf16.msra.mxu1 %v12541_v20  ;;  %v12595_v55 = vld [vmem:[#allocation2 + $0xf6c] ss:$392 sps:$4 sm:$0xff]   ;;  %v12593_v57 = vld [vmem:[#allocation2 + $0xf68] ss:$392 sps:$4 sm:$0xff]   ;;  %v12601_v59 = vld [vmem:[#allocation2 + $0x127c] ss:$392 sps:$4 sm:$0xff]  }
  0x39   :  { %4756 = vmatprep.subr.bf16.mxu0 %v12542_v21  ;;  %4797 = vmatprep.subr.bf16.mxu1 %v12544_v22  ;;  %v12598_v58 = vld [vmem:[#allocation2 + $0x1274] ss:$392 sps:$4 sm:$0xff]   ;;  %v12596_v60 = vld [vmem:[#allocation2 + $0x1270] ss:$392 sps:$4 sm:$0xff]   ;;  %v12604_v62 = vld [vmem:[#allocation2 + $0x1584] ss:$392 sps:$4 sm:$0xff]  }
  0x3a   :  { %v12599_v61 = vld [vmem:[#allocation2 + $0x1278] ss:$392 sps:$4 sm:$0xff]   ;;  %v12607_v63 = vld [vmem:[#allocation2 + $0x158c] ss:$392 sps:$4 sm:$0xff]   ;;  %v12605_v2 = vld [vmem:[#allocation2 + $0x1588] ss:$392 sps:$4 sm:$0xff]  }
  0x3b   :  { %v12602_v1 = vld [vmem:[#allocation2 + $0x1580] ss:$392 sps:$4 sm:$0xff]   ;;  %v12610_v3 = vld [vmem:[#allocation2 + $0x24] ss:$392 sps:$4 sm:$0xff]   ;;  %v12616_v7 = vld [vmem:[#allocation2 + $0x334] ss:$392 sps:$4 sm:$0xff]  }
  0x3c   :  { %4757 = vmatpush1.bf16.msra.mxu0 %v12546_v23  ;;  %4798 = vmatpush1.bf16.msra.mxu1 %v12547_v24  ;;  %v12613_v4 = vld [vmem:[#allocation2 + $0x2c] ss:$392 sps:$4 sm:$0xff]   ;;  %v12608_v5 = vld [vmem:[#allocation2 + $0x20] ss:$392 sps:$4 sm:$0xff]   ;;  %v12619_v8 = vld [vmem:[#allocation2 + $0x33c] ss:$392 sps:$4 sm:$0xff]  }
  0x3d   :  { %4758 = vmatprep.subr.bf16.mxu0 %v12548_v25  ;;  %4799 = vmatprep.subr.bf16.mxu1 %v12550_v26  ;;  %v12611_v6 = vld [vmem:[#allocation2 + $0x28] ss:$392 sps:$4 sm:$0xff]   ;;  %v12617_v10 = vld [vmem:[#allocation2 + $0x338] ss:$392 sps:$4 sm:$0xff]   ;;  %v12622_v11 = vld [vmem:[#allocation2 + $0x644] ss:$392 sps:$4 sm:$0xff]  }
  0x3e   :  { %v12614_v9 = vld [vmem:[#allocation2 + $0x330] ss:$392 sps:$4 sm:$0xff]   ;;  %v12625_v12 = vld [vmem:[#allocation2 + $0x64c] ss:$392 sps:$4 sm:$0xff]   ;;  %v12620_v13 = vld [vmem:[#allocation2 + $0x640] ss:$392 sps:$4 sm:$0xff]  }
  0x3f   :  { %v12623_v14 = vld [vmem:[#allocation2 + $0x648] ss:$392 sps:$4 sm:$0xff]   ;;  %v12628_v15 = vld [vmem:[#allocation2 + $0x954] ss:$392 sps:$4 sm:$0xff]   ;;  %v12629_v18 = vld [vmem:[#allocation2 + $0x958] ss:$392 sps:$4 sm:$0xff]  }
  0x40   :  { %4759 = vmatpush1.bf16.msra.mxu0 %v12552_v27  ;;  %4800 = vmatpush1.bf16.msra.mxu1 %v12553_v28  ;;  %v12631_v16 = vld [vmem:[#allocation2 + $0x95c] ss:$392 sps:$4 sm:$0xff]   ;;  %v12626_v17 = vld [vmem:[#allocation2 + $0x950] ss:$392 sps:$4 sm:$0xff]   ;;  %v12637_v20 = vld [vmem:[#allocation2 + $0xc6c] ss:$392 sps:$4 sm:$0xff]  }
  0x41   :  { %4760 = vmatprep.subr.bf16.mxu0 %v12554_v29  ;;  %4801 = vmatprep.subr.bf16.mxu1 %v12556_v30  ;;  %v12634_v19 = vld [vmem:[#allocation2 + $0xc64] ss:$392 sps:$4 sm:$0xff]   ;;  %v12632_v21 = vld [vmem:[#allocation2 + $0xc60] ss:$392 sps:$4 sm:$0xff]   ;;  %v12640_v23 = vld [vmem:[#allocation2 + $0xf74] ss:$392 sps:$4 sm:$0xff]  }
  0x42   :  { %v12635_v22 = vld [vmem:[#allocation2 + $0xc68] ss:$392 sps:$4 sm:$0xff]   ;;  %v12643_v24 = vld [vmem:[#allocation2 + $0xf7c] ss:$392 sps:$4 sm:$0xff]   ;;  %v12641_v26 = vld [vmem:[#allocation2 + $0xf78] ss:$392 sps:$4 sm:$0xff]  }
  0x43   :  { %v12638_v25 = vld [vmem:[#allocation2 + $0xf70] ss:$392 sps:$4 sm:$0xff]   ;;  %v12646_v27 = vld [vmem:[#allocation2 + $0x1284] ss:$392 sps:$4 sm:$0xff]   ;;  %v12644_v29 = vld [vmem:[#allocation2 + $0x1280] ss:$392 sps:$4 sm:$0xff]  }
  0x44   :  { %4761 = vmatpush1.bf16.msra.mxu0 %v12558_v31  ;;  %4802 = vmatpush1.bf16.msra.mxu1 %v12559_v32  ;;  %v12649_v28 = vld [vmem:[#allocation2 + $0x128c] ss:$392 sps:$4 sm:$0xff]   ;;  %v12647_v30 = vld [vmem:[#allocation2 + $0x1288] ss:$392 sps:$4 sm:$0xff]   ;;  %v12655_v32 = vld [vmem:[#allocation2 + $0x159c] ss:$392 sps:$4 sm:$0xff]  }
  0x45   :  { %4828 = vmatprep.subr.bf16.mxu0 %v12562_v33  ;;  %4869 = vmatprep.subr.bf16.mxu1 %v12565_v34  ;;  %v12652_v31 = vld [vmem:[#allocation2 + $0x1594] ss:$392 sps:$4 sm:$0xff]   ;;  %v12650_v33 = vld [vmem:[#allocation2 + $0x1590] ss:$392 sps:$4 sm:$0xff]  }
  0x46   :  { %v12653_v34 = vld [vmem:[#allocation2 + $0x1598] ss:$392 sps:$4 sm:$0xff]  }
  0x47   :  { %4779 = vmatmul.mubr.bf16.vlgmr.msra.gmra.mrb[0].mxu0 %v13994_v35  ;;  %4820 = vmatmul.mubr.bf16.vlgmr.msra.gmra.mrb[0].mxu1 %v13994_v35 }
  0x48   :  { %4829 = vmatpush1.bf16.msra.mxu0 %v12560_v36  ;;  %4870 = vmatpush1.bf16.msra.mxu1 %v12563_v37  ;;  %v12658_v36 = vld [vmem:[#allocation2 + $0x34] ss:$392 sps:$4 sm:$0xff]  }
  0x49   :  { %4830 = vmatprep.subr.bf16.mxu0 %v12568_v38  ;;  %4871 = vmatprep.subr.bf16.mxu1 %v12571_v39  ;;  %v12661_v37 = vld [vmem:[#allocation2 + $0x3c] ss:$392 sps:$4 sm:$0xff]   ;;  %v12656_v38 = vld [vmem:[#allocation2 + $0x30] ss:$392 sps:$4 sm:$0xff]  }
  0x4a   :  { %4860 = vmatprep.mubr.bf16.mxu0 %v16653_v0  ;;  %4901 = vmatprep.mubr.bf16.mxu1 %v16653_v0  ;;  %v12659_v39 = vld [vmem:[#allocation2 + $0x38] ss:$392 sps:$4 sm:$0xff]  }
  0x4c   :  { %4831 = vmatpush1.bf16.msra.mxu0 %v12566_v40  ;;  %4872 = vmatpush1.bf16.msra.mxu1 %v12569_v41  ;;  %v12664_v40 = vld [vmem:[#allocation2 + $0x344] ss:$392 sps:$4 sm:$0xff]  }
  0x4d   :  { %4832 = vmatprep.subr.bf16.mxu0 %v12574_v42  ;;  %4873 = vmatprep.subr.bf16.mxu1 %v12577_v43  ;;  %v12667_v41 = vld [vmem:[#allocation2 + $0x34c] ss:$392 sps:$4 sm:$0xff]   ;;  %v12662_v42 = vld [vmem:[#allocation2 + $0x340] ss:$392 sps:$4 sm:$0xff]  }
  0x4e   :  { %v12665_v43 = vld [vmem:[#allocation2 + $0x348] ss:$392 sps:$4 sm:$0xff]  }
  0x50   :  { %4833 = vmatpush1.bf16.msra.mxu0 %v12572_v44  ;;  %4874 = vmatpush1.bf16.msra.mxu1 %v12575_v45  ;;  %v12670_v44 = vld [vmem:[#allocation2 + $0x654] ss:$392 sps:$4 sm:$0xff]  }
  0x51   :  { %4834 = vmatprep.subr.bf16.mxu0 %v12580_v46  ;;  %4875 = vmatprep.subr.bf16.mxu1 %v12583_v47  ;;  %v12673_v45 = vld [vmem:[#allocation2 + $0x65c] ss:$392 sps:$4 sm:$0xff]   ;;  %v12668_v46 = vld [vmem:[#allocation2 + $0x650] ss:$392 sps:$4 sm:$0xff]  }
  0x52   :  { %v12671_v47 = vld [vmem:[#allocation2 + $0x658] ss:$392 sps:$4 sm:$0xff]  }
  0x54   :  { %4835 = vmatpush1.bf16.msra.mxu0 %v12578_v48  ;;  %4876 = vmatpush1.bf16.msra.mxu1 %v12581_v49  ;;  %v12676_v48 = vld [vmem:[#allocation2 + $0x964] ss:$392 sps:$4 sm:$0xff]  }
  0x55   :  { %4836 = vmatprep.subr.bf16.mxu0 %v12586_v50  ;;  %4877 = vmatprep.subr.bf16.mxu1 %v12589_v51  ;;  %v12679_v49 = vld [vmem:[#allocation2 + $0x96c] ss:$392 sps:$4 sm:$0xff]   ;;  %v12674_v50 = vld [vmem:[#allocation2 + $0x960] ss:$392 sps:$4 sm:$0xff]  }
  0x56   :  { %v12677_v51 = vld [vmem:[#allocation2 + $0x968] ss:$392 sps:$4 sm:$0xff]  }
  0x58   :  { %4837 = vmatpush1.bf16.msra.mxu0 %v12584_v52  ;;  %4878 = vmatpush1.bf16.msra.mxu1 %v12587_v53  ;;  %v12682_v52 = vld [vmem:[#allocation2 + $0xc74] ss:$392 sps:$4 sm:$0xff]  }
  0x59   :  { %4838 = vmatprep.subr.bf16.mxu0 %v12592_v54  ;;  %4879 = vmatprep.subr.bf16.mxu1 %v12595_v55  ;;  %v12685_v53 = vld [vmem:[#allocation2 + $0xc7c] ss:$392 sps:$4 sm:$0xff]   ;;  %v12680_v54 = vld [vmem:[#allocation2 + $0xc70] ss:$392 sps:$4 sm:$0xff]  }
  0x5a   :  { %v12683_v55 = vld [vmem:[#allocation2 + $0xc78] ss:$392 sps:$4 sm:$0xff]  }
  0x5c   :  { %4839 = vmatpush1.bf16.msra.mxu0 %v12590_v56  ;;  %4880 = vmatpush1.bf16.msra.mxu1 %v12593_v57  ;;  %v12688_v56 = vld [vmem:[#allocation2 + $0xf84] ss:$392 sps:$4 sm:$0xff]  }
  0x5d   :  { %4840 = vmatprep.subr.bf16.mxu0 %v12598_v58  ;;  %4881 = vmatprep.subr.bf16.mxu1 %v12601_v59  ;;  %v12691_v57 = vld [vmem:[#allocation2 + $0xf8c] ss:$392 sps:$4 sm:$0xff]   ;;  %v12686_v58 = vld [vmem:[#allocation2 + $0xf80] ss:$392 sps:$4 sm:$0xff]  }
  0x5e   :  { %v12689_v59 = vld [vmem:[#allocation2 + $0xf88] ss:$392 sps:$4 sm:$0xff]  }
  0x60   :  { %4841 = vmatpush1.bf16.msra.mxu0 %v12596_v60  ;;  %4882 = vmatpush1.bf16.msra.mxu1 %v12599_v61  ;;  %v12694_v60 = vld [vmem:[#allocation2 + $0x1294] ss:$392 sps:$4 sm:$0xff]  }
  0x61   :  { %4842 = vmatprep.subr.bf16.mxu0 %v12604_v62  ;;  %4883 = vmatprep.subr.bf16.mxu1 %v12607_v63  ;;  %v12697_v61 = vld [vmem:[#allocation2 + $0x129c] ss:$392 sps:$4 sm:$0xff]   ;;  %v12692_v62 = vld [vmem:[#allocation2 + $0x1290] ss:$392 sps:$4 sm:$0xff]  }
  0x62   :  { %v12695_v63 = vld [vmem:[#allocation2 + $0x1298] ss:$392 sps:$4 sm:$0xff]  }
  0x64   :  { %4843 = vmatpush1.bf16.msra.mxu0 %v12602_v1  ;;  %4884 = vmatpush1.bf16.msra.mxu1 %v12605_v2  ;;  %v12700_v1 = vld [vmem:[#allocation2 + $0x15a4] ss:$392 sps:$4 sm:$0xff]  }
  0x65   :  { %4910 = vmatprep.subr.bf16.mxu0 %v12610_v3  ;;  %4951 = vmatprep.subr.bf16.mxu1 %v12613_v4  ;;  %v12703_v2 = vld [vmem:[#allocation2 + $0x15ac] ss:$392 sps:$4 sm:$0xff]   ;;  %v12698_v3 = vld [vmem:[#allocation2 + $0x15a0] ss:$392 sps:$4 sm:$0xff]  }
  0x66   :  { %v12701_v4 = vld [vmem:[#allocation2 + $0x15a8] ss:$392 sps:$4 sm:$0xff]  }
  0x67   :  { %4861 = vmatmul.mubr.bf16.vlgmr.msra.gmra.mrb[4].mxu0 %v13994_v35  ;;  %4902 = vmatmul.mubr.bf16.vlgmr.msra.gmra.mrb[4].mxu1 %v13994_v35 }
  0x68   :  { %4911 = vmatpush1.bf16.msra.mxu0 %v12608_v5  ;;  %4952 = vmatpush1.bf16.msra.mxu1 %v12611_v6  ;;  %v12706_v5 = vld [vmem:[#allocation2 + $0x44] ss:$392 sps:$4 sm:$0xff]  }
  0x69   :  { %4912 = vmatprep.subr.bf16.mxu0 %v12616_v7  ;;  %4953 = vmatprep.subr.bf16.mxu1 %v12619_v8  ;;  %v12709_v6 = vld [vmem:[#allocation2 + $0x4c] ss:$392 sps:$4 sm:$0xff]   ;;  %v12704_v7 = vld [vmem:[#allocation2 + $0x40] ss:$392 sps:$4 sm:$0xff]  }
  0x6a   :  { %4942 = vmatprep.mubr.bf16.mxu0 %v16653_v0  ;;  %4983 = vmatprep.mubr.bf16.mxu1 %v16653_v0  ;;  %v12707_v8 = vld [vmem:[#allocation2 + $0x48] ss:$392 sps:$4 sm:$0xff]  }
  0x6c   :  { %4913 = vmatpush1.bf16.msra.mxu0 %v12614_v9  ;;  %4954 = vmatpush1.bf16.msra.mxu1 %v12617_v10  ;;  %v12712_v9 = vld [vmem:[#allocation2 + $0x354] ss:$392 sps:$4 sm:$0xff]  }
  0x6d   :  { %4914 = vmatprep.subr.bf16.mxu0 %v12622_v11  ;;  %4955 = vmatprep.subr.bf16.mxu1 %v12625_v12  ;;  %v12715_v10 = vld [vmem:[#allocation2 + $0x35c] ss:$392 sps:$4 sm:$0xff]   ;;  %v12710_v11 = vld [vmem:[#allocation2 + $0x350] ss:$392 sps:$4 sm:$0xff]  }
  0x6e   :  { %v12713_v12 = vld [vmem:[#allocation2 + $0x358] ss:$392 sps:$4 sm:$0xff]  }
  0x70   :  { %4915 = vmatpush1.bf16.msra.mxu0 %v12620_v13  ;;  %4956 = vmatpush1.bf16.msra.mxu1 %v12623_v14  ;;  %v12718_v13 = vld [vmem:[#allocation2 + $0x664] ss:$392 sps:$4 sm:$0xff]  }
  0x71   :  { %4916 = vmatprep.subr.bf16.mxu0 %v12628_v15  ;;  %4957 = vmatprep.subr.bf16.mxu1 %v12631_v16  ;;  %v12721_v14 = vld [vmem:[#allocation2 + $0x66c] ss:$392 sps:$4 sm:$0xff]   ;;  %v12716_v15 = vld [vmem:[#allocation2 + $0x660] ss:$392 sps:$4 sm:$0xff]  }
  0x72   :  { %v12719_v16 = vld [vmem:[#allocation2 + $0x668] ss:$392 sps:$4 sm:$0xff]  }
  0x74   :  { %4917 = vmatpush1.bf16.msra.mxu0 %v12626_v17  ;;  %4958 = vmatpush1.bf16.msra.mxu1 %v12629_v18  ;;  %v12724_v17 = vld [vmem:[#allocation2 + $0x974] ss:$392 sps:$4 sm:$0xff]  }
  0x75   :  { %4918 = vmatprep.subr.bf16.mxu0 %v12634_v19  ;;  %4959 = vmatprep.subr.bf16.mxu1 %v12637_v20  ;;  %v12727_v18 = vld [vmem:[#allocation2 + $0x97c] ss:$392 sps:$4 sm:$0xff]   ;;  %v12722_v19 = vld [vmem:[#allocation2 + $0x970] ss:$392 sps:$4 sm:$0xff]  }
  0x76   :  { %v12725_v20 = vld [vmem:[#allocation2 + $0x978] ss:$392 sps:$4 sm:$0xff]  }
  0x78   :  { %4919 = vmatpush1.bf16.msra.mxu0 %v12632_v21  ;;  %4960 = vmatpush1.bf16.msra.mxu1 %v12635_v22  ;;  %v12730_v21 = vld [vmem:[#allocation2 + $0xc84] ss:$392 sps:$4 sm:$0xff]  }
  0x79   :  { %4920 = vmatprep.subr.bf16.mxu0 %v12640_v23  ;;  %4961 = vmatprep.subr.bf16.mxu1 %v12643_v24  ;;  %v12733_v22 = vld [vmem:[#allocation2 + $0xc8c] ss:$392 sps:$4 sm:$0xff]   ;;  %v12728_v23 = vld [vmem:[#allocation2 + $0xc80] ss:$392 sps:$4 sm:$0xff]  }
  0x7a   :  { %v12731_v24 = vld [vmem:[#allocation2 + $0xc88] ss:$392 sps:$4 sm:$0xff]  }
  0x7c   :  { %4921 = vmatpush1.bf16.msra.mxu0 %v12638_v25  ;;  %4962 = vmatpush1.bf16.msra.mxu1 %v12641_v26  ;;  %v12736_v25 = vld [vmem:[#allocation2 + $0xf94] ss:$392 sps:$4 sm:$0xff]  }
  0x7d   :  { %4922 = vmatprep.subr.bf16.mxu0 %v12646_v27  ;;  %4963 = vmatprep.subr.bf16.mxu1 %v12649_v28  ;;  %v12739_v26 = vld [vmem:[#allocation2 + $0xf9c] ss:$392 sps:$4 sm:$0xff]   ;;  %v12734_v27 = vld [vmem:[#allocation2 + $0xf90] ss:$392 sps:$4 sm:$0xff]  }
  0x7e   :  { %v12737_v28 = vld [vmem:[#allocation2 + $0xf98] ss:$392 sps:$4 sm:$0xff]  }
  0x80   :  { %4923 = vmatpush1.bf16.msra.mxu0 %v12644_v29  ;;  %4964 = vmatpush1.bf16.msra.mxu1 %v12647_v30  ;;  %v12742_v29 = vld [vmem:[#allocation2 + $0x12a4] ss:$392 sps:$4 sm:$0xff]  }
  0x81   :  { %4924 = vmatprep.subr.bf16.mxu0 %v12652_v31  ;;  %4965 = vmatprep.subr.bf16.mxu1 %v12655_v32  ;;  %v12745_v30 = vld [vmem:[#allocation2 + $0x12ac] ss:$392 sps:$4 sm:$0xff]   ;;  %v12740_v31 = vld [vmem:[#allocation2 + $0x12a0] ss:$392 sps:$4 sm:$0xff]  }
  0x82   :  { %v12743_v32 = vld [vmem:[#allocation2 + $0x12a8] ss:$392 sps:$4 sm:$0xff]  }
  0x84   :  { %4925 = vmatpush1.bf16.msra.mxu0 %v12650_v33  ;;  %4966 = vmatpush1.bf16.msra.mxu1 %v12653_v34  ;;  %v12748_v33 = vld [vmem:[#allocation2 + $0x15b4] ss:$392 sps:$4 sm:$0xff]  }
  0x85   :  { %4992 = vmatprep.subr.bf16.mxu0 %v12658_v36  ;;  %5033 = vmatprep.subr.bf16.mxu1 %v12661_v37  ;;  %v12751_v34 = vld [vmem:[#allocation2 + $0x15bc] ss:$392 sps:$4 sm:$0xff]   ;;  %v12746_v36 = vld [vmem:[#allocation2 + $0x15b0] ss:$392 sps:$4 sm:$0xff]  }
  0x86   :  { %v12749_v37 = vld [vmem:[#allocation2 + $0x15b8] ss:$392 sps:$4 sm:$0xff]  }
  0x87   :  { %4943 = vmatmul.mubr.bf16.vlgmr.msra.gmra.mrb[8].mxu0 %v13994_v35  ;;  %4984 = vmatmul.mubr.bf16.vlgmr.msra.gmra.mrb[8].mxu1 %v13994_v35 }
  0x88   :  { %4993 = vmatpush1.bf16.msra.mxu0 %v12656_v38  ;;  %5034 = vmatpush1.bf16.msra.mxu1 %v12659_v39  ;;  %v12754_v38 = vld [vmem:[#allocation2 + $0x54] ss:$392 sps:$4 sm:$0xff]  }
  0x89   :  { %4994 = vmatprep.subr.bf16.mxu0 %v12664_v40  ;;  %5035 = vmatprep.subr.bf16.mxu1 %v12667_v41  ;;  %v12757_v39 = vld [vmem:[#allocation2 + $0x5c] ss:$392 sps:$4 sm:$0xff]   ;;  %v12752_v40 = vld [vmem:[#allocation2 + $0x50] ss:$392 sps:$4 sm:$0xff]  }
  0x8a   :  { %5024 = vmatprep.mubr.bf16.mxu0 %v16653_v0  ;;  %5065 = vmatprep.mubr.bf16.mxu1 %v16653_v0  ;;  %v12755_v41 = vld [vmem:[#allocation2 + $0x58] ss:$392 sps:$4 sm:$0xff]  }
  0x8c   :  { %4995 = vmatpush1.bf16.msra.mxu0 %v12662_v42  ;;  %5036 = vmatpush1.bf16.msra.mxu1 %v12665_v43  ;;  %v12760_v42 = vld [vmem:[#allocation2 + $0x364] ss:$392 sps:$4 sm:$0xff]  }
  0x8d   :  { %4996 = vmatprep.subr.bf16.mxu0 %v12670_v44  ;;  %5037 = vmatprep.subr.bf16.mxu1 %v12673_v45  ;;  %v12763_v43 = vld [vmem:[#allocation2 + $0x36c] ss:$392 sps:$4 sm:$0xff]   ;;  %v12758_v44 = vld [vmem:[#allocation2 + $0x360] ss:$392 sps:$4 sm:$0xff]  }
  0x8e   :  { %v12761_v45 = vld [vmem:[#allocation2 + $0x368] ss:$392 sps:$4 sm:$0xff]  }
  0x90   :  { %4997 = vmatpush1.bf16.msra.mxu0 %v12668_v46  ;;  %5038 = vmatpush1.bf16.msra.mxu1 %v12671_v47  ;;  %v12766_v46 = vld [vmem:[#allocation2 + $0x674] ss:$392 sps:$4 sm:$0xff]  }
  0x91   :  { %4998 = vmatprep.subr.bf16.mxu0 %v12676_v48  ;;  %5039 = vmatprep.subr.bf16.mxu1 %v12679_v49  ;;  %v12769_v47 = vld [vmem:[#allocation2 + $0x67c] ss:$392 sps:$4 sm:$0xff]   ;;  %v12764_v48 = vld [vmem:[#allocation2 + $0x670] ss:$392 sps:$4 sm:$0xff]  }
  0x92   :  { %v12767_v49 = vld [vmem:[#allocation2 + $0x678] ss:$392 sps:$4 sm:$0xff]  }
  0x94   :  { %4999 = vmatpush1.bf16.msra.mxu0 %v12674_v50  ;;  %5040 = vmatpush1.bf16.msra.mxu1 %v12677_v51  ;;  %v12772_v50 = vld [vmem:[#allocation2 + $0x984] ss:$392 sps:$4 sm:$0xff]   ;;  %v12770_v51 = vld [vmem:[#allocation2 + $0x980] ss:$392 sps:$4 sm:$0xff]  }
  0x95   :  { %5000 = vmatprep.subr.bf16.mxu0 %v12682_v52  ;;  %5041 = vmatprep.subr.bf16.mxu1 %v12685_v53  ;;  %v12773_v52 = vld [vmem:[#allocation2 + $0x988] ss:$392 sps:$4 sm:$0xff]   ;;  %v12778_v53 = vld [vmem:[#allocation2 + $0xc94] ss:$392 sps:$4 sm:$0xff]  }
  0x98   :  { %5001 = vmatpush1.bf16.msra.mxu0 %v12680_v54  ;;  %5042 = vmatpush1.bf16.msra.mxu1 %v12683_v55  ;;  %v12781_v54 = vld [vmem:[#allocation2 + $0xc9c] ss:$392 sps:$4 sm:$0xff]   ;;  %v12776_v55 = vld [vmem:[#allocation2 + $0xc90] ss:$392 sps:$4 sm:$0xff]  }
  0x99   :  { %5002 = vmatprep.subr.bf16.mxu0 %v12688_v56  ;;  %5043 = vmatprep.subr.bf16.mxu1 %v12691_v57  ;;  %v12779_v56 = vld [vmem:[#allocation2 + $0xc98] ss:$392 sps:$4 sm:$0xff]   ;;  %v12784_v57 = vld [vmem:[#allocation2 + $0xfa4] ss:$392 sps:$4 sm:$0xff]  }
  0x9c   :  { %5003 = vmatpush1.bf16.msra.mxu0 %v12686_v58  ;;  %5044 = vmatpush1.bf16.msra.mxu1 %v12689_v59  ;;  %v12787_v58 = vld [vmem:[#allocation2 + $0xfac] ss:$392 sps:$4 sm:$0xff]   ;;  %v12782_v59 = vld [vmem:[#allocation2 + $0xfa0] ss:$392 sps:$4 sm:$0xff]  }
  0x9d   :  { %5004 = vmatprep.subr.bf16.mxu0 %v12694_v60  ;;  %5045 = vmatprep.subr.bf16.mxu1 %v12697_v61  ;;  %v12785_v60 = vld [vmem:[#allocation2 + $0xfa8] ss:$392 sps:$4 sm:$0xff]   ;;  %v12790_v61 = vld [vmem:[#allocation2 + $0x12b4] ss:$392 sps:$4 sm:$0xff]  }
  0xa0   :  { %5005 = vmatpush1.bf16.msra.mxu0 %v12692_v62  ;;  %5046 = vmatpush1.bf16.msra.mxu1 %v12695_v63  ;;  %v12793_v62 = vld [vmem:[#allocation2 + $0x12bc] ss:$392 sps:$4 sm:$0xff]   ;;  %v12788_v63 = vld [vmem:[#allocation2 + $0x12b0] ss:$392 sps:$4 sm:$0xff]  }
  0xa1   :  { %5006 = vmatprep.subr.bf16.mxu0 %v12700_v1  ;;  %5047 = vmatprep.subr.bf16.mxu1 %v12703_v2  ;;  %v12791_v1 = vld [vmem:[#allocation2 + $0x12b8] ss:$392 sps:$4 sm:$0xff]   ;;  %v12796_v2 = vld [vmem:[#allocation2 + $0x15c4] ss:$392 sps:$4 sm:$0xff]  }
  0xa4   :  { %5007 = vmatpush1.bf16.msra.mxu0 %v12698_v3  ;;  %5048 = vmatpush1.bf16.msra.mxu1 %v12701_v4  ;;  %v12799_v3 = vld [vmem:[#allocation2 + $0x15cc] ss:$392 sps:$4 sm:$0xff]   ;;  %v12794_v4 = vld [vmem:[#allocation2 + $0x15c0] ss:$392 sps:$4 sm:$0xff]  }
  0xa5   :  { %5074 = vmatprep.subr.bf16.mxu0 %v12706_v5  ;;  %5115 = vmatprep.subr.bf16.mxu1 %v12709_v6  ;;  %v12797_v5 = vld [vmem:[#allocation2 + $0x15c8] ss:$392 sps:$4 sm:$0xff]   ;;  %v12802_v6 = vld [vmem:[#allocation2 + $0x64] ss:$392 sps:$4 sm:$0xff]  }
  0xa7   :  { %5025 = vmatmul.mubr.bf16.vlgmr.msra.gmra.mrb[12].mxu0 %v13994_v35  ;;  %5066 = vmatmul.mubr.bf16.vlgmr.msra.gmra.mrb[12].mxu1 %v13994_v35 }
  0xa8   :  { %5075 = vmatpush1.bf16.msra.mxu0 %v12704_v7  ;;  %5116 = vmatpush1.bf16.msra.mxu1 %v12707_v8  ;;  %v12805_v7 = vld [vmem:[#allocation2 + $0x6c] ss:$392 sps:$4 sm:$0xff]   ;;  %v12800_v8 = vld [vmem:[#allocation2 + $0x60] ss:$392 sps:$4 sm:$0xff]  }
  0xa9   :  { %5076 = vmatprep.subr.bf16.mxu0 %v12712_v9  ;;  %5117 = vmatprep.subr.bf16.mxu1 %v12715_v10  ;;  %v12803_v9 = vld [vmem:[#allocation2 + $0x68] ss:$392 sps:$4 sm:$0xff]   ;;  %v12808_v10 = vld [vmem:[#allocation2 + $0x374] ss:$392 sps:$4 sm:$0xff]  }
  0xaa   :  { %5106 = vmatprep.mubr.bf16.mxu0 %v16653_v0  ;;  %5147 = vmatprep.mubr.bf16.mxu1 %v16653_v0 }
  0xac   :  { %5077 = vmatpush1.bf16.msra.mxu0 %v12710_v11  ;;  %5118 = vmatpush1.bf16.msra.mxu1 %v12713_v12  ;;  %v12811_v11 = vld [vmem:[#allocation2 + $0x37c] ss:$392 sps:$4 sm:$0xff]   ;;  %v14019_v12 = vld [vmem:[%s16649_s0] sm:$0xf] }
  0xad   :  { %5078 = vmatprep.subr.bf16.mxu0 %v12718_v13  ;;  %5119 = vmatprep.subr.bf16.mxu1 %v12721_v14  ;;  %v12806_v13 = vld [vmem:[#allocation2 + $0x370] ss:$392 sps:$4 sm:$0xff]  }
  0xae   :  { %v12809_v14 = vld [vmem:[#allocation2 + $0x378] ss:$392 sps:$4 sm:$0xff]  }
  0xb0   :  { %5079 = vmatpush1.bf16.msra.mxu0 %v12716_v15  ;;  %5120 = vmatpush1.bf16.msra.mxu1 %v12719_v16  ;;  %v12814_v15 = vld [vmem:[#allocation2 + $0x684] ss:$392 sps:$4 sm:$0xff]  }
  0xb1   :  { %5080 = vmatprep.subr.bf16.mxu0 %v12724_v17  ;;  %5121 = vmatprep.subr.bf16.mxu1 %v12727_v18  ;;  %v12817_v16 = vld [vmem:[#allocation2 + $0x68c] ss:$392 sps:$4 sm:$0xff]   ;;  %v12812_v17 = vld [vmem:[#allocation2 + $0x680] ss:$392 sps:$4 sm:$0xff]  }
  0xb2   :  { %v12815_v18 = vld [vmem:[#allocation2 + $0x688] ss:$392 sps:$4 sm:$0xff]  }
  0xb4   :  { %5081 = vmatpush1.bf16.msra.mxu0 %v12722_v19  ;;  %5122 = vmatpush1.bf16.msra.mxu1 %v12725_v20  ;;  %v12820_v19 = vld [vmem:[#allocation2 + $0x994] ss:$392 sps:$4 sm:$0xff]  }
  0xb5   :  { %5082 = vmatprep.subr.bf16.mxu0 %v12730_v21  ;;  %5123 = vmatprep.subr.bf16.mxu1 %v12733_v22  ;;  %v12823_v20 = vld [vmem:[#allocation2 + $0x99c] ss:$392 sps:$4 sm:$0xff]   ;;  %v12818_v21 = vld [vmem:[#allocation2 + $0x990] ss:$392 sps:$4 sm:$0xff]  }
  0xb6   :  { %v12821_v22 = vld [vmem:[#allocation2 + $0x998] ss:$392 sps:$4 sm:$0xff]  }
  0xb8   :  { %5083 = vmatpush1.bf16.msra.mxu0 %v12728_v23  ;;  %5124 = vmatpush1.bf16.msra.mxu1 %v12731_v24  ;;  %v12826_v23 = vld [vmem:[#allocation2 + $0xca4] ss:$392 sps:$4 sm:$0xff]  }
  0xb9   :  { %5084 = vmatprep.subr.bf16.mxu0 %v12736_v25  ;;  %5125 = vmatprep.subr.bf16.mxu1 %v12739_v26  ;;  %v12829_v24 = vld [vmem:[#allocation2 + $0xcac] ss:$392 sps:$4 sm:$0xff]   ;;  %v12824_v25 = vld [vmem:[#allocation2 + $0xca0] ss:$392 sps:$4 sm:$0xff]  }
  0xba   :  { %v12827_v26 = vld [vmem:[#allocation2 + $0xca8] ss:$392 sps:$4 sm:$0xff]  }
  0xbc   :  { %5085 = vmatpush1.bf16.msra.mxu0 %v12734_v27  ;;  %5126 = vmatpush1.bf16.msra.mxu1 %v12737_v28  ;;  %v12832_v27 = vld [vmem:[#allocation2 + $0xfb4] ss:$392 sps:$4 sm:$0xff]  }
  0xbd   :  { %5086 = vmatprep.subr.bf16.mxu0 %v12742_v29  ;;  %5127 = vmatprep.subr.bf16.mxu1 %v12745_v30  ;;  %v12835_v28 = vld [vmem:[#allocation2 + $0xfbc] ss:$392 sps:$4 sm:$0xff]   ;;  %v12830_v29 = vld [vmem:[#allocation2 + $0xfb0] ss:$392 sps:$4 sm:$0xff]  }
  0xbe   :  { %v12833_v30 = vld [vmem:[#allocation2 + $0xfb8] ss:$392 sps:$4 sm:$0xff]  }
  0xc0   :  { %5087 = vmatpush1.bf16.msra.mxu0 %v12740_v31  ;;  %5128 = vmatpush1.bf16.msra.mxu1 %v12743_v32  ;;  %v12838_v31 = vld [vmem:[#allocation2 + $0x12c4] ss:$392 sps:$4 sm:$0xff]  }
  0xc1   :  { %5088 = vmatprep.subr.bf16.mxu0 %v12748_v33  ;;  %5129 = vmatprep.subr.bf16.mxu1 %v12751_v34  ;;  %v12841_v32 = vld [vmem:[#allocation2 + $0x12cc] ss:$392 sps:$4 sm:$0xff]   ;;  %v12836_v33 = vld [vmem:[#allocation2 + $0x12c0] ss:$392 sps:$4 sm:$0xff]  }
  0xc2   :  { %v12839_v34 = vld [vmem:[#allocation2 + $0x12c8] ss:$392 sps:$4 sm:$0xff]  }
  0xc4   :  { %5089 = vmatpush1.bf16.msra.mxu0 %v12746_v36  ;;  %5130 = vmatpush1.bf16.msra.mxu1 %v12749_v37  ;;  %v12844_v36 = vld [vmem:[#allocation2 + $0x15d4] ss:$392 sps:$4 sm:$0xff]  }
  0xc5   :  { %5156 = vmatprep.subr.bf16.mxu0 %v12754_v38  ;;  %5197 = vmatprep.subr.bf16.mxu1 %v12757_v39  ;;  %v12847_v37 = vld [vmem:[#allocation2 + $0x15dc] ss:$392 sps:$4 sm:$0xff]   ;;  %v12842_v38 = vld [vmem:[#allocation2 + $0x15d0] ss:$392 sps:$4 sm:$0xff]  }
  0xc6   :  { %v12845_v39 = vld [vmem:[#allocation2 + $0x15d8] ss:$392 sps:$4 sm:$0xff]  }
  0xc7   :  { %5107 = vmatmul.mubr.bf16.vlgmr.msra.gmra.mrb[16].mxu0 %v13994_v35  ;;  %5148 = vmatmul.mubr.bf16.vlgmr.msra.gmra.mrb[16].mxu1 %v13994_v35  ;;  %v12775_v35 = vld [vmem:[#allocation2 + $0x98c] ss:$392 sps:$4 sm:$0xff]  }
  0xc8   :  { %5157 = vmatpush1.bf16.msra.mxu0 %v12752_v40  ;;  %5198 = vmatpush1.bf16.msra.mxu1 %v12755_v41  ;;  %v12850_v40 = vld [vmem:[#allocation2 + $0x74] ss:$392 sps:$4 sm:$0xff]  }
  0xc9   :  { %5158 = vmatprep.subr.bf16.mxu0 %v12760_v42  ;;  %5199 = vmatprep.subr.bf16.mxu1 %v12763_v43  ;;  %v12853_v41 = vld [vmem:[#allocation2 + $0x7c] ss:$392 sps:$4 sm:$0xff]   ;;  %v12848_v42 = vld [vmem:[#allocation2 + $0x70] ss:$392 sps:$4 sm:$0xff]  }
  0xca   :  { %5188 = vmatprep.mubr.bf16.mxu0 %v16653_v0  ;;  %5229 = vmatprep.mubr.bf16.mxu1 %v16653_v0  ;;  %v12851_v43 = vld [vmem:[#allocation2 + $0x78] ss:$392 sps:$4 sm:$0xff]  }
  0xcc   :  { %5159 = vmatpush1.bf16.msra.mxu0 %v12758_v44  ;;  %5200 = vmatpush1.bf16.msra.mxu1 %v12761_v45  ;;  %v12856_v44 = vld [vmem:[#allocation2 + $0x384] ss:$392 sps:$4 sm:$0xff]  }
  0xcd   :  { %5160 = vmatprep.subr.bf16.mxu0 %v12766_v46  ;;  %5201 = vmatprep.subr.bf16.mxu1 %v12769_v47  ;;  %v12859_v45 = vld [vmem:[#allocation2 + $0x38c] ss:$392 sps:$4 sm:$0xff]   ;;  %v12854_v46 = vld [vmem:[#allocation2 + $0x380] ss:$392 sps:$4 sm:$0xff]  }
  0xce   :  { %v12857_v47 = vld [vmem:[#allocation2 + $0x388] ss:$392 sps:$4 sm:$0xff]  }
  0xd0   :  { %5161 = vmatpush1.bf16.msra.mxu0 %v12764_v48  ;;  %5202 = vmatpush1.bf16.msra.mxu1 %v12767_v49  ;;  %v12862_v48 = vld [vmem:[#allocation2 + $0x694] ss:$392 sps:$4 sm:$0xff]  }
  0xd1   :  { %5162 = vmatprep.subr.bf16.mxu0 %v12772_v50  ;;  %5203 = vmatprep.subr.bf16.mxu1 %v12775_v35  ;;  %v12865_v49 = vld [vmem:[#allocation2 + $0x69c] ss:$392 sps:$4 sm:$0xff]   ;;  %v12860_v50 = vld [vmem:[#allocation2 + $0x690] ss:$392 sps:$4 sm:$0xff]  }
  0xd2   :  { %v12863_v35 = vld [vmem:[#allocation2 + $0x698] ss:$392 sps:$4 sm:$0xff]  }
  0xd4   :  { %5163 = vmatpush1.bf16.msra.mxu0 %v12770_v51  ;;  %5204 = vmatpush1.bf16.msra.mxu1 %v12773_v52  ;;  %v12868_v51 = vld [vmem:[#allocation2 + $0x9a4] ss:$392 sps:$4 sm:$0xff]  }
  0xd5   :  { %5164 = vmatprep.subr.bf16.mxu0 %v12778_v53  ;;  %5205 = vmatprep.subr.bf16.mxu1 %v12781_v54  ;;  %v12871_v52 = vld [vmem:[#allocation2 + $0x9ac] ss:$392 sps:$4 sm:$0xff]   ;;  %v12866_v53 = vld [vmem:[#allocation2 + $0x9a0] ss:$392 sps:$4 sm:$0xff]  }
  0xd6   :  { %v12869_v54 = vld [vmem:[#allocation2 + $0x9a8] ss:$392 sps:$4 sm:$0xff]  }
  0xd8   :  { %5165 = vmatpush1.bf16.msra.mxu0 %v12776_v55  ;;  %5206 = vmatpush1.bf16.msra.mxu1 %v12779_v56  ;;  %v12874_v55 = vld [vmem:[#allocation2 + $0xcb4] ss:$392 sps:$4 sm:$0xff]  }
  0xd9   :  { %5166 = vmatprep.subr.bf16.mxu0 %v12784_v57  ;;  %5207 = vmatprep.subr.bf16.mxu1 %v12787_v58  ;;  %v12877_v56 = vld [vmem:[#allocation2 + $0xcbc] ss:$392 sps:$4 sm:$0xff]   ;;  %v12872_v57 = vld [vmem:[#allocation2 + $0xcb0] ss:$392 sps:$4 sm:$0xff]  }
  0xda   :  { %v12875_v58 = vld [vmem:[#allocation2 + $0xcb8] ss:$392 sps:$4 sm:$0xff]  }
  0xdc   :  { %5167 = vmatpush1.bf16.msra.mxu0 %v12782_v59  ;;  %5208 = vmatpush1.bf16.msra.mxu1 %v12785_v60  ;;  %v12880_v59 = vld [vmem:[#allocation2 + $0xfc4] ss:$392 sps:$4 sm:$0xff]  }
  0xdd   :  { %5168 = vmatprep.subr.bf16.mxu0 %v12790_v61  ;;  %5209 = vmatprep.subr.bf16.mxu1 %v12793_v62  ;;  %v12883_v60 = vld [vmem:[#allocation2 + $0xfcc] ss:$392 sps:$4 sm:$0xff]   ;;  %v12878_v61 = vld [vmem:[#allocation2 + $0xfc0] ss:$392 sps:$4 sm:$0xff]  }
  0xde   :  { %v12881_v62 = vld [vmem:[#allocation2 + $0xfc8] ss:$392 sps:$4 sm:$0xff]  }
  0xe0   :  { %5169 = vmatpush1.bf16.msra.mxu0 %v12788_v63  ;;  %5210 = vmatpush1.bf16.msra.mxu1 %v12791_v1  ;;  %v12886_v63 = vld [vmem:[#allocation2 + $0x12d4] ss:$392 sps:$4 sm:$0xff]  }
  0xe1   :  { %5170 = vmatprep.subr.bf16.mxu0 %v12796_v2  ;;  %5211 = vmatprep.subr.bf16.mxu1 %v12799_v3  ;;  %v12889_v1 = vld [vmem:[#allocation2 + $0x12dc] ss:$392 sps:$4 sm:$0xff]  }
  0xe4   :  { %5171 = vmatpush1.bf16.msra.mxu0 %v12794_v4  ;;  %5212 = vmatpush1.bf16.msra.mxu1 %v12797_v5  ;;  %v12884_v4 = vld [vmem:[#allocation2 + $0x12d0] ss:$392 sps:$4 sm:$0xff]  }
  0xe5   :  { %5238 = vmatprep.subr.bf16.mxu0 %v12802_v6  ;;  %5279 = vmatprep.subr.bf16.mxu1 %v12805_v7 }
  0xe7   :  { %5189 = vmatmul.mubr.bf16.vlgmr.msra.gmra.mrb[20].mxu0 %v14019_v12  ;;  %5230 = vmatmul.mubr.bf16.vlgmr.msra.gmra.mrb[20].mxu1 %v14019_v12 }
  0xe8   :  { %5239 = vmatpush1.bf16.msra.mxu0 %v12800_v8  ;;  %5280 = vmatpush1.bf16.msra.mxu1 %v12803_v9 }
  0xe9   :  { %5240 = vmatprep.subr.bf16.mxu0 %v12808_v10  ;;  %5281 = vmatprep.subr.bf16.mxu1 %v12811_v11  ;;  %v12887_v11 = vld [vmem:[#allocation2 + $0x12d8] ss:$392 sps:$4 sm:$0xff]  }
  0xea   :  { %5270 = vmatprep.mubr.bf16.mxu0 %v16653_v0  ;;  %5311 = vmatprep.mubr.bf16.mxu1 %v16653_v0 }
  0xec   :  { %5241 = vmatpush1.bf16.msra.mxu0 %v12806_v13  ;;  %5282 = vmatpush1.bf16.msra.mxu1 %v12809_v14 }
  0xed   :  { %5242 = vmatprep.subr.bf16.mxu0 %v12814_v15  ;;  %5283 = vmatprep.subr.bf16.mxu1 %v12817_v16 }
  0xf0   :  { %5243 = vmatpush1.bf16.msra.mxu0 %v12812_v17  ;;  %5284 = vmatpush1.bf16.msra.mxu1 %v12815_v18  ;;  %v12892_v18 = vld [vmem:[#allocation2 + $0x15e4] ss:$392 sps:$4 sm:$0xff]  }
  0xf1   :  { %5244 = vmatprep.subr.bf16.mxu0 %v12820_v19  ;;  %5285 = vmatprep.subr.bf16.mxu1 %v12823_v20 }
  0xf4   :  { %5245 = vmatpush1.bf16.msra.mxu0 %v12818_v21  ;;  %5286 = vmatpush1.bf16.msra.mxu1 %v12821_v22 }
  0xf5   :  { %5246 = vmatprep.subr.bf16.mxu0 %v12826_v23  ;;  %5287 = vmatprep.subr.bf16.mxu1 %v12829_v24 }
  0xf8   :  { %5247 = vmatpush1.bf16.msra.mxu0 %v12824_v25  ;;  %5288 = vmatpush1.bf16.msra.mxu1 %v12827_v26  ;;  %v12895_v25 = vld [vmem:[#allocation2 + $0x15ec] ss:$392 sps:$4 sm:$0xff]  }
  0xf9   :  { %5248 = vmatprep.subr.bf16.mxu0 %v12832_v27  ;;  %5289 = vmatprep.subr.bf16.mxu1 %v12835_v28 }
  0xfc   :  { %5249 = vmatpush1.bf16.msra.mxu0 %v12830_v29  ;;  %5290 = vmatpush1.bf16.msra.mxu1 %v12833_v30 }
  0xfd   :  { %5250 = vmatprep.subr.bf16.mxu0 %v12838_v31  ;;  %5291 = vmatprep.subr.bf16.mxu1 %v12841_v32 }
 0x100   :  { %5251 = vmatpush1.bf16.msra.mxu0 %v12836_v33  ;;  %5292 = vmatpush1.bf16.msra.mxu1 %v12839_v34 }
 0x101   :  { %5252 = vmatprep.subr.bf16.mxu0 %v12844_v36  ;;  %5293 = vmatprep.subr.bf16.mxu1 %v12847_v37  ;;  %v12890_v36 = vld [vmem:[#allocation2 + $0x15e0] ss:$392 sps:$4 sm:$0xff]  }
 0x102   :  { %v12893_v37 = vld [vmem:[#allocation2 + $0x15e8] ss:$392 sps:$4 sm:$0xff]  }
 0x104   :  { %5253 = vmatpush1.bf16.msra.mxu0 %v12842_v38  ;;  %5294 = vmatpush1.bf16.msra.mxu1 %v12845_v39 }
 0x105   :  { %5320 = vmatprep.subr.bf16.mxu0 %v12850_v40  ;;  %5361 = vmatprep.subr.bf16.mxu1 %v12853_v41 }
 0x107   :  { %5271 = vmatmul.mubr.bf16.vlgmr.msra.gmra.mrb[24].mxu0 %v14019_v12  ;;  %5312 = vmatmul.mubr.bf16.vlgmr.msra.gmra.mrb[24].mxu1 %v14019_v12 }
 0x108   :  { %5321 = vmatpush1.bf16.msra.mxu0 %v12848_v42  ;;  %5362 = vmatpush1.bf16.msra.mxu1 %v12851_v43  ;;  %v12898_v42 = vld [vmem:[#allocation2 + $0x84] ss:$392 sps:$4 sm:$0xff]  }
 0x109   :  { %5322 = vmatprep.subr.bf16.mxu0 %v12856_v44  ;;  %5363 = vmatprep.subr.bf16.mxu1 %v12859_v45  ;;  %v12901_v43 = vld [vmem:[#allocation2 + $0x8c] ss:$392 sps:$4 sm:$0xff]  }
 0x10a   :  { %5352 = vmatprep.mubr.bf16.mxu0 %v16653_v0  ;;  %5393 = vmatprep.mubr.bf16.mxu1 %v16653_v0 }
 0x10c   :  { %5323 = vmatpush1.bf16.msra.mxu0 %v12854_v46  ;;  %5364 = vmatpush1.bf16.msra.mxu1 %v12857_v47 }
 0x10d   :  { %5324 = vmatprep.subr.bf16.mxu0 %v12862_v48  ;;  %5365 = vmatprep.subr.bf16.mxu1 %v12865_v49 }
 0x110   :  { %5325 = vmatpush1.bf16.msra.mxu0 %v12860_v50  ;;  %5366 = vmatpush1.bf16.msra.mxu1 %v12863_v35 }
 0x111   :  { %5326 = vmatprep.subr.bf16.mxu0 %v12868_v51  ;;  %5367 = vmatprep.subr.bf16.mxu1 %v12871_v52 }
 0x114   :  { %5327 = vmatpush1.bf16.msra.mxu0 %v12866_v53  ;;  %5368 = vmatpush1.bf16.msra.mxu1 %v12869_v54 }
 0x115   :  { %5328 = vmatprep.subr.bf16.mxu0 %v12874_v55  ;;  %5369 = vmatprep.subr.bf16.mxu1 %v12877_v56  ;;  %v12896_v55 = vld [vmem:[#allocation2 + $0x80] ss:$392 sps:$4 sm:$0xff]  }
 0x116   :  { %v12899_v56 = vld [vmem:[#allocation2 + $0x88] ss:$392 sps:$4 sm:$0xff]  }
 0x118   :  { %5329 = vmatpush1.bf16.msra.mxu0 %v12872_v57  ;;  %5370 = vmatpush1.bf16.msra.mxu1 %v12875_v58 }
 0x119   :  { %5330 = vmatprep.subr.bf16.mxu0 %v12880_v59  ;;  %5371 = vmatprep.subr.bf16.mxu1 %v12883_v60 }
 0x11a   :  { %v14029_v2 = vpop.f32.mrb[0].mxu0  ;;  %v14031_v3 = vpop.f32.mrb[0].mxu1 }
 0x11b   :  { %v6755_v5 = vrot.slane %v14029_v2, 4  ;;  %v7441_v6 = vmul.f32 %v14029_v2, %v14029_v2  ;;  %v6767_v7 = vrot.slane %v14031_v3, 4  ;;  %v7443_v8 = vmul.f32 %v14031_v3, %v14031_v3  ;;  %v14039_v9 = vpop.f32.mrb[1].mxu0  ;;  %v14041_v10 = vpop.f32.mrb[1].mxu1 }
 0x11c   :  { %v6761_v13 = vrot.slane %v14039_v9, 4  ;;  %v7442_v14 = vmul.f32 %v14039_v9, %v14039_v9  ;;  %v6773_v15 = vrot.slane %v14041_v10, 4  ;;  %v7444_v16 = vmul.f32 %v14041_v10, %v14041_v10  ;;  %v4784_v17 = vpop.f32.mrb[2].mxu0  ;;  %5331 = vmatpush1.bf16.msra.mxu0 %v12878_v61  ;;  %5372 = vmatpush1.bf16.msra.mxu1 %v12881_v62  ;;  %v4825_v19 = vpop.f32.mrb[2].mxu1  ;;  %v12904_v61 = vld [vmem:[#allocation2 + $0x394] ss:$392 sps:$4 sm:$0xff]  }
 0x11d   :  { %v6756_v20 = vadd.f32 %v6755_v5, %v14029_v2  ;;  %v7539_v21 = vrot.slane %v7441_v6, 4  ;;  %v6768_v22 = vadd.f32 %v6767_v7, %v14031_v3  ;;  %v7551_v23 = vrot.slane %v7443_v8, 4  ;;  %v4785_v24 = vpop.f32.mrb[3].mxu0  ;;  %5332 = vmatprep.subr.bf16.mxu0 %v12886_v63  ;;  %5373 = vmatprep.subr.bf16.mxu1 %v12889_v1  ;;  %v4826_v26 = vpop.f32.mrb[3].mxu1  ;;  %v12907_v62 = vld [vmem:[#allocation2 + $0x39c] ss:$392 sps:$4 sm:$0xff]  }
 0x11e   :  { %v6762_v27 = vadd.f32 %v6761_v13, %v14039_v9  ;;  %v7545_v28 = vrot.slane %v7442_v14, 4  ;;  %v6774_v29 = vadd.f32 %v6773_v15, %v14041_v10  ;;  %v7557_v30 = vrot.slane %v7444_v16, 4 }
 0x11f   :  { %v6757_v31 = vrot.slane %v6756_v20, 2  ;;  %v7540_v32 = vadd.f32 %v7539_v21, %v7441_v6  ;;  %v6769_v33 = vrot.slane %v6768_v22, 2  ;;  %v7552_v34 = vadd.f32 %v7551_v23, %v7443_v8  ;;  %v12902_v21 = vld [vmem:[#allocation2 + $0x390] ss:$392 sps:$4 sm:$0xff]  }
 0x120   :  { %v6763_v38 = vrot.slane %v6762_v27, 2  ;;  %v7546_v39 = vadd.f32 %v7545_v28, %v7442_v14  ;;  %v6775_v40 = vrot.slane %v6774_v29, 2  ;;  %v7558_v41 = vadd.f32 %v7557_v30, %v7444_v16  ;;  %5333 = vmatpush1.bf16.msra.mxu0 %v12884_v4  ;;  %5374 = vmatpush1.bf16.msra.mxu1 %v12887_v11 }
 0x121   :  { %v6758_v44 = vadd.f32 %v6757_v31, %v6756_v20  ;;  %v7541_v45 = vrot.slane %v7540_v32, 2  ;;  %v6770_v46 = vadd.f32 %v6769_v33, %v6768_v22  ;;  %v7553_v47 = vrot.slane %v7552_v34, 2  ;;  %5334 = vmatprep.subr.bf16.mxu0 %v12892_v18  ;;  %5375 = vmatprep.subr.bf16.mxu1 %v12895_v25  ;;  %v12905_v22 = vld [vmem:[#allocation2 + $0x398] ss:$392 sps:$4 sm:$0xff]  }
 0x122   :  { %v6764_v48 = vadd.f32 %v6763_v38, %v6762_v27  ;;  %v7547_v49 = vrot.slane %v7546_v39, 2  ;;  %v6776_v50 = vadd.f32 %v6775_v40, %v6774_v29  ;;  %v7559_v35 = vrot.slane %v7558_v41, 2  ;;  %v12913_v27 = vld [vmem:[#allocation2 + $0x6ac] ss:$392 sps:$4 sm:$0xff]   ;;  %v12919_v40 = vld [vmem:[#allocation2 + $0x9bc] ss:$392 sps:$4 sm:$0xff]  }
 0x123   :  { %v6759_v51 = vrot.slane %v6758_v44, 1  ;;  %v7542_v52 = vadd.f32 %v7541_v45, %v7540_v32  ;;  %v6771_v53 = vrot.slane %v6770_v46, 1  ;;  %v7554_v54 = vadd.f32 %v7553_v47, %v7552_v34  ;;  %v12908_v34 = vld [vmem:[#allocation2 + $0x6a0] ss:$392 sps:$4 sm:$0xff]   ;;  %v12914_v47 = vld [vmem:[#allocation2 + $0x9b0] ss:$392 sps:$4 sm:$0xff]  }
 0x124   :  { %v6765_v57 = vrot.slane %v6764_v48, 1  ;;  %v7548_v58 = vadd.f32 %v7547_v49, %v7546_v39  ;;  %v6777_v59 = vrot.slane %v6776_v50, 1  ;;  %v7560_v60 = vadd.f32 %v7559_v35, %v7558_v41  ;;  %5335 = vmatpush1.bf16.msra.mxu0 %v12890_v36  ;;  %5376 = vmatpush1.bf16.msra.mxu1 %v12893_v37  ;;  %v12911_v36 = vld [vmem:[#allocation2 + $0x6a8] ss:$392 sps:$4 sm:$0xff]   ;;  %v12916_v39 = vld [vmem:[#allocation2 + $0x9b4] ss:$392 sps:$4 sm:$0xff]  }
 0x125   :  { %v6760_v63 = vadd.f32 %v6759_v51, %v6758_v44  ;;  %v7543_v1 = vrot.slane %v7542_v52, 1  ;;  %v6772_v4 = vadd.f32 %v6771_v53, %v6770_v46  ;;  %v7555_v5 = vrot.slane %v7554_v54, 1  ;;  %5402 = vmatprep.subr.bf16.mxu0 %v12898_v42  ;;  %5443 = vmatprep.subr.bf16.mxu1 %v12901_v43  ;;  %v12922_v35 = vld [vmem:[#allocation2 + $0xcc4] ss:$392 sps:$4 sm:$0xff]  }
 0x126   :  { %v6766_v6 = vadd.f32 %v6765_v57, %v6764_v48  ;;  %v7549_v7 = vrot.slane %v7548_v58, 1  ;;  %v6778_v8 = vadd.f32 %v6777_v59, %v6776_v50  ;;  %v7561_v11 = vrot.slane %v7560_v60, 1  ;;  %v12917_v50 = vld [vmem:[#allocation2 + $0x9b8] ss:$392 sps:$4 sm:$0xff]   ;;  %v12925_v51 = vld [vmem:[#allocation2 + $0xccc] ss:$392 sps:$4 sm:$0xff]  }
 0x127   :  { %v14053_v13 = vmul.f32 0.125, %v6760_v63  ;;  %v7544_v14 = vadd.f32 %v7543_v1, %v7542_v52  ;;  %v14055_v15 = vmul.f32 0.125, %v6772_v4  ;;  %v7556_v16 = vadd.f32 %v7555_v5, %v7554_v54  ;;  %5353 = vmatmul.mubr.bf16.vlgmr.msra.gmra.mrb[28].mxu0 %v14019_v12  ;;  %5394 = vmatmul.mubr.bf16.vlgmr.msra.gmra.mrb[28].mxu1 %v14019_v12  ;;  %v12910_v12 = vld [vmem:[#allocation2 + $0x6a4] ss:$392 sps:$4 sm:$0xff]   ;;  %v12928_v57 = vld [vmem:[#allocation2 + $0xfd4] ss:$392 sps:$4 sm:$0xff]  }
 0x128   :  { %v14059_v17 = vmul.f32 0.125, %v6766_v6  ;;  %v7550_v18 = vadd.f32 %v7549_v7, %v7548_v58  ;;  %v14061_v19 = vmul.f32 0.125, %v6778_v8  ;;  %v7562_v20 = vadd.f32 %v7561_v11, %v7560_v60  ;;  %5403 = vmatpush1.bf16.msra.mxu0 %v12896_v55  ;;  %5444 = vmatpush1.bf16.msra.mxu1 %v12899_v56  ;;  %v12920_v55 = vld [vmem:[#allocation2 + $0xcc0] ss:$392 sps:$4 sm:$0xff]   ;;  %v12931_v58 = vld [vmem:[#allocation2 + $0xfdc] ss:$392 sps:$4 sm:$0xff]  }
 0x129   :  { %v8127_v23 = vmul.f32 0.125, %v7544_v14  ;;  %v8225_v24 = vmul.f32 %v14053_v13, %v14053_v13  ;;  %v8129_v25 = vmul.f32 0.125, %v7556_v16  ;;  %v8227_v26 = vmul.f32 %v14055_v15, %v14055_v15  ;;  %5404 = vmatprep.subr.bf16.mxu0 %v12904_v61  ;;  %5445 = vmatprep.subr.bf16.mxu1 %v12907_v62  ;;  %v12923_v56 = vld [vmem:[#allocation2 + $0xcc8] ss:$392 sps:$4 sm:$0xff]   ;;  %v12929_v62 = vld [vmem:[#allocation2 + $0xfd8] ss:$392 sps:$4 sm:$0xff]  }
 0x12a   :  { %v8128_v28 = vmul.f32 0.125, %v7550_v18  ;;  %v8226_v29 = vmul.f32 %v14059_v17, %v14059_v17  ;;  %v8130_v30 = vmul.f32 0.125, %v7562_v20  ;;  %v8228_v31 = vmul.f32 %v14061_v19, %v14061_v19  ;;  %5434 = vmatprep.mubr.bf16.mxu0 %v16653_v0  ;;  %5475 = vmatprep.mubr.bf16.mxu1 %v16653_v0  ;;  %v12926_v61 = vld [vmem:[#allocation2 + $0xfd0] ss:$392 sps:$4 sm:$0xff]   ;;  %v12934_v63 = vld [vmem:[#allocation2 + $0x12e4] ss:$392 sps:$4 sm:$0xff]  }
 0x12b   :  { %v8323_v32 = vsub.f32 %v8127_v23, %v8225_v24  ;;  %v8325_v33 = vsub.f32 %v8129_v25, %v8227_v26  ;;  %v13944_v52 = vmov 1966171168   ;;  %v8871_v54 = vlaneseq  ;;  %v12937_v1 = vld [vmem:[#allocation2 + $0x12ec] ss:$392 sps:$4 sm:$0xff]   ;;  %v12932_v7 = vld [vmem:[#allocation2 + $0x12e0] ss:$392 sps:$4 sm:$0xff]  }
 0x12c   :  { %v8324_v37 = vsub.f32 %v8128_v28, %v8226_v29  ;;  %v8326_v38 = vsub.f32 %v8130_v30, %v8228_v31  ;;  %5405 = vmatpush1.bf16.msra.mxu0 %v12902_v21  ;;  %5446 = vmatpush1.bf16.msra.mxu1 %v12905_v22  ;;  %v8869_v53 = vunpack.c.l.s4 %v13944_v52  ;;  %v12935_v22 = vld [vmem:[#allocation2 + $0x12e8] ss:$392 sps:$4 sm:$0xff]   ;;  %v12940_v28 = vld [vmem:[#allocation2 + $0x15f4] ss:$392 sps:$4 sm:$0xff]  }
 0x12d   :  { %v8421_v41 = vmax.f32 %v8323_v32, 0.0  ;;  %v8423_v42 = vmax.f32 %v8325_v33, 0.0  ;;  %5406 = vmatprep.subr.bf16.mxu0 %v12910_v12  ;;  %5447 = vmatprep.subr.bf16.mxu1 %v12913_v27  ;;  %v14073_v60 = vshrl.u32 %v8871_v54, 7  ;;  %v12949_v54 = vld [vmem:[#allocation2 + $0x9c] ss:$392 sps:$4 sm:$0xff]  }
 0x12e   :  { %v8422_v43 = vmax.f32 %v8324_v37, 0.0  ;;  %v8424_v44 = vmax.f32 %v8326_v38, 0.0  ;;  %v8870_v59 = vunpack.c.0.s8 %v8869_v53  ;;  %v12943_v37 = vld [vmem:[#allocation2 + $0x15fc] ss:$392 sps:$4 sm:$0xff]  }
 0x12f   :  { %v8519_v45 = vadd.f32 1e-05, %v8421_v41  ;;  %v8521_v46 = vadd.f32 1e-05, %v8423_v42  ;;  %v12946_v53 = vld [vmem:[#allocation2 + $0x94] ss:$392 sps:$4 sm:$0xff]  }
 0x130   :  { %v8520_v48 = vadd.f32 1e-05, %v8422_v43  ;;  %v8522_v49 = vadd.f32 1e-05, %v8424_v44  ;;  %5407 = vmatpush1.bf16.msra.mxu0 %v12908_v34  ;;  %5448 = vmatpush1.bf16.msra.mxu1 %v12911_v36  ;;  %v14076_v4 = vsub.s32 %v8870_v59, %v14073_v60 }
 0x131   :  { %13688 = vrsqrt.f32 %v8519_v45  ;;  %5408 = vmatprep.subr.bf16.mxu0 %v12916_v39  ;;  %5449 = vmatprep.subr.bf16.mxu1 %v12919_v40 }
 0x132   :  { %13690 = vrsqrt.f32 %v8521_v46 }
 0x133   :  { %13692 = vrsqrt.f32 %v8520_v48  ;;  %v12938_v48 = vld [vmem:[#allocation2 + $0x15f0] ss:$392 sps:$4 sm:$0xff]  }
 0x134   :  { %13694 = vrsqrt.f32 %v8522_v49  ;;  %5409 = vmatpush1.bf16.msra.mxu0 %v12914_v47  ;;  %5450 = vmatpush1.bf16.msra.mxu1 %v12917_v50  ;;  %v12941_v49 = vld [vmem:[#allocation2 + $0x15f8] ss:$392 sps:$4 sm:$0xff]  }
 0x135   :  { %5410 = vmatprep.subr.bf16.mxu0 %v12922_v35  ;;  %5451 = vmatprep.subr.bf16.mxu1 %v12925_v51 }
 0x138   :  { %5411 = vmatpush1.bf16.msra.mxu0 %v12920_v55  ;;  %5452 = vmatpush1.bf16.msra.mxu1 %v12923_v56 }
 0x139   :  { %5412 = vmatprep.subr.bf16.mxu0 %v12928_v57  ;;  %5453 = vmatprep.subr.bf16.mxu1 %v12931_v58 }
 0x13a   :  { %v14078_v5 = vpop.f32.mrb[4].mxu0  ;;  %v14080_v6 = vpop.f32.mrb[4].mxu1 }
 0x13b   :  { %v13689_v8 = vpop.eup %13688  ;;  %v6779_v11 = vrot.slane %v14078_v5, 4  ;;  %v7445_v14 = vmul.f32 %v14078_v5, %v14078_v5  ;;  %v6791_v16 = vrot.slane %v14080_v6, 4  ;;  %v7447_v18 = vmul.f32 %v14080_v6, %v14080_v6  ;;  %v14088_v20 = vpop.f32.mrb[5].mxu0 }
 0x13c   :  { %v14090_v21 = vpop.f32.mrb[5].mxu1  ;;  %v13691_v23 = vpop.eup %13690  ;;  %v6785_v24 = vrot.slane %v14088_v20, 4  ;;  %v7446_v25 = vmul.f32 %v14088_v20, %v14088_v20  ;;  %5413 = vmatpush1.bf16.msra.mxu0 %v12926_v61  ;;  %5454 = vmatpush1.bf16.msra.mxu1 %v12929_v62 }
 0x13d   :  { %v6797_v26 = vrot.slane %v14090_v21, 4  ;;  %v14098_v12 = vmul.f32 %v14090_v21, %v14090_v21  ;;  %v4866_v27 = vpop.f32.mrb[6].mxu0  ;;  %v4907_v29 = vpop.f32.mrb[6].mxu1  ;;  %v6780_v31 = vadd.f32 %v6779_v11, %v14078_v5  ;;  %v7563_v32 = vrot.slane %v7445_v14, 4  ;;  %5414 = vmatprep.subr.bf16.mxu0 %v12934_v63  ;;  %5455 = vmatprep.subr.bf16.mxu1 %v12937_v1 }
 0x13e   :  { %v13693_v30 = vpop.eup %13692  ;;  %v6792_v33 = vadd.f32 %v6791_v16, %v14080_v6  ;;  %v7575_v34 = vrot.slane %v7447_v18, 4  ;;  %v4867_v36 = vpop.f32.mrb[7].mxu0  ;;  %v6786_v41 = vadd.f32 %v6785_v24, %v14088_v20  ;;  %v7569_v42 = vrot.slane %v7446_v25, 4  ;;  %v12947_v16 = vld [vmem:[#allocation2 + $0x98] ss:$392 sps:$4 sm:$0xff]  }
 0x13f   :  { %v4908_v38 = vpop.f32.mrb[7].mxu1  ;;  %v13695_v39 = vpop.eup %13694  ;;  %v8864_v40 = vcombine.low %v13689_v8, %v13693_v30  ;;  %v6798_v43 = vadd.f32 %v6797_v26, %v14090_v21  ;;  %v6781_v45 = vrot.slane %v6780_v31, 2  ;;  %v7564_v46 = vadd.f32 %v7563_v32, %v7445_v14  ;;  %v12944_v14 = vld [vmem:[#allocation2 + $0x90] ss:$392 sps:$4 sm:$0xff]   ;;  %v12955_v26 = vld [vmem:[#allocation2 + $0x3ac] ss:$392 sps:$4 sm:$0xff]  }
 0x140   :  { %v8865_v44 = vcombine.low %v13691_v23, %v13695_v39  ;;  %v6793_v47 = vrot.slane %v6792_v33, 2  ;;  %v7576_v35 = vadd.f32 %v7575_v34, %v7447_v18  ;;  %v6787_v51 = vrot.slane %v6786_v41, 2  ;;  %5415 = vmatpush1.bf16.msra.mxu0 %v12932_v7  ;;  %5456 = vmatpush1.bf16.msra.mxu1 %v12935_v22  ;;  %v14120_v39 = vld [vmem:[%s16649_s0] sm:$0xf] }
 0x141   :  { %v14105_v50 = vrot.slane %v8864_v40, %v14076_v4  ;;  %v7570_v52 = vadd.f32 %v7569_v42, %v7446_v25  ;;  %v6782_v56 = vadd.f32 %v6781_v45, %v6780_v31  ;;  %v7565_v57 = vrot.slane %v7564_v46, 2  ;;  %5416 = vmatprep.subr.bf16.mxu0 %v12940_v28  ;;  %5457 = vmatprep.subr.bf16.mxu1 %v12943_v37  ;;  %v12952_v25 = vld [vmem:[#allocation2 + $0x3a4] ss:$392 sps:$4 sm:$0xff]   ;;  %v12950_v40 = vld [vmem:[#allocation2 + $0x3a0] ss:$392 sps:$4 sm:$0xff]  }
 0x142   :  { %v14108_v55 = vrot.slane %v8865_v44, %v14076_v4  ;;  %v6794_v58 = vadd.f32 %v6793_v47, %v6792_v33  ;;  %v7577_v59 = vrot.slane %v7576_v35, 2  ;;  %v6788_v61 = vadd.f32 %v6787_v51, %v6786_v41  ;;  %v12953_v45 = vld [vmem:[#allocation2 + $0x3a8] ss:$392 sps:$4 sm:$0xff]   ;;  %v12961_v51 = vld [vmem:[#allocation2 + $0x6bc] ss:$392 sps:$4 sm:$0xff]  }
 0x143   :  { %v7571_v62 = vrot.slane %v7570_v52, 2  ;;  %v6799_v63 = vrot.slane %v6798_v43, 2  ;;  %v6783_v8 = vrot.slane %v6782_v56, 1  ;;  %v7566_v7 = vadd.f32 %v7565_v57, %v7564_v46  ;;  %v12958_v46 = vld [vmem:[#allocation2 + $0x6b4] ss:$392 sps:$4 sm:$0xff]  }
 0x144   :  { %v6795_v11 = vrot.slane %v6794_v58, 1  ;;  %v7578_v18 = vadd.f32 %v7577_v59, %v7576_v35  ;;  %v6789_v22 = vrot.slane %v6788_v61, 1  ;;  %5417 = vmatpush1.bf16.msra.mxu0 %v12938_v48  ;;  %5458 = vmatpush1.bf16.msra.mxu1 %v12941_v49  ;;  %v7581_v38 = vrot.slane %v14098_v12, 4  ;;  %v12959_v59 = vld [vmem:[#allocation2 + $0x6b8] ss:$392 sps:$4 sm:$0xff]  }
 0x145   :  { %v7572_v23 = vadd.f32 %v7571_v62, %v7570_v52  ;;  %v6800_v24 = vadd.f32 %v6799_v63, %v6798_v43  ;;  %v6784_v27 = vadd.f32 %v6783_v8, %v6782_v56  ;;  %v7567_v28 = vrot.slane %v7566_v7, 1  ;;  %5484 = vmatprep.subr.bf16.mxu0 %v12946_v53  ;;  %5525 = vmatprep.subr.bf16.mxu1 %v12949_v54  ;;  %v12967_v62 = vld [vmem:[#allocation2 + $0x9cc] ss:$392 sps:$4 sm:$0xff]  }
 0x146   :  { %v6796_v29 = vadd.f32 %v6795_v11, %v6794_v58  ;;  %v7579_v30 = vrot.slane %v7578_v18, 1  ;;  %v6790_v31 = vadd.f32 %v6789_v22, %v6788_v61  ;;  %v7582_v35 = vadd.f32 %v7581_v38, %v14098_v12  ;;  %v12956_v58 = vld [vmem:[#allocation2 + $0x6b0] ss:$392 sps:$4 sm:$0xff]   ;;  %v12964_v12 = vld [vmem:[#allocation2 + $0x9c4] ss:$392 sps:$4 sm:$0xff]  }
 0x147   :  { %v7573_v32 = vrot.slane %v7572_v23, 1  ;;  %v6801_v33 = vrot.slane %v6800_v24, 1  ;;  %v14112_v34 = vmul.f32 0.125, %v6784_v27  ;;  %v7568_v36 = vadd.f32 %v7567_v28, %v7566_v7  ;;  %5435 = vmatmul.mubr.bf16.vlgmr.msra.gmra.mrb[32].mxu0 %v14120_v39  ;;  %5476 = vmatmul.mubr.bf16.vlgmr.msra.gmra.mrb[32].mxu1 %v14120_v39  ;;  %v12970_v28 = vld [vmem:[#allocation2 + $0xcd4] ss:$392 sps:$4 sm:$0xff]  }
 0x148   :  { %v14114_v37 = vmul.f32 0.125, %v6796_v29  ;;  %v7580_v41 = vadd.f32 %v7579_v30, %v7578_v18  ;;  %v14124_v42 = vmul.f32 0.125, %v6790_v31  ;;  %5485 = vmatpush1.bf16.msra.mxu0 %v12944_v14  ;;  %5526 = vmatpush1.bf16.msra.mxu1 %v12947_v16  ;;  %v7583_v57 = vrot.slane %v7582_v35, 2  ;;  %v12973_v29 = vld [vmem:[#allocation2 + $0xcdc] ss:$392 sps:$4 sm:$0xff]  }
 0x149   :  { %v7574_v43 = vadd.f32 %v7573_v32, %v7572_v23  ;;  %v6802_v44 = vadd.f32 %v6801_v33, %v6800_v24  ;;  %v8131_v47 = vmul.f32 0.125, %v7568_v36  ;;  %v8229_v48 = vmul.f32 %v14112_v34, %v14112_v34  ;;  %5486 = vmatprep.subr.bf16.mxu0 %v12952_v25  ;;  %5527 = vmatprep.subr.bf16.mxu1 %v12955_v26  ;;  %v12962_v23 = vld [vmem:[#allocation2 + $0x9c0] ss:$392 sps:$4 sm:$0xff]   ;;  %v12968_v30 = vld [vmem:[#allocation2 + $0xcd0] ss:$392 sps:$4 sm:$0xff]  }
 0x14a   :  { %v8231_v49 = vmul.f32 %v14114_v37, %v14114_v37  ;;  %v8133_v52 = vmul.f32 0.125, %v7580_v41  ;;  %v8230_v54 = vmul.f32 %v14124_v42, %v14124_v42  ;;  %5516 = vmatprep.mubr.bf16.mxu0 %v16653_v0  ;;  %5557 = vmatprep.mubr.bf16.mxu1 %v16653_v0  ;;  %v7584_v11 = vadd.f32 %v7583_v57, %v7582_v35  ;;  %v12965_v24 = vld [vmem:[#allocation2 + $0x9c8] ss:$392 sps:$4 sm:$0xff]   ;;  %v12971_v31 = vld [vmem:[#allocation2 + $0xcd8] ss:$392 sps:$4 sm:$0xff]  }
 0x14b   :  { %v8132_v53 = vmul.f32 0.125, %v7574_v43  ;;  %v8327_v56 = vsub.f32 %v8131_v47, %v8229_v48  ;;  %v14135_v7 = vmul.f32 0.125, %v6802_v44  ;;  %v12976_v33 = vld [vmem:[#allocation2 + $0xfe4] ss:$392 sps:$4 sm:$0xff]   ;;  %v12974_v41 = vld [vmem:[#allocation2 + $0xfe0] ss:$392 sps:$4 sm:$0xff]  }
 0x14c   :  { %5487 = vmatpush1.bf16.msra.mxu0 %v12950_v40  ;;  %5528 = vmatpush1.bf16.msra.mxu1 %v12953_v45  ;;  %v8329_v8 = vsub.f32 %v8133_v52, %v8231_v49  ;;  %v7585_v18 = vrot.slane %v7584_v11, 1  ;;  %v12979_v36 = vld [vmem:[#allocation2 + $0xfec] ss:$392 sps:$4 sm:$0xff]   ;;  %v12977_v43 = vld [vmem:[#allocation2 + $0xfe8] ss:$392 sps:$4 sm:$0xff]   ;;  %v14140_v45 = vsub.s32 0, %v14073_v60 }
 0x14d   :  { %v8328_v61 = vsub.f32 %v8132_v53, %v8230_v54  ;;  %v8425_v63 = vmax.f32 %v8327_v56, 0.0  ;;  %5488 = vmatprep.subr.bf16.mxu0 %v12958_v46  ;;  %5529 = vmatprep.subr.bf16.mxu1 %v12961_v51  ;;  %v8232_v27 = vmul.f32 %v14135_v7, %v14135_v7  ;;  %v14143_v46 = vsub.s32 1, %v14073_v60  ;;  %v12982_v51 = vld [vmem:[#allocation2 + $0x12f4] ss:$392 sps:$4 sm:$0xff]   ;;  %v12980_v56 = vld [vmem:[#allocation2 + $0x12f0] ss:$392 sps:$4 sm:$0xff]  }
 0x14e   :  { %v8427_v25 = vmax.f32 %v8329_v8, 0.0  ;;  %v7586_v26 = vadd.f32 %v7585_v18, %v7584_v11  ;;  %v14146_v47 = vsub.s32 2, %v14073_v60  ;;  %v14149_v48 = vsub.s32 3, %v14073_v60  ;;  %v12985_v52 = vld [vmem:[#allocation2 + $0x12fc] ss:$392 sps:$4 sm:$0xff]  }
 0x14f   :  { %v8426_v14 = vmax.f32 %v8328_v61, 0.0  ;;  %v8523_v16 = vadd.f32 1e-05, %v8425_v63  ;;  %v14152_v49 = vsub.s32 4, %v14073_v60  ;;  %v12983_v57 = vld [vmem:[#allocation2 + $0x12f8] ss:$392 sps:$4 sm:$0xff]  }
 0x150   :  { %5489 = vmatpush1.bf16.msra.mxu0 %v12956_v58  ;;  %5530 = vmatpush1.bf16.msra.mxu1 %v12959_v59  ;;  %v8134_v32 = vmul.f32 0.125, %v7586_v26  ;;  %v8525_v38 = vadd.f32 1e-05, %v8427_v25  ;;  %v12988_v8 = vld [vmem:[#allocation2 + $0x1604] ss:$392 sps:$4 sm:$0xff]  }
 0x151   :  { %v8524_v22 = vadd.f32 1e-05, %v8426_v14  ;;  %13696 = vrsqrt.f32 %v8523_v16  ;;  %5490 = vmatprep.subr.bf16.mxu0 %v12964_v12  ;;  %5531 = vmatprep.subr.bf16.mxu1 %v12967_v62  ;;  %v12992_v0 = vld [vmem:[#allocation2 + $0xa0] ss:$392 sps:$4 sm:$0xff]  }
 0x152   :  { %v8330_v40 = vsub.f32 %v8134_v32, %v8232_v27 }
 0x153   :  { %13698 = vrsqrt.f32 %v8524_v22 }
 0x154   :  { %5491 = vmatpush1.bf16.msra.mxu0 %v12962_v23  ;;  %5532 = vmatpush1.bf16.msra.mxu1 %v12965_v24  ;;  %v8428_v44 = vmax.f32 %v8330_v40, 0.0  ;;  %13700 = vrsqrt.f32 %v8525_v38  ;;  %v12986_v40 = vld [vmem:[#allocation2 + $0x1600] ss:$392 sps:$4 sm:$0xff]  }
 0x155   :  { %5492 = vmatprep.subr.bf16.mxu0 %v12970_v28  ;;  %5533 = vmatprep.subr.bf16.mxu1 %v12973_v29 }
 0x156   :  { %v8526_v35 = vadd.f32 1e-05, %v8428_v44 }
 0x158   :  { %5493 = vmatpush1.bf16.msra.mxu0 %v12968_v30  ;;  %5534 = vmatpush1.bf16.msra.mxu1 %v12971_v31  ;;  %13702 = vrsqrt.f32 %v8526_v35  ;;  %v12991_v30 = vld [vmem:[#allocation2 + $0x160c] ss:$392 sps:$4 sm:$0xff]  }
 0x159   :  { %5494 = vmatprep.subr.bf16.mxu0 %v12976_v33  ;;  %5535 = vmatprep.subr.bf16.mxu1 %v12979_v36 }
 0x15a   :  { %v14154_v53 = vpop.f32.mrb[8].mxu0  ;;  %v14156_v54 = vpop.f32.mrb[8].mxu1 }
 0x15b   :  { %16697 = vst [vmem:[#allocation8_spill] sm:$0xff] %v14156_v54  ;;  %v13697_v58 = vpop.eup %13696  ;;  %v6803_v59 = vrot.slane %v14154_v53, 4  ;;  %v7449_v61 = vmul.f32 %v14154_v53, %v14154_v53  ;;  %v6815_v12 = vrot.slane %v14156_v54, 4  ;;  %v14162_v62 = vpop.f32.mrb[9].mxu0  ;;  %v7451_v11 = vmul.f32 %v14156_v54, %v14156_v54 }
 0x15c   :  { %16698 = vst [vmem:[#allocation9_spill] sm:$0xff] %v14162_v62  ;;  %v14164_v63 = vpop.f32.mrb[9].mxu1  ;;  %v6809_v14 = vrot.slane %v14162_v62, 4  ;;  %v7450_v16 = vmul.f32 %v14162_v62, %v14162_v62  ;;  %v4948_v22 = vpop.f32.mrb[10].mxu0  ;;  %5495 = vmatpush1.bf16.msra.mxu0 %v12974_v41  ;;  %5536 = vmatpush1.bf16.msra.mxu1 %v12977_v43 }
 0x15d   :  { %16699 = vst [vmem:[#allocation10_spill] sm:$0xff] %v14164_v63  ;;  %v6821_v18 = vrot.slane %v14164_v63, 4  ;;  %v4989_v23 = vpop.f32.mrb[10].mxu1  ;;  %v13699_v24 = vpop.eup %13698  ;;  %v6804_v25 = vadd.f32 %v6803_v59, %v14154_v53  ;;  %v7587_v26 = vrot.slane %v7449_v61, 4  ;;  %v6816_v27 = vadd.f32 %v6815_v12, %v14156_v54  ;;  %5496 = vmatprep.subr.bf16.mxu0 %v12982_v51  ;;  %5537 = vmatprep.subr.bf16.mxu1 %v12985_v52  ;;  %v12989_v59 = vld [vmem:[#allocation2 + $0x1608] ss:$392 sps:$4 sm:$0xff]  }
 0x15e   :  { %v7452_v28 = vmul.f32 %v14164_v63, %v14164_v63  ;;  %v4949_v29 = vpop.f32.mrb[11].mxu0  ;;  %v4990_v31 = vpop.f32.mrb[11].mxu1  ;;  %v8866_v32 = vcombine.low %v13697_v58, %v13699_v24  ;;  %v7599_v33 = vrot.slane %v7451_v11, 4  ;;  %v6810_v36 = vadd.f32 %v6809_v14, %v14162_v62  ;;  %v13003_v54 = vld [vmem:[#allocation2 + $0x3bc] ss:$392 sps:$4 sm:$0xff]  }
 0x15f   :  { %v7593_v38 = vrot.slane %v7450_v16, 4  ;;  %v6805_v41 = vrot.slane %v6804_v25, 2  ;;  %v7588_v43 = vadd.f32 %v7587_v26, %v7449_v61  ;;  %v6817_v44 = vrot.slane %v6816_v27, 2  ;;  %v12994_v29 = vld [vmem:[#allocation2 + $0xa4] ss:$392 sps:$4 sm:$0xff]  }
 0x160   :  { %v6822_v35 = vadd.f32 %v6821_v18, %v14164_v63  ;;  %v14179_v12 = vrot.slane %v8866_v32, %v14076_v4  ;;  %v7600_v22 = vadd.f32 %v7599_v33, %v7451_v11  ;;  %v6811_v51 = vrot.slane %v6810_v36, 2  ;;  %5497 = vmatpush1.bf16.msra.mxu0 %v12980_v56  ;;  %5538 = vmatpush1.bf16.msra.mxu1 %v12983_v57  ;;  %v12997_v61 = vld [vmem:[#allocation2 + $0xac] ss:$392 sps:$4 sm:$0xff]   ;;  %v13701_v32 = vpop.eup %13700  ;;  %v12995_v56 = vld [vmem:[#allocation2 + $0xa8] ss:$392 sps:$4 sm:$0xff]  }
 0x161   :  { %v7594_v52 = vadd.f32 %v7593_v38, %v7450_v16  ;;  %v6806_v58 = vadd.f32 %v6805_v41, %v6804_v25  ;;  %v7589_v23 = vrot.slane %v7588_v43, 2  ;;  %v6818_v24 = vadd.f32 %v6817_v44, %v6816_v27  ;;  %5498 = vmatprep.subr.bf16.mxu0 %v12988_v8  ;;  %5539 = vmatprep.subr.bf16.mxu1 %v12991_v30 }
 0x162   :  { %v6823_v14 = vrot.slane %v6822_v35, 2  ;;  %v7601_v26 = vrot.slane %v7600_v22, 2  ;;  %v6812_v31 = vadd.f32 %v6811_v51, %v6810_v36  ;;  %v7605_v1 = vrot.slane %v7452_v28, 4  ;;  %v13703_v8 = vpop.eup %13702  ;;  %v13000_v51 = vld [vmem:[#allocation2 + $0x3b4] ss:$392 sps:$4 sm:$0xff]  }
 0x163   :  { %v7595_v18 = vrot.slane %v7594_v52, 2  ;;  %v6807_v63 = vrot.slane %v6806_v58, 1  ;;  %v7590_v11 = vadd.f32 %v7589_v23, %v7588_v43  ;;  %v6819_v33 = vrot.slane %v6818_v24, 1 }
 0x164   :  { %v6824_v16 = vadd.f32 %v6823_v14, %v6822_v35  ;;  %v7602_v57 = vadd.f32 %v7601_v26, %v7600_v22  ;;  %v6813_v25 = vrot.slane %v6812_v31, 1  ;;  %v7606_v27 = vadd.f32 %v7605_v1, %v7452_v28  ;;  %5499 = vmatpush1.bf16.msra.mxu0 %v12986_v40  ;;  %5540 = vmatpush1.bf16.msra.mxu1 %v12989_v59  ;;  %v12998_v14 = vld [vmem:[#allocation2 + $0x3b0] ss:$392 sps:$4 sm:$0xff]  }
 0x165   :  { %v7596_v38 = vadd.f32 %v7595_v18, %v7594_v52  ;;  %v6808_v30 = vadd.f32 %v6807_v63, %v6806_v58  ;;  %v7591_v41 = vrot.slane %v7590_v11, 1  ;;  %v6820_v44 = vadd.f32 %v6819_v33, %v6818_v24  ;;  %5566 = vmatprep.subr.bf16.mxu0 %v12994_v29  ;;  %5607 = vmatprep.subr.bf16.mxu1 %v12997_v61  ;;  %v13001_v22 = vld [vmem:[#allocation2 + $0x3b8] ss:$392 sps:$4 sm:$0xff]   ;;  %v13006_v18 = vld [vmem:[#allocation2 + $0x6c4] ss:$392 sps:$4 sm:$0xff]  }
 0x166   :  { %v6825_v36 = vrot.slane %v6824_v16, 1  ;;  %v8867_v62 = vcombine.low %v13701_v32, %v13703_v8  ;;  %v7603_v43 = vrot.slane %v7602_v57, 1  ;;  %v6814_v23 = vadd.f32 %v6813_v25, %v6812_v31 }
 0x167   :  { %v7597_v35 = vrot.slane %v7596_v38, 1  ;;  %v14181_v26 = vmul.f32 0.125, %v6808_v30  ;;  %v7592_v1 = vadd.f32 %v7591_v41, %v7590_v11  ;;  %v14183_v28 = vmul.f32 0.125, %v6820_v44  ;;  %5517 = vmatmul.mubr.bf16.vlgmr.msra.gmra.mrb[36].mxu0 %v14120_v39  ;;  %5558 = vmatmul.mubr.bf16.vlgmr.msra.gmra.mrb[36].mxu1 %v14120_v39 }
 0x168   :  { %v6826_v40 = vadd.f32 %v6825_v36, %v6824_v16  ;;  %v8895_v63 = vrot.slane %v8867_v62, %v14076_v4  ;;  %v7604_v59 = vadd.f32 %v7603_v43, %v7602_v57  ;;  %v14188_v52 = vmul.f32 0.125, %v6814_v23  ;;  %5567 = vmatpush1.bf16.msra.mxu0 %v12992_v0  ;;  %5608 = vmatpush1.bf16.msra.mxu1 %v12995_v56  ;;  %v13009_v62 = vld [vmem:[#allocation2 + $0x6cc] ss:$392 sps:$4 sm:$0xff]   ;;  %v13004_v16 = vld [vmem:[#allocation2 + $0x6c0] ss:$392 sps:$4 sm:$0xff]  }
 0x169   :  { %v7598_v58 = vadd.f32 %v7597_v35, %v7596_v38  ;;  %v14191_v24 = vsub.s32 5, %v14073_v60  ;;  %v8135_v29 = vmul.f32 0.125, %v7592_v1  ;;  %v8233_v61 = vmul.f32 %v14181_v26, %v14181_v26  ;;  %5568 = vmatprep.subr.bf16.mxu0 %v13000_v51  ;;  %5609 = vmatprep.subr.bf16.mxu1 %v13003_v54  ;;  %v13007_v56 = vld [vmem:[#allocation2 + $0x6c8] ss:$392 sps:$4 sm:$0xff]  }
 0x16a   :  { %v8235_v31 = vmul.f32 %v14183_v28, %v14183_v28  ;;  %v8897_v32 = vcombine.low %v14179_v12, %v8895_v63  ;;  %v8137_v11 = vmul.f32 0.125, %v7604_v59  ;;  %v8234_v0 = vmul.f32 %v14188_v52, %v14188_v52  ;;  %v8715_v38 = vld [vmem:[#allocation4] ss:$2 sm:$0xff] }
 0x16b   :  { %v8136_v33 = vmul.f32 0.125, %v7598_v58  ;;  %v16700_v57 = vmov 0   ;;  %v16701_v25 = vcombine.low %v14105_v50, %v14108_v55  ;;  %v14207_v8 = vsub.s32 6, %v14073_v60  ;;  %v13012_v50 = vld [vmem:[#allocation2 + $0x9d4] ss:$392 sps:$4 sm:$0xff]  }
 0x16c   :  { %5598 = vmatprep.mubr.bf16.mxu0 %v16700_v57  ;;  %5639 = vmatprep.mubr.bf16.mxu1 %v16700_v57  ;;  %v8331_v12 = vsub.f32 %v8135_v29, %v8233_v61  ;;  %v7607_v30 = vrot.slane %v7606_v27, 2  ;;  %v8911_v41 = vrot.slane %v8897_v32, %v14076_v4  ;;  %v8333_v44 = vsub.f32 %v8137_v11, %v8235_v31  ;;  %v13015_v55 = vld [vmem:[#allocation2 + $0x9dc] ss:$392 sps:$4 sm:$0xff]  }
 0x16d   :  { %v8904_v54 = vrot.slane %v16701_v25, %v14076_v4  ;;  %v8332_v36 = vsub.f32 %v8136_v33, %v8234_v0  ;;  %v14210_v51 = vmul.f32 0.125, %v6826_v40  ;;  %5569 = vmatpush1.bf16.msra.mxu0 %v12998_v14  ;;  %5610 = vmatpush1.bf16.msra.mxu1 %v13001_v22  ;;  %v14213_v1 = vsub.s32 7, %v14073_v60  ;;  %v13013_v60 = vld [vmem:[#allocation2 + $0x9d8] ss:$392 sps:$4 sm:$0xff]   ;;  %v13018_v0 = vld [vmem:[#allocation2 + $0xce4] ss:$392 sps:$4 sm:$0xff]  }
 0x16e   :  { %v8429_v43 = vmax.f32 %v8331_v12, 0.0  ;;  %v7608_v23 = vadd.f32 %v7607_v30, %v7606_v27  ;;  %5570 = vmatprep.subr.bf16.mxu0 %v13006_v18  ;;  %5611 = vmatprep.subr.bf16.mxu1 %v13009_v62  ;;  %v8431_v63 = vmax.f32 %v8333_v44, 0.0  ;;  %v13010_v27 = vld [vmem:[#allocation2 + $0x9d0] ss:$392 sps:$4 sm:$0xff]   ;;  %v13016_v33 = vld [vmem:[#allocation2 + $0xce0] ss:$392 sps:$4 sm:$0xff]  }
 0x16f   :  { %v8912_v35 = vcombine.low %v8904_v54, %v8911_v41  ;;  %v8430_v59 = vmax.f32 %v8332_v36, 0.0  ;;  %v14217_v40 = vmul.f32 %v14210_v51, %v14210_v51 }
 0x170   :  { %v8527_v58 = vadd.f32 1e-05, %v8429_v43  ;;  %v7609_v29 = vrot.slane %v7608_v23, 1  ;;  %v8529_v14 = vadd.f32 1e-05, %v8431_v63 }
 0x171   :  { %v9480_v61 = vmul.f32 %v8912_v35, %v8715_v38  ;;  %5571 = vmatpush1.bf16.msra.mxu0 %v13004_v16  ;;  %5612 = vmatpush1.bf16.msra.mxu1 %v13007_v56  ;;  %v14219_v22 = vadd.f32 1e-05, %v8430_v59  ;;  %v13021_v16 = vld [vmem:[#allocation2 + $0xcec] ss:$392 sps:$4 sm:$0xff]  }
 0x172   :  { %13704 = vrsqrt.f32 %v8527_v58  ;;  %v7610_v31 = vadd.f32 %v7609_v29, %v7608_v23  ;;  %5572 = vmatprep.subr.bf16.mxu0 %v13012_v50  ;;  %5613 = vmatprep.subr.bf16.mxu1 %v13015_v55  ;;  %v13019_v55 = vld [vmem:[#allocation2 + $0xce8] ss:$392 sps:$4 sm:$0xff]   ;;  %v13024_v35 = vld [vmem:[#allocation2 + $0xff4] ss:$392 sps:$4 sm:$0xff]   ;;  %v13025_v58 = vld [vmem:[#allocation2 + $0xff8] ss:$392 sps:$4 sm:$0xff]  }
 0x173   :  { %v9509_v18 = vrot.slane %v9480_v61, %v14140_v45  ;;  %v9513_v62 = vrot.slane %v9480_v61, %v14143_v46  ;;  %v9517_v32 = vrot.slane %v9480_v61, %v14146_v47  ;;  %v9521_v11 = vrot.slane %v9480_v61, %v14149_v48 }
 0x174   :  { %v9525_v56 = vrot.slane %v9480_v61, %v14152_v49  ;;  %v9529_v25 = vrot.slane %v9480_v61, %v14191_v24  ;;  %v9533_v54 = vrot.slane %v9480_v61, %v14207_v8  ;;  %v9537_v38 = vrot.slane %v9480_v61, %v14213_v1 }
 0x175   :  { %v9996_v12 = vmul.f32 %v9509_v18, %v14053_v13  ;;  %v9997_v30 = vmul.f32 %v9513_v62, %v14059_v17  ;;  %v9998_v41 = vmul.f32 %v9517_v32, %v14055_v15  ;;  %v9999_v44 = vmul.f32 %v9521_v11, %v14061_v19  ;;  %5573 = vmatpush1.bf16.msra.mxu0 %v13010_v27  ;;  %v13022_v19 = vld [vmem:[#allocation2 + $0xff0] ss:$392 sps:$4 sm:$0xff]  }
 0x176   :  { %v10000_v36 = vmul.f32 %v9525_v56, %v14112_v34  ;;  %v10001_v43 = vmul.f32 %v9529_v25, %v14124_v42  ;;  %v10002_v23 = vmul.f32 %v9533_v54, %v14114_v37  ;;  %v10003_v50 = vmul.f32 %v9537_v38, %v14135_v7  ;;  %5614 = vmatpush1.bf16.msra.mxu1 %v13013_v60  ;;  %v13027_v34 = vld [vmem:[#allocation2 + $0xffc] ss:$392 sps:$4 sm:$0xff]  }
 0x177   :  { %v10192_v63 = vcombine.low %v9996_v12, %v9997_v30  ;;  %v10193_v13 = vcombine.low %v9998_v41, %v9999_v44  ;;  %v14238_v17 = vmul.f32 %v9509_v18, %v14029_v2  ;;  %v14241_v15 = vmul.f32 %v9513_v62, %v14039_v9  ;;  %5574 = vmatprep.subr.bf16.mxu0 %v13018_v0  ;;  %v13030_v18 = vld [vmem:[#allocation2 + $0x1304] ss:$392 sps:$4 sm:$0xff]  }
 0x178   :  { %v10194_v59 = vcombine.low %v10000_v36, %v10001_v43  ;;  %v10195_v42 = vcombine.low %v10002_v23, %v10003_v50  ;;  %v14244_v37 = vmul.f32 %v9517_v32, %v14031_v3  ;;  %v14247_v7 = vmul.f32 %v9521_v11, %v14041_v10  ;;  %5615 = vmatprep.subr.bf16.mxu1 %v13021_v16  ;;  %v13033_v62 = vld [vmem:[#allocation2 + $0x130c] ss:$392 sps:$4 sm:$0xff]  }
 0x179   :  { %v10202_v29 = vrot.slane %v10192_v63, %v14076_v4  ;;  %v10209_v2 = vrot.slane %v10193_v13, %v14076_v4  ;;  %v14252_v9 = vmul.f32 %v9525_v56, %v14078_v5  ;;  %v14255_v61 = vmul.f32 %v9529_v25, %v14088_v20  ;;  %5575 = vmatpush1.bf16.msra.mxu0 %v13016_v33  ;;  %v13028_v33 = vld [vmem:[#allocation2 + $0x1300] ss:$392 sps:$4 sm:$0xff]   ;;  %v13036_v50 = vld [vmem:[#allocation2 + $0x1614] ss:$392 sps:$4 sm:$0xff]  }
 0x17a   :  { %v10216_v27 = vrot.slane %v10194_v59, %v14076_v4  ;;  %v10223_v3 = vrot.slane %v10195_v42, %v14076_v4  ;;  %v14260_v10 = vmul.f32 %v9533_v54, %v14080_v6  ;;  %v14263_v60 = vmul.f32 %v9537_v38, %v14090_v21  ;;  %5616 = vmatpush1.bf16.msra.mxu1 %v13019_v55  ;;  %v14265_v11 = vpop.f32.mrb[12].mxu0  ;;  %v14267_v20 = vpop.f32.mrb[12].mxu1  ;;  %v8741_v55 = vld [vmem:[#allocation4 + $0x1] ss:$2 sm:$0xff] }
 0x17b   :  { %v10224_v32 = vcombine.low %v10202_v29, %v10209_v2  ;;  %13706 = vrsqrt.f32 %v8529_v14  ;;  %v8138_v5 = vmul.f32 0.125, %v7610_v31  ;;  %5576 = vmatprep.subr.bf16.mxu0 %v13024_v35  ;;  %5617 = vmatprep.subr.bf16.mxu1 %v13027_v34  ;;  %v6827_v21 = vrot.slane %v14265_v11, 4  ;;  %v14275_v56 = vpop.f32.mrb[13].mxu0  ;;  %v14277_v14 = vpop.f32.mrb[13].mxu1  ;;  %v13031_v31 = vld [vmem:[#allocation2 + $0x1308] ss:$392 sps:$4 sm:$0xff]  }
 0x17c   :  { %v14269_v0 = vpop.eup %13704  ;;  %v10225_v6 = vcombine.low %v10216_v27, %v10223_v3  ;;  %13708 = vrsqrt.f32 %v14219_v22  ;;  %v7453_v16 = vmul.f32 %v14265_v11, %v14265_v11  ;;  %v6839_v38 = vrot.slane %v14267_v20, 4  ;;  %v5030_v22 = vpop.f32.mrb[14].mxu0  ;;  %v13039_v34 = vld [vmem:[#allocation2 + $0x161c] ss:$392 sps:$4 sm:$0xff]   ;;  %v13034_v2 = vld [vmem:[#allocation2 + $0x1610] ss:$392 sps:$4 sm:$0xff]  }
 0x17d   :  { %v10232_v25 = vrot.slane %v10224_v32, %v14076_v4  ;;  %v8334_v54 = vsub.f32 %v8138_v5, %v14217_v40  ;;  %v7455_v12 = vmul.f32 %v14267_v20, %v14267_v20  ;;  %5577 = vmatpush1.bf16.msra.mxu0 %v13022_v19  ;;  %v5071_v30 = vpop.f32.mrb[14].mxu1  ;;  %v6828_v44 = vadd.f32 %v6827_v21, %v14265_v11  ;;  %v5031_v23 = vpop.f32.mrb[15].mxu0  ;;  %v13045_v22 = vld [vmem:[#allocation2 + $0xbc] ss:$392 sps:$4 sm:$0xff]  }
 0x17e   :  { %v10239_v41 = vrot.slane %v10225_v6, %v14076_v4  ;;  %v7611_v36 = vrot.slane %v7453_v16, 4  ;;  %v6833_v43 = vrot.slane %v14275_v56, 4  ;;  %5618 = vmatpush1.bf16.msra.mxu1 %v13025_v58  ;;  %5578 = vmatprep.subr.bf16.mxu0 %v13030_v18  ;;  %v5072_v40 = vpop.f32.mrb[15].mxu1  ;;  %v6840_v63 = vadd.f32 %v6839_v38, %v14267_v20 }
 0x17f   :  { %v8432_v35 = vmax.f32 %v8334_v54, 0.0  ;;  %v7623_v13 = vrot.slane %v7455_v12, 4  ;;  %v7454_v19 = vmul.f32 %v14275_v56, %v14275_v56  ;;  %5619 = vmatprep.subr.bf16.mxu1 %v13033_v62  ;;  %v6829_v42 = vrot.slane %v6828_v44, 2 }
 0x180   :  { %v10240_v59 = vcombine.low %v10232_v25, %v10239_v41  ;;  %v14290_v29 = vadd.f32 %v7611_v36, %v7453_v16  ;;  %v14293_v58 = vadd.f32 %v6833_v43, %v14275_v56  ;;  %v6841_v3 = vrot.slane %v6840_v63, 2  ;;  %v13037_v16 = vld [vmem:[#allocation2 + $0x1618] ss:$392 sps:$4 sm:$0xff]   ;;  %v13042_v25 = vld [vmem:[#allocation2 + $0xb4] ss:$392 sps:$4 sm:$0xff]  }
 0x181   :  { %v8530_v27 = vadd.f32 1e-05, %v8432_v35  ;;  %v14295_v18 = vadd.f32 %v7623_v13, %v7455_v12  ;;  %v7617_v32 = vrot.slane %v7454_v19, 4  ;;  %5579 = vmatpush1.bf16.msra.mxu0 %v13028_v33  ;;  %v14297_v6 = vadd.f32 %v6829_v42, %v6828_v44  ;;  %v13040_v33 = vld [vmem:[#allocation2 + $0xb0] ss:$392 sps:$4 sm:$0xff]  }
 0x182   :  { %v10808_v5 = vsub.f32 %v8741_v55, %v10240_v59  ;;  %v7613_v62 = vrot.slane %v14290_v29, 2  ;;  %v6835_v21 = vrot.slane %v14293_v58, 2  ;;  %5620 = vmatpush1.bf16.msra.mxu1 %v13031_v31  ;;  %5580 = vmatprep.subr.bf16.mxu0 %v13036_v50  ;;  %v14301_v54 = vadd.f32 %v6841_v3, %v6840_v63  ;;  %v13048_v59 = vld [vmem:[#allocation2 + $0x3c4] ss:$392 sps:$4 sm:$0xff]  }
 0x183   :  { %13710 = vrsqrt.f32 %v8530_v27  ;;  %v7625_v38 = vrot.slane %v14295_v18, 2  ;;  %v14304_v12 = vadd.f32 %v7617_v32, %v7454_v19  ;;  %5621 = vmatprep.subr.bf16.mxu1 %v13039_v34  ;;  %v13043_v34 = vld [vmem:[#allocation2 + $0xb8] ss:$392 sps:$4 sm:$0xff]  }
 0x184   :  { %v10935_v30 = vrot.slane %v10808_v5, %v14140_v45  ;;  %v10939_v41 = vrot.slane %v10808_v5, %v14143_v46  ;;  %v10943_v44 = vrot.slane %v10808_v5, %v14146_v47  ;;  %v10947_v31 = vrot.slane %v10808_v5, %v14149_v48  ;;  %v13046_v32 = vld [vmem:[#allocation2 + $0x3c0] ss:$392 sps:$4 sm:$0xff]  }
 0x185   :  { %v14310_v36 = vpop.eup %13706  ;;  %v10951_v43 = vrot.slane %v10808_v5, %v14152_v49  ;;  %v10955_v23 = vrot.slane %v10808_v5, %v14191_v24  ;;  %v10959_v50 = vrot.slane %v10808_v5, %v14207_v8  ;;  %v10963_v40 = vrot.slane %v10808_v5, %v14213_v1  ;;  %5581 = vmatpush1.bf16.msra.mxu0 %v13034_v2 }
 0x186   :  { %v13709_v55 = vpop.eup %13708  ;;  %v11422_v35 = vadd.f32 %v10935_v30, %v14238_v17  ;;  %v11423_v63 = vadd.f32 %v10939_v41, %v14241_v15  ;;  %v11424_v13 = vadd.f32 %v10943_v44, %v14244_v37  ;;  %v11425_v19 = vadd.f32 %v10947_v31, %v14247_v7  ;;  %5622 = vmatpush1.bf16.msra.mxu1 %v13037_v16  ;;  %v13051_v17 = vld [vmem:[#allocation2 + $0x3cc] ss:$392 sps:$4 sm:$0xff]   ;;  %v13052_v44 = vld [vmem:[#allocation2 + $0x6d0] ss:$392 sps:$4 sm:$0xff]   ;;  %v13057_v31 = vld [vmem:[#allocation2 + $0x6dc] ss:$392 sps:$4 sm:$0xff]  }
 0x187   :  { %v11426_v42 = vadd.f32 %v10951_v43, %v14252_v9  ;;  %v11427_v27 = vadd.f32 %v10955_v23, %v14255_v61  ;;  %v11428_v3 = vadd.f32 %v10959_v50, %v14260_v10  ;;  %v11429_v2 = vadd.f32 %v10963_v40, %v14263_v60  ;;  %5648 = vmatprep.subr.bf16.mxu0 %v13042_v25  ;;  %v13049_v25 = vld [vmem:[#allocation2 + $0x3c8] ss:$392 sps:$4 sm:$0xff]  }
 0x188   :  { %v11520_v5 = vmax.f32 %v11422_v35, 0.0  ;;  %v11521_v15 = vmax.f32 %v11423_v63, 0.0  ;;  %v11522_v30 = vmax.f32 %v11424_v13, 0.0  ;;  %v11523_v37 = vmax.f32 %v11425_v19, 0.0  ;;  %5599 = vmatmul.mubr.bf16.vlgmr.msra.gmra.mrb[40].mxu0 %v14120_v39  ;;  %5689 = vmatprep.subr.bf16.mxu1 %v13045_v22 }
 0x189   :  { %v11524_v7 = vmax.f32 %v11426_v42, 0.0  ;;  %v11525_v16 = vmax.f32 %v11427_v27, 0.0  ;;  %v11526_v41 = vmax.f32 %v11428_v3, 0.0  ;;  %v11527_v9 = vmax.f32 %v11429_v2, 0.0  ;;  %5640 = vmatmul.mubr.bf16.vlgmr.msra.gmra.mrb[40].mxu1 %v14120_v39  ;;  %5649 = vmatpush1.bf16.msra.mxu0 %v13040_v33  ;;  %v13054_v33 = vld [vmem:[#allocation2 + $0x6d4] ss:$392 sps:$4 sm:$0xff]  }
 0x18a   :  { %11618 = vst [vmem:[%s16652_s3] sm:$0xff] %v11520_v5  ;;  %11619 = vst [vmem:[%s16652_s3 + $0x8] sm:$0xff] %v11521_v15  ;;  %v8913_v61 = vcombine.low %v14269_v0, %v13709_v55  ;;  %v6831_v39 = vrot.slane %v14297_v6, 1  ;;  %v7614_v10 = vadd.f32 %v7613_v62, %v14290_v29  ;;  %v6843_v60 = vrot.slane %v14301_v54, 1  ;;  %5690 = vmatpush1.bf16.msra.mxu1 %v13043_v34  ;;  %v13063_v3 = vld [vmem:[#allocation2 + $0x9ec] ss:$392 sps:$4 sm:$0xff]  }
 0x18b   :  { %11620 = vst [vmem:[%s16652_s3 + $0x10] sm:$0xff] %v11522_v30  ;;  %11621 = vst [vmem:[%s16652_s3 + $0x18] sm:$0xff] %v11523_v37  ;;  %5650 = vmatprep.subr.bf16.mxu0 %v13048_v59  ;;  %v7626_v0 = vadd.f32 %v7625_v38, %v14295_v18  ;;  %v6836_v29 = vadd.f32 %v6835_v21, %v14293_v58  ;;  %v7619_v62 = vrot.slane %v14304_v12, 2  ;;  %v6845_v22 = vrot.slane %v14277_v14, 4 }
 0x18c   :  { %11622 = vst [vmem:[%s16652_s3 + $0x20] sm:$0xff] %v11524_v7  ;;  %11623 = vst [vmem:[%s16652_s3 + $0x28] sm:$0xff] %v11525_v16  ;;  %5691 = vmatprep.subr.bf16.mxu1 %v13051_v17  ;;  %5680 = vmatprep.mubr.bf16.mxu0 %v16700_v57  ;;  %v14362_v43 = vrot.slane %v8913_v61, %v14076_v4  ;;  %v6832_v23 = vadd.f32 %v6831_v39, %v14297_v6  ;;  %v7615_v50 = vrot.slane %v7614_v10, 1  ;;  %v13055_v6 = vld [vmem:[#allocation2 + $0x6d8] ss:$392 sps:$4 sm:$0xff]  }
 0x18d   :  { %11624 = vst [vmem:[%s16652_s3 + $0x30] sm:$0xff] %v11526_v41  ;;  %11625 = vst [vmem:[%s16652_s3 + $0x38] sm:$0xff] %v11527_v9  ;;  %v6844_v18 = vadd.f32 %v6843_v60, %v14301_v54  ;;  %5721 = vmatprep.mubr.bf16.mxu1 %v16700_v57  ;;  %v13711_v58 = vpop.eup %13710  ;;  %v7627_v21 = vrot.slane %v7626_v0, 1  ;;  %v6837_v38 = vrot.slane %v6836_v29, 1  ;;  %v7620_v40 = vadd.f32 %v7619_v62, %v14304_v12  ;;  %v13060_v54 = vld [vmem:[#allocation2 + $0x9e4] ss:$392 sps:$4 sm:$0xff]  }
 0x18e   :  { %v6846_v55 = vadd.f32 %v6845_v22, %v14277_v14  ;;  %5651 = vmatpush1.bf16.msra.mxu0 %v13046_v32  ;;  %v8914_v35 = vcombine.low %v14310_v36, %v13711_v58  ;;  %v14370_v63 = vmul.f32 0.125, %v6832_v23  ;;  %v7616_v13 = vadd.f32 %v7615_v50, %v7614_v10  ;;  %5692 = vmatpush1.bf16.msra.mxu1 %v13049_v25  ;;  %v13058_v12 = vld [vmem:[#allocation2 + $0x9e0] ss:$392 sps:$4 sm:$0xff]   ;;  %v13066_v61 = vld [vmem:[#allocation2 + $0xcf4] ss:$392 sps:$4 sm:$0xff]  }
 0x18f   :  { %v14372_v19 = vmul.f32 0.125, %v6844_v18  ;;  %5652 = vmatprep.subr.bf16.mxu0 %v13054_v33  ;;  %v7628_v34 = vadd.f32 %v7627_v21, %v7626_v0  ;;  %v6838_v59 = vadd.f32 %v6837_v38, %v6836_v29  ;;  %v7621_v42 = vrot.slane %v7620_v40, 1  ;;  %5693 = vmatprep.subr.bf16.mxu1 %v13057_v31  ;;  %v13061_v9 = vld [vmem:[#allocation2 + $0x9e8] ss:$392 sps:$4 sm:$0xff]   ;;  %v13069_v0 = vld [vmem:[#allocation2 + $0xcfc] ss:$392 sps:$4 sm:$0xff]  }
 0x190   :  { %v6847_v27 = vrot.slane %v6846_v55, 2  ;;  %v14375_v2 = vrot.slane %v8914_v35, %v14076_v4  ;;  %v8139_v36 = vmul.f32 0.125, %v7616_v13  ;;  %v8237_v32 = vmul.f32 %v14370_v63, %v14370_v63  ;;  %v13064_v33 = vld [vmem:[#allocation2 + $0xcf0] ss:$392 sps:$4 sm:$0xff]   ;;  %v13072_v58 = vld [vmem:[#allocation2 + $0x1004] ss:$392 sps:$4 sm:$0xff]  }
 0x191   :  { %v8239_v17 = vmul.f32 %v14372_v19, %v14372_v19  ;;  %v8141_v5 = vmul.f32 0.125, %v7628_v34  ;;  %v14381_v15 = vmul.f32 0.125, %v6838_v59  ;;  %v7622_v30 = vadd.f32 %v7621_v42, %v7620_v40  ;;  %v13067_v22 = vld [vmem:[#allocation2 + $0xcf8] ss:$392 sps:$4 sm:$0xff]   ;;  %v13073_v13 = vld [vmem:[#allocation2 + $0x1008] ss:$392 sps:$4 sm:$0xff]  }
 0x192   :  { %v6848_v37 = vadd.f32 %v6847_v27, %v6846_v55  ;;  %5653 = vmatpush1.bf16.msra.mxu0 %v13052_v44  ;;  %v8335_v16 = vsub.f32 %v8139_v36, %v8237_v32  ;;  %v7456_v41 = vmul.f32 %v14277_v14, %v14277_v14  ;;  %5694 = vmatpush1.bf16.msra.mxu1 %v13055_v6  ;;  %v13070_v40 = vld [vmem:[#allocation2 + $0x1000] ss:$392 sps:$4 sm:$0xff]   ;;  %v13075_v55 = vld [vmem:[#allocation2 + $0x100c] ss:$392 sps:$4 sm:$0xff]   ;;  %v13081_v34 = vld [vmem:[#allocation2 + $0x131c] ss:$392 sps:$4 sm:$0xff]  }
 0x193   :  { %5654 = vmatprep.subr.bf16.mxu0 %v13060_v54  ;;  %v8337_v39 = vsub.f32 %v8141_v5, %v8239_v17  ;;  %v8140_v10 = vmul.f32 0.125, %v7622_v30  ;;  %v8238_v60 = vmul.f32 %v14381_v15, %v14381_v15  ;;  %5695 = vmatprep.subr.bf16.mxu1 %v13063_v3  ;;  %v13078_v6 = vld [vmem:[#allocation2 + $0x1314] ss:$392 sps:$4 sm:$0xff]   ;;  %v13076_v36 = vld [vmem:[#allocation2 + $0x1310] ss:$392 sps:$4 sm:$0xff]  }
 0x194   :  { %v6849_v25 = vrot.slane %v6848_v37, 1  ;;  %v8433_v29 = vmax.f32 %v8335_v16, 0.0  ;;  %v7629_v62 = vrot.slane %v7456_v41, 4 }
 0x195   :  { %v8336_v44 = vsub.f32 %v8140_v10, %v8238_v60  ;;  %v8435_v50 = vmax.f32 %v8337_v39, 0.0  ;;  %v13079_v60 = vld [vmem:[#allocation2 + $0x1318] ss:$392 sps:$4 sm:$0xff]  }
 0x196   :  { %v6850_v31 = vadd.f32 %v6849_v25, %v6848_v37  ;;  %5655 = vmatpush1.bf16.msra.mxu0 %v13058_v12  ;;  %v8531_v23 = vadd.f32 1e-05, %v8433_v29  ;;  %v7630_v18 = vadd.f32 %v7629_v62, %v7456_v41  ;;  %5696 = vmatpush1.bf16.msra.mxu1 %v13061_v9 }
 0x197   :  { %5656 = vmatprep.subr.bf16.mxu0 %v13066_v61  ;;  %v8434_v21 = vmax.f32 %v8336_v44, 0.0  ;;  %5697 = vmatprep.subr.bf16.mxu1 %v13069_v0  ;;  %v8533_v59 = vadd.f32 1e-05, %v8435_v50  ;;  %v13084_v44 = vld [vmem:[#allocation2 + $0x1624] ss:$392 sps:$4 sm:$0xff]  }
 0x198   :  { %v14389_v38 = vmul.f32 0.125, %v6850_v31  ;;  %v7631_v35 = vrot.slane %v7630_v18, 2  ;;  %13712 = vrsqrt.f32 %v8531_v23 }
 0x199   :  { %v8532_v54 = vadd.f32 1e-05, %v8434_v21  ;;  %v13087_v21 = vld [vmem:[#allocation2 + $0x162c] ss:$392 sps:$4 sm:$0xff]  }
 0x19a   :  { %5657 = vmatpush1.bf16.msra.mxu0 %v13064_v33  ;;  %v7632_v42 = vadd.f32 %v7631_v35, %v7630_v18  ;;  %5698 = vmatpush1.bf16.msra.mxu1 %v13067_v22  ;;  %v8240_v27 = vmul.f32 %v14389_v38, %v14389_v38  ;;  %v14393_v12 = vpop.f32.mrb[16].mxu0  ;;  %v14395_v3 = vpop.f32.mrb[16].mxu1 }
 0x19b   :  { %5658 = vmatprep.subr.bf16.mxu0 %v13072_v58  ;;  %13714 = vrsqrt.f32 %v8532_v54  ;;  %16702 = vst [vmem:[#allocation11_spill] sm:$0xff] %v14393_v12  ;;  %16703 = vst [vmem:[#allocation12_spill] sm:$0xff] %v14395_v3  ;;  %5699 = vmatprep.subr.bf16.mxu1 %v13075_v55  ;;  %v6851_v17 = vrot.slane %v14393_v12, 4  ;;  %v7457_v5 = vmul.f32 %v14393_v12, %v14393_v12  ;;  %v6863_v30 = vrot.slane %v14395_v3, 4  ;;  %v14401_v37 = vpop.f32.mrb[17].mxu0  ;;  %v14403_v16 = vpop.f32.mrb[17].mxu1 }
 0x19c   :  { %v7633_v32 = vrot.slane %v7632_v42, 1  ;;  %16704 = vst [vmem:[#allocation13_spill] sm:$0xff] %v14401_v37  ;;  %16705 = vst [vmem:[#allocation14_spill] sm:$0xff] %v14403_v16  ;;  %v7459_v41 = vmul.f32 %v14395_v3, %v14395_v3  ;;  %v6857_v9 = vrot.slane %v14401_v37, 4  ;;  %v7458_v61 = vmul.f32 %v14401_v37, %v14401_v37  ;;  %v5112_v10 = vpop.f32.mrb[18].mxu0  ;;  %v5153_v25 = vpop.f32.mrb[18].mxu1 }
 0x19d   :  { %v6869_v39 = vrot.slane %v14403_v16, 4  ;;  %v6852_v0 = vadd.f32 %v6851_v17, %v14393_v12  ;;  %v7635_v29 = vrot.slane %v7457_v5, 4  ;;  %v6864_v62 = vadd.f32 %v6863_v30, %v14395_v3  ;;  %v5113_v22 = vpop.f32.mrb[19].mxu0  ;;  %v5154_v31 = vpop.f32.mrb[19].mxu1  ;;  %v13085_v30 = vld [vmem:[#allocation2 + $0x1628] ss:$392 sps:$4 sm:$0xff]  }
 0x19e   :  { %5659 = vmatpush1.bf16.msra.mxu0 %v13070_v40  ;;  %v7634_v33 = vadd.f32 %v7633_v32, %v7632_v42  ;;  %5700 = vmatpush1.bf16.msra.mxu1 %v13073_v13  ;;  %v7647_v23 = vrot.slane %v7459_v41, 4  ;;  %v6858_v50 = vadd.f32 %v6857_v9, %v14401_v37  ;;  %v7641_v18 = vrot.slane %v7458_v61, 4  ;;  %v16711_v37 = vld [vmem:[#allocation8_spill] sm:$0xff] }
 0x19f   :  { %5660 = vmatprep.subr.bf16.mxu0 %v13078_v6  ;;  %v6870_v58 = vadd.f32 %v6869_v39, %v14403_v16  ;;  %5701 = vmatprep.subr.bf16.mxu1 %v13081_v34  ;;  %v6853_v55 = vrot.slane %v6852_v0, 2  ;;  %v7636_v35 = vadd.f32 %v7635_v29, %v7457_v5  ;;  %v6865_v54 = vrot.slane %v6864_v62, 2  ;;  %v13082_v6 = vld [vmem:[#allocation2 + $0x1620] ss:$392 sps:$4 sm:$0xff]   ;;  %v13090_v39 = vld [vmem:[#allocation2 + $0xc4] ss:$392 sps:$4 sm:$0xff]  }
 0x1a0   :  { %v8142_v40 = vmul.f32 0.125, %v7634_v33  ;;  %v7648_v42 = vadd.f32 %v7647_v23, %v7459_v41  ;;  %v6859_v32 = vrot.slane %v6858_v50, 2  ;;  %v7642_v17 = vadd.f32 %v7641_v18, %v7458_v61  ;;  %v13093_v34 = vld [vmem:[#allocation2 + $0xcc] ss:$392 sps:$4 sm:$0xff]   ;;  %v13088_v61 = vld [vmem:[#allocation2 + $0xc0] ss:$392 sps:$4 sm:$0xff]  }
 0x1a1   :  { %v6871_v13 = vrot.slane %v6870_v58, 2  ;;  %v6854_v25 = vadd.f32 %v6853_v55, %v6852_v0  ;;  %v7637_v22 = vrot.slane %v7636_v35, 2  ;;  %v6866_v9 = vadd.f32 %v6865_v54, %v6864_v62  ;;  %v13096_v55 = vld [vmem:[#allocation2 + $0x3d4] ss:$392 sps:$4 sm:$0xff]  }
 0x1a2   :  { %5661 = vmatpush1.bf16.msra.mxu0 %v13076_v36  ;;  %v8338_v10 = vsub.f32 %v8142_v40, %v8240_v27  ;;  %5702 = vmatpush1.bf16.msra.mxu1 %v13079_v60  ;;  %v14415_v31 = vpop.eup %13712  ;;  %13716 = vrsqrt.f32 %v8533_v59  ;;  %v7649_v5 = vrot.slane %v7648_v42, 2  ;;  %v6860_v33 = vadd.f32 %v6859_v32, %v6858_v50  ;;  %v13091_v40 = vld [vmem:[#allocation2 + $0xc8] ss:$392 sps:$4 sm:$0xff]   ;;  %v13099_v32 = vld [vmem:[#allocation2 + $0x3dc] ss:$392 sps:$4 sm:$0xff]  }
 0x1a3   :  { %5662 = vmatprep.subr.bf16.mxu0 %v13084_v44  ;;  %v7643_v41 = vrot.slane %v7642_v17, 2  ;;  %5703 = vmatprep.subr.bf16.mxu1 %v13087_v21  ;;  %v6855_v36 = vrot.slane %v6854_v25, 1  ;;  %v7638_v23 = vadd.f32 %v7637_v22, %v7636_v35  ;;  %v6867_v18 = vrot.slane %v6866_v9, 1 }
 0x1a4   :  { %v8436_v29 = vmax.f32 %v8338_v10, 0.0  ;;  %v7650_v0 = vadd.f32 %v7649_v5, %v7648_v42  ;;  %v6861_v62 = vrot.slane %v6860_v33, 1  ;;  %v6872_v44 = vadd.f32 %v6871_v13, %v6870_v58  ;;  %v13094_v42 = vld [vmem:[#allocation2 + $0x3d0] ss:$392 sps:$4 sm:$0xff]   ;;  %v14426_v13 = vld [vmem:[%s16649_s0] sm:$0xf] }
 0x1a5   :  { %v14417_v27 = vpop.eup %13714  ;;  %v7644_v60 = vadd.f32 %v7643_v41, %v7642_v17  ;;  %v6856_v54 = vadd.f32 %v6855_v36, %v6854_v25  ;;  %v7639_v21 = vrot.slane %v7638_v23, 1  ;;  %v6868_v35 = vadd.f32 %v6867_v18, %v6866_v9  ;;  %v13105_v36 = vld [vmem:[#allocation2 + $0x6ec] ss:$392 sps:$4 sm:$0xff]  }
 0x1a6   :  { %5663 = vmatpush1.bf16.msra.mxu0 %v13082_v6  ;;  %v8534_v50 = vadd.f32 1e-05, %v8436_v29  ;;  %5704 = vmatpush1.bf16.msra.mxu1 %v13085_v30  ;;  %v7651_v10 = vrot.slane %v7650_v0, 1  ;;  %v6862_v22 = vadd.f32 %v6861_v62, %v6860_v33  ;;  %v6873_v41 = vrot.slane %v6872_v44, 1 }
 0x1a7   :  { %5730 = vmatprep.subr.bf16.mxu0 %v13090_v39  ;;  %v7645_v7 = vrot.slane %v7644_v60, 1  ;;  %5771 = vmatprep.subr.bf16.mxu1 %v13093_v34  ;;  %v14421_v58 = vmul.f32 0.125, %v6856_v54  ;;  %v7640_v17 = vadd.f32 %v7639_v21, %v7638_v23  ;;  %v14429_v6 = vmul.f32 0.125, %v6868_v35  ;;  %v13097_v39 = vld [vmem:[#allocation2 + $0x3d8] ss:$392 sps:$4 sm:$0xff]  }
 0x1a8   :  { %13718 = vrsqrt.f32 %v8534_v50  ;;  %v7652_v30 = vadd.f32 %v7651_v10, %v7650_v0  ;;  %v14431_v25 = vmul.f32 0.125, %v6862_v22  ;;  %v13102_v34 = vld [vmem:[#allocation2 + $0x6e4] ss:$392 sps:$4 sm:$0xff]   ;;  %v7460_v29 = vmul.f32 %v14403_v16, %v14403_v16  ;;  %v13108_v35 = vld [vmem:[#allocation2 + $0x9f4] ss:$392 sps:$4 sm:$0xff]  }
 0x1a9   :  { %5681 = vmatmul.mubr.bf16.vlgmr.msra.gmra.mrb[44].mxu0 %v14426_v13  ;;  %v7646_v9 = vadd.f32 %v7645_v7, %v7644_v60  ;;  %5722 = vmatmul.mubr.bf16.vlgmr.msra.gmra.mrb[44].mxu1 %v14426_v13  ;;  %v8143_v5 = vmul.f32 0.125, %v7640_v17  ;;  %v8241_v33 = vmul.f32 %v14421_v58, %v14421_v58  ;;  %v8243_v7 = vmul.f32 %v14429_v6, %v14429_v6  ;;  %v13111_v10 = vld [vmem:[#allocation2 + $0x9fc] ss:$392 sps:$4 sm:$0xff]  }
 0x1aa   :  { %5731 = vmatpush1.bf16.msra.mxu0 %v13088_v61  ;;  %5772 = vmatpush1.bf16.msra.mxu1 %v13091_v40  ;;  %v8145_v23 = vmul.f32 0.125, %v7652_v30  ;;  %v8242_v61 = vmul.f32 %v14431_v25, %v14431_v25  ;;  %v7653_v0 = vrot.slane %v7460_v29, 4  ;;  %v13100_v40 = vld [vmem:[#allocation2 + $0x6e0] ss:$392 sps:$4 sm:$0xff]   ;;  %v6874_v54 = vadd.f32 %v6873_v41, %v6872_v44  ;;  %v13106_v30 = vld [vmem:[#allocation2 + $0x9f0] ss:$392 sps:$4 sm:$0xff]  }
 0x1ab   :  { %5732 = vmatprep.subr.bf16.mxu0 %v13096_v55  ;;  %v8144_v18 = vmul.f32 0.125, %v7646_v9  ;;  %5773 = vmatprep.subr.bf16.mxu1 %v13099_v32  ;;  %v8339_v60 = vsub.f32 %v8143_v5, %v8241_v33  ;;  %v13103_v55 = vld [vmem:[#allocation2 + $0x6e8] ss:$392 sps:$4 sm:$0xff]   ;;  %v13109_v5 = vld [vmem:[#allocation2 + $0x9f8] ss:$392 sps:$4 sm:$0xff]  }
 0x1ac   :  { %5762 = vmatprep.mubr.bf16.mxu0 %v16700_v57  ;;  %5803 = vmatprep.mubr.bf16.mxu1 %v16700_v57  ;;  %v13717_v62 = vpop.eup %13716  ;;  %v7654_v21 = vadd.f32 %v7653_v0, %v7460_v29  ;;  %v8341_v22 = vsub.f32 %v8145_v23, %v8243_v7  ;;  %v14444_v16 = vmul.f32 0.125, %v6874_v54  ;;  %v13114_v44 = vld [vmem:[#allocation2 + $0xd04] ss:$392 sps:$4 sm:$0xff]   ;;  %v13112_v29 = vld [vmem:[#allocation2 + $0xd00] ss:$392 sps:$4 sm:$0xff]  }
 0x1ad   :  { %v8340_v50 = vsub.f32 %v8144_v18, %v8242_v61  ;;  %v8437_v17 = vmax.f32 %v8339_v60, 0.0  ;;  %v13115_v7 = vld [vmem:[#allocation2 + $0xd08] ss:$392 sps:$4 sm:$0xff]   ;;  %v13120_v0 = vld [vmem:[#allocation2 + $0x1014] ss:$392 sps:$4 sm:$0xff]  }
 0x1ae   :  { %5733 = vmatpush1.bf16.msra.mxu0 %v13094_v42  ;;  %5774 = vmatpush1.bf16.msra.mxu1 %v13097_v39  ;;  %v7655_v32 = vrot.slane %v7654_v21, 2  ;;  %v16706_v39 = vcombine.low %v14415_v31, %v14417_v27  ;;  %v8439_v41 = vmax.f32 %v8341_v22, 0.0  ;;  %v13123_v31 = vld [vmem:[#allocation2 + $0x101c] ss:$392 sps:$4 sm:$0xff]   ;;  %v13121_v22 = vld [vmem:[#allocation2 + $0x1018] ss:$392 sps:$4 sm:$0xff]  }
 0x1af   :  { %5734 = vmatprep.subr.bf16.mxu0 %v13102_v34  ;;  %5775 = vmatprep.subr.bf16.mxu1 %v13105_v36  ;;  %v8438_v59 = vmax.f32 %v8340_v50, 0.0  ;;  %v13117_v36 = vld [vmem:[#allocation2 + $0xd0c] ss:$392 sps:$4 sm:$0xff]   ;;  %v8535_v61 = vadd.f32 1e-05, %v8437_v17 }
 0x1b0   :  { %v7656_v42 = vadd.f32 %v7655_v32, %v7654_v21  ;;  %v8937_v34 = vrot.slane %v16706_v39, %v14076_v4  ;;  %v8717_v50 = vld [vmem:[#allocation4 + $0x10] ss:$2 sm:$0xff]  ;;  %v16707_v21 = vcombine.low %v14362_v43, %v14375_v2  ;;  %v13126_v17 = vld [vmem:[#allocation2 + $0x1324] ss:$392 sps:$4 sm:$0xff]   ;;  %v13124_v43 = vld [vmem:[#allocation2 + $0x1320] ss:$392 sps:$4 sm:$0xff]  }
 0x1b1   :  { %v8536_v60 = vadd.f32 1e-05, %v8438_v59  ;;  %13720 = vrsqrt.f32 %v8535_v61  ;;  %v13118_v59 = vld [vmem:[#allocation2 + $0x1010] ss:$392 sps:$4 sm:$0xff]  }
 0x1b2   :  { %5735 = vmatpush1.bf16.msra.mxu0 %v13100_v40  ;;  %v13719_v9 = vpop.eup %13718  ;;  %5776 = vmatpush1.bf16.msra.mxu1 %v13103_v55  ;;  %v7657_v23 = vrot.slane %v7656_v42, 1  ;;  %v8244_v55 = vmul.f32 %v14444_v16, %v14444_v16  ;;  %v13127_v61 = vld [vmem:[#allocation2 + $0x1328] ss:$392 sps:$4 sm:$0xff]  }
 0x1b3   :  { %5736 = vmatprep.subr.bf16.mxu0 %v13108_v35  ;;  %v8916_v33 = vcombine.low %v13717_v62, %v13719_v9  ;;  %5777 = vmatprep.subr.bf16.mxu1 %v13111_v10  ;;  %v8537_v62 = vadd.f32 1e-05, %v8439_v41  ;;  %v8953_v35 = vrot.slane %v16707_v21, %v14076_v4  ;;  %13722 = vrsqrt.f32 %v8536_v60 }
 0x1b4   :  { %v7658_v40 = vadd.f32 %v7657_v23, %v7656_v42 }
 0x1b5   :  { %v8944_v18 = vrot.slane %v8916_v33, %v14076_v4  ;;  %13724 = vrsqrt.f32 %v8537_v62 }
 0x1b6   :  { %5737 = vmatpush1.bf16.msra.mxu0 %v13106_v30  ;;  %5778 = vmatpush1.bf16.msra.mxu1 %v13109_v5  ;;  %v8146_v54 = vmul.f32 0.125, %v7658_v40  ;;  %v13129_v30 = vld [vmem:[#allocation2 + $0x132c] ss:$392 sps:$4 sm:$0xff]  }
 0x1b7   :  { %5738 = vmatprep.subr.bf16.mxu0 %v13114_v44  ;;  %v8946_v27 = vcombine.low %v8937_v34, %v8944_v18  ;;  %5779 = vmatprep.subr.bf16.mxu1 %v13117_v36 }
 0x1b8   :  { %v8342_v32 = vsub.f32 %v8146_v54, %v8244_v55 }
 0x1b9   :  { %v8960_v10 = vrot.slane %v8946_v27, %v14076_v4 }
 0x1ba   :  { %5739 = vmatpush1.bf16.msra.mxu0 %v13112_v29  ;;  %5780 = vmatpush1.bf16.msra.mxu1 %v13115_v7  ;;  %v14458_v42 = vpop.f32.mrb[20].mxu0  ;;  %v14460_v5 = vpop.f32.mrb[20].mxu1  ;;  %v8440_v2 = vmax.f32 %v8342_v32, 0.0 }
 0x1bb   :  { %5740 = vmatprep.subr.bf16.mxu0 %v13120_v0  ;;  %v8961_v9 = vcombine.low %v8953_v35, %v8960_v10  ;;  %16708 = vst [vmem:[#allocation15_spill] sm:$0xff] %v14458_v42  ;;  %16709 = vst [vmem:[#allocation16_spill] sm:$0xff] %v14460_v5  ;;  %5781 = vmatprep.subr.bf16.mxu1 %v13123_v31  ;;  %v6875_v44 = vrot.slane %v14458_v42, 4  ;;  %v14465_v39 = vmul.f32 %v14458_v42, %v14458_v42  ;;  %v14468_v33 = vpop.f32.mrb[21].mxu0  ;;  %v14470_v41 = vpop.f32.mrb[21].mxu1 }
 0x1bc   :  { %v6887_v34 = vrot.slane %v14460_v5, 4  ;;  %v14474_v36 = vmul.f32 %v14460_v5, %v14460_v5  ;;  %v14479_v7 = vmul.f32 %v14468_v33, %v14468_v33  ;;  %v5194_v18 = vpop.f32.mrb[22].mxu0  ;;  %v5235_v0 = vpop.f32.mrb[22].mxu1  ;;  %v8538_v60 = vadd.f32 1e-05, %v8440_v2 }
 0x1bd   :  { %v9481_v29 = vmul.f32 %v8961_v9, %v8717_v50  ;;  %v14482_v40 = vadd.f32 %v6875_v44, %v14458_v42  ;;  %v5195_v27 = vpop.f32.mrb[23].mxu0  ;;  %v5236_v62 = vpop.f32.mrb[23].mxu1  ;;  %v13132_v10 = vld [vmem:[#allocation2 + $0x1634] ss:$392 sps:$4 sm:$0xff]   ;;  %v13133_v0 = vld [vmem:[#allocation2 + $0x1638] ss:$392 sps:$4 sm:$0xff]  }
 0x1be   :  { %5741 = vmatpush1.bf16.msra.mxu0 %v13118_v59  ;;  %v14486_v31 = vadd.f32 %v6887_v34, %v14460_v5  ;;  %5782 = vmatpush1.bf16.msra.mxu1 %v13121_v22  ;;  %v13135_v59 = vld [vmem:[#allocation2 + $0x163c] ss:$392 sps:$4 sm:$0xff]   ;;  %v13721_v5 = vpop.eup %13720  ;;  %13726 = vrsqrt.f32 %v8538_v60 }
 0x1bf   :  { %5742 = vmatprep.subr.bf16.mxu0 %v13126_v17  ;;  %v9541_v50 = vrot.slane %v9481_v29, %v14140_v45  ;;  %v9545_v54 = vrot.slane %v9481_v29, %v14143_v46  ;;  %v9549_v21 = vrot.slane %v9481_v29, %v14146_v47  ;;  %v9553_v35 = vrot.slane %v9481_v29, %v14149_v48 }
 0x1c0   :  { %5783 = vmatprep.subr.bf16.mxu1 %v13129_v30  ;;  %v9557_v32 = vrot.slane %v9481_v29, %v14152_v49  ;;  %v9561_v9 = vrot.slane %v9481_v29, %v14191_v24  ;;  %v9565_v22 = vrot.slane %v9481_v29, %v14207_v8  ;;  %v9569_v17 = vrot.slane %v9481_v29, %v14213_v1  ;;  %v13130_v30 = vld [vmem:[#allocation2 + $0x1630] ss:$392 sps:$4 sm:$0xff]   ;;  %v13138_v29 = vld [vmem:[#allocation2 + $0xd4] ss:$392 sps:$4 sm:$0xff]  }
 0x1c1   :  { %v10004_v2 = vmul.f32 %v9541_v50, %v14181_v26  ;;  %v10005_v44 = vmul.f32 %v9545_v54, %v14188_v52  ;;  %v10006_v34 = vmul.f32 %v9549_v21, %v14183_v28  ;;  %v10007_v18 = vmul.f32 %v9553_v35, %v14210_v51  ;;  %v13141_v26 = vld [vmem:[#allocation2 + $0xdc] ss:$392 sps:$4 sm:$0xff]   ;;  %v16710_v51 = vld [vmem:[#allocation9_spill] sm:$0xff] }
 0x1c2   :  { %5743 = vmatpush1.bf16.msra.mxu0 %v13124_v43  ;;  %v10008_v27 = vmul.f32 %v9557_v32, %v14370_v63  ;;  %v10009_v62 = vmul.f32 %v9561_v9, %v14381_v15  ;;  %v10010_v23 = vmul.f32 %v9565_v22, %v14372_v19  ;;  %v10011_v55 = vmul.f32 %v9569_v17, %v14389_v38  ;;  %v13723_v63 = vpop.eup %13722  ;;  %v16712_v38 = vld [vmem:[#allocation10_spill] sm:$0xff] }
 0x1c3   :  { %5784 = vmatpush1.bf16.msra.mxu1 %v13127_v61  ;;  %v10241_v52 = vcombine.low %v10004_v2, %v10005_v44  ;;  %v10242_v42 = vcombine.low %v10006_v34, %v10007_v18  ;;  %v14505_v28 = vmul.f32 %v9541_v50, %v14154_v53  ;;  %v14508_v43 = vmul.f32 %v9545_v54, %v16710_v51  ;;  %v14516_v12 = vpop.eup %13724 }
 0x1c4   :  { %5744 = vmatprep.subr.bf16.mxu0 %v13132_v10  ;;  %v10243_v3 = vcombine.low %v10008_v27, %v10009_v62  ;;  %v10244_v15 = vcombine.low %v10010_v23, %v10011_v55  ;;  %v14511_v19 = vmul.f32 %v9549_v21, %v16711_v37  ;;  %v14514_v61 = vmul.f32 %v9553_v35, %v16712_v38  ;;  %v13136_v23 = vld [vmem:[#allocation2 + $0xd0] ss:$392 sps:$4 sm:$0xff]  }
 0x1c5   :  { %5785 = vmatprep.subr.bf16.mxu1 %v13135_v59  ;;  %v10251_v2 = vrot.slane %v10241_v52, %v14076_v4  ;;  %v10258_v53 = vrot.slane %v10242_v42, %v14076_v4  ;;  %v14521_v50 = vmul.f32 %v9557_v32, %v14265_v11  ;;  %v14524_v54 = vmul.f32 %v9561_v9, %v14275_v56  ;;  %v13139_v37 = vld [vmem:[#allocation2 + $0xd8] ss:$392 sps:$4 sm:$0xff]   ;;  %v13144_v42 = vld [vmem:[#allocation2 + $0x3e4] ss:$392 sps:$4 sm:$0xff]  }
 0x1c6   :  { %5745 = vmatpush1.bf16.msra.mxu0 %v13130_v30  ;;  %v10265_v55 = vrot.slane %v10243_v3, %v14076_v4  ;;  %v10272_v21 = vrot.slane %v10244_v15, %v14076_v4  ;;  %v14529_v35 = vmul.f32 %v9565_v22, %v14267_v20  ;;  %v14532_v10 = vmul.f32 %v9569_v17, %v14277_v14  ;;  %v13147_v11 = vld [vmem:[#allocation2 + $0x3ec] ss:$392 sps:$4 sm:$0xff]   ;;  %v13145_v30 = vld [vmem:[#allocation2 + $0x3e8] ss:$392 sps:$4 sm:$0xff]   ;;  %v13153_v52 = vld [vmem:[#allocation2 + $0x6fc] ss:$392 sps:$4 sm:$0xff]  }
 0x1c7   :  { %5786 = vmatpush1.bf16.msra.mxu1 %v13133_v0  ;;  %v10273_v59 = vcombine.low %v10251_v2, %v10258_v53  ;;  %v8962_v32 = vcombine.low %v13721_v5, %v13723_v63  ;;  %v6877_v56 = vrot.slane %v14482_v40, 2  ;;  %5812 = vmatprep.subr.bf16.mxu0 %v13138_v29  ;;  %v16713_v3 = vrot.slane %v14465_v39, 4  ;;  %v8743_v22 = vld [vmem:[#allocation4 + $0x11] ss:$2 sm:$0xff] }
 0x1c8   :  { %5853 = vmatprep.subr.bf16.mxu1 %v13141_v26  ;;  %v10274_v9 = vcombine.low %v10265_v55, %v10272_v21  ;;  %v6889_v20 = vrot.slane %v14486_v31, 2  ;;  %v7671_v14 = vrot.slane %v14474_v36, 4  ;;  %v16714_v34 = vrot.slane %v14468_v33, 4  ;;  %v13150_v26 = vld [vmem:[#allocation2 + $0x6f4] ss:$392 sps:$4 sm:$0xff]  }
 0x1c9   :  { %v7660_v44 = vadd.f32 %v16713_v3, %v14465_v39  ;;  %5763 = vmatmul.mubr.bf16.vlgmr.msra.gmra.mrb[48].mxu0 %v14426_v13  ;;  %v10281_v17 = vrot.slane %v10273_v59, %v14076_v4  ;;  %v14543_v5 = vrot.slane %v8962_v32, %v14076_v4  ;;  %v6878_v60 = vadd.f32 %v6877_v56, %v14482_v40  ;;  %v13142_v39 = vld [vmem:[#allocation2 + $0x3e0] ss:$392 sps:$4 sm:$0xff]   ;;  %v13148_v21 = vld [vmem:[#allocation2 + $0x6f0] ss:$392 sps:$4 sm:$0xff]   ;;  %v13159_v3 = vld [vmem:[#allocation2 + $0xa0c] ss:$392 sps:$4 sm:$0xff]  }
 0x1ca   :  { %v6882_v18 = vadd.f32 %v16714_v34, %v14468_v33  ;;  %5804 = vmatmul.mubr.bf16.vlgmr.msra.gmra.mrb[48].mxu1 %v14426_v13  ;;  %v10288_v0 = vrot.slane %v10274_v9, %v14076_v4  ;;  %v6890_v62 = vadd.f32 %v6889_v20, %v14486_v31  ;;  %v7672_v29 = vadd.f32 %v7671_v14, %v14474_v36  ;;  %v13156_v9 = vld [vmem:[#allocation2 + $0xa04] ss:$392 sps:$4 sm:$0xff]  }
 0x1cb   :  { %v7661_v27 = vrot.slane %v7660_v44, 2  ;;  %5813 = vmatpush1.bf16.msra.mxu0 %v13136_v23  ;;  %5854 = vmatpush1.bf16.msra.mxu1 %v13139_v37  ;;  %v6879_v40 = vrot.slane %v6878_v60, 1  ;;  %v7665_v63 = vrot.slane %v14479_v7, 4  ;;  %v6893_v15 = vrot.slane %v14470_v41, 4 }
 0x1cc   :  { %v6883_v51 = vrot.slane %v6882_v18, 2  ;;  %5814 = vmatprep.subr.bf16.mxu0 %v13144_v42  ;;  %5855 = vmatprep.subr.bf16.mxu1 %v13147_v11  ;;  %v10289_v38 = vcombine.low %v10281_v17, %v10288_v0  ;;  %v6891_v53 = vrot.slane %v6890_v62, 1  ;;  %v7673_v55 = vrot.slane %v7672_v29, 2  ;;  %v13151_v42 = vld [vmem:[#allocation2 + $0x6f8] ss:$392 sps:$4 sm:$0xff]  }
 0x1cd   :  { %v14555_v2 = vadd.f32 %v7661_v27, %v7660_v44  ;;  %5844 = vmatprep.mubr.bf16.mxu0 %v16700_v57  ;;  %5885 = vmatprep.mubr.bf16.mxu1 %v16700_v57  ;;  %v6880_v36 = vadd.f32 %v6879_v40, %v6878_v60  ;;  %v14562_v23 = vadd.f32 %v7665_v63, %v14479_v7  ;;  %v13162_v63 = vld [vmem:[#allocation2 + $0xd14] ss:$392 sps:$4 sm:$0xff]  }
 0x1ce   :  { %v14559_v31 = vadd.f32 %v6883_v51, %v6882_v18  ;;  %v14565_v37 = vadd.f32 %v6893_v15, %v14470_v41  ;;  %v10809_v11 = vsub.f32 %v8743_v22, %v10289_v38  ;;  %v6892_v32 = vadd.f32 %v6891_v53, %v6890_v62  ;;  %v13727_v18 = vpop.eup %13726  ;;  %v13154_v62 = vld [vmem:[#allocation2 + $0xa00] ss:$392 sps:$4 sm:$0xff]   ;;  %v13165_v15 = vld [vmem:[#allocation2 + $0xd1c] ss:$392 sps:$4 sm:$0xff]  }
 0x1cf   :  { %v7663_v59 = vrot.slane %v14555_v2, 1  ;;  %v14568_v56 = vadd.f32 %v7673_v55, %v7672_v29  ;;  %5815 = vmatpush1.bf16.msra.mxu0 %v13142_v39  ;;  %5856 = vmatpush1.bf16.msra.mxu1 %v13145_v30  ;;  %v14570_v44 = vmul.f32 0.125, %v6880_v36  ;;  %v7667_v20 = vrot.slane %v14562_v23, 2  ;;  %v13157_v29 = vld [vmem:[#allocation2 + $0xa08] ss:$392 sps:$4 sm:$0xff]  }
 0x1d0   :  { %v6885_v7 = vrot.slane %v14559_v31, 1  ;;  %v6895_v14 = vrot.slane %v14565_v37, 2  ;;  %5816 = vmatprep.subr.bf16.mxu0 %v13150_v26  ;;  %5857 = vmatprep.subr.bf16.mxu1 %v13153_v52  ;;  %v10967_v22 = vrot.slane %v10809_v11, %v14140_v45  ;;  %v10971_v17 = vrot.slane %v10809_v11, %v14143_v46 }
 0x1d1   :  { %v10975_v60 = vrot.slane %v10809_v11, %v14146_v47  ;;  %v10979_v34 = vrot.slane %v10809_v11, %v14149_v48  ;;  %v10983_v39 = vrot.slane %v10809_v11, %v14152_v49  ;;  %v10987_v30 = vrot.slane %v10809_v11, %v14191_v24 }
 0x1d2   :  { %v10991_v0 = vrot.slane %v10809_v11, %v14207_v8  ;;  %v10995_v27 = vrot.slane %v10809_v11, %v14213_v1  ;;  %v11430_v26 = vadd.f32 %v10967_v22, %v14505_v28  ;;  %v11431_v52 = vadd.f32 %v10971_v17, %v14508_v43 }
 0x1d3   :  { %v11432_v40 = vadd.f32 %v10975_v60, %v14511_v19  ;;  %v11433_v51 = vadd.f32 %v10979_v34, %v14514_v61  ;;  %5817 = vmatpush1.bf16.msra.mxu0 %v13148_v21  ;;  %v11434_v38 = vadd.f32 %v10983_v39, %v14521_v50  ;;  %v11435_v53 = vadd.f32 %v10987_v30, %v14524_v54  ;;  %v13160_v60 = vld [vmem:[#allocation2 + $0xd10] ss:$392 sps:$4 sm:$0xff]  }
 0x1d4   :  { %v11436_v55 = vadd.f32 %v10991_v0, %v14529_v35  ;;  %v11437_v36 = vadd.f32 %v10995_v27, %v14532_v10  ;;  %5858 = vmatpush1.bf16.msra.mxu1 %v13151_v42  ;;  %v11528_v11 = vmax.f32 %v11430_v26, 0.0  ;;  %v11529_v28 = vmax.f32 %v11431_v52, 0.0  ;;  %5818 = vmatprep.subr.bf16.mxu0 %v13156_v9  ;;  %v13163_v42 = vld [vmem:[#allocation2 + $0xd18] ss:$392 sps:$4 sm:$0xff]   ;;  %v13168_v9 = vld [vmem:[#allocation2 + $0x1024] ss:$392 sps:$4 sm:$0xff]  }
 0x1d5   :  { %v11530_v22 = vmax.f32 %v11432_v40, 0.0  ;;  %v11531_v43 = vmax.f32 %v11433_v51, 0.0  ;;  %5859 = vmatprep.subr.bf16.mxu1 %v13159_v3  ;;  %v11532_v19 = vmax.f32 %v11434_v38, 0.0  ;;  %v11533_v61 = vmax.f32 %v11435_v53, 0.0  ;;  %v13171_v3 = vld [vmem:[#allocation2 + $0x102c] ss:$392 sps:$4 sm:$0xff]  }
 0x1d6   :  { %v11534_v21 = vmax.f32 %v11436_v55, 0.0  ;;  %v11535_v17 = vmax.f32 %v11437_v36, 0.0  ;;  %11626 = vst [vmem:[%s16652_s3 + $0x40] sm:$0xff] %v11528_v11  ;;  %11627 = vst [vmem:[%s16652_s3 + $0x48] sm:$0xff] %v11529_v28  ;;  %v8963_v50 = vcombine.low %v14516_v12, %v13727_v18  ;;  %v7664_v54 = vadd.f32 %v7663_v59, %v14555_v2  ;;  %v13172_v28 = vld [vmem:[#allocation2 + $0x1330] ss:$392 sps:$4 sm:$0xff]  }
 0x1d7   :  { %11628 = vst [vmem:[%s16652_s3 + $0x50] sm:$0xff] %v11530_v22  ;;  %11629 = vst [vmem:[%s16652_s3 + $0x58] sm:$0xff] %v11531_v43  ;;  %v8245_v35 = vmul.f32 %v14570_v44, %v14570_v44  ;;  %v14607_v10 = vmul.f32 0.125, %v6892_v32  ;;  %5819 = vmatpush1.bf16.msra.mxu0 %v13154_v62  ;;  %v7675_v12 = vrot.slane %v14568_v56, 1  ;;  %v6886_v2 = vadd.f32 %v6885_v7, %v14559_v31  ;;  %v13169_v62 = vld [vmem:[#allocation2 + $0x1028] ss:$392 sps:$4 sm:$0xff]  }
 0x1d8   :  { %11630 = vst [vmem:[%s16652_s3 + $0x60] sm:$0xff] %v11532_v19  ;;  %11631 = vst [vmem:[%s16652_s3 + $0x68] sm:$0xff] %v11533_v61  ;;  %v7668_v59 = vadd.f32 %v7667_v20, %v14562_v23  ;;  %v6896_v32 = vadd.f32 %v6895_v14, %v14565_v37  ;;  %5860 = vmatpush1.bf16.msra.mxu1 %v13157_v29  ;;  %5820 = vmatprep.subr.bf16.mxu0 %v13162_v63  ;;  %v8147_v18 = vmul.f32 0.125, %v7664_v54  ;;  %v13166_v20 = vld [vmem:[#allocation2 + $0x1020] ss:$392 sps:$4 sm:$0xff]  }
 0x1d9   :  { %11632 = vst [vmem:[%s16652_s3 + $0x70] sm:$0xff] %v11534_v21  ;;  %11633 = vst [vmem:[%s16652_s3 + $0x78] sm:$0xff] %v11535_v17  ;;  %v14626_v34 = vrot.slane %v8963_v50, %v14076_v4  ;;  %v8247_v39 = vmul.f32 %v14607_v10, %v14607_v10  ;;  %v7464_v30 = vmul.f32 %v14470_v41, %v14470_v41  ;;  %5861 = vmatprep.subr.bf16.mxu1 %v13165_v15  ;;  %v13174_v29 = vld [vmem:[#allocation2 + $0x1334] ss:$392 sps:$4 sm:$0xff]  }
 0x1da   :  { %v7676_v31 = vadd.f32 %v7675_v12, %v14568_v56  ;;  %v14633_v7 = vmul.f32 0.125, %v6886_v2  ;;  %v7669_v23 = vrot.slane %v7668_v59, 1  ;;  %v6897_v37 = vrot.slane %v6896_v32, 1  ;;  %v14639_v56 = vpop.f32.mrb[24].mxu0  ;;  %v14641_v63 = vpop.f32.mrb[24].mxu1 }
 0x1db   :  { %v8994_v14 = vcombine.low %v14543_v5, %v14626_v34  ;;  %v8343_v0 = vsub.f32 %v8147_v18, %v8245_v35  ;;  %v7677_v27 = vrot.slane %v7464_v30, 4  ;;  %5821 = vmatpush1.bf16.msra.mxu0 %v13160_v60  ;;  %v13177_v15 = vld [vmem:[#allocation2 + $0x133c] ss:$392 sps:$4 sm:$0xff]   ;;  %v6899_v55 = vrot.slane %v14639_v56, 4  ;;  %v14644_v36 = vpop.f32.mrb[25].mxu0  ;;  %v14646_v11 = vpop.f32.mrb[25].mxu1 }
 0x1dc   :  { %v8149_v26 = vmul.f32 0.125, %v7676_v31  ;;  %v7670_v52 = vadd.f32 %v7669_v23, %v7668_v59  ;;  %v8246_v40 = vmul.f32 %v14633_v7, %v14633_v7  ;;  %v6898_v51 = vadd.f32 %v6897_v37, %v6896_v32  ;;  %5862 = vmatpush1.bf16.msra.mxu1 %v13163_v42  ;;  %5822 = vmatprep.subr.bf16.mxu0 %v13168_v9  ;;  %v5276_v21 = vpop.f32.mrb[26].mxu0  ;;  %v5317_v17 = vpop.f32.mrb[26].mxu1  ;;  %v13180_v18 = vld [vmem:[#allocation2 + $0x1644] ss:$392 sps:$4 sm:$0xff]  }
 0x1dd   :  { %v8441_v38 = vmax.f32 %v8343_v0, 0.0  ;;  %v7678_v53 = vadd.f32 %v7677_v27, %v7464_v30  ;;  %5863 = vmatprep.subr.bf16.mxu1 %v13171_v3  ;;  %v7465_v61 = vmul.f32 %v14639_v56, %v14639_v56  ;;  %v6900_v54 = vadd.f32 %v6899_v55, %v14639_v56  ;;  %v5277_v42 = vpop.f32.mrb[27].mxu0  ;;  %v5318_v9 = vpop.f32.mrb[27].mxu1  ;;  %v13175_v3 = vld [vmem:[#allocation2 + $0x1338] ss:$392 sps:$4 sm:$0xff]  }
 0x1de   :  { %v8345_v22 = vsub.f32 %v8149_v26, %v8247_v39  ;;  %v8148_v43 = vmul.f32 0.125, %v7670_v52  ;;  %v14648_v19 = vmul.f32 0.125, %v6898_v51  ;;  %v6911_v35 = vrot.slane %v14641_v63, 4  ;;  %v13178_v23 = vld [vmem:[#allocation2 + $0x1640] ss:$392 sps:$4 sm:$0xff]  }
 0x1df   :  { %v8539_v60 = vadd.f32 1e-05, %v8441_v38  ;;  %v7679_v50 = vrot.slane %v7678_v53, 2  ;;  %5823 = vmatpush1.bf16.msra.mxu0 %v13166_v20  ;;  %v7683_v32 = vrot.slane %v7465_v61, 4  ;;  %v6901_v30 = vrot.slane %v6900_v54, 2 }
 0x1e0   :  { %v8443_v12 = vmax.f32 %v8345_v22, 0.0  ;;  %v8344_v2 = vsub.f32 %v8148_v43, %v8246_v40  ;;  %v14656_v59 = vmul.f32 %v14648_v19, %v14648_v19  ;;  %5864 = vmatpush1.bf16.msra.mxu1 %v13169_v62  ;;  %5824 = vmatprep.subr.bf16.mxu0 %v13174_v29  ;;  %v6912_v31 = vadd.f32 %v6911_v35, %v14641_v63  ;;  %v13183_v37 = vld [vmem:[#allocation2 + $0x164c] ss:$392 sps:$4 sm:$0xff]   ;;  %v13181_v51 = vld [vmem:[#allocation2 + $0x1648] ss:$392 sps:$4 sm:$0xff]  }
 0x1e1   :  { %13728 = vrsqrt.f32 %v8539_v60  ;;  %v7680_v39 = vadd.f32 %v7679_v50, %v7678_v53  ;;  %5865 = vmatprep.subr.bf16.mxu1 %v13177_v15  ;;  %v7684_v27 = vadd.f32 %v7683_v32, %v7465_v61  ;;  %v7467_v26 = vmul.f32 %v14641_v63, %v14641_v63  ;;  %v13186_v15 = vld [vmem:[#allocation2 + $0xe4] ss:$392 sps:$4 sm:$0xff]   ;;  %v13184_v17 = vld [vmem:[#allocation2 + $0xe0] ss:$392 sps:$4 sm:$0xff]  }
 0x1e2   :  { %v8541_v20 = vadd.f32 1e-05, %v8443_v12  ;;  %v8442_v0 = vmax.f32 %v8344_v2, 0.0  ;;  %v6902_v40 = vadd.f32 %v6901_v30, %v6900_v54  ;;  %v6913_v62 = vrot.slane %v6912_v31, 2  ;;  %v13189_v60 = vld [vmem:[#allocation2 + $0xec] ss:$392 sps:$4 sm:$0xff]  }
 0x1e3   :  { %v7681_v52 = vrot.slane %v7680_v39, 1  ;;  %v6905_v29 = vrot.slane %v14644_v36, 4  ;;  %5825 = vmatpush1.bf16.msra.mxu0 %v13172_v28  ;;  %v7685_v53 = vrot.slane %v7684_v27, 2  ;;  %v7695_v55 = vrot.slane %v7467_v26, 4  ;;  %v13187_v2 = vld [vmem:[#allocation2 + $0xe8] ss:$392 sps:$4 sm:$0xff]  }
 0x1e4   :  { %13730 = vrsqrt.f32 %v8541_v20  ;;  %v8540_v38 = vadd.f32 1e-05, %v8442_v0  ;;  %5866 = vmatpush1.bf16.msra.mxu1 %v13175_v3  ;;  %5826 = vmatprep.subr.bf16.mxu0 %v13180_v18  ;;  %v6903_v43 = vrot.slane %v6902_v40, 1  ;;  %v6914_v61 = vadd.f32 %v6913_v62, %v6912_v31  ;;  %v13192_v30 = vld [vmem:[#allocation2 + $0x3f4] ss:$392 sps:$4 sm:$0xff]  }
 0x1e5   :  { %v7682_v22 = vadd.f32 %v7681_v52, %v7680_v39  ;;  %v6906_v21 = vadd.f32 %v6905_v29, %v14644_v36  ;;  %5867 = vmatprep.subr.bf16.mxu1 %v13183_v37  ;;  %v7686_v50 = vadd.f32 %v7685_v53, %v7684_v27  ;;  %v7696_v54 = vadd.f32 %v7695_v55, %v7467_v26  ;;  %v13190_v27 = vld [vmem:[#allocation2 + $0x3f0] ss:$392 sps:$4 sm:$0xff]   ;;  %v13195_v26 = vld [vmem:[#allocation2 + $0x3fc] ss:$392 sps:$4 sm:$0xff]  }
 0x1e6   :  { %13732 = vrsqrt.f32 %v8540_v38  ;;  %v7466_v28 = vmul.f32 %v14644_v36, %v14644_v36  ;;  %v6904_v42 = vadd.f32 %v6903_v43, %v6902_v40  ;;  %v6915_v9 = vrot.slane %v6914_v61, 1  ;;  %v13193_v55 = vld [vmem:[#allocation2 + $0x3f8] ss:$392 sps:$4 sm:$0xff]  }
 0x1e7   :  { %v8150_v35 = vmul.f32 0.125, %v7682_v22  ;;  %v6907_v12 = vrot.slane %v6906_v21, 2  ;;  %5827 = vmatpush1.bf16.msra.mxu0 %v13178_v23  ;;  %v7687_v32 = vrot.slane %v7686_v50, 1  ;;  %v7697_v3 = vrot.slane %v7696_v54, 2 }
 0x1e8   :  { %v7689_v18 = vrot.slane %v7466_v28, 4  ;;  %v6917_v39 = vrot.slane %v14646_v11, 4  ;;  %5868 = vmatpush1.bf16.msra.mxu1 %v13181_v51  ;;  %5894 = vmatprep.subr.bf16.mxu0 %v13186_v15  ;;  %v14667_v37 = vmul.f32 0.125, %v6904_v42  ;;  %v6916_v20 = vadd.f32 %v6915_v9, %v6914_v61 }
 0x1e9   :  { %v8346_v31 = vsub.f32 %v8150_v35, %v14656_v59  ;;  %v6908_v0 = vadd.f32 %v6907_v12, %v6906_v21  ;;  %5935 = vmatprep.subr.bf16.mxu1 %v13189_v60  ;;  %v7688_v52 = vadd.f32 %v7687_v32, %v7686_v50  ;;  %v7698_v23 = vadd.f32 %v7697_v3, %v7696_v54  ;;  %v13198_v21 = vld [vmem:[#allocation2 + $0x704] ss:$392 sps:$4 sm:$0xff]   ;;  %v13196_v3 = vld [vmem:[#allocation2 + $0x700] ss:$392 sps:$4 sm:$0xff]  }
 0x1ea   :  { %v7690_v40 = vadd.f32 %v7689_v18, %v7466_v28  ;;  %v6918_v62 = vadd.f32 %v6917_v39, %v14646_v11  ;;  %5845 = vmatmul.mubr.bf16.vlgmr.msra.gmra.mrb[52].mxu0 %v14426_v13  ;;  %v8249_v59 = vmul.f32 %v14667_v37, %v14667_v37  ;;  %v14675_v38 = vmul.f32 0.125, %v6916_v20  ;;  %v13201_v35 = vld [vmem:[#allocation2 + $0x70c] ss:$392 sps:$4 sm:$0xff]   ;;  %v13199_v18 = vld [vmem:[#allocation2 + $0x708] ss:$392 sps:$4 sm:$0xff]  }
 0x1eb   :  { %v14671_v29 = vpop.eup %13728  ;;  %v8444_v51 = vmax.f32 %v8346_v31, 0.0  ;;  %v6909_v53 = vrot.slane %v6908_v0, 1  ;;  %5886 = vmatmul.mubr.bf16.vlgmr.msra.gmra.mrb[52].mxu1 %v14426_v13  ;;  %5895 = vmatpush1.bf16.msra.mxu0 %v13184_v17  ;;  %v8151_v15 = vmul.f32 0.125, %v7688_v52  ;;  %v7699_v22 = vrot.slane %v7698_v23, 1 }
 0x1ec   :  { %v7691_v43 = vrot.slane %v7690_v40, 2  ;;  %v6919_v61 = vrot.slane %v6918_v62, 2  ;;  %5936 = vmatpush1.bf16.msra.mxu1 %v13187_v2  ;;  %5896 = vmatprep.subr.bf16.mxu0 %v13192_v30  ;;  %v8251_v50 = vmul.f32 %v14675_v38, %v14675_v38  ;;  %v7468_v28 = vmul.f32 %v14646_v11, %v14646_v11 }
 0x1ed   :  { %v8542_v60 = vadd.f32 1e-05, %v8444_v51  ;;  %v6910_v54 = vadd.f32 %v6909_v53, %v6908_v0  ;;  %5937 = vmatprep.subr.bf16.mxu1 %v13195_v26  ;;  %5926 = vmatprep.mubr.bf16.mxu0 %v16700_v57  ;;  %v8347_v17 = vsub.f32 %v8151_v15, %v8249_v59  ;;  %v7700_v42 = vadd.f32 %v7699_v22, %v7698_v23  ;;  %v13204_v0 = vld [vmem:[#allocation2 + $0xa14] ss:$392 sps:$4 sm:$0xff]   ;;  %v13202_v15 = vld [vmem:[#allocation2 + $0xa10] ss:$392 sps:$4 sm:$0xff]  }
 0x1ee   :  { %v14683_v13 = vpop.eup %13730  ;;  %v7692_v9 = vadd.f32 %v7691_v43, %v7690_v40  ;;  %v6920_v12 = vadd.f32 %v6919_v61, %v6918_v62  ;;  %5967 = vmatprep.mubr.bf16.mxu1 %v16700_v57  ;;  %v7701_v32 = vrot.slane %v7468_v28, 4  ;;  %v13207_v40 = vld [vmem:[#allocation2 + $0xa1c] ss:$392 sps:$4 sm:$0xff]   ;;  %v13205_v22 = vld [vmem:[#allocation2 + $0xa18] ss:$392 sps:$4 sm:$0xff]  }
 0x1ef   :  { %13734 = vrsqrt.f32 %v8542_v60  ;;  %v14686_v2 = vmul.f32 0.125, %v6910_v54  ;;  %5897 = vmatpush1.bf16.msra.mxu0 %v13190_v27  ;;  %v8153_v30 = vmul.f32 0.125, %v7700_v42  ;;  %v8445_v52 = vmax.f32 %v8347_v17, 0.0  ;;  %v13210_v61 = vld [vmem:[#allocation2 + $0xd24] ss:$392 sps:$4 sm:$0xff]  }
 0x1f0   :  { %v13733_v39 = vpop.eup %13732  ;;  %v7693_v31 = vrot.slane %v7692_v9, 1  ;;  %v6921_v20 = vrot.slane %v6920_v12, 1  ;;  %5938 = vmatpush1.bf16.msra.mxu1 %v13193_v55  ;;  %5898 = vmatprep.subr.bf16.mxu0 %v13198_v21  ;;  %v7702_v23 = vadd.f32 %v7701_v32, %v7468_v28  ;;  %v13208_v60 = vld [vmem:[#allocation2 + $0xd20] ss:$392 sps:$4 sm:$0xff]   ;;  %v13219_v32 = vld [vmem:[#allocation2 + $0x103c] ss:$392 sps:$4 sm:$0xff]  }
 0x1f1   :  { %v8964_v26 = vcombine.low %v14671_v29, %v13733_v39  ;;  %5939 = vmatprep.subr.bf16.mxu1 %v13201_v35  ;;  %v8349_v62 = vsub.f32 %v8153_v30, %v8251_v50  ;;  %v8250_v27 = vmul.f32 %v14686_v2, %v14686_v2  ;;  %v13213_v50 = vld [vmem:[#allocation2 + $0xd2c] ss:$392 sps:$4 sm:$0xff]   ;;  %v8543_v54 = vadd.f32 1e-05, %v8445_v52  ;;  %v13211_v42 = vld [vmem:[#allocation2 + $0xd28] ss:$392 sps:$4 sm:$0xff]  }
 0x1f2   :  { %v7694_v51 = vadd.f32 %v7693_v31, %v7692_v9  ;;  %v6922_v59 = vadd.f32 %v6921_v20, %v6920_v12  ;;  %v7703_v53 = vrot.slane %v7702_v23, 2  ;;  %v13216_v12 = vld [vmem:[#allocation2 + $0x1034] ss:$392 sps:$4 sm:$0xff]   ;;  %v13214_v52 = vld [vmem:[#allocation2 + $0x1030] ss:$392 sps:$4 sm:$0xff]  }
 0x1f3   :  { %5899 = vmatpush1.bf16.msra.mxu0 %v13196_v3  ;;  %v8447_v43 = vmax.f32 %v8349_v62, 0.0  ;;  %v8986_v30 = vrot.slane %v8964_v26, %v14076_v4  ;;  %13736 = vrsqrt.f32 %v8543_v54 }
 0x1f4   :  { %v8152_v55 = vmul.f32 0.125, %v7694_v51  ;;  %5940 = vmatpush1.bf16.msra.mxu1 %v13199_v18  ;;  %5900 = vmatprep.subr.bf16.mxu0 %v13204_v0  ;;  %v14691_v29 = vmul.f32 0.125, %v6922_v59  ;;  %v7704_v21 = vadd.f32 %v7703_v53, %v7702_v23  ;;  %v13217_v23 = vld [vmem:[#allocation2 + $0x1038] ss:$392 sps:$4 sm:$0xff]  }
 0x1f5   :  { %5941 = vmatprep.subr.bf16.mxu1 %v13207_v40  ;;  %v8545_v35 = vadd.f32 1e-05, %v8447_v43  ;;  %v9002_v40 = vrot.slane %v8994_v14, %v14076_v4 }
 0x1f6   :  { %v8348_v28 = vsub.f32 %v8152_v55, %v8250_v27  ;;  %v7705_v17 = vrot.slane %v7704_v21, 1  ;;  %v8252_v39 = vmul.f32 %v14691_v29, %v14691_v29  ;;  %v13225_v27 = vld [vmem:[#allocation2 + $0x134c] ss:$392 sps:$4 sm:$0xff]  }
 0x1f7   :  { %5901 = vmatpush1.bf16.msra.mxu0 %v13202_v15  ;;  %13738 = vrsqrt.f32 %v8545_v35 }
 0x1f8   :  { %v8446_v9 = vmax.f32 %v8348_v28, 0.0  ;;  %5942 = vmatpush1.bf16.msra.mxu1 %v13205_v22  ;;  %5902 = vmatprep.subr.bf16.mxu0 %v13210_v61  ;;  %v7706_v18 = vadd.f32 %v7705_v17, %v7704_v21 }
 0x1f9   :  { %v13735_v3 = vpop.eup %13734  ;;  %5943 = vmatprep.subr.bf16.mxu1 %v13213_v50  ;;  %v8719_v50 = vld [vmem:[#allocation4 + $0x20] ss:$2 sm:$0xff] }
 0x1fa   :  { %v8965_v31 = vcombine.low %v14683_v13, %v13735_v3  ;;  %v8544_v20 = vadd.f32 1e-05, %v8446_v9  ;;  %v8154_v0 = vmul.f32 0.125, %v7706_v18  ;;  %v14702_v51 = vpop.f32.mrb[28].mxu0  ;;  %v14704_v26 = vpop.f32.mrb[28].mxu1 }
 0x1fb   :  { %5903 = vmatpush1.bf16.msra.mxu0 %v13208_v60  ;;  %16715 = vst [vmem:[#allocation9_spill] sm:$0xff] %v14702_v51  ;;  %16716 = vst [vmem:[#allocation8_spill] sm:$0xff] %v14704_v26  ;;  %v13222_v13 = vld [vmem:[#allocation2 + $0x1344] ss:$392 sps:$4 sm:$0xff]   ;;  %v6923_v53 = vrot.slane %v14702_v51, 4  ;;  %v7469_v15 = vmul.f32 %v14702_v51, %v14702_v51  ;;  %v6935_v5 = vrot.slane %v14704_v26, 4  ;;  %v7471_v43 = vmul.f32 %v14704_v26, %v14704_v26 }
 0x1fc   :  { %v8993_v62 = vrot.slane %v8965_v31, %v14076_v4  ;;  %13740 = vrsqrt.f32 %v8544_v20  ;;  %5944 = vmatpush1.bf16.msra.mxu1 %v13211_v42  ;;  %5904 = vmatprep.subr.bf16.mxu0 %v13216_v12  ;;  %v8350_v59 = vsub.f32 %v8154_v0, %v8252_v39  ;;  %v14710_v34 = vpop.f32.mrb[29].mxu0  ;;  %v14712_v14 = vpop.f32.mrb[29].mxu1  ;;  %v13220_v9 = vld [vmem:[#allocation2 + $0x1340] ss:$392 sps:$4 sm:$0xff]   ;;  %v13228_v31 = vld [vmem:[#allocation2 + $0x1654] ss:$392 sps:$4 sm:$0xff]  }
 0x1fd   :  { %16717 = vst [vmem:[#allocation10_spill] sm:$0xff] %v14710_v34  ;;  %16718 = vst [vmem:[#allocation17_spill] sm:$0xff] %v14712_v14  ;;  %5945 = vmatprep.subr.bf16.mxu1 %v13219_v32  ;;  %v6929_v55 = vrot.slane %v14710_v34, 4  ;;  %v7470_v61 = vmul.f32 %v14710_v34, %v14710_v34  ;;  %v5358_v21 = vpop.f32.mrb[30].mxu0  ;;  %v5399_v60 = vpop.f32.mrb[30].mxu1  ;;  %v6924_v28 = vadd.f32 %v6923_v53, %v14702_v51  ;;  %v7707_v35 = vrot.slane %v7469_v15, 4 }
 0x1fe   :  { %v8995_v22 = vcombine.low %v8986_v30, %v8993_v62  ;;  %v8448_v54 = vmax.f32 %v8350_v59, 0.0  ;;  %v6936_v17 = vadd.f32 %v6935_v5, %v14704_v26  ;;  %v5359_v42 = vpop.f32.mrb[31].mxu0  ;;  %v5400_v12 = vpop.f32.mrb[31].mxu1  ;;  %v7719_v3 = vrot.slane %v7471_v43, 4  ;;  %v13223_v30 = vld [vmem:[#allocation2 + $0x1348] ss:$392 sps:$4 sm:$0xff]  }
 0x1ff   :  { %5905 = vmatpush1.bf16.msra.mxu0 %v13214_v52  ;;  %v6930_v18 = vadd.f32 %v6929_v55, %v14710_v34  ;;  %v7713_v39 = vrot.slane %v7470_v61, 4  ;;  %v6925_v0 = vrot.slane %v6924_v28, 2  ;;  %v7708_v62 = vadd.f32 %v7707_v35, %v7469_v15  ;;  %v13231_v53 = vld [vmem:[#allocation2 + $0x165c] ss:$392 sps:$4 sm:$0xff]  }
 0x200   :  { %v9009_v32 = vrot.slane %v8995_v22, %v14076_v4  ;;  %5946 = vmatpush1.bf16.msra.mxu1 %v13217_v23  ;;  %5906 = vmatprep.subr.bf16.mxu0 %v13222_v13  ;;  %v8546_v20 = vadd.f32 1e-05, %v8448_v54  ;;  %v6937_v59 = vrot.slane %v6936_v17, 2  ;;  %v14723_v5 = vadd.f32 %v7719_v3, %v7471_v43  ;;  %v13226_v13 = vld [vmem:[#allocation2 + $0x1650] ss:$392 sps:$4 sm:$0xff]   ;;  %v14731_v54 = vpop.eup %13736 }
 0x201   :  { %5947 = vmatprep.subr.bf16.mxu1 %v13225_v27  ;;  %v6931_v21 = vrot.slane %v6930_v18, 2  ;;  %v14725_v60 = vadd.f32 %v7713_v39, %v7470_v61  ;;  %v14727_v22 = vadd.f32 %v6925_v0, %v6924_v28  ;;  %v7709_v55 = vrot.slane %v7708_v62, 2  ;;  %v13229_v43 = vld [vmem:[#allocation2 + $0x1658] ss:$392 sps:$4 sm:$0xff]   ;;  %v13234_v61 = vld [vmem:[#allocation2 + $0xf4] ss:$392 sps:$4 sm:$0xff]   ;;  %v14737_v28 = vpop.eup %13738 }
 0x202   :  { %v9010_v52 = vcombine.low %v9002_v40, %v9009_v32  ;;  %13742 = vrsqrt.f32 %v8546_v20  ;;  %v14729_v23 = vadd.f32 %v6937_v59, %v6936_v17 }
 0x203   :  { %5907 = vmatpush1.bf16.msra.mxu0 %v13220_v9  ;;  %v14734_v35 = vadd.f32 %v6931_v21, %v6930_v18  ;;  %v6927_v17 = vrot.slane %v14727_v22, 1  ;;  %v14740_v42 = vadd.f32 %v7709_v55, %v7708_v62  ;;  %v13237_v62 = vld [vmem:[#allocation2 + $0xfc] ss:$392 sps:$4 sm:$0xff]   ;;  %v13232_v55 = vld [vmem:[#allocation2 + $0xf0] ss:$392 sps:$4 sm:$0xff]  }
 0x204   :  { %v9482_v15 = vmul.f32 %v9010_v52, %v8719_v50  ;;  %5948 = vmatpush1.bf16.msra.mxu1 %v13223_v30  ;;  %5908 = vmatprep.subr.bf16.mxu0 %v13228_v31  ;;  %v6939_v9 = vrot.slane %v14729_v23, 1  ;;  %v13235_v50 = vld [vmem:[#allocation2 + $0xf8] ss:$392 sps:$4 sm:$0xff]  }
 0x205   :  { %5949 = vmatprep.subr.bf16.mxu1 %v13231_v53 }
 0x206   :  { %v14744_v12 = vpop.eup %13740  ;;  %v9573_v32 = vrot.slane %v9482_v15, %v14140_v45  ;;  %v9577_v3 = vrot.slane %v9482_v15, %v14143_v46  ;;  %v9581_v18 = vrot.slane %v9482_v15, %v14146_v47  ;;  %v9585_v39 = vrot.slane %v9482_v15, %v14149_v48 }
 0x207   :  { %v9589_v30 = vrot.slane %v9482_v15, %v14152_v49  ;;  %v9593_v31 = vrot.slane %v9482_v15, %v14191_v24  ;;  %v9597_v20 = vrot.slane %v9482_v15, %v14207_v8  ;;  %v9601_v0 = vrot.slane %v9482_v15, %v14213_v1  ;;  %5909 = vmatpush1.bf16.msra.mxu0 %v13226_v13  ;;  %v13240_v15 = vld [vmem:[#allocation2 + $0x404] ss:$392 sps:$4 sm:$0xff]  }
 0x208   :  { %v10012_v59 = vmul.f32 %v9573_v32, %v14421_v58  ;;  %v10013_v53 = vmul.f32 %v9577_v3, %v14431_v25  ;;  %v10014_v52 = vmul.f32 %v9581_v18, %v14429_v6  ;;  %v10015_v21 = vmul.f32 %v9585_v39, %v14444_v16  ;;  %5950 = vmatpush1.bf16.msra.mxu1 %v13229_v43  ;;  %v16719_v25 = vld [vmem:[#allocation11_spill] sm:$0xff]  ;;  %v16720_v6 = vld [vmem:[#allocation13_spill] sm:$0xff] }
 0x209   :  { %v10016_v40 = vmul.f32 %v9589_v30, %v14570_v44  ;;  %v10017_v27 = vmul.f32 %v9593_v31, %v14633_v7  ;;  %v10018_v26 = vmul.f32 %v9597_v20, %v14607_v10  ;;  %v10019_v13 = vmul.f32 %v9601_v0, %v14648_v19  ;;  %5976 = vmatprep.subr.bf16.mxu0 %v13234_v61  ;;  %v14771_v44 = vld [vmem:[%s16649_s0] sm:$0xf]  ;;  %v16721_v19 = vld [vmem:[#allocation12_spill] sm:$0xff]  ;;  %v16722_v61 = vld [vmem:[#allocation14_spill] sm:$0xff] }
 0x20a   :  { %v10290_v58 = vcombine.low %v10012_v59, %v10013_v53  ;;  %v10291_v34 = vcombine.low %v10014_v52, %v10015_v21  ;;  %v14763_v51 = vmul.f32 %v9573_v32, %v16719_v25  ;;  %v14766_v16 = vmul.f32 %v9577_v3, %v16720_v6  ;;  %5927 = vmatmul.mubr.bf16.vlgmr.msra.gmra.mrb[56].mxu0 %v14771_v44  ;;  %v13238_v32 = vld [vmem:[#allocation2 + $0x400] ss:$392 sps:$4 sm:$0xff]   ;;  %v13243_v3 = vld [vmem:[#allocation2 + $0x40c] ss:$392 sps:$4 sm:$0xff]  }
 0x20b   :  { %v10292_v10 = vcombine.low %v10016_v40, %v10017_v27  ;;  %v10293_v7 = vcombine.low %v10018_v26, %v10019_v13  ;;  %v14775_v43 = vmul.f32 %v9581_v18, %v16721_v19  ;;  %v14778_v59 = vmul.f32 %v9585_v39, %v16722_v61  ;;  %5968 = vmatmul.mubr.bf16.vlgmr.msra.gmra.mrb[56].mxu1 %v14771_v44  ;;  %v16723_v21 = vld [vmem:[#allocation15_spill] sm:$0xff]  ;;  %v13241_v26 = vld [vmem:[#allocation2 + $0x408] ss:$392 sps:$4 sm:$0xff]  }
 0x20c   :  { %v10300_v53 = vrot.slane %v10290_v58, %v14076_v4  ;;  %v10307_v52 = vrot.slane %v10291_v34, %v14076_v4  ;;  %v14784_v25 = vmul.f32 %v9589_v30, %v16723_v21  ;;  %v14787_v27 = vmul.f32 %v9593_v31, %v14468_v33  ;;  %6017 = vmatprep.subr.bf16.mxu1 %v13237_v62  ;;  %v13246_v40 = vld [vmem:[#allocation2 + $0x714] ss:$392 sps:$4 sm:$0xff]   ;;  %v13743_v18 = vpop.eup %13742  ;;  %v16724_v6 = vld [vmem:[#allocation16_spill] sm:$0xff] }
 0x20d   :  { %v10314_v39 = vrot.slane %v10292_v10, %v14076_v4  ;;  %v10321_v13 = vrot.slane %v10293_v7, %v14076_v4  ;;  %v14792_v19 = vmul.f32 %v9597_v20, %v16724_v6  ;;  %v14795_v58 = vmul.f32 %v9601_v0, %v14470_v41  ;;  %5977 = vmatpush1.bf16.msra.mxu0 %v13232_v55  ;;  %v13244_v0 = vld [vmem:[#allocation2 + $0x710] ss:$392 sps:$4 sm:$0xff]   ;;  %v13249_v55 = vld [vmem:[#allocation2 + $0x71c] ss:$392 sps:$4 sm:$0xff]  }
 0x20e   :  { %v10322_v34 = vcombine.low %v10300_v53, %v10307_v52  ;;  %v9011_v33 = vcombine.low %v14731_v54, %v14744_v12  ;;  %v9012_v30 = vcombine.low %v14737_v28, %v13743_v18  ;;  %v6928_v31 = vadd.f32 %v6927_v17, %v14727_v22  ;;  %6018 = vmatpush1.bf16.msra.mxu1 %v13235_v50  ;;  %v8745_v61 = vld [vmem:[#allocation4 + $0x21] ss:$2 sm:$0xff] }
 0x20f   :  { %v10323_v62 = vcombine.low %v10314_v39, %v10321_v13  ;;  %v7711_v10 = vrot.slane %v14740_v42, 1  ;;  %v6940_v7 = vadd.f32 %v6939_v9, %v14729_v23  ;;  %v16725_v20 = vrot.slane %v14723_v5, 2  ;;  %5978 = vmatprep.subr.bf16.mxu0 %v13240_v15  ;;  %6019 = vmatprep.subr.bf16.mxu1 %v13243_v3  ;;  %v13247_v23 = vld [vmem:[#allocation2 + $0x718] ss:$392 sps:$4 sm:$0xff]   ;;  %v13252_v9 = vld [vmem:[#allocation2 + $0xa24] ss:$392 sps:$4 sm:$0xff]  }
 0x210   :  { %v10330_v54 = vrot.slane %v10322_v34, %v14076_v4  ;;  %v14808_v28 = vrot.slane %v9011_v33, %v14076_v4  ;;  %v14811_v22 = vrot.slane %v9012_v30, %v14076_v4  ;;  %v14813_v17 = vmul.f32 0.125, %v6928_v31  ;;  %6008 = vmatprep.mubr.bf16.mxu0 %v16700_v57  ;;  %6049 = vmatprep.mubr.bf16.mxu1 %v16700_v57  ;;  %v13250_v31 = vld [vmem:[#allocation2 + $0xa20] ss:$392 sps:$4 sm:$0xff]  }
 0x211   :  { %v7722_v41 = vadd.f32 %v16725_v20, %v14723_v5  ;;  %v10337_v5 = vrot.slane %v10323_v62, %v14076_v4  ;;  %v7712_v50 = vadd.f32 %v7711_v10, %v14740_v42  ;;  %v14819_v12 = vmul.f32 0.125, %v6940_v7  ;;  %5979 = vmatpush1.bf16.msra.mxu0 %v13238_v32  ;;  %v13255_v32 = vld [vmem:[#allocation2 + $0xa2c] ss:$392 sps:$4 sm:$0xff]   ;;  %v13253_v62 = vld [vmem:[#allocation2 + $0xa28] ss:$392 sps:$4 sm:$0xff]  }
 0x212   :  { %v14825_v53 = vmul.f32 %v14813_v17, %v14813_v17  ;;  %v6933_v52 = vrot.slane %v14734_v35, 1  ;;  %v16726_v21 = vrot.slane %v14725_v60, 2  ;;  %6020 = vmatpush1.bf16.msra.mxu1 %v13241_v26  ;;  %5980 = vmatprep.subr.bf16.mxu0 %v13246_v40  ;;  %v16727_v33 = vrot.slane %v14712_v14, 4 }
 0x213   :  { %v7723_v15 = vrot.slane %v7722_v41, 1  ;;  %v10338_v42 = vcombine.low %v10330_v54, %v10337_v5  ;;  %v14831_v39 = vmul.f32 0.125, %v7712_v50  ;;  %6021 = vmatprep.subr.bf16.mxu1 %v13249_v55  ;;  %v14845_v40 = vmul.f32 %v14819_v12, %v14819_v12  ;;  %v13261_v50 = vld [vmem:[#allocation2 + $0xd3c] ss:$392 sps:$4 sm:$0xff]  }
 0x214   :  { %v7716_v18 = vadd.f32 %v16726_v21, %v14725_v60  ;;  %v6934_v6 = vadd.f32 %v6933_v52, %v14734_v35  ;;  %v14837_v30 = vadd.f32 %v16727_v33, %v14712_v14  ;;  %v13259_v21 = vld [vmem:[#allocation2 + $0xd38] ss:$392 sps:$4 sm:$0xff]  }
 0x215   :  { %v7724_v13 = vadd.f32 %v7723_v15, %v7722_v41  ;;  %v10810_v10 = vsub.f32 %v8745_v61, %v10338_v42  ;;  %v8351_v60 = vsub.f32 %v14831_v39, %v14825_v53  ;;  %5981 = vmatpush1.bf16.msra.mxu0 %v13244_v0  ;;  %v14852_v41 = vmul.f32 %v14712_v14, %v14712_v14  ;;  %v13258_v0 = vld [vmem:[#allocation2 + $0xd34] ss:$392 sps:$4 sm:$0xff]  }
 0x216   :  { %v7717_v34 = vrot.slane %v7716_v18, 1  ;;  %v14847_v35 = vmul.f32 0.125, %v6934_v6  ;;  %v6943_v20 = vrot.slane %v14837_v30, 2  ;;  %6022 = vmatpush1.bf16.msra.mxu1 %v13247_v23  ;;  %5982 = vmatprep.subr.bf16.mxu0 %v13252_v9  ;;  %v13256_v9 = vld [vmem:[#allocation2 + $0xd30] ss:$392 sps:$4 sm:$0xff]  }
 0x217   :  { %v14841_v26 = vmul.f32 0.125, %v7724_v13  ;;  %v10999_v55 = vrot.slane %v10810_v10, %v14140_v45  ;;  %v11003_v61 = vrot.slane %v10810_v10, %v14143_v46  ;;  %v11007_v54 = vrot.slane %v10810_v10, %v14146_v47  ;;  %6023 = vmatprep.subr.bf16.mxu1 %v13255_v32 }
 0x218   :  { %v7718_v7 = vadd.f32 %v7717_v34, %v7716_v18  ;;  %v11011_v5 = vrot.slane %v10810_v10, %v14149_v48  ;;  %v11015_v15 = vrot.slane %v10810_v10, %v14152_v49  ;;  %v11019_v53 = vrot.slane %v10810_v10, %v14191_v24 }
 0x219   :  { %v11023_v52 = vrot.slane %v10810_v10, %v14207_v8  ;;  %v11027_v23 = vrot.slane %v10810_v10, %v14213_v1  ;;  %v11438_v18 = vadd.f32 %v10999_v55, %v14763_v51  ;;  %v11439_v42 = vadd.f32 %v11003_v61, %v14766_v16  ;;  %5983 = vmatpush1.bf16.msra.mxu0 %v13250_v31  ;;  %v13264_v10 = vld [vmem:[#allocation2 + $0x1044] ss:$392 sps:$4 sm:$0xff]   ;;  %v13262_v16 = vld [vmem:[#allocation2 + $0x1040] ss:$392 sps:$4 sm:$0xff]  }
 0x21a   :  { %v11440_v39 = vadd.f32 %v11007_v54, %v14775_v43  ;;  %v11441_v13 = vadd.f32 %v11011_v5, %v14778_v59  ;;  %v11442_v32 = vadd.f32 %v11015_v15, %v14784_v25  ;;  %v11443_v6 = vadd.f32 %v11019_v53, %v14787_v27  ;;  %6024 = vmatpush1.bf16.msra.mxu1 %v13253_v62  ;;  %v13267_v43 = vld [vmem:[#allocation2 + $0x104c] ss:$392 sps:$4 sm:$0xff]   ;;  %v14870_v54 = vpop.f32.mrb[32].mxu0  ;;  %v14872_v27 = vpop.f32.mrb[32].mxu1  ;;  %v13273_v53 = vld [vmem:[#allocation2 + $0x135c] ss:$392 sps:$4 sm:$0xff]  }
 0x21b   :  { %v11444_v34 = vadd.f32 %v11023_v52, %v14792_v19  ;;  %v11445_v33 = vadd.f32 %v11027_v23, %v14795_v58  ;;  %v11536_v3 = vmax.f32 %v11438_v18, 0.0  ;;  %v11537_v14 = vmax.f32 %v11439_v42, 0.0  ;;  %5984 = vmatprep.subr.bf16.mxu0 %v13258_v0  ;;  %6025 = vmatprep.subr.bf16.mxu1 %v13261_v50  ;;  %v13265_v19 = vld [vmem:[#allocation2 + $0x1048] ss:$392 sps:$4 sm:$0xff]   ;;  %v14890_v0 = vpop.f32.mrb[33].mxu0 }
 0x21c   :  { %v11538_v51 = vmax.f32 %v11440_v39, 0.0  ;;  %v11539_v55 = vmax.f32 %v11441_v13, 0.0  ;;  %v11540_v59 = vmax.f32 %v11442_v32, 0.0  ;;  %v11541_v31 = vmax.f32 %v11443_v6, 0.0  ;;  %v13270_v50 = vld [vmem:[#allocation2 + $0x1354] ss:$392 sps:$4 sm:$0xff]  }
 0x21d   :  { %v11542_v61 = vmax.f32 %v11444_v34, 0.0  ;;  %v11543_v25 = vmax.f32 %v11445_v33, 0.0  ;;  %11634 = vst [vmem:[%s16652_s3 + $0x80] sm:$0xff] %v11536_v3  ;;  %11635 = vst [vmem:[%s16652_s3 + $0x88] sm:$0xff] %v11537_v14  ;;  %v8449_v58 = vmax.f32 %v8351_v60, 0.0  ;;  %v8353_v62 = vsub.f32 %v14841_v26, %v14845_v40  ;;  %5985 = vmatpush1.bf16.msra.mxu0 %v13256_v9  ;;  %v14892_v14 = vpop.f32.mrb[33].mxu1 }
 0x21e   :  { %11636 = vst [vmem:[%s16652_s3 + $0x90] sm:$0xff] %v11538_v51  ;;  %11637 = vst [vmem:[%s16652_s3 + $0x98] sm:$0xff] %v11539_v55  ;;  %v8156_v5 = vmul.f32 0.125, %v7718_v7  ;;  %v8254_v3 = vmul.f32 %v14847_v35, %v14847_v35  ;;  %v6944_v60 = vadd.f32 %v6943_v20, %v14837_v30  ;;  %v7725_v26 = vrot.slane %v14852_v41, 4  ;;  %6026 = vmatpush1.bf16.msra.mxu1 %v13259_v21  ;;  %v5440_v15 = vpop.f32.mrb[34].mxu0  ;;  %v5481_v52 = vpop.f32.mrb[34].mxu1 }
 0x21f   :  { %16728 = vst [vmem:[#allocation11_spill] sm:$0xff] %v14892_v14  ;;  %11638 = vst [vmem:[%s16652_s3 + $0xa0] sm:$0xff] %v11540_v59  ;;  %v6947_v40 = vrot.slane %v14870_v54, 4  ;;  %v7473_v7 = vmul.f32 %v14870_v54, %v14870_v54  ;;  %5986 = vmatprep.subr.bf16.mxu0 %v13264_v10  ;;  %v8547_v23 = vadd.f32 1e-05, %v8449_v58  ;;  %v8451_v9 = vmax.f32 %v8353_v62, 0.0  ;;  %6027 = vmatprep.subr.bf16.mxu1 %v13267_v43 }
 0x220   :  { %11639 = vst [vmem:[%s16652_s3 + $0xa8] sm:$0xff] %v11541_v31  ;;  %11640 = vst [vmem:[%s16652_s3 + $0xb0] sm:$0xff] %v11542_v61  ;;  %v8352_v18 = vsub.f32 %v8156_v5, %v8254_v3  ;;  %v6959_v42 = vrot.slane %v14872_v27, 4  ;;  %v5441_v39 = vpop.f32.mrb[35].mxu0  ;;  %v5482_v30 = vpop.f32.mrb[35].mxu1  ;;  %v6945_v20 = vrot.slane %v6944_v60, 1  ;;  %v7726_v21 = vadd.f32 %v7725_v26, %v14852_v41 }
 0x221   :  { %11641 = vst [vmem:[%s16652_s3 + $0xb8] sm:$0xff] %v11543_v25  ;;  %v6948_v13 = vadd.f32 %v6947_v40, %v14870_v54  ;;  %v7731_v32 = vrot.slane %v7473_v7, 4  ;;  %13744 = vrsqrt.f32 %v8547_v23  ;;  %5987 = vmatpush1.bf16.msra.mxu0 %v13262_v16  ;;  %v13268_v33 = vld [vmem:[#allocation2 + $0x1350] ss:$392 sps:$4 sm:$0xff]   ;;  %v13276_v43 = vld [vmem:[#allocation2 + $0x1664] ss:$392 sps:$4 sm:$0xff]   ;;  %v7475_v62 = vmul.f32 %v14872_v27, %v14872_v27 }
 0x222   :  { %v8450_v6 = vmax.f32 %v8352_v18, 0.0  ;;  %v6960_v34 = vadd.f32 %v6959_v42, %v14872_v27  ;;  %v13271_v10 = vld [vmem:[#allocation2 + $0x1358] ss:$392 sps:$4 sm:$0xff]   ;;  %v6946_v51 = vadd.f32 %v6945_v20, %v6944_v60  ;;  %v7727_v55 = vrot.slane %v7726_v21, 2  ;;  %6028 = vmatpush1.bf16.msra.mxu1 %v13265_v19  ;;  %5988 = vmatprep.subr.bf16.mxu0 %v13270_v50  ;;  %v13279_v61 = vld [vmem:[#allocation2 + $0x166c] ss:$392 sps:$4 sm:$0xff]  }
 0x223   :  { %v6949_v59 = vrot.slane %v6948_v13, 2  ;;  %v7732_v31 = vadd.f32 %v7731_v32, %v7473_v7  ;;  %v14915_v25 = vadd.f32 1e-05, %v8451_v9  ;;  %6029 = vmatprep.subr.bf16.mxu1 %v13273_v53  ;;  %v7743_v40 = vrot.slane %v7475_v62, 4  ;;  %v13274_v50 = vld [vmem:[#allocation2 + $0x1660] ss:$392 sps:$4 sm:$0xff]  }
 0x224   :  { %v8548_v41 = vadd.f32 1e-05, %v8450_v6  ;;  %v6961_v58 = vrot.slane %v6960_v34, 2  ;;  %v14919_v5 = vmul.f32 0.125, %v6946_v51  ;;  %v7728_v16 = vadd.f32 %v7727_v55, %v7726_v21  ;;  %v13277_v53 = vld [vmem:[#allocation2 + $0x1668] ss:$392 sps:$4 sm:$0xff]  }
 0x225   :  { %v6950_v3 = vadd.f32 %v6949_v59, %v6948_v13  ;;  %v7733_v60 = vrot.slane %v7732_v31, 2  ;;  %v6953_v19 = vrot.slane %v14890_v0, 4  ;;  %5989 = vmatpush1.bf16.msra.mxu0 %v13268_v33  ;;  %v13282_v9 = vld [vmem:[#allocation2 + $0x104] ss:$392 sps:$4 sm:$0xff]   ;;  %v7744_v42 = vadd.f32 %v7743_v40, %v7475_v62  ;;  %v13280_v55 = vld [vmem:[#allocation2 + $0x100] ss:$392 sps:$4 sm:$0xff]  }
 0x226   :  { %13746 = vrsqrt.f32 %v8548_v41  ;;  %v6962_v26 = vadd.f32 %v6961_v58, %v6960_v34  ;;  %v7729_v7 = vrot.slane %v7728_v16, 1  ;;  %v8256_v15 = vmul.f32 %v14919_v5, %v14919_v5  ;;  %6030 = vmatpush1.bf16.msra.mxu1 %v13271_v10  ;;  %5990 = vmatprep.subr.bf16.mxu0 %v13276_v43  ;;  %v13285_v20 = vld [vmem:[#allocation2 + $0x10c] ss:$392 sps:$4 sm:$0xff]   ;;  %v13291_v40 = vld [vmem:[#allocation2 + $0x41c] ss:$392 sps:$4 sm:$0xff]  }
 0x227   :  { %v6951_v52 = vrot.slane %v6950_v3, 1  ;;  %v7734_v23 = vadd.f32 %v7733_v60, %v7732_v31  ;;  %v6954_v39 = vadd.f32 %v6953_v19, %v14890_v0  ;;  %v7474_v30 = vmul.f32 %v14890_v0, %v14890_v0  ;;  %6031 = vmatprep.subr.bf16.mxu1 %v13279_v61  ;;  %v13283_v61 = vld [vmem:[#allocation2 + $0x108] ss:$392 sps:$4 sm:$0xff]   ;;  %v13288_v58 = vld [vmem:[#allocation2 + $0x414] ss:$392 sps:$4 sm:$0xff]  }
 0x228   :  { %v6963_v18 = vrot.slane %v6962_v26, 1  ;;  %v7730_v21 = vadd.f32 %v7729_v7, %v7728_v16  ;;  %v6965_v6 = vrot.slane %v14892_v14, 4  ;;  %v7745_v33 = vrot.slane %v7744_v42, 2 }
 0x229   :  { %v6952_v13 = vadd.f32 %v6951_v52, %v6950_v3  ;;  %v7735_v32 = vrot.slane %v7734_v23, 1  ;;  %v6955_v10 = vrot.slane %v6954_v39, 2  ;;  %v7737_v51 = vrot.slane %v7474_v30, 4  ;;  %5991 = vmatpush1.bf16.msra.mxu0 %v13274_v50 }
 0x22a   :  { %v6964_v34 = vadd.f32 %v6963_v18, %v6962_v26  ;;  %v8158_v59 = vmul.f32 0.125, %v7730_v21  ;;  %v6966_v41 = vadd.f32 %v6965_v6, %v14892_v14  ;;  %6032 = vmatpush1.bf16.msra.mxu1 %v13277_v53  ;;  %6058 = vmatprep.subr.bf16.mxu0 %v13282_v9  ;;  %v7746_v3 = vadd.f32 %v7745_v33, %v7744_v42  ;;  %v13286_v42 = vld [vmem:[#allocation2 + $0x410] ss:$392 sps:$4 sm:$0xff]  }
 0x22b   :  { %v14928_v31 = vmul.f32 0.125, %v6952_v13  ;;  %v7736_v43 = vadd.f32 %v7735_v32, %v7734_v23  ;;  %v14931_v62 = vpop.eup %13744  ;;  %v6956_v60 = vadd.f32 %v6955_v10, %v6954_v39  ;;  %v7738_v26 = vadd.f32 %v7737_v51, %v7474_v30  ;;  %6099 = vmatprep.subr.bf16.mxu1 %v13285_v20  ;;  %v13289_v21 = vld [vmem:[#allocation2 + $0x418] ss:$392 sps:$4 sm:$0xff]   ;;  %v13294_v13 = vld [vmem:[#allocation2 + $0x724] ss:$392 sps:$4 sm:$0xff]  }
 0x22c   :  { %v14933_v16 = vmul.f32 0.125, %v6964_v34  ;;  %v8354_v19 = vsub.f32 %v8158_v59, %v8256_v15  ;;  %v6967_v52 = vrot.slane %v6966_v41, 2  ;;  %6009 = vmatmul.mubr.bf16.vlgmr.msra.gmra.mrb[60].mxu0 %v14771_v44  ;;  %v7747_v23 = vrot.slane %v7746_v3, 1  ;;  %v13297_v10 = vld [vmem:[#allocation2 + $0x72c] ss:$392 sps:$4 sm:$0xff]  }
 0x22d   :  { %v8159_v50 = vmul.f32 0.125, %v7736_v43  ;;  %v8257_v7 = vmul.f32 %v14928_v31, %v14928_v31  ;;  %v6957_v9 = vrot.slane %v6956_v60, 1  ;;  %v7739_v18 = vrot.slane %v7738_v26, 2  ;;  %6050 = vmatmul.mubr.bf16.vlgmr.msra.gmra.mrb[60].mxu1 %v14771_v44  ;;  %6059 = vmatpush1.bf16.msra.mxu0 %v13280_v55 }
 0x22e   :  { %v8259_v53 = vmul.f32 %v14933_v16, %v14933_v16  ;;  %v8452_v39 = vmax.f32 %v8354_v19, 0.0  ;;  %v6968_v15 = vadd.f32 %v6967_v52, %v6966_v41  ;;  %v7476_v20 = vmul.f32 %v14892_v14, %v14892_v14  ;;  %6100 = vmatpush1.bf16.msra.mxu1 %v13283_v61  ;;  %6060 = vmatprep.subr.bf16.mxu0 %v13288_v58  ;;  %v13303_v52 = vld [vmem:[#allocation2 + $0xa3c] ss:$392 sps:$4 sm:$0xff]  }
 0x22f   :  { %v8355_v30 = vsub.f32 %v8159_v50, %v8257_v7  ;;  %v7748_v6 = vadd.f32 %v7747_v23, %v7746_v3  ;;  %v6958_v34 = vadd.f32 %v6957_v9, %v6956_v60  ;;  %v7740_v33 = vadd.f32 %v7739_v18, %v7738_v26  ;;  %6101 = vmatprep.subr.bf16.mxu1 %v13291_v40  ;;  %v13292_v3 = vld [vmem:[#allocation2 + $0x720] ss:$392 sps:$4 sm:$0xff]   ;;  %v13300_v40 = vld [vmem:[#allocation2 + $0xa34] ss:$392 sps:$4 sm:$0xff]  }
 0x230   :  { %v14943_v32 = vpop.eup %13746  ;;  %6090 = vmatprep.mubr.bf16.mxu0 %v16700_v57  ;;  %13748 = vrsqrt.f32 %v14915_v25  ;;  %v8550_v55 = vadd.f32 1e-05, %v8452_v39  ;;  %v6969_v59 = vrot.slane %v6968_v15, 1  ;;  %6131 = vmatprep.mubr.bf16.mxu1 %v16700_v57  ;;  %v7749_v58 = vrot.slane %v7476_v20, 4  ;;  %v13295_v25 = vld [vmem:[#allocation2 + $0x728] ss:$392 sps:$4 sm:$0xff]  }
 0x231   :  { %v9013_v51 = vcombine.low %v14931_v62, %v14943_v32  ;;  %v8161_v43 = vmul.f32 0.125, %v7748_v6  ;;  %v14950_v41 = vmul.f32 0.125, %v6958_v34  ;;  %v7741_v61 = vrot.slane %v7740_v33, 1  ;;  %6061 = vmatpush1.bf16.msra.mxu0 %v13286_v42  ;;  %v13298_v42 = vld [vmem:[#allocation2 + $0xa30] ss:$392 sps:$4 sm:$0xff]  }
 0x232   :  { %13750 = vrsqrt.f32 %v8550_v55  ;;  %v8453_v60 = vmax.f32 %v8355_v30, 0.0  ;;  %v6970_v26 = vadd.f32 %v6969_v59, %v6968_v15  ;;  %6102 = vmatpush1.bf16.msra.mxu1 %v13289_v21  ;;  %6062 = vmatprep.subr.bf16.mxu0 %v13294_v13  ;;  %v7750_v7 = vadd.f32 %v7749_v58, %v7476_v20  ;;  %v13301_v39 = vld [vmem:[#allocation2 + $0xa38] ss:$392 sps:$4 sm:$0xff]   ;;  %v13306_v30 = vld [vmem:[#allocation2 + $0xd44] ss:$392 sps:$4 sm:$0xff]  }
 0x233   :  { %v8357_v19 = vsub.f32 %v8161_v43, %v8259_v53  ;;  %v7742_v62 = vadd.f32 %v7741_v61, %v7740_v33  ;;  %v8258_v50 = vmul.f32 %v14950_v41, %v14950_v41  ;;  %6103 = vmatprep.subr.bf16.mxu1 %v13297_v10  ;;  %v13309_v32 = vld [vmem:[#allocation2 + $0xd4c] ss:$392 sps:$4 sm:$0xff]   ;;  %v13304_v33 = vld [vmem:[#allocation2 + $0xd40] ss:$392 sps:$4 sm:$0xff]  }
 0x234   :  { %v7751_v18 = vrot.slane %v7750_v7, 2  ;;  %v8551_v15 = vadd.f32 1e-05, %v8453_v60  ;;  %v14954_v13 = vmul.f32 0.125, %v6970_v26  ;;  %v13307_v55 = vld [vmem:[#allocation2 + $0xd48] ss:$392 sps:$4 sm:$0xff]   ;;  %v16729_v26 = vcombine.low %v14808_v28, %v14811_v22 }
 0x235   :  { %v8455_v23 = vmax.f32 %v8357_v19, 0.0  ;;  %v8160_v9 = vmul.f32 0.125, %v7742_v62  ;;  %6063 = vmatpush1.bf16.msra.mxu0 %v13292_v3  ;;  %v13312_v59 = vld [vmem:[#allocation2 + $0x1054] ss:$392 sps:$4 sm:$0xff]   ;;  %v13313_v28 = vld [vmem:[#allocation2 + $0x1058] ss:$392 sps:$4 sm:$0xff]  }
 0x236   :  { %6104 = vmatpush1.bf16.msra.mxu1 %v13295_v25  ;;  %6064 = vmatprep.subr.bf16.mxu0 %v13300_v40  ;;  %v7752_v53 = vadd.f32 %v7751_v18, %v7750_v7  ;;  %13752 = vrsqrt.f32 %v8551_v15  ;;  %v8260_v58 = vmul.f32 %v14954_v13, %v14954_v13  ;;  %v13315_v3 = vld [vmem:[#allocation2 + $0x105c] ss:$392 sps:$4 sm:$0xff]   ;;  %v14962_v25 = vrot.slane %v16729_v26, %v14076_v4 }
 0x237   :  { %v8356_v21 = vsub.f32 %v8160_v9, %v8258_v50  ;;  %6105 = vmatprep.subr.bf16.mxu1 %v13303_v52  ;;  %v8553_v6 = vadd.f32 1e-05, %v8455_v23  ;;  %v9035_v40 = vrot.slane %v9013_v51, %v14076_v4  ;;  %v13310_v50 = vld [vmem:[#allocation2 + $0x1050] ss:$392 sps:$4 sm:$0xff]   ;;  %v13318_v15 = vld [vmem:[#allocation2 + $0x1364] ss:$392 sps:$4 sm:$0xff]  }
 0x238   :  { %v7753_v34 = vrot.slane %v7752_v53, 1 }
 0x239   :  { %v8454_v20 = vmax.f32 %v8356_v21, 0.0  ;;  %6065 = vmatpush1.bf16.msra.mxu0 %v13298_v42  ;;  %13754 = vrsqrt.f32 %v8553_v6 }
 0x23a   :  { %v13749_v10 = vpop.eup %13748  ;;  %6106 = vmatpush1.bf16.msra.mxu1 %v13301_v39  ;;  %6066 = vmatprep.subr.bf16.mxu0 %v13306_v30  ;;  %v7754_v61 = vadd.f32 %v7753_v34, %v7752_v53  ;;  %v14965_v19 = vpop.f32.mrb[36].mxu0 }
 0x23b   :  { %v8552_v43 = vadd.f32 1e-05, %v8454_v20  ;;  %6107 = vmatprep.subr.bf16.mxu1 %v13309_v32  ;;  %16730 = vst [vmem:[#allocation13_spill] sm:$0xff] %v14965_v19  ;;  %v14967_v62 = vpop.f32.mrb[36].mxu1  ;;  %v6971_v23 = vrot.slane %v14965_v19, 4  ;;  %v14970_v9 = vpop.f32.mrb[37].mxu0  ;;  %v7477_v22 = vmul.f32 %v14965_v19, %v14965_v19 }
 0x23c   :  { %v13751_v60 = vpop.eup %13750  ;;  %16731 = vst [vmem:[#allocation12_spill] sm:$0xff] %v14967_v62  ;;  %v8162_v52 = vmul.f32 0.125, %v7754_v61  ;;  %16732 = vst [vmem:[#allocation14_spill] sm:$0xff] %v14970_v9  ;;  %v14972_v18 = vpop.f32.mrb[37].mxu1  ;;  %v6983_v51 = vrot.slane %v14967_v62, 4  ;;  %v7479_v42 = vmul.f32 %v14967_v62, %v14967_v62  ;;  %v6977_v39 = vrot.slane %v14970_v9, 4 }
 0x23d   :  { %v9014_v7 = vcombine.low %v13749_v10, %v13751_v60  ;;  %13756 = vrsqrt.f32 %v8552_v43  ;;  %6067 = vmatpush1.bf16.msra.mxu0 %v13304_v33  ;;  %v5522_v30 = vpop.f32.mrb[38].mxu0  ;;  %v5563_v21 = vpop.f32.mrb[38].mxu1  ;;  %v6972_v6 = vadd.f32 %v6971_v23, %v14965_v19  ;;  %v7478_v20 = vmul.f32 %v14970_v9, %v14970_v9  ;;  %v13321_v33 = vld [vmem:[#allocation2 + $0x136c] ss:$392 sps:$4 sm:$0xff]  }
 0x23e   :  { %6108 = vmatpush1.bf16.msra.mxu1 %v13307_v55  ;;  %6068 = vmatprep.subr.bf16.mxu0 %v13312_v59  ;;  %v8358_v32 = vsub.f32 %v8162_v52, %v8260_v58  ;;  %v5523_v34 = vpop.f32.mrb[39].mxu0  ;;  %v5564_v10 = vpop.f32.mrb[39].mxu1  ;;  %v7755_v55 = vrot.slane %v7477_v22, 4  ;;  %v6984_v43 = vadd.f32 %v6983_v51, %v14967_v62  ;;  %v7767_v61 = vrot.slane %v7479_v42, 4  ;;  %v13316_v58 = vld [vmem:[#allocation2 + $0x1360] ss:$392 sps:$4 sm:$0xff]  }
 0x23f   :  { %v9042_v53 = vrot.slane %v9014_v7, %v14076_v4  ;;  %6109 = vmatprep.subr.bf16.mxu1 %v13315_v3  ;;  %v6978_v59 = vadd.f32 %v6977_v39, %v14970_v9  ;;  %v6973_v30 = vrot.slane %v6972_v6, 2  ;;  %v7761_v7 = vrot.slane %v7478_v20, 4  ;;  %v13319_v3 = vld [vmem:[#allocation2 + $0x1368] ss:$392 sps:$4 sm:$0xff]   ;;  %v13324_v34 = vld [vmem:[#allocation2 + $0x1674] ss:$392 sps:$4 sm:$0xff]  }
 0x240   :  { %v8456_v26 = vmax.f32 %v8358_v32, 0.0  ;;  %v7756_v52 = vadd.f32 %v7755_v55, %v7477_v22  ;;  %v6985_v23 = vrot.slane %v6984_v43, 2  ;;  %v7768_v21 = vadd.f32 %v7767_v61, %v7479_v42  ;;  %v8721_v39 = vld [vmem:[#allocation4 + $0x30] ss:$2 sm:$0xff]  ;;  %v14989_v22 = vpop.eup %13752 }
 0x241   :  { %v9044_v60 = vcombine.low %v9035_v40, %v9042_v53  ;;  %6069 = vmatpush1.bf16.msra.mxu0 %v13310_v50  ;;  %v6979_v19 = vrot.slane %v6978_v59, 2  ;;  %v6974_v62 = vadd.f32 %v6973_v30, %v6972_v6  ;;  %v7762_v14 = vadd.f32 %v7761_v7, %v7478_v20  ;;  %v13327_v40 = vld [vmem:[#allocation2 + $0x167c] ss:$392 sps:$4 sm:$0xff]   ;;  %v13322_v55 = vld [vmem:[#allocation2 + $0x1670] ss:$392 sps:$4 sm:$0xff]  }
 0x242   :  { %6110 = vmatpush1.bf16.msra.mxu1 %v13313_v28  ;;  %6070 = vmatprep.subr.bf16.mxu0 %v13318_v15  ;;  %v8554_v51 = vadd.f32 1e-05, %v8456_v26  ;;  %v7757_v53 = vrot.slane %v7756_v52, 2  ;;  %v6986_v32 = vadd.f32 %v6985_v23, %v6984_v43  ;;  %v7769_v50 = vrot.slane %v7768_v21, 2  ;;  %v13330_v7 = vld [vmem:[#allocation2 + $0x114] ss:$392 sps:$4 sm:$0xff]  }
 0x243   :  { %v9058_v10 = vrot.slane %v9044_v60, %v14076_v4  ;;  %6111 = vmatprep.subr.bf16.mxu1 %v13321_v33  ;;  %v14987_v9 = vadd.f32 %v6979_v19, %v6978_v59  ;;  %v6975_v42 = vrot.slane %v6974_v62, 1  ;;  %v7763_v15 = vrot.slane %v7762_v14, 2  ;;  %v14992_v61 = vpop.eup %13754  ;;  %v13325_v19 = vld [vmem:[#allocation2 + $0x1678] ss:$392 sps:$4 sm:$0xff]  }
 0x244   :  { %13758 = vrsqrt.f32 %v8554_v51  ;;  %v14994_v6 = vadd.f32 %v7757_v53, %v7756_v52  ;;  %v6987_v20 = vrot.slane %v6986_v32, 1  ;;  %v14996_v33 = vadd.f32 %v7769_v50, %v7768_v21  ;;  %v13333_v53 = vld [vmem:[#allocation2 + $0x11c] ss:$392 sps:$4 sm:$0xff]  }
 0x245   :  { %v9059_v28 = vcombine.low %v14962_v25, %v9058_v10  ;;  %6071 = vmatpush1.bf16.msra.mxu0 %v13316_v58  ;;  %v6981_v43 = vrot.slane %v14987_v9, 1  ;;  %v6976_v25 = vadd.f32 %v6975_v42, %v6974_v62  ;;  %v14999_v26 = vadd.f32 %v7763_v15, %v7762_v14  ;;  %v13328_v42 = vld [vmem:[#allocation2 + $0x110] ss:$392 sps:$4 sm:$0xff]  }
 0x246   :  { %6112 = vmatpush1.bf16.msra.mxu1 %v13319_v3  ;;  %6072 = vmatprep.subr.bf16.mxu0 %v13324_v34  ;;  %v6989_v30 = vrot.slane %v14972_v18, 4  ;;  %v7759_v52 = vrot.slane %v14994_v6, 1  ;;  %v6988_v23 = vadd.f32 %v6987_v20, %v6986_v32  ;;  %v7771_v21 = vrot.slane %v14996_v33, 1 }
 0x247   :  { %v13757_v59 = vpop.eup %13756  ;;  %v9483_v60 = vmul.f32 %v9059_v28, %v8721_v39  ;;  %6113 = vmatprep.subr.bf16.mxu1 %v13327_v40 }
 0x248   :  { %v9060_v58 = vcombine.low %v14989_v22, %v13757_v59 }
 0x249   :  { %v9605_v3 = vrot.slane %v9483_v60, %v14140_v45  ;;  %v9609_v34 = vrot.slane %v9483_v60, %v14143_v46  ;;  %v9613_v10 = vrot.slane %v9483_v60, %v14146_v47  ;;  %v9617_v14 = vrot.slane %v9483_v60, %v14149_v48  ;;  %6073 = vmatpush1.bf16.msra.mxu0 %v13322_v55 }
 0x24a   :  { %v9621_v62 = vrot.slane %v9483_v60, %v14152_v49  ;;  %v9625_v51 = vrot.slane %v9483_v60, %v14191_v24  ;;  %v9629_v40 = vrot.slane %v9483_v60, %v14207_v8  ;;  %v9633_v39 = vrot.slane %v9483_v60, %v14213_v1  ;;  %6114 = vmatpush1.bf16.msra.mxu1 %v13325_v19  ;;  %v13331_v19 = vld [vmem:[#allocation2 + $0x118] ss:$392 sps:$4 sm:$0xff]  }
 0x24b   :  { %v10020_v32 = vmul.f32 %v9605_v3, %v14667_v37  ;;  %v10021_v50 = vmul.f32 %v9609_v34, %v14686_v2  ;;  %v10022_v22 = vmul.f32 %v9613_v10, %v14675_v38  ;;  %v10023_v28 = vmul.f32 %v9617_v14, %v14691_v29  ;;  %6140 = vmatprep.subr.bf16.mxu0 %v13330_v7  ;;  %v13336_v29 = vld [vmem:[#allocation2 + $0x424] ss:$392 sps:$4 sm:$0xff]  }
 0x24c   :  { %v10024_v15 = vmul.f32 %v9621_v62, %v14813_v17  ;;  %v10025_v55 = vmul.f32 %v9625_v51, %v14847_v35  ;;  %v10026_v20 = vmul.f32 %v9629_v40, %v14819_v12  ;;  %v10027_v59 = vmul.f32 %v9633_v39, %v14919_v5  ;;  %6091 = vmatmul.mubr.bf16.vlgmr.msra.gmra.mrb[64].mxu0 %v14771_v44  ;;  %v13339_v17 = vld [vmem:[#allocation2 + $0x42c] ss:$392 sps:$4 sm:$0xff]  }
 0x24d   :  { %v10339_v37 = vcombine.low %v10020_v32, %v10021_v50  ;;  %v10340_v60 = vcombine.low %v10022_v22, %v10023_v28  ;;  %v15023_v2 = vmul.f32 %v9605_v3, %v14639_v56  ;;  %v15026_v38 = vmul.f32 %v9609_v34, %v14644_v36  ;;  %6132 = vmatmul.mubr.bf16.vlgmr.msra.gmra.mrb[64].mxu1 %v14771_v44  ;;  %v16733_v36 = vld [vmem:[#allocation9_spill] sm:$0xff]  ;;  %v16734_v44 = vld [vmem:[#allocation10_spill] sm:$0xff]  ;;  %v13334_v22 = vld [vmem:[#allocation2 + $0x420] ss:$392 sps:$4 sm:$0xff]  }
 0x24e   :  { %v10341_v35 = vcombine.low %v10024_v15, %v10025_v55  ;;  %v10342_v7 = vcombine.low %v10026_v20, %v10027_v59  ;;  %v15030_v12 = vmul.f32 %v9613_v10, %v14641_v63  ;;  %v15033_v5 = vmul.f32 %v9617_v14, %v14646_v11  ;;  %6181 = vmatprep.subr.bf16.mxu1 %v13333_v53  ;;  %v13759_v32 = vpop.eup %13758  ;;  %v16735_v11 = vld [vmem:[#allocation8_spill] sm:$0xff]  ;;  %v16736_v53 = vld [vmem:[#allocation17_spill] sm:$0xff]  ;;  %v13342_v55 = vld [vmem:[#allocation2 + $0x734] ss:$392 sps:$4 sm:$0xff]  }
 0x24f   :  { %v10349_v56 = vrot.slane %v10339_v37, %v14076_v4  ;;  %v10356_v3 = vrot.slane %v10340_v60, %v14076_v4  ;;  %v15038_v34 = vmul.f32 %v9621_v62, %v16733_v36  ;;  %v15041_v50 = vmul.f32 %v9625_v51, %v16734_v44  ;;  %6141 = vmatpush1.bf16.msra.mxu0 %v13328_v42  ;;  %v13337_v15 = vld [vmem:[#allocation2 + $0x428] ss:$392 sps:$4 sm:$0xff]   ;;  %v13345_v59 = vld [vmem:[#allocation2 + $0x73c] ss:$392 sps:$4 sm:$0xff]  }
 0x250   :  { %v10363_v63 = vrot.slane %v10341_v35, %v14076_v4  ;;  %v10370_v10 = vrot.slane %v10342_v7, %v14076_v4  ;;  %v15046_v14 = vmul.f32 %v9629_v40, %v16735_v11  ;;  %v15049_v28 = vmul.f32 %v9633_v39, %v16736_v53  ;;  %6182 = vmatpush1.bf16.msra.mxu1 %v13331_v19  ;;  %v8747_v35 = vld [vmem:[#allocation4 + $0x31] ss:$2 sm:$0xff]  ;;  %v13346_v11 = vld [vmem:[#allocation2 + $0xa40] ss:$392 sps:$4 sm:$0xff]  }
 0x251   :  { %v10371_v62 = vcombine.low %v10349_v56, %v10356_v3  ;;  %v15052_v20 = vrot.slane %v9060_v58, %v14076_v4  ;;  %v9061_v51 = vcombine.low %v14992_v61, %v13759_v32  ;;  %v15055_v42 = vmul.f32 0.125, %v6976_v25  ;;  %6142 = vmatprep.subr.bf16.mxu0 %v13336_v29  ;;  %6183 = vmatprep.subr.bf16.mxu1 %v13339_v17  ;;  %v13343_v29 = vld [vmem:[#allocation2 + $0x738] ss:$392 sps:$4 sm:$0xff]   ;;  %v13348_v17 = vld [vmem:[#allocation2 + $0xa44] ss:$392 sps:$4 sm:$0xff]  }
 0x252   :  { %v10372_v37 = vcombine.low %v10363_v63, %v10370_v10  ;;  %v7760_v40 = vadd.f32 %v7759_v52, %v14994_v6  ;;  %v15058_v60 = vmul.f32 0.125, %v6988_v23  ;;  %v7772_v39 = vadd.f32 %v7771_v21, %v14996_v33  ;;  %6172 = vmatprep.mubr.bf16.mxu0 %v16700_v57  ;;  %6213 = vmatprep.mubr.bf16.mxu1 %v16700_v57  ;;  %v13340_v52 = vld [vmem:[#allocation2 + $0x730] ss:$392 sps:$4 sm:$0xff]   ;;  %v13351_v56 = vld [vmem:[#allocation2 + $0xa4c] ss:$392 sps:$4 sm:$0xff]  }
 0x253   :  { %v10379_v58 = vrot.slane %v10371_v62, %v14076_v4  ;;  %v15065_v61 = vrot.slane %v9061_v51, %v14076_v4  ;;  %v8261_v25 = vmul.f32 %v15055_v42, %v15055_v42  ;;  %v6982_v6 = vadd.f32 %v6981_v43, %v14987_v9  ;;  %6143 = vmatpush1.bf16.msra.mxu0 %v13334_v22 }
 0x254   :  { %v10386_v33 = vrot.slane %v10372_v37, %v14076_v4  ;;  %v8163_v23 = vmul.f32 0.125, %v7760_v40  ;;  %v8165_v21 = vmul.f32 0.125, %v7772_v39  ;;  %v8263_v19 = vmul.f32 %v15058_v60, %v15058_v60  ;;  %6184 = vmatpush1.bf16.msra.mxu1 %v13337_v15  ;;  %6144 = vmatprep.subr.bf16.mxu0 %v13342_v55 }
 0x255   :  { %v9092_v7 = vcombine.low %v15052_v20, %v15065_v61  ;;  %v15077_v32 = vmul.f32 0.125, %v6982_v6  ;;  %v7765_v9 = vrot.slane %v14999_v26, 1  ;;  %v6990_v43 = vadd.f32 %v6989_v30, %v14972_v18  ;;  %6185 = vmatprep.subr.bf16.mxu1 %v13345_v59  ;;  %v13349_v30 = vld [vmem:[#allocation2 + $0xa48] ss:$392 sps:$4 sm:$0xff]   ;;  %v13357_v6 = vld [vmem:[#allocation2 + $0xd5c] ss:$392 sps:$4 sm:$0xff]  }
 0x256   :  { %v10387_v3 = vcombine.low %v10379_v58, %v10386_v33  ;;  %v8359_v36 = vsub.f32 %v8163_v23, %v8261_v25  ;;  %v8361_v44 = vsub.f32 %v8165_v21, %v8263_v19  ;;  %v15085_v22 = vmul.f32 %v14972_v18, %v14972_v18  ;;  %v13352_v19 = vld [vmem:[#allocation2 + $0xd50] ss:$392 sps:$4 sm:$0xff]  }
 0x257   :  { %v7766_v63 = vadd.f32 %v7765_v9, %v14999_v26  ;;  %v6991_v10 = vrot.slane %v6990_v43, 2  ;;  %6145 = vmatpush1.bf16.msra.mxu0 %v13340_v52  ;;  %v15090_v55 = vmul.f32 %v15077_v32, %v15077_v32  ;;  %v13354_v26 = vld [vmem:[#allocation2 + $0xd54] ss:$392 sps:$4 sm:$0xff]  }
 0x258   :  { %v10811_v53 = vsub.f32 %v8747_v35, %v10387_v3  ;;  %v8457_v15 = vmax.f32 %v8359_v36, 0.0  ;;  %6186 = vmatpush1.bf16.msra.mxu1 %v13343_v29  ;;  %6146 = vmatprep.subr.bf16.mxu0 %v13348_v17  ;;  %v8459_v62 = vmax.f32 %v8361_v44, 0.0  ;;  %v7773_v37 = vrot.slane %v15085_v22, 4  ;;  %v13360_v3 = vld [vmem:[#allocation2 + $0x1064] ss:$392 sps:$4 sm:$0xff]  }
 0x259   :  { %v15092_v51 = vmul.f32 0.125, %v7766_v63  ;;  %v15094_v59 = vadd.f32 %v6991_v10, %v6990_v43  ;;  %6187 = vmatprep.subr.bf16.mxu1 %v13351_v56  ;;  %v13355_v43 = vld [vmem:[#allocation2 + $0xd58] ss:$392 sps:$4 sm:$0xff]  }
 0x25a   :  { %v11031_v40 = vrot.slane %v10811_v53, %v14140_v45  ;;  %v11035_v39 = vrot.slane %v10811_v53, %v14143_v46  ;;  %v11039_v58 = vrot.slane %v10811_v53, %v14146_v47  ;;  %v11043_v25 = vrot.slane %v10811_v53, %v14149_v48 }
 0x25b   :  { %v11047_v52 = vrot.slane %v10811_v53, %v14152_v49  ;;  %v11051_v33 = vrot.slane %v10811_v53, %v14191_v24  ;;  %v11055_v23 = vrot.slane %v10811_v53, %v14207_v8  ;;  %v11059_v21 = vrot.slane %v10811_v53, %v14213_v1  ;;  %6147 = vmatpush1.bf16.msra.mxu0 %v13346_v11  ;;  %v15109_v56 = vpop.f32.mrb[40].mxu0 }
 0x25c   :  { %v11446_v29 = vadd.f32 %v11031_v40, %v15023_v2  ;;  %v11447_v17 = vadd.f32 %v11035_v39, %v15026_v38  ;;  %v11448_v35 = vadd.f32 %v11039_v58, %v15030_v12  ;;  %v11449_v9 = vadd.f32 %v11043_v25, %v15033_v5  ;;  %6188 = vmatpush1.bf16.msra.mxu1 %v13349_v30  ;;  %v15115_v2 = vpop.f32.mrb[40].mxu1  ;;  %v15117_v38 = vpop.f32.mrb[41].mxu0  ;;  %v13358_v12 = vld [vmem:[#allocation2 + $0x1060] ss:$392 sps:$4 sm:$0xff]   ;;  %v13363_v5 = vld [vmem:[#allocation2 + $0x106c] ss:$392 sps:$4 sm:$0xff]  }
 0x25d   :  { %v11450_v36 = vadd.f32 %v11047_v52, %v15038_v34  ;;  %v11451_v44 = vadd.f32 %v11051_v33, %v15041_v50  ;;  %v11452_v63 = vadd.f32 %v11055_v23, %v15046_v14  ;;  %v11453_v10 = vadd.f32 %v11059_v21, %v15049_v28  ;;  %6148 = vmatprep.subr.bf16.mxu0 %v13354_v26  ;;  %v15119_v39 = vpop.f32.mrb[41].mxu1  ;;  %v13361_v34 = vld [vmem:[#allocation2 + $0x1068] ss:$392 sps:$4 sm:$0xff]   ;;  %v5604_v50 = vpop.f32.mrb[42].mxu0  ;;  %v13366_v58 = vld [vmem:[#allocation2 + $0x1374] ss:$392 sps:$4 sm:$0xff]  }
 0x25e   :  { %16737 = vst [vmem:[#allocation15_spill] sm:$0xff] %v15115_v2  ;;  %v11544_v11 = vmax.f32 %v11446_v29, 0.0  ;;  %v11545_v53 = vmax.f32 %v11447_v17, 0.0  ;;  %v11546_v30 = vmax.f32 %v11448_v35, 0.0  ;;  %v11547_v40 = vmax.f32 %v11449_v9, 0.0  ;;  %6189 = vmatprep.subr.bf16.mxu1 %v13357_v6  ;;  %16738 = vst [vmem:[#allocation16_spill] sm:$0xff] %v15119_v39 }
 0x25f   :  { %v11548_v14 = vmax.f32 %v11450_v36, 0.0  ;;  %v11549_v25 = vmax.f32 %v11451_v44, 0.0  ;;  %v11550_v28 = vmax.f32 %v11452_v63, 0.0  ;;  %v11551_v26 = vmax.f32 %v11453_v10, 0.0  ;;  %6149 = vmatpush1.bf16.msra.mxu0 %v13352_v19  ;;  %v5605_v52 = vpop.f32.mrb[43].mxu0  ;;  %v5645_v33 = vpop.f32.mrb[42].mxu1 }
 0x260   :  { %11642 = vst [vmem:[%s16652_s3 + $0xc0] sm:$0xff] %v11544_v11  ;;  %11643 = vst [vmem:[%s16652_s3 + $0xc8] sm:$0xff] %v11545_v53  ;;  %v8555_v6 = vadd.f32 1e-05, %v8457_v15  ;;  %v8557_v23 = vadd.f32 1e-05, %v8459_v62  ;;  %v8360_v21 = vsub.f32 %v15092_v51, %v15090_v55  ;;  %6190 = vmatpush1.bf16.msra.mxu1 %v13355_v43  ;;  %6150 = vmatprep.subr.bf16.mxu0 %v13360_v3 }
 0x261   :  { %11644 = vst [vmem:[%s16652_s3 + $0xd0] sm:$0xff] %v11546_v30  ;;  %11645 = vst [vmem:[%s16652_s3 + $0xd8] sm:$0xff] %v11547_v40  ;;  %v6993_v19 = vrot.slane %v15094_v59, 1  ;;  %v5646_v29 = vpop.f32.mrb[43].mxu1  ;;  %v7774_v15 = vadd.f32 %v7773_v37, %v15085_v22  ;;  %v6995_v55 = vrot.slane %v15109_v56, 4  ;;  %v7481_v62 = vmul.f32 %v15109_v56, %v15109_v56  ;;  %6191 = vmatprep.subr.bf16.mxu1 %v13363_v5 }
 0x262   :  { %11646 = vst [vmem:[%s16652_s3 + $0xe0] sm:$0xff] %v11548_v14  ;;  %11647 = vst [vmem:[%s16652_s3 + $0xe8] sm:$0xff] %v11549_v25  ;;  %v7007_v51 = vrot.slane %v15115_v2, 4  ;;  %v13369_v17 = vld [vmem:[#allocation2 + $0x137c] ss:$392 sps:$4 sm:$0xff]   ;;  %13760 = vrsqrt.f32 %v8555_v6  ;;  %v8458_v35 = vmax.f32 %v8360_v21, 0.0  ;;  %v7483_v43 = vmul.f32 %v15115_v2, %v15115_v2 }
 0x263   :  { %11648 = vst [vmem:[%s16652_s3 + $0xf0] sm:$0xff] %v11550_v28  ;;  %11649 = vst [vmem:[%s16652_s3 + $0xf8] sm:$0xff] %v11551_v26  ;;  %v6994_v9 = vadd.f32 %v6993_v19, %v15094_v59  ;;  %13762 = vrsqrt.f32 %v8557_v23  ;;  %v7775_v3 = vrot.slane %v7774_v15, 2  ;;  %v6996_v22 = vadd.f32 %v6995_v55, %v15109_v56  ;;  %6151 = vmatpush1.bf16.msra.mxu0 %v13358_v12  ;;  %v13364_v36 = vld [vmem:[#allocation2 + $0x1370] ss:$392 sps:$4 sm:$0xff]  }
 0x264   :  { %v7779_v37 = vrot.slane %v7481_v62, 4  ;;  %v13367_v44 = vld [vmem:[#allocation2 + $0x1378] ss:$392 sps:$4 sm:$0xff]   ;;  %v8556_v63 = vadd.f32 1e-05, %v8458_v35  ;;  %v7008_v5 = vadd.f32 %v7007_v51, %v15115_v2  ;;  %v7791_v11 = vrot.slane %v7483_v43, 4  ;;  %6192 = vmatpush1.bf16.msra.mxu1 %v13361_v34  ;;  %6152 = vmatprep.subr.bf16.mxu0 %v13366_v58 }
 0x265   :  { %v15157_v10 = vmul.f32 0.125, %v6994_v9  ;;  %v13372_v59 = vld [vmem:[#allocation2 + $0x1684] ss:$392 sps:$4 sm:$0xff]   ;;  %v7776_v53 = vadd.f32 %v7775_v3, %v7774_v15  ;;  %v6997_v30 = vrot.slane %v6996_v22, 2  ;;  %v7001_v50 = vrot.slane %v15117_v38, 4  ;;  %6193 = vmatprep.subr.bf16.mxu1 %v13369_v17 }
 0x266   :  { %v7780_v40 = vadd.f32 %v7779_v37, %v7481_v62  ;;  %v13375_v14 = vld [vmem:[#allocation2 + $0x168c] ss:$392 sps:$4 sm:$0xff]   ;;  %13764 = vrsqrt.f32 %v8556_v63  ;;  %v7009_v25 = vrot.slane %v7008_v5, 2  ;;  %v7792_v28 = vadd.f32 %v7791_v11, %v7483_v43  ;;  %v13370_v58 = vld [vmem:[#allocation2 + $0x1680] ss:$392 sps:$4 sm:$0xff]  }
 0x267   :  { %v8264_v12 = vmul.f32 %v15157_v10, %v15157_v10  ;;  %v7777_v26 = vrot.slane %v7776_v53, 1  ;;  %v6998_v52 = vadd.f32 %v6997_v30, %v6996_v22  ;;  %v7002_v34 = vadd.f32 %v7001_v50, %v15117_v38  ;;  %6153 = vmatpush1.bf16.msra.mxu0 %v13364_v36  ;;  %v13373_v29 = vld [vmem:[#allocation2 + $0x1688] ss:$392 sps:$4 sm:$0xff]   ;;  %v13378_v15 = vld [vmem:[#allocation2 + $0x124] ss:$392 sps:$4 sm:$0xff]  }
 0x268   :  { %v7781_v33 = vrot.slane %v7780_v40, 2  ;;  %v7010_v6 = vadd.f32 %v7009_v25, %v7008_v5  ;;  %v7793_v23 = vrot.slane %v7792_v28, 2  ;;  %v7482_v21 = vmul.f32 %v15117_v38, %v15117_v38  ;;  %6194 = vmatpush1.bf16.msra.mxu1 %v13367_v44  ;;  %6154 = vmatprep.subr.bf16.mxu0 %v13372_v59  ;;  %v13381_v35 = vld [vmem:[#allocation2 + $0x12c] ss:$392 sps:$4 sm:$0xff]   ;;  %v13376_v44 = vld [vmem:[#allocation2 + $0x120] ss:$392 sps:$4 sm:$0xff]  }
 0x269   :  { %v7013_v19 = vrot.slane %v15119_v39, 4  ;;  %v7778_v55 = vadd.f32 %v7777_v26, %v7776_v53  ;;  %v6999_v62 = vrot.slane %v6998_v52, 1  ;;  %v7003_v17 = vrot.slane %v7002_v34, 2  ;;  %6195 = vmatprep.subr.bf16.mxu1 %v13375_v14  ;;  %v13379_v50 = vld [vmem:[#allocation2 + $0x128] ss:$392 sps:$4 sm:$0xff]  }
 0x26a   :  { %v7782_v51 = vadd.f32 %v7781_v33, %v7780_v40  ;;  %v7011_v9 = vrot.slane %v7010_v6, 1  ;;  %v7794_v43 = vadd.f32 %v7793_v23, %v7792_v28  ;;  %v7785_v3 = vrot.slane %v7482_v21, 4  ;;  %v13384_v14 = vld [vmem:[#allocation2 + $0x434] ss:$392 sps:$4 sm:$0xff]  }
 0x26b   :  { %v7014_v22 = vadd.f32 %v7013_v19, %v15119_v39  ;;  %v8166_v37 = vmul.f32 0.125, %v7778_v55  ;;  %v7000_v36 = vadd.f32 %v6999_v62, %v6998_v52  ;;  %v7004_v5 = vadd.f32 %v7003_v17, %v7002_v34  ;;  %6155 = vmatpush1.bf16.msra.mxu0 %v13370_v58  ;;  %v13387_v34 = vld [vmem:[#allocation2 + $0x43c] ss:$392 sps:$4 sm:$0xff]   ;;  %v13382_v62 = vld [vmem:[#allocation2 + $0x430] ss:$392 sps:$4 sm:$0xff]  }
 0x26c   :  { %v7783_v63 = vrot.slane %v7782_v51, 1  ;;  %v15168_v11 = vpop.eup %13760  ;;  %v7012_v59 = vadd.f32 %v7011_v9, %v7010_v6  ;;  %v7795_v53 = vrot.slane %v7794_v43, 1  ;;  %v7786_v30 = vadd.f32 %v7785_v3, %v7482_v21  ;;  %6196 = vmatpush1.bf16.msra.mxu1 %v13373_v29  ;;  %6222 = vmatprep.subr.bf16.mxu0 %v13378_v15  ;;  %v15179_v21 = vld [vmem:[%s16649_s0] sm:$0xf] }
 0x26d   :  { %v7015_v40 = vrot.slane %v7014_v22, 2  ;;  %v15170_v25 = vpop.eup %13762  ;;  %v8362_v28 = vsub.f32 %v8166_v37, %v8264_v12  ;;  %v15172_v26 = vmul.f32 0.125, %v7000_v36  ;;  %v7005_v33 = vrot.slane %v7004_v5, 1  ;;  %6263 = vmatprep.subr.bf16.mxu1 %v13381_v35  ;;  %v13385_v3 = vld [vmem:[#allocation2 + $0x438] ss:$392 sps:$4 sm:$0xff]  }
 0x26e   :  { %v7784_v52 = vadd.f32 %v7783_v63, %v7782_v51  ;;  %v15174_v58 = vmul.f32 0.125, %v7012_v59  ;;  %v7796_v23 = vadd.f32 %v7795_v53, %v7794_v43  ;;  %v7787_v6 = vrot.slane %v7786_v30, 2  ;;  %6173 = vmatmul.mubr.bf16.vlgmr.msra.gmra.mrb[68].mxu0 %v15179_v21 }
 0x26f   :  { %v7016_v19 = vadd.f32 %v7015_v40, %v7014_v22  ;;  %v8460_v29 = vmax.f32 %v8362_v28, 0.0  ;;  %v8265_v15 = vmul.f32 %v15172_v26, %v15172_v26  ;;  %v7006_v55 = vadd.f32 %v7005_v33, %v7004_v5  ;;  %6214 = vmatmul.mubr.bf16.vlgmr.msra.gmra.mrb[68].mxu1 %v15179_v21  ;;  %6223 = vmatpush1.bf16.msra.mxu0 %v13376_v44  ;;  %v13390_v22 = vld [vmem:[#allocation2 + $0x744] ss:$392 sps:$4 sm:$0xff]   ;;  %v13388_v40 = vld [vmem:[#allocation2 + $0x740] ss:$392 sps:$4 sm:$0xff]  }
 0x270   :  { %v8167_v12 = vmul.f32 0.125, %v7784_v52  ;;  %v13765_v51 = vpop.eup %13764  ;;  %v8169_v17 = vmul.f32 0.125, %v7796_v23  ;;  %v8267_v35 = vmul.f32 %v15174_v58, %v15174_v58  ;;  %v7788_v9 = vadd.f32 %v7787_v6, %v7786_v30  ;;  %6264 = vmatpush1.bf16.msra.mxu1 %v13379_v50  ;;  %6224 = vmatprep.subr.bf16.mxu0 %v13384_v14  ;;  %v13393_v44 = vld [vmem:[#allocation2 + $0x74c] ss:$392 sps:$4 sm:$0xff]   ;;  %v13391_v52 = vld [vmem:[#allocation2 + $0x748] ss:$392 sps:$4 sm:$0xff]  }
 0x271   :  { %v7017_v43 = vrot.slane %v7016_v19, 1  ;;  %v9062_v37 = vcombine.low %v15168_v11, %v13765_v51  ;;  %v8558_v36 = vadd.f32 1e-05, %v8460_v29  ;;  %v15188_v5 = vmul.f32 0.125, %v7006_v55  ;;  %6265 = vmatprep.subr.bf16.mxu1 %v13387_v34  ;;  %6254 = vmatprep.mubr.bf16.mxu0 %v16700_v57  ;;  %v13396_v33 = vld [vmem:[#allocation2 + $0xa54] ss:$392 sps:$4 sm:$0xff]  }
 0x272   :  { %v8363_v63 = vsub.f32 %v8167_v12, %v8265_v15  ;;  %v8365_v59 = vsub.f32 %v8169_v17, %v8267_v35  ;;  %v7789_v53 = vrot.slane %v7788_v9, 1  ;;  %v7484_v30 = vmul.f32 %v15119_v39, %v15119_v39  ;;  %6295 = vmatprep.mubr.bf16.mxu1 %v16700_v57  ;;  %v13399_v6 = vld [vmem:[#allocation2 + $0xa5c] ss:$392 sps:$4 sm:$0xff]   ;;  %v13394_v15 = vld [vmem:[#allocation2 + $0xa50] ss:$392 sps:$4 sm:$0xff]  }
 0x273   :  { %13766 = vrsqrt.f32 %v8558_v36  ;;  %6225 = vmatpush1.bf16.msra.mxu0 %v13382_v62  ;;  %v8266_v14 = vmul.f32 %v15188_v5, %v15188_v5  ;;  %v7018_v23 = vadd.f32 %v7017_v43, %v7016_v19  ;;  %v13397_v55 = vld [vmem:[#allocation2 + $0xa58] ss:$392 sps:$4 sm:$0xff]   ;;  %v13402_v35 = vld [vmem:[#allocation2 + $0xd64] ss:$392 sps:$4 sm:$0xff]   ;;  %v15202_v43 = vrot.slane %v9092_v7, %v14076_v4 }
 0x274   :  { %v8461_v50 = vmax.f32 %v8363_v63, 0.0  ;;  %v7790_v11 = vadd.f32 %v7789_v53, %v7788_v9  ;;  %v7797_v28 = vrot.slane %v7484_v30, 4  ;;  %6266 = vmatpush1.bf16.msra.mxu1 %v13385_v3  ;;  %6226 = vmatprep.subr.bf16.mxu0 %v13390_v22  ;;  %v8463_v34 = vmax.f32 %v8365_v59, 0.0  ;;  %v13405_v22 = vld [vmem:[#allocation2 + $0xd6c] ss:$392 sps:$4 sm:$0xff]  }
 0x275   :  { %6267 = vmatprep.subr.bf16.mxu1 %v13393_v44  ;;  %v15196_v3 = vmul.f32 0.125, %v7018_v23  ;;  %v13400_v63 = vld [vmem:[#allocation2 + $0xd60] ss:$392 sps:$4 sm:$0xff]   ;;  %v9084_v59 = vrot.slane %v9062_v37, %v14076_v4 }
 0x276   :  { %v8168_v29 = vmul.f32 0.125, %v7790_v11  ;;  %v7798_v12 = vadd.f32 %v7797_v28, %v7484_v30  ;;  %v8559_v62 = vadd.f32 1e-05, %v8461_v50  ;;  %v8561_v9 = vadd.f32 1e-05, %v8463_v34 }
 0x277   :  { %6227 = vmatpush1.bf16.msra.mxu0 %v13388_v40  ;;  %v13403_v44 = vld [vmem:[#allocation2 + $0xd68] ss:$392 sps:$4 sm:$0xff]   ;;  %v13408_v50 = vld [vmem:[#allocation2 + $0x1074] ss:$392 sps:$4 sm:$0xff]   ;;  %v8268_v20 = vmul.f32 %v15196_v3, %v15196_v3 }
 0x278   :  { %v8364_v51 = vsub.f32 %v8168_v29, %v8266_v14  ;;  %v7799_v17 = vrot.slane %v7798_v12, 2  ;;  %6268 = vmatpush1.bf16.msra.mxu1 %v13391_v52  ;;  %6228 = vmatprep.subr.bf16.mxu0 %v13396_v33  ;;  %13768 = vrsqrt.f32 %v8559_v62  ;;  %v13411_v28 = vld [vmem:[#allocation2 + $0x107c] ss:$392 sps:$4 sm:$0xff]   ;;  %v13406_v62 = vld [vmem:[#allocation2 + $0x1070] ss:$392 sps:$4 sm:$0xff]  }
 0x279   :  { %6269 = vmatprep.subr.bf16.mxu1 %v13399_v6  ;;  %13770 = vrsqrt.f32 %v8561_v9 }
 0x27a   :  { %v8462_v36 = vmax.f32 %v8364_v51, 0.0  ;;  %v7800_v19 = vadd.f32 %v7799_v17, %v7798_v12 }
 0x27b   :  { %6229 = vmatpush1.bf16.msra.mxu0 %v13394_v15 }
 0x27c   :  { %v8560_v53 = vadd.f32 1e-05, %v8462_v36  ;;  %v7801_v30 = vrot.slane %v7800_v19, 1  ;;  %6270 = vmatpush1.bf16.msra.mxu1 %v13397_v55  ;;  %6230 = vmatprep.subr.bf16.mxu0 %v13402_v35  ;;  %v15205_v40 = vpop.f32.mrb[44].mxu0  ;;  %v15212_v37 = vpop.f32.mrb[44].mxu1 }
 0x27d   :  { %16739 = vst [vmem:[#allocation9_spill] sm:$0xff] %v15205_v40  ;;  %v13767_v11 = vpop.eup %13766  ;;  %6271 = vmatprep.subr.bf16.mxu1 %v13405_v22  ;;  %v7019_v61 = vrot.slane %v15205_v40, 4  ;;  %v7485_v7 = vmul.f32 %v15205_v40, %v15205_v40  ;;  %16740 = vst [vmem:[#allocation10_spill] sm:$0xff] %v15212_v37  ;;  %v15214_v14 = vpop.f32.mrb[45].mxu0  ;;  %v7031_v34 = vrot.slane %v15212_v37, 4  ;;  %v7487_v15 = vmul.f32 %v15212_v37, %v15212_v37 }
 0x27e   :  { %v9063_v52 = vcombine.low %v15170_v25, %v13767_v11  ;;  %13772 = vrsqrt.f32 %v8560_v53  ;;  %v7802_v33 = vadd.f32 %v7801_v30, %v7800_v19  ;;  %v15218_v23 = vpop.f32.mrb[45].mxu1  ;;  %v5686_v6 = vpop.f32.mrb[46].mxu0  ;;  %v7025_v55 = vrot.slane %v15214_v14, 4  ;;  %v13409_v36 = vld [vmem:[#allocation2 + $0x1078] ss:$392 sps:$4 sm:$0xff]  }
 0x27f   :  { %6231 = vmatpush1.bf16.msra.mxu0 %v13400_v63  ;;  %v7020_v29 = vadd.f32 %v7019_v61, %v15205_v40  ;;  %v7803_v12 = vrot.slane %v7485_v7, 4  ;;  %v5687_v51 = vpop.f32.mrb[47].mxu0  ;;  %v5727_v17 = vpop.f32.mrb[46].mxu1  ;;  %v7032_v9 = vadd.f32 %v7031_v34, %v15212_v37  ;;  %v7486_v22 = vmul.f32 %v15214_v14, %v15214_v14  ;;  %v13414_v19 = vld [vmem:[#allocation2 + $0x1384] ss:$392 sps:$4 sm:$0xff]  }
 0x280   :  { %v9091_v25 = vrot.slane %v9063_v52, %v14076_v4  ;;  %v8170_v35 = vmul.f32 0.125, %v7802_v33  ;;  %6272 = vmatpush1.bf16.msra.mxu1 %v13403_v44  ;;  %6232 = vmatprep.subr.bf16.mxu0 %v13408_v50  ;;  %v5728_v63 = vpop.f32.mrb[47].mxu1  ;;  %v7815_v11 = vrot.slane %v7487_v15, 4  ;;  %v7026_v61 = vadd.f32 %v7025_v55, %v15214_v14  ;;  %v13417_v6 = vld [vmem:[#allocation2 + $0x138c] ss:$392 sps:$4 sm:$0xff]  }
 0x281   :  { %v7021_v53 = vrot.slane %v7020_v29, 2  ;;  %v7804_v30 = vadd.f32 %v7803_v12, %v7485_v7  ;;  %6273 = vmatprep.subr.bf16.mxu1 %v13411_v28  ;;  %v7033_v33 = vrot.slane %v7032_v9, 2  ;;  %v7809_v44 = vrot.slane %v7486_v22, 4  ;;  %v13412_v50 = vld [vmem:[#allocation2 + $0x1380] ss:$392 sps:$4 sm:$0xff]  }
 0x282   :  { %v9093_v51 = vcombine.low %v9084_v59, %v9091_v25  ;;  %v8366_v52 = vsub.f32 %v8170_v35, %v8268_v20  ;;  %v7816_v37 = vadd.f32 %v7815_v11, %v7487_v15  ;;  %v7027_v40 = vrot.slane %v7026_v61, 2  ;;  %v13415_v12 = vld [vmem:[#allocation2 + $0x1388] ss:$392 sps:$4 sm:$0xff]   ;;  %v13420_v28 = vld [vmem:[#allocation2 + $0x1694] ss:$392 sps:$4 sm:$0xff]   ;;  %v15232_v15 = vpop.eup %13768 }
 0x283   :  { %v7022_v17 = vadd.f32 %v7021_v53, %v7020_v29  ;;  %v7805_v34 = vrot.slane %v7804_v30, 2  ;;  %6233 = vmatpush1.bf16.msra.mxu0 %v13406_v62  ;;  %v7034_v2 = vadd.f32 %v7033_v33, %v7032_v9  ;;  %v7810_v7 = vadd.f32 %v7809_v44, %v7486_v22  ;;  %v8723_v55 = vld [vmem:[#allocation4 + $0x40] ss:$2 sm:$0xff]  ;;  %v15235_v22 = vpop.eup %13770 }
 0x284   :  { %v9107_v39 = vrot.slane %v9093_v51, %v14076_v4  ;;  %v8464_v63 = vmax.f32 %v8366_v52, 0.0  ;;  %6274 = vmatpush1.bf16.msra.mxu1 %v13409_v36  ;;  %6234 = vmatprep.subr.bf16.mxu0 %v13414_v19  ;;  %v7817_v25 = vrot.slane %v7816_v37, 2  ;;  %v15230_v35 = vadd.f32 %v7027_v40, %v7026_v61  ;;  %v13423_v29 = vld [vmem:[#allocation2 + $0x169c] ss:$392 sps:$4 sm:$0xff]   ;;  %v13418_v40 = vld [vmem:[#allocation2 + $0x1690] ss:$392 sps:$4 sm:$0xff]  }
 0x285   :  { %v7023_v59 = vrot.slane %v7022_v17, 1  ;;  %v7806_v20 = vadd.f32 %v7805_v34, %v7804_v30  ;;  %6275 = vmatprep.subr.bf16.mxu1 %v13417_v6  ;;  %v7035_v11 = vrot.slane %v7034_v2, 1  ;;  %v7811_v9 = vrot.slane %v7810_v7, 2  ;;  %v13426_v34 = vld [vmem:[#allocation2 + $0x134] ss:$392 sps:$4 sm:$0xff]  }
 0x286   :  { %v9108_v62 = vcombine.low %v15202_v43, %v9107_v39  ;;  %v8562_v53 = vadd.f32 1e-05, %v8464_v63  ;;  %v15237_v51 = vadd.f32 %v7817_v25, %v7816_v37  ;;  %v7029_v30 = vrot.slane %v15230_v35, 1  ;;  %v13421_v39 = vld [vmem:[#allocation2 + $0x1698] ss:$392 sps:$4 sm:$0xff]  }
 0x287   :  { %v7024_v36 = vadd.f32 %v7023_v59, %v7022_v17  ;;  %v7807_v19 = vrot.slane %v7806_v20, 1  ;;  %6235 = vmatpush1.bf16.msra.mxu0 %v13412_v50  ;;  %v15240_v52 = vadd.f32 %v7035_v11, %v7034_v2  ;;  %v15242_v33 = vadd.f32 %v7811_v9, %v7810_v7 }
 0x288   :  { %v13773_v61 = vpop.eup %13772  ;;  %v9484_v6 = vmul.f32 %v9108_v62, %v8723_v55  ;;  %13774 = vrsqrt.f32 %v8562_v53  ;;  %6276 = vmatpush1.bf16.msra.mxu1 %v13415_v12  ;;  %6236 = vmatprep.subr.bf16.mxu0 %v13420_v28  ;;  %v7819_v17 = vrot.slane %v15237_v51, 1  ;;  %v13429_v62 = vld [vmem:[#allocation2 + $0x13c] ss:$392 sps:$4 sm:$0xff]  }
 0x289   :  { %v9109_v43 = vcombine.low %v15232_v15, %v13773_v61  ;;  %v15245_v44 = vmul.f32 0.125, %v7024_v36  ;;  %v7808_v37 = vadd.f32 %v7807_v19, %v7806_v20  ;;  %6277 = vmatprep.subr.bf16.mxu1 %v13423_v29  ;;  %v13424_v19 = vld [vmem:[#allocation2 + $0x130] ss:$392 sps:$4 sm:$0xff]  }
 0x28a   :  { %v9637_v50 = vrot.slane %v9484_v6, %v14140_v45  ;;  %v9641_v63 = vrot.slane %v9484_v6, %v14143_v46  ;;  %v9645_v2 = vrot.slane %v9484_v6, %v14146_v47  ;;  %v9649_v7 = vrot.slane %v9484_v6, %v14149_v48 }
 0x28b   :  { %v9653_v12 = vrot.slane %v9484_v6, %v14152_v49  ;;  %v9657_v28 = vrot.slane %v9484_v6, %v14191_v24  ;;  %v9661_v55 = vrot.slane %v9484_v6, %v14207_v8  ;;  %v9665_v59 = vrot.slane %v9484_v6, %v14213_v1  ;;  %6237 = vmatpush1.bf16.msra.mxu0 %v13418_v40 }
 0x28c   :  { %v10028_v20 = vmul.f32 %v9637_v50, %v14928_v31  ;;  %v10029_v25 = vmul.f32 %v9641_v63, %v14950_v41  ;;  %v10030_v29 = vmul.f32 %v9645_v2, %v14933_v16  ;;  %v10031_v15 = vmul.f32 %v9649_v7, %v14954_v13  ;;  %6278 = vmatpush1.bf16.msra.mxu1 %v13421_v39  ;;  %v13427_v13 = vld [vmem:[#allocation2 + $0x138] ss:$392 sps:$4 sm:$0xff]   ;;  %v13435_v39 = vld [vmem:[#allocation2 + $0x44c] ss:$392 sps:$4 sm:$0xff]  }
 0x28d   :  { %v10032_v53 = vmul.f32 %v9653_v12, %v15055_v42  ;;  %v10033_v11 = vmul.f32 %v9657_v28, %v15077_v32  ;;  %v10034_v9 = vmul.f32 %v9661_v55, %v15058_v60  ;;  %v10035_v36 = vmul.f32 %v9665_v59, %v15157_v10  ;;  %6304 = vmatprep.subr.bf16.mxu0 %v13426_v34  ;;  %v13432_v42 = vld [vmem:[#allocation2 + $0x444] ss:$392 sps:$4 sm:$0xff]   ;;  %v16741_v10 = vld [vmem:[#allocation11_spill] sm:$0xff] }
 0x28e   :  { %v10388_v40 = vcombine.low %v10028_v20, %v10029_v25  ;;  %v10389_v31 = vcombine.low %v10030_v29, %v10031_v15  ;;  %v15265_v41 = vmul.f32 %v9637_v50, %v14870_v54  ;;  %v15268_v16 = vmul.f32 %v9641_v63, %v14890_v0  ;;  %6255 = vmatmul.mubr.bf16.vlgmr.msra.gmra.mrb[72].mxu0 %v15179_v21  ;;  %v16742_v34 = vld [vmem:[#allocation13_spill] sm:$0xff]  ;;  %v16743_v63 = vld [vmem:[#allocation14_spill] sm:$0xff]  ;;  %v13430_v15 = vld [vmem:[#allocation2 + $0x440] ss:$392 sps:$4 sm:$0xff]  }
 0x28f   :  { %v10390_v61 = vcombine.low %v10032_v53, %v10033_v11  ;;  %v10391_v32 = vcombine.low %v10034_v9, %v10035_v36  ;;  %v15272_v60 = vmul.f32 %v9645_v2, %v14872_v27  ;;  %v15275_v6 = vmul.f32 %v9649_v7, %v16741_v10  ;;  %6296 = vmatmul.mubr.bf16.vlgmr.msra.gmra.mrb[72].mxu1 %v15179_v21  ;;  %v16744_v7 = vld [vmem:[#allocation12_spill] sm:$0xff]  ;;  %v13438_v36 = vld [vmem:[#allocation2 + $0x754] ss:$392 sps:$4 sm:$0xff]  }
 0x290   :  { %v10398_v54 = vrot.slane %v10388_v40, %v14076_v4  ;;  %v10405_v0 = vrot.slane %v10389_v31, %v14076_v4  ;;  %v15281_v50 = vmul.f32 %v9653_v12, %v16742_v34  ;;  %v15284_v20 = vmul.f32 %v9657_v28, %v16743_v63  ;;  %6345 = vmatprep.subr.bf16.mxu1 %v13429_v62  ;;  %v13433_v9 = vld [vmem:[#allocation2 + $0x448] ss:$392 sps:$4 sm:$0xff]  }
 0x291   :  { %v10412_v27 = vrot.slane %v10390_v61, %v14076_v4  ;;  %v10419_v2 = vrot.slane %v10391_v32, %v14076_v4  ;;  %v15289_v25 = vmul.f32 %v9661_v55, %v16744_v7  ;;  %v15292_v29 = vmul.f32 %v9665_v59, %v14972_v18  ;;  %6305 = vmatpush1.bf16.msra.mxu0 %v13424_v19  ;;  %v13441_v19 = vld [vmem:[#allocation2 + $0x75c] ss:$392 sps:$4 sm:$0xff]   ;;  %v13436_v61 = vld [vmem:[#allocation2 + $0x750] ss:$392 sps:$4 sm:$0xff]  }
 0x292   :  { %v13775_v53 = vpop.eup %13774  ;;  %v10420_v11 = vcombine.low %v10398_v54, %v10405_v0  ;;  %v15295_v12 = vrot.slane %v9109_v43, %v14076_v4  ;;  %v8171_v28 = vmul.f32 0.125, %v7808_v37  ;;  %v8269_v62 = vmul.f32 %v15245_v44, %v15245_v44  ;;  %6346 = vmatpush1.bf16.msra.mxu1 %v13427_v13  ;;  %6306 = vmatprep.subr.bf16.mxu0 %v13432_v42  ;;  %v8749_v43 = vld [vmem:[#allocation4 + $0x41] ss:$2 sm:$0xff] }
 0x293   :  { %v10421_v55 = vcombine.low %v10412_v27, %v10419_v2  ;;  %v9110_v40 = vcombine.low %v15235_v22, %v13775_v53  ;;  %v15301_v18 = vmul.f32 0.125, %v15240_v52  ;;  %v7820_v59 = vadd.f32 %v7819_v17, %v15237_v51  ;;  %6347 = vmatprep.subr.bf16.mxu1 %v13435_v39  ;;  %6336 = vmatprep.mubr.bf16.mxu0 %v16700_v57  ;;  %v13439_v32 = vld [vmem:[#allocation2 + $0x758] ss:$392 sps:$4 sm:$0xff]   ;;  %v13444_v54 = vld [vmem:[#allocation2 + $0xa64] ss:$392 sps:$4 sm:$0xff]  }
 0x294   :  { %v10428_v37 = vrot.slane %v10420_v11, %v14076_v4  ;;  %v8367_v31 = vsub.f32 %v8171_v28, %v8269_v62  ;;  %v7030_v13 = vadd.f32 %v7029_v30, %v15230_v35  ;;  %v7813_v42 = vrot.slane %v15242_v33, 1  ;;  %6377 = vmatprep.mubr.bf16.mxu1 %v16700_v57  ;;  %v13447_v2 = vld [vmem:[#allocation2 + $0xa6c] ss:$392 sps:$4 sm:$0xff]   ;;  %v13442_v62 = vld [vmem:[#allocation2 + $0xa60] ss:$392 sps:$4 sm:$0xff]  }
 0x295   :  { %v10435_v22 = vrot.slane %v10421_v55, %v14076_v4  ;;  %v15313_v51 = vrot.slane %v9110_v40, %v14076_v4  ;;  %v8173_v52 = vmul.f32 0.125, %v7820_v59  ;;  %v8271_v17 = vmul.f32 %v15301_v18, %v15301_v18  ;;  %6307 = vmatpush1.bf16.msra.mxu0 %v13430_v15  ;;  %v13445_v40 = vld [vmem:[#allocation2 + $0xa68] ss:$392 sps:$4 sm:$0xff]  }
 0x296   :  { %v8465_v10 = vmax.f32 %v8367_v31, 0.0  ;;  %v15317_v39 = vmul.f32 0.125, %v7030_v13  ;;  %v7814_v35 = vadd.f32 %v7813_v42, %v15242_v33  ;;  %v7037_v30 = vrot.slane %v15218_v23, 4  ;;  %6348 = vmatpush1.bf16.msra.mxu1 %v13433_v9  ;;  %6308 = vmatprep.subr.bf16.mxu0 %v13438_v36  ;;  %v13453_v13 = vld [vmem:[#allocation2 + $0xd7c] ss:$392 sps:$4 sm:$0xff]  }
 0x297   :  { %v10436_v0 = vcombine.low %v10428_v37, %v10435_v22  ;;  %v9141_v34 = vcombine.low %v15295_v12, %v15313_v51  ;;  %v8369_v63 = vsub.f32 %v8173_v52, %v8271_v17  ;;  %v15325_v27 = vmul.f32 %v15218_v23, %v15218_v23  ;;  %6349 = vmatprep.subr.bf16.mxu1 %v13441_v19 }
 0x298   :  { %v8563_v7 = vadd.f32 1e-05, %v8465_v10  ;;  %v8172_v15 = vmul.f32 0.125, %v7814_v35  ;;  %v8270_v33 = vmul.f32 %v15317_v39, %v15317_v39  ;;  %v7038_v53 = vadd.f32 %v7037_v30, %v15218_v23 }
 0x299   :  { %v10812_v11 = vsub.f32 %v8749_v43, %v10436_v0  ;;  %v8467_v28 = vmax.f32 %v8369_v63, 0.0  ;;  %6309 = vmatpush1.bf16.msra.mxu0 %v13436_v61  ;;  %v7821_v55 = vrot.slane %v15325_v27, 4  ;;  %v13450_v43 = vld [vmem:[#allocation2 + $0xd74] ss:$392 sps:$4 sm:$0xff]   ;;  %v13451_v0 = vld [vmem:[#allocation2 + $0xd78] ss:$392 sps:$4 sm:$0xff]  }
 0x29a   :  { %13776 = vrsqrt.f32 %v8563_v7  ;;  %v8368_v9 = vsub.f32 %v8172_v15, %v8270_v33  ;;  %v7039_v36 = vrot.slane %v7038_v53, 2  ;;  %6350 = vmatpush1.bf16.msra.mxu1 %v13439_v32  ;;  %6310 = vmatprep.subr.bf16.mxu0 %v13444_v54  ;;  %v13448_v54 = vld [vmem:[#allocation2 + $0xd70] ss:$392 sps:$4 sm:$0xff]  }
 0x29b   :  { %v11063_v59 = vrot.slane %v10812_v11, %v14140_v45  ;;  %v11067_v19 = vrot.slane %v10812_v11, %v14143_v46  ;;  %v11071_v37 = vrot.slane %v10812_v11, %v14146_v47  ;;  %v11075_v31 = vrot.slane %v10812_v11, %v14149_v48  ;;  %6351 = vmatprep.subr.bf16.mxu1 %v13447_v2 }
 0x29c   :  { %v11079_v42 = vrot.slane %v10812_v11, %v14152_v49  ;;  %v11083_v22 = vrot.slane %v10812_v11, %v14191_v24  ;;  %v11087_v52 = vrot.slane %v10812_v11, %v14207_v8  ;;  %v11091_v17 = vrot.slane %v10812_v11, %v14213_v1  ;;  %v15339_v61 = vpop.f32.mrb[48].mxu0 }
 0x29d   :  { %v11454_v32 = vadd.f32 %v11063_v59, %v15265_v41  ;;  %v11455_v10 = vadd.f32 %v11067_v19, %v15268_v16  ;;  %v11456_v35 = vadd.f32 %v11071_v37, %v15272_v60  ;;  %v11457_v30 = vadd.f32 %v11075_v31, %v15275_v6  ;;  %6311 = vmatpush1.bf16.msra.mxu0 %v13442_v62  ;;  %v15345_v63 = vpop.f32.mrb[48].mxu1  ;;  %v15347_v2 = vpop.f32.mrb[49].mxu0  ;;  %v13456_v60 = vld [vmem:[#allocation2 + $0x1084] ss:$392 sps:$4 sm:$0xff]  }
 0x29e   :  { %v11458_v7 = vadd.f32 %v11079_v42, %v15281_v50  ;;  %v11459_v15 = vadd.f32 %v11083_v22, %v15284_v20  ;;  %v11460_v33 = vadd.f32 %v11087_v52, %v15289_v25  ;;  %v11461_v41 = vadd.f32 %v11091_v17, %v15292_v29  ;;  %6352 = vmatpush1.bf16.msra.mxu1 %v13445_v40  ;;  %v15353_v16 = vpop.f32.mrb[49].mxu1  ;;  %v13459_v6 = vld [vmem:[#allocation2 + $0x108c] ss:$392 sps:$4 sm:$0xff]   ;;  %v5768_v11 = vpop.f32.mrb[50].mxu0  ;;  %v13454_v17 = vld [vmem:[#allocation2 + $0x1080] ss:$392 sps:$4 sm:$0xff]  }
 0x29f   :  { %16745 = vst [vmem:[#allocation8_spill] sm:$0xff] %v15353_v16  ;;  %v11552_v62 = vmax.f32 %v11454_v32, 0.0  ;;  %v11553_v59 = vmax.f32 %v11455_v10, 0.0  ;;  %v11554_v19 = vmax.f32 %v11456_v35, 0.0  ;;  %v11555_v37 = vmax.f32 %v11457_v30, 0.0  ;;  %6312 = vmatprep.subr.bf16.mxu0 %v13450_v43  ;;  %6353 = vmatprep.subr.bf16.mxu1 %v13453_v13  ;;  %v5769_v31 = vpop.f32.mrb[51].mxu0 }
 0x2a0   :  { %v5809_v50 = vpop.f32.mrb[50].mxu1  ;;  %v11556_v42 = vmax.f32 %v11458_v7, 0.0  ;;  %v11557_v20 = vmax.f32 %v11459_v15, 0.0  ;;  %v11558_v22 = vmax.f32 %v11460_v33, 0.0  ;;  %v11559_v25 = vmax.f32 %v11461_v41, 0.0 }
 0x2a1   :  { %v5810_v52 = vpop.f32.mrb[51].mxu1  ;;  %11650 = vst [vmem:[%s16652_s3 + $0x100] sm:$0xff] %v11552_v62  ;;  %11651 = vst [vmem:[%s16652_s3 + $0x108] sm:$0xff] %v11553_v59  ;;  %v8565_v29 = vadd.f32 1e-05, %v8467_v28  ;;  %v8466_v40 = vmax.f32 %v8368_v9, 0.0  ;;  %v7040_v43 = vadd.f32 %v7039_v36, %v7038_v53  ;;  %v7822_v13 = vadd.f32 %v7821_v55, %v15325_v27  ;;  %6313 = vmatpush1.bf16.msra.mxu0 %v13448_v54 }
 0x2a2   :  { %11652 = vst [vmem:[%s16652_s3 + $0x110] sm:$0xff] %v11554_v19  ;;  %11653 = vst [vmem:[%s16652_s3 + $0x118] sm:$0xff] %v11555_v37  ;;  %6354 = vmatpush1.bf16.msra.mxu1 %v13451_v0  ;;  %v7043_v27 = vrot.slane %v15339_v61, 4  ;;  %v7489_v53 = vmul.f32 %v15339_v61, %v15339_v61  ;;  %v7055_v28 = vrot.slane %v15345_v63, 4  ;;  %v7491_v9 = vmul.f32 %v15345_v63, %v15345_v63  ;;  %v13457_v36 = vld [vmem:[#allocation2 + $0x1088] ss:$392 sps:$4 sm:$0xff]  }
 0x2a3   :  { %11654 = vst [vmem:[%s16652_s3 + $0x120] sm:$0xff] %v11556_v42  ;;  %11655 = vst [vmem:[%s16652_s3 + $0x128] sm:$0xff] %v11557_v20  ;;  %6314 = vmatprep.subr.bf16.mxu0 %v13456_v60  ;;  %v13462_v55 = vld [vmem:[#allocation2 + $0x1394] ss:$392 sps:$4 sm:$0xff]   ;;  %13778 = vrsqrt.f32 %v8565_v29  ;;  %v8564_v32 = vadd.f32 1e-05, %v8466_v40  ;;  %6355 = vmatprep.subr.bf16.mxu1 %v13459_v6 }
 0x2a4   :  { %11656 = vst [vmem:[%s16652_s3 + $0x130] sm:$0xff] %v11558_v22  ;;  %11657 = vst [vmem:[%s16652_s3 + $0x138] sm:$0xff] %v11559_v25  ;;  %v7041_v10 = vrot.slane %v7040_v43, 1  ;;  %v7823_v35 = vrot.slane %v7822_v13, 2  ;;  %v13465_v30 = vld [vmem:[#allocation2 + $0x139c] ss:$392 sps:$4 sm:$0xff]   ;;  %v15386_v54 = vpop.eup %13776  ;;  %v7044_v0 = vadd.f32 %v7043_v27, %v15339_v61  ;;  %v7056_v15 = vadd.f32 %v7055_v28, %v15345_v63 }
 0x2a5   :  { %v7827_v7 = vrot.slane %v7489_v53, 4  ;;  %v7839_v33 = vrot.slane %v7491_v9, 4  ;;  %13780 = vrsqrt.f32 %v8564_v32  ;;  %v7049_v60 = vrot.slane %v15347_v2, 4  ;;  %6315 = vmatpush1.bf16.msra.mxu0 %v13454_v17  ;;  %v13460_v62 = vld [vmem:[#allocation2 + $0x1390] ss:$392 sps:$4 sm:$0xff]  }
 0x2a6   :  { %v7042_v41 = vadd.f32 %v7041_v10, %v7040_v43  ;;  %v7824_v11 = vadd.f32 %v7823_v35, %v7822_v13  ;;  %v7045_v59 = vrot.slane %v7044_v0, 2  ;;  %v7057_v37 = vrot.slane %v7056_v15, 2  ;;  %6356 = vmatpush1.bf16.msra.mxu1 %v13457_v36  ;;  %6316 = vmatprep.subr.bf16.mxu0 %v13462_v55  ;;  %v13463_v31 = vld [vmem:[#allocation2 + $0x1398] ss:$392 sps:$4 sm:$0xff]   ;;  %v13468_v50 = vld [vmem:[#allocation2 + $0x16a4] ss:$392 sps:$4 sm:$0xff]  }
 0x2a7   :  { %v7828_v19 = vadd.f32 %v7827_v7, %v7489_v53  ;;  %v7840_v6 = vadd.f32 %v7839_v33, %v7491_v9  ;;  %v7050_v22 = vadd.f32 %v7049_v60, %v15347_v2  ;;  %v7490_v25 = vmul.f32 %v15347_v2, %v15347_v2  ;;  %6357 = vmatprep.subr.bf16.mxu1 %v13465_v30  ;;  %v13471_v52 = vld [vmem:[#allocation2 + $0x16ac] ss:$392 sps:$4 sm:$0xff]   ;;  %v13466_v9 = vld [vmem:[#allocation2 + $0x16a0] ss:$392 sps:$4 sm:$0xff]  }
 0x2a8   :  { %v15391_v42 = vmul.f32 0.125, %v7042_v41  ;;  %v7825_v20 = vrot.slane %v7824_v11, 1  ;;  %v7046_v29 = vadd.f32 %v7045_v59, %v7044_v0  ;;  %v7058_v43 = vadd.f32 %v7057_v37, %v7056_v15  ;;  %v13469_v35 = vld [vmem:[#allocation2 + $0x16a8] ss:$392 sps:$4 sm:$0xff]   ;;  %v13474_v30 = vld [vmem:[#allocation2 + $0x144] ss:$392 sps:$4 sm:$0xff]  }
 0x2a9   :  { %v7829_v40 = vrot.slane %v7828_v19, 2  ;;  %v7841_v13 = vrot.slane %v7840_v6, 2  ;;  %v7051_v53 = vrot.slane %v7050_v22, 2  ;;  %v7833_v28 = vrot.slane %v7490_v25, 4  ;;  %6317 = vmatpush1.bf16.msra.mxu0 %v13460_v62  ;;  %v13477_v41 = vld [vmem:[#allocation2 + $0x14c] ss:$392 sps:$4 sm:$0xff]  }
 0x2aa   :  { %v7826_v17 = vadd.f32 %v7825_v20, %v7824_v11  ;;  %v8272_v27 = vmul.f32 %v15391_v42, %v15391_v42  ;;  %v7047_v36 = vrot.slane %v7046_v29, 1  ;;  %v7059_v32 = vrot.slane %v7058_v43, 1  ;;  %6358 = vmatpush1.bf16.msra.mxu1 %v13463_v31  ;;  %6318 = vmatprep.subr.bf16.mxu0 %v13468_v50  ;;  %v13472_v50 = vld [vmem:[#allocation2 + $0x140] ss:$392 sps:$4 sm:$0xff]  }
 0x2ab   :  { %v7830_v55 = vadd.f32 %v7829_v40, %v7828_v19  ;;  %v7842_v10 = vadd.f32 %v7841_v13, %v7840_v6  ;;  %v7052_v7 = vadd.f32 %v7051_v53, %v7050_v22  ;;  %v7834_v15 = vadd.f32 %v7833_v28, %v7490_v25  ;;  %6359 = vmatprep.subr.bf16.mxu1 %v13471_v52  ;;  %v13480_v28 = vld [vmem:[#allocation2 + $0x454] ss:$392 sps:$4 sm:$0xff]  }
 0x2ac   :  { %v8174_v0 = vmul.f32 0.125, %v7826_v17  ;;  %v7061_v33 = vrot.slane %v15353_v16, 4  ;;  %v7048_v11 = vadd.f32 %v7047_v36, %v7046_v29  ;;  %v7060_v59 = vadd.f32 %v7059_v32, %v7058_v43  ;;  %v13475_v29 = vld [vmem:[#allocation2 + $0x148] ss:$392 sps:$4 sm:$0xff]   ;;  %v13483_v36 = vld [vmem:[#allocation2 + $0x45c] ss:$392 sps:$4 sm:$0xff]  }
 0x2ad   :  { %v7831_v60 = vrot.slane %v7830_v55, 1  ;;  %v7843_v62 = vrot.slane %v7842_v10, 1  ;;  %v15399_v37 = vpop.eup %13778  ;;  %v7053_v20 = vrot.slane %v7052_v7, 1  ;;  %v7835_v6 = vrot.slane %v7834_v15, 2  ;;  %6319 = vmatpush1.bf16.msra.mxu0 %v13466_v9 }
 0x2ae   :  { %v8370_v19 = vsub.f32 %v8174_v0, %v8272_v27  ;;  %v7062_v31 = vadd.f32 %v7061_v33, %v15353_v16  ;;  %v15402_v40 = vmul.f32 0.125, %v7048_v11  ;;  %v15404_v25 = vmul.f32 0.125, %v7060_v59  ;;  %6360 = vmatpush1.bf16.msra.mxu1 %v13469_v35  ;;  %6386 = vmatprep.subr.bf16.mxu0 %v13474_v30  ;;  %v13486_v59 = vld [vmem:[#allocation2 + $0x764] ss:$392 sps:$4 sm:$0xff]  }
 0x2af   :  { %v7832_v22 = vadd.f32 %v7831_v60, %v7830_v55  ;;  %v7844_v52 = vadd.f32 %v7843_v62, %v7842_v10  ;;  %v15406_v43 = vpop.eup %13780  ;;  %v7054_v17 = vadd.f32 %v7053_v20, %v7052_v7  ;;  %v7836_v27 = vadd.f32 %v7835_v6, %v7834_v15  ;;  %6427 = vmatprep.subr.bf16.mxu1 %v13477_v41  ;;  %v13478_v15 = vld [vmem:[#allocation2 + $0x450] ss:$392 sps:$4 sm:$0xff]   ;;  %v13489_v6 = vld [vmem:[#allocation2 + $0x76c] ss:$392 sps:$4 sm:$0xff]  }
 0x2b0   :  { %v8468_v13 = vmax.f32 %v8370_v19, 0.0  ;;  %v7063_v53 = vrot.slane %v7062_v31, 2  ;;  %v9111_v9 = vcombine.low %v15386_v54, %v15406_v43  ;;  %v8273_v55 = vmul.f32 %v15402_v40, %v15402_v40  ;;  %6337 = vmatmul.mubr.bf16.vlgmr.msra.gmra.mrb[76].mxu0 %v15179_v21  ;;  %v13481_v60 = vld [vmem:[#allocation2 + $0x458] ss:$392 sps:$4 sm:$0xff]   ;;  %v13504_v43 = vld [vmem:[#allocation2 + $0x1094] ss:$392 sps:$4 sm:$0xff]  }
 0x2b1   :  { %v8175_v32 = vmul.f32 0.125, %v7832_v22  ;;  %v8177_v10 = vmul.f32 0.125, %v7844_v52  ;;  %v8275_v30 = vmul.f32 %v15404_v25, %v15404_v25  ;;  %v15415_v0 = vmul.f32 0.125, %v7054_v17  ;;  %6378 = vmatmul.mubr.bf16.vlgmr.msra.gmra.mrb[76].mxu1 %v15179_v21  ;;  %6387 = vmatpush1.bf16.msra.mxu0 %v13472_v50 }
 0x2b2   :  { %v8566_v35 = vadd.f32 1e-05, %v8468_v13  ;;  %v7837_v7 = vrot.slane %v7836_v27, 1  ;;  %v7064_v41 = vadd.f32 %v7063_v53, %v7062_v31  ;;  %v7492_v11 = vmul.f32 %v15353_v16, %v15353_v16  ;;  %6428 = vmatpush1.bf16.msra.mxu1 %v13475_v29  ;;  %6388 = vmatprep.subr.bf16.mxu0 %v13480_v28  ;;  %v13484_v29 = vld [vmem:[#allocation2 + $0x760] ss:$392 sps:$4 sm:$0xff]  }
 0x2b3   :  { %v8371_v33 = vsub.f32 %v8175_v32, %v8273_v55  ;;  %v8373_v62 = vsub.f32 %v8177_v10, %v8275_v30  ;;  %v8274_v20 = vmul.f32 %v15415_v0, %v15415_v0  ;;  %6429 = vmatprep.subr.bf16.mxu1 %v13483_v36  ;;  %6418 = vmatprep.mubr.bf16.mxu0 %v16700_v57  ;;  %v13492_v53 = vld [vmem:[#allocation2 + $0xa74] ss:$392 sps:$4 sm:$0xff]  }
 0x2b4   :  { %13782 = vrsqrt.f32 %v8566_v35  ;;  %v7838_v19 = vadd.f32 %v7837_v7, %v7836_v27  ;;  %v7065_v50 = vrot.slane %v7064_v41, 1  ;;  %v7845_v22 = vrot.slane %v7492_v11, 4  ;;  %6459 = vmatprep.mubr.bf16.mxu1 %v16700_v57  ;;  %v13487_v27 = vld [vmem:[#allocation2 + $0x768] ss:$392 sps:$4 sm:$0xff]   ;;  %v13495_v32 = vld [vmem:[#allocation2 + $0xa7c] ss:$392 sps:$4 sm:$0xff]  }
 0x2b5   :  { %v8469_v21 = vmax.f32 %v8371_v33, 0.0  ;;  %v8471_v31 = vmax.f32 %v8373_v62, 0.0  ;;  %6389 = vmatpush1.bf16.msra.mxu0 %v13478_v15  ;;  %v13490_v7 = vld [vmem:[#allocation2 + $0xa70] ss:$392 sps:$4 sm:$0xff]  }
 0x2b6   :  { %v8176_v52 = vmul.f32 0.125, %v7838_v19  ;;  %v7066_v13 = vadd.f32 %v7065_v50, %v7064_v41  ;;  %v7846_v17 = vadd.f32 %v7845_v22, %v7492_v11  ;;  %6430 = vmatpush1.bf16.msra.mxu1 %v13481_v60  ;;  %6390 = vmatprep.subr.bf16.mxu0 %v13486_v59  ;;  %v13493_v15 = vld [vmem:[#allocation2 + $0xa78] ss:$392 sps:$4 sm:$0xff]   ;;  %v13498_v41 = vld [vmem:[#allocation2 + $0xd84] ss:$392 sps:$4 sm:$0xff]   ;;  %v15430_v19 = vrot.slane %v9141_v34, %v14076_v4 }
 0x2b7   :  { %v8567_v28 = vadd.f32 1e-05, %v8469_v21  ;;  %6431 = vmatprep.subr.bf16.mxu1 %v13489_v6  ;;  %v8569_v55 = vadd.f32 1e-05, %v8471_v31  ;;  %v13501_v60 = vld [vmem:[#allocation2 + $0xd8c] ss:$392 sps:$4 sm:$0xff]  }
 0x2b8   :  { %v8372_v36 = vsub.f32 %v8176_v52, %v8274_v20  ;;  %v7847_v10 = vrot.slane %v7846_v17, 2  ;;  %v15424_v30 = vmul.f32 0.125, %v7066_v13  ;;  %v9133_v20 = vrot.slane %v9111_v9, %v14076_v4  ;;  %v13496_v21 = vld [vmem:[#allocation2 + $0xd80] ss:$392 sps:$4 sm:$0xff]  }
 0x2b9   :  { %6391 = vmatpush1.bf16.msra.mxu0 %v13484_v29  ;;  %13784 = vrsqrt.f32 %v8567_v28  ;;  %v13499_v50 = vld [vmem:[#allocation2 + $0xd88] ss:$392 sps:$4 sm:$0xff]  }
 0x2ba   :  { %v8470_v35 = vmax.f32 %v8372_v36, 0.0  ;;  %v7848_v33 = vadd.f32 %v7847_v10, %v7846_v17  ;;  %6432 = vmatpush1.bf16.msra.mxu1 %v13487_v27  ;;  %6392 = vmatprep.subr.bf16.mxu0 %v13492_v53  ;;  %13786 = vrsqrt.f32 %v8569_v55  ;;  %v8276_v6 = vmul.f32 %v15424_v30, %v15424_v30  ;;  %v13507_v27 = vld [vmem:[#allocation2 + $0x109c] ss:$392 sps:$4 sm:$0xff]  }
 0x2bb   :  { %6433 = vmatprep.subr.bf16.mxu1 %v13495_v32 }
 0x2bc   :  { %v8568_v11 = vadd.f32 1e-05, %v8470_v35  ;;  %v7849_v59 = vrot.slane %v7848_v33, 1 }
 0x2bd   :  { %6393 = vmatpush1.bf16.msra.mxu0 %v13490_v7  ;;  %v15438_v22 = vpop.f32.mrb[52].mxu0 }
 0x2be   :  { %v13783_v62 = vpop.eup %13782  ;;  %13788 = vrsqrt.f32 %v8568_v11  ;;  %16746 = vst [vmem:[#allocation17_spill] sm:$0xff] %v15438_v22  ;;  %v7850_v52 = vadd.f32 %v7849_v59, %v7848_v33  ;;  %6434 = vmatpush1.bf16.msra.mxu1 %v13493_v15  ;;  %6394 = vmatprep.subr.bf16.mxu0 %v13498_v41  ;;  %v7067_v12 = vrot.slane %v15438_v22, 4  ;;  %v7493_v51 = vmul.f32 %v15438_v22, %v15438_v22  ;;  %v15444_v34 = vpop.f32.mrb[52].mxu1  ;;  %v13502_v11 = vld [vmem:[#allocation2 + $0x1090] ss:$392 sps:$4 sm:$0xff]  }
 0x2bf   :  { %v9112_v31 = vcombine.low %v15399_v37, %v13783_v62  ;;  %16747 = vst [vmem:[#allocation11_spill] sm:$0xff] %v15444_v34  ;;  %v15446_v54 = vpop.f32.mrb[53].mxu0  ;;  %6435 = vmatprep.subr.bf16.mxu1 %v13501_v60  ;;  %v7079_v9 = vrot.slane %v15444_v34, 4  ;;  %v7495_v29 = vmul.f32 %v15444_v34, %v15444_v34  ;;  %v15454_v17 = vpop.f32.mrb[53].mxu1 }
 0x2c0   :  { %16748 = vst [vmem:[#allocation13_spill] sm:$0xff] %v15446_v54  ;;  %v7073_v37 = vrot.slane %v15446_v54, 4  ;;  %v7494_v13 = vmul.f32 %v15446_v54, %v15446_v54  ;;  %v5850_v53 = vpop.f32.mrb[54].mxu0  ;;  %v8178_v36 = vmul.f32 0.125, %v7850_v52  ;;  %v7068_v32 = vadd.f32 %v7067_v12, %v15438_v22  ;;  %v5891_v35 = vpop.f32.mrb[54].mxu1 }
 0x2c1   :  { %v9140_v28 = vrot.slane %v9112_v31, %v14076_v4  ;;  %v7851_v55 = vrot.slane %v7493_v51, 4  ;;  %v5851_v10 = vpop.f32.mrb[55].mxu0  ;;  %6395 = vmatpush1.bf16.msra.mxu0 %v13496_v21  ;;  %v7080_v7 = vadd.f32 %v7079_v9, %v15444_v34  ;;  %v7863_v33 = vrot.slane %v7495_v29, 4  ;;  %v5892_v60 = vpop.f32.mrb[55].mxu1  ;;  %v13505_v52 = vld [vmem:[#allocation2 + $0x1098] ss:$392 sps:$4 sm:$0xff]  }
 0x2c2   :  { %v7074_v15 = vadd.f32 %v7073_v37, %v15446_v54  ;;  %v7857_v41 = vrot.slane %v7494_v13, 4  ;;  %v8374_v62 = vsub.f32 %v8178_v36, %v8276_v6  ;;  %6436 = vmatpush1.bf16.msra.mxu1 %v13499_v50  ;;  %v7069_v53 = vrot.slane %v7068_v32, 2  ;;  %6396 = vmatprep.subr.bf16.mxu0 %v13504_v43  ;;  %v13510_v12 = vld [vmem:[#allocation2 + $0x13a4] ss:$392 sps:$4 sm:$0xff]  }
 0x2c3   :  { %v9142_v59 = vcombine.low %v9133_v20, %v9140_v28  ;;  %v7852_v31 = vadd.f32 %v7851_v55, %v7493_v51  ;;  %v7081_v22 = vrot.slane %v7080_v7, 2  ;;  %v7864_v10 = vadd.f32 %v7863_v33, %v7495_v29  ;;  %6437 = vmatprep.subr.bf16.mxu1 %v13507_v27  ;;  %v13513_v9 = vld [vmem:[#allocation2 + $0x13ac] ss:$392 sps:$4 sm:$0xff]   ;;  %v15461_v60 = vpop.eup %13784  ;;  %v13508_v28 = vld [vmem:[#allocation2 + $0x13a0] ss:$392 sps:$4 sm:$0xff]  }
 0x2c4   :  { %v7075_v35 = vrot.slane %v7074_v15, 2  ;;  %v7858_v21 = vadd.f32 %v7857_v41, %v7494_v13  ;;  %v8472_v37 = vmax.f32 %v8374_v62, 0.0  ;;  %v7070_v54 = vadd.f32 %v7069_v53, %v7068_v32  ;;  %v8725_v20 = vld [vmem:[#allocation4 + $0x50] ss:$2 sm:$0xff]  ;;  %v15463_v36 = vpop.eup %13786 }
 0x2c5   :  { %v9156_v34 = vrot.slane %v9142_v59, %v14076_v4  ;;  %v7853_v16 = vrot.slane %v7852_v31, 2  ;;  %v7082_v6 = vadd.f32 %v7081_v22, %v7080_v7  ;;  %v7865_v50 = vrot.slane %v7864_v10, 2  ;;  %6397 = vmatpush1.bf16.msra.mxu0 %v13502_v11  ;;  %v13511_v32 = vld [vmem:[#allocation2 + $0x13a8] ss:$392 sps:$4 sm:$0xff]   ;;  %v13516_v11 = vld [vmem:[#allocation2 + $0x16b4] ss:$392 sps:$4 sm:$0xff]  }
 0x2c6   :  { %v7076_v51 = vadd.f32 %v7075_v35, %v7074_v15  ;;  %v7859_v43 = vrot.slane %v7858_v21, 2  ;;  %v8570_v13 = vadd.f32 1e-05, %v8472_v37  ;;  %v7071_v27 = vrot.slane %v7070_v54, 1  ;;  %6438 = vmatpush1.bf16.msra.mxu1 %v13505_v52  ;;  %6398 = vmatprep.subr.bf16.mxu0 %v13510_v12  ;;  %v13514_v12 = vld [vmem:[#allocation2 + $0x16b0] ss:$392 sps:$4 sm:$0xff]  }
 0x2c7   :  { %v9157_v29 = vcombine.low %v15430_v19, %v9156_v34  ;;  %v15466_v55 = vadd.f32 %v7853_v16, %v7852_v31  ;;  %v7083_v41 = vrot.slane %v7082_v6, 1  ;;  %v15470_v22 = vadd.f32 %v7865_v50, %v7864_v10  ;;  %6439 = vmatprep.subr.bf16.mxu1 %v13513_v9  ;;  %v13519_v34 = vld [vmem:[#allocation2 + $0x16bc] ss:$392 sps:$4 sm:$0xff]  }
 0x2c8   :  { %v15468_v33 = vpop.eup %13788  ;;  %v7077_v7 = vrot.slane %v7076_v51, 1  ;;  %v15472_v15 = vadd.f32 %v7859_v43, %v7858_v21  ;;  %13790 = vrsqrt.f32 %v8570_v13  ;;  %v7072_v16 = vadd.f32 %v7071_v27, %v7070_v54  ;;  %v13517_v54 = vld [vmem:[#allocation2 + $0x16b8] ss:$392 sps:$4 sm:$0xff]   ;;  %v13522_v50 = vld [vmem:[#allocation2 + $0x154] ss:$392 sps:$4 sm:$0xff]  }
 0x2c9   :  { %v9485_v59 = vmul.f32 %v9157_v29, %v8725_v20  ;;  %v9158_v19 = vcombine.low %v15461_v60, %v15468_v33  ;;  %v7855_v62 = vrot.slane %v15466_v55, 1  ;;  %v15477_v53 = vadd.f32 %v7083_v41, %v7082_v6  ;;  %6399 = vmatpush1.bf16.msra.mxu0 %v13508_v28 }
 0x2ca   :  { %v7867_v31 = vrot.slane %v15470_v22, 1  ;;  %v15480_v52 = vadd.f32 %v7077_v7, %v7076_v51  ;;  %6440 = vmatpush1.bf16.msra.mxu1 %v13511_v32  ;;  %6400 = vmatprep.subr.bf16.mxu0 %v13516_v11 }
 0x2cb   :  { %v9669_v10 = vrot.slane %v9485_v59, %v14140_v45  ;;  %v9673_v35 = vrot.slane %v9485_v59, %v14143_v46  ;;  %v9677_v21 = vrot.slane %v9485_v59, %v14146_v47  ;;  %v9681_v9 = vrot.slane %v9485_v59, %v14149_v48  ;;  %6441 = vmatprep.subr.bf16.mxu1 %v13519_v34 }
 0x2cc   :  { %v9685_v37 = vrot.slane %v9485_v59, %v14152_v49  ;;  %v9689_v60 = vrot.slane %v9485_v59, %v14191_v24  ;;  %v9693_v20 = vrot.slane %v9485_v59, %v14207_v8  ;;  %v9697_v6 = vrot.slane %v9485_v59, %v14213_v1  ;;  %v16749_v59 = vld [vmem:[#allocation15_spill] sm:$0xff] }
 0x2cd   :  { %v10036_v51 = vmul.f32 %v9669_v10, %v15172_v26  ;;  %v10037_v43 = vmul.f32 %v9673_v35, %v15188_v5  ;;  %v10038_v28 = vmul.f32 %v9677_v21, %v15174_v58  ;;  %v10039_v29 = vmul.f32 %v9681_v9, %v15196_v3  ;;  %6401 = vmatpush1.bf16.msra.mxu0 %v13514_v12  ;;  %v13520_v58 = vld [vmem:[#allocation2 + $0x150] ss:$392 sps:$4 sm:$0xff]   ;;  %v13525_v3 = vld [vmem:[#allocation2 + $0x15c] ss:$392 sps:$4 sm:$0xff]  }
 0x2ce   :  { %v10040_v13 = vmul.f32 %v9685_v37, %v15245_v44  ;;  %v10041_v27 = vmul.f32 %v9689_v60, %v15317_v39  ;;  %v10042_v32 = vmul.f32 %v9693_v20, %v15301_v18  ;;  %v10043_v33 = vmul.f32 %v9697_v6, %v15391_v42  ;;  %6442 = vmatpush1.bf16.msra.mxu1 %v13517_v54  ;;  %v16750_v18 = vld [vmem:[#allocation16_spill] sm:$0xff]  ;;  %v13523_v42 = vld [vmem:[#allocation2 + $0x158] ss:$392 sps:$4 sm:$0xff]  }
 0x2cf   :  { %v10437_v41 = vcombine.low %v10036_v51, %v10037_v43  ;;  %v10438_v7 = vcombine.low %v10038_v28, %v10039_v29  ;;  %v15499_v26 = vmul.f32 %v9669_v10, %v15109_v56  ;;  %v15502_v5 = vmul.f32 %v9673_v35, %v15117_v38  ;;  %6468 = vmatprep.subr.bf16.mxu0 %v13522_v50  ;;  %v13528_v12 = vld [vmem:[#allocation2 + $0x464] ss:$392 sps:$4 sm:$0xff]   ;;  %v16752_v43 = vld [vmem:[#allocation10_spill] sm:$0xff] }
 0x2d0   :  { %v10439_v11 = vcombine.low %v10040_v13, %v10041_v27  ;;  %v10440_v44 = vcombine.low %v10042_v32, %v10043_v33  ;;  %v15505_v39 = vmul.f32 %v9677_v21, %v16749_v59  ;;  %v15508_v34 = vmul.f32 %v9681_v9, %v16750_v18  ;;  %v16751_v38 = vld [vmem:[#allocation9_spill] sm:$0xff]  ;;  %v15521_v21 = vld [vmem:[%s16649_s0] sm:$0xf]  ;;  %6509 = vmatprep.subr.bf16.mxu1 %v13525_v3 }
 0x2d1   :  { %v10447_v56 = vrot.slane %v10437_v41, %v14076_v4  ;;  %v10454_v10 = vrot.slane %v10438_v7, %v14076_v4  ;;  %v15513_v35 = vmul.f32 %v9685_v37, %v16751_v38  ;;  %v15516_v54 = vmul.f32 %v9689_v60, %v15214_v14  ;;  %6419 = vmatmul.mubr.bf16.vlgmr.msra.gmra.mrb[80].mxu0 %v15521_v21  ;;  %v13531_v9 = vld [vmem:[#allocation2 + $0x46c] ss:$392 sps:$4 sm:$0xff]   ;;  %v13526_v32 = vld [vmem:[#allocation2 + $0x460] ss:$392 sps:$4 sm:$0xff]   ;;  %v13532_v59 = vld [vmem:[#allocation2 + $0x770] ss:$392 sps:$4 sm:$0xff]  }
 0x2d2   :  { %v10461_v50 = vrot.slane %v10439_v11, %v14076_v4  ;;  %v10468_v51 = vrot.slane %v10440_v44, %v14076_v4  ;;  %v15527_v28 = vmul.f32 %v9693_v20, %v16752_v43  ;;  %v15530_v37 = vmul.f32 %v9697_v6, %v15218_v23  ;;  %6460 = vmatmul.mubr.bf16.vlgmr.msra.gmra.mrb[80].mxu1 %v15521_v21  ;;  %v13791_v14 = vpop.eup %13790  ;;  %v8751_v3 = vld [vmem:[#allocation4 + $0x51] ss:$2 sm:$0xff] }
 0x2d3   :  { %v10469_v60 = vcombine.low %v10447_v56, %v10454_v10  ;;  %v15534_v29 = vrot.slane %v9158_v19, %v14076_v4  ;;  %v15536_v13 = vmul.f32 0.125, %v7072_v16  ;;  %v7856_v27 = vadd.f32 %v7855_v62, %v15466_v55  ;;  %6469 = vmatpush1.bf16.msra.mxu0 %v13520_v58  ;;  %6510 = vmatpush1.bf16.msra.mxu1 %v13523_v42  ;;  %v13529_v19 = vld [vmem:[#allocation2 + $0x468] ss:$392 sps:$4 sm:$0xff]   ;;  %v13535_v10 = vld [vmem:[#allocation2 + $0x778] ss:$392 sps:$4 sm:$0xff]  }
 0x2d4   :  { %v10470_v33 = vcombine.low %v10461_v50, %v10468_v51  ;;  %v9159_v20 = vcombine.low %v15463_v36, %v13791_v14  ;;  %v15541_v23 = vmul.f32 0.125, %v15477_v53  ;;  %v7868_v6 = vadd.f32 %v7867_v31, %v15470_v22  ;;  %6470 = vmatprep.subr.bf16.mxu0 %v13528_v12  ;;  %6511 = vmatprep.subr.bf16.mxu1 %v13531_v9  ;;  %v13534_v36 = vld [vmem:[#allocation2 + $0x774] ss:$392 sps:$4 sm:$0xff]   ;;  %v13540_v51 = vld [vmem:[#allocation2 + $0xa84] ss:$392 sps:$4 sm:$0xff]  }
 0x2d5   :  { %v10477_v16 = vrot.slane %v10469_v60, %v14076_v4  ;;  %v8179_v41 = vmul.f32 0.125, %v7856_v27  ;;  %v8277_v55 = vmul.f32 %v15536_v13, %v15536_v13  ;;  %v15550_v62 = vmul.f32 0.125, %v15480_v52  ;;  %v13537_v53 = vld [vmem:[#allocation2 + $0x77c] ss:$392 sps:$4 sm:$0xff]   ;;  %6500 = vmatprep.mubr.bf16.mxu0 %v16700_v57  ;;  %6541 = vmatprep.mubr.bf16.mxu1 %v16700_v57  ;;  %v13538_v27 = vld [vmem:[#allocation2 + $0xa80] ss:$392 sps:$4 sm:$0xff]  }
 0x2d6   :  { %v10484_v7 = vrot.slane %v10470_v33, %v14076_v4  ;;  %v15555_v22 = vrot.slane %v9159_v20, %v14076_v4  ;;  %v8181_v31 = vmul.f32 0.125, %v7868_v6  ;;  %v8279_v58 = vmul.f32 %v15541_v23, %v15541_v23 }
 0x2d7   :  { %v8375_v11 = vsub.f32 %v8179_v41, %v8277_v55  ;;  %v7861_v52 = vrot.slane %v15472_v15, 1  ;;  %v7085_v44 = vrot.slane %v15454_v17, 4  ;;  %6471 = vmatpush1.bf16.msra.mxu0 %v13526_v32  ;;  %v15566_v56 = vmul.f32 %v15454_v17, %v15454_v17  ;;  %6512 = vmatpush1.bf16.msra.mxu1 %v13529_v19  ;;  %v13543_v32 = vld [vmem:[#allocation2 + $0xa8c] ss:$392 sps:$4 sm:$0xff]  }
 0x2d8   :  { %v10485_v18 = vcombine.low %v10477_v16, %v10484_v7  ;;  %v8377_v12 = vsub.f32 %v8181_v31, %v8279_v58  ;;  %6472 = vmatprep.subr.bf16.mxu0 %v13534_v36  ;;  %6513 = vmatprep.subr.bf16.mxu1 %v13537_v53  ;;  %v15574_v60 = vmul.f32 %v15550_v62, %v15550_v62  ;;  %v13541_v36 = vld [vmem:[#allocation2 + $0xa88] ss:$392 sps:$4 sm:$0xff]   ;;  %v13546_v53 = vld [vmem:[#allocation2 + $0xd94] ss:$392 sps:$4 sm:$0xff]  }
 0x2d9   :  { %v8473_v38 = vmax.f32 %v8375_v11, 0.0  ;;  %v7862_v9 = vadd.f32 %v7861_v52, %v15472_v15  ;;  %v15570_v50 = vadd.f32 %v7085_v44, %v15454_v17  ;;  %v7869_v15 = vrot.slane %v15566_v56, 4  ;;  %v13549_v11 = vld [vmem:[#allocation2 + $0xd9c] ss:$392 sps:$4 sm:$0xff]  }
 0x2da   :  { %v10813_v43 = vsub.f32 %v8751_v3, %v10485_v18  ;;  %v8475_v14 = vmax.f32 %v8377_v12, 0.0  ;;  %v13544_v12 = vld [vmem:[#allocation2 + $0xd90] ss:$392 sps:$4 sm:$0xff]  }
 0x2db   :  { %v8571_v33 = vadd.f32 1e-05, %v8473_v38  ;;  %v15576_v20 = vmul.f32 0.125, %v7862_v9  ;;  %v7087_v6 = vrot.slane %v15570_v50, 2  ;;  %6473 = vmatpush1.bf16.msra.mxu0 %v13532_v59  ;;  %6514 = vmatpush1.bf16.msra.mxu1 %v13535_v10  ;;  %v13547_v10 = vld [vmem:[#allocation2 + $0xd98] ss:$392 sps:$4 sm:$0xff]  }
 0x2dc   :  { %v11095_v19 = vrot.slane %v10813_v43, %v14140_v45  ;;  %v11099_v16 = vrot.slane %v10813_v43, %v14143_v46  ;;  %v11103_v41 = vrot.slane %v10813_v43, %v14146_v47  ;;  %v11107_v55 = vrot.slane %v10813_v43, %v14149_v48  ;;  %6474 = vmatprep.subr.bf16.mxu0 %v13540_v51 }
 0x2dd   :  { %v11111_v7 = vrot.slane %v10813_v43, %v14152_v49  ;;  %v11115_v31 = vrot.slane %v10813_v43, %v14191_v24  ;;  %v11119_v58 = vrot.slane %v10813_v43, %v14207_v8  ;;  %v11123_v3 = vrot.slane %v10813_v43, %v14213_v1  ;;  %6515 = vmatprep.subr.bf16.mxu1 %v13543_v32  ;;  %v15592_v38 = vpop.f32.mrb[56].mxu0 }
 0x2de   :  { %v11462_v52 = vadd.f32 %v11095_v19, %v15499_v26  ;;  %v11463_v44 = vadd.f32 %v11099_v16, %v15502_v5  ;;  %v11464_v59 = vadd.f32 %v11103_v41, %v15505_v39  ;;  %v11465_v18 = vadd.f32 %v11107_v55, %v15508_v34  ;;  %v15598_v26 = vpop.f32.mrb[56].mxu1  ;;  %v15600_v5 = vpop.f32.mrb[57].mxu0  ;;  %v13552_v39 = vld [vmem:[#allocation2 + $0x10a4] ss:$392 sps:$4 sm:$0xff]  }
 0x2df   :  { %v11466_v9 = vadd.f32 %v11111_v7, %v15513_v35  ;;  %v11467_v42 = vadd.f32 %v11115_v31, %v15516_v54  ;;  %v11468_v51 = vadd.f32 %v11119_v58, %v15527_v28  ;;  %v11469_v43 = vadd.f32 %v11123_v3, %v15530_v37  ;;  %6475 = vmatpush1.bf16.msra.mxu0 %v13538_v27  ;;  %v13555_v34 = vld [vmem:[#allocation2 + $0x10ac] ss:$392 sps:$4 sm:$0xff]   ;;  %v15602_v35 = vpop.f32.mrb[57].mxu1  ;;  %v5932_v54 = vpop.f32.mrb[58].mxu0 }
 0x2e0   :  { %v11560_v32 = vmax.f32 %v11462_v52, 0.0  ;;  %v11561_v19 = vmax.f32 %v11463_v44, 0.0  ;;  %v11562_v16 = vmax.f32 %v11464_v59, 0.0  ;;  %v11563_v41 = vmax.f32 %v11465_v18, 0.0  ;;  %6516 = vmatpush1.bf16.msra.mxu1 %v13541_v36  ;;  %6476 = vmatprep.subr.bf16.mxu0 %v13546_v53  ;;  %v5933_v27 = vpop.f32.mrb[59].mxu0  ;;  %v5973_v31 = vpop.f32.mrb[58].mxu1 }
 0x2e1   :  { %v11564_v55 = vmax.f32 %v11466_v9, 0.0  ;;  %v11565_v28 = vmax.f32 %v11467_v42, 0.0  ;;  %v11566_v7 = vmax.f32 %v11468_v51, 0.0  ;;  %v11567_v37 = vmax.f32 %v11469_v43, 0.0  ;;  %6517 = vmatprep.subr.bf16.mxu1 %v13549_v11  ;;  %v5974_v58 = vpop.f32.mrb[59].mxu1 }
 0x2e2   :  { %11658 = vst [vmem:[%s16652_s3 + $0x140] sm:$0xff] %v11560_v32  ;;  %11659 = vst [vmem:[%s16652_s3 + $0x148] sm:$0xff] %v11561_v19  ;;  %13792 = vrsqrt.f32 %v8571_v33  ;;  %v8573_v42 = vadd.f32 1e-05, %v8475_v14  ;;  %v8376_v36 = vsub.f32 %v15576_v20, %v15574_v60  ;;  %v7088_v53 = vadd.f32 %v7087_v6, %v15570_v50  ;;  %v13550_v20 = vld [vmem:[#allocation2 + $0x10a0] ss:$392 sps:$4 sm:$0xff]  }
 0x2e3   :  { %11660 = vst [vmem:[%s16652_s3 + $0x150] sm:$0xff] %v11562_v16  ;;  %11661 = vst [vmem:[%s16652_s3 + $0x158] sm:$0xff] %v11563_v41  ;;  %v7870_v14 = vadd.f32 %v7869_v15, %v15566_v56  ;;  %6477 = vmatpush1.bf16.msra.mxu0 %v13544_v12  ;;  %v7091_v50 = vrot.slane %v15592_v38, 4  ;;  %v7497_v60 = vmul.f32 %v15592_v38, %v15592_v38  ;;  %v7103_v33 = vrot.slane %v15598_v26, 4  ;;  %v13553_v52 = vld [vmem:[#allocation2 + $0x10a8] ss:$392 sps:$4 sm:$0xff]  }
 0x2e4   :  { %11662 = vst [vmem:[%s16652_s3 + $0x160] sm:$0xff] %v11564_v55  ;;  %11663 = vst [vmem:[%s16652_s3 + $0x168] sm:$0xff] %v11565_v28  ;;  %13794 = vrsqrt.f32 %v8573_v42  ;;  %v8474_v6 = vmax.f32 %v8376_v36, 0.0  ;;  %v7089_v3 = vrot.slane %v7088_v53, 1  ;;  %6518 = vmatpush1.bf16.msra.mxu1 %v13547_v10  ;;  %v7499_v11 = vmul.f32 %v15598_v26, %v15598_v26  ;;  %6478 = vmatprep.subr.bf16.mxu0 %v13552_v39  ;;  %v13558_v44 = vld [vmem:[#allocation2 + $0x13b4] ss:$392 sps:$4 sm:$0xff]  }
 0x2e5   :  { %11664 = vst [vmem:[%s16652_s3 + $0x170] sm:$0xff] %v11566_v7  ;;  %11665 = vst [vmem:[%s16652_s3 + $0x178] sm:$0xff] %v11567_v37  ;;  %v7871_v56 = vrot.slane %v7870_v14, 2  ;;  %v7092_v15 = vadd.f32 %v7091_v50, %v15592_v38  ;;  %v7875_v59 = vrot.slane %v7497_v60, 4  ;;  %v7104_v18 = vadd.f32 %v7103_v33, %v15598_v26  ;;  %6519 = vmatprep.subr.bf16.mxu1 %v13555_v34  ;;  %v13561_v12 = vld [vmem:[#allocation2 + $0x13bc] ss:$392 sps:$4 sm:$0xff]  }
 0x2e6   :  { %v8572_v9 = vadd.f32 1e-05, %v8474_v6  ;;  %v7090_v51 = vadd.f32 %v7089_v3, %v7088_v53  ;;  %v7887_v43 = vrot.slane %v7499_v11, 4  ;;  %v7097_v32 = vrot.slane %v15600_v5, 4  ;;  %v13556_v39 = vld [vmem:[#allocation2 + $0x13b0] ss:$392 sps:$4 sm:$0xff]  }
 0x2e7   :  { %v7872_v10 = vadd.f32 %v7871_v56, %v7870_v14  ;;  %v7093_v19 = vrot.slane %v7092_v15, 2  ;;  %v7876_v16 = vadd.f32 %v7875_v59, %v7497_v60  ;;  %v7105_v41 = vrot.slane %v7104_v18, 2  ;;  %6479 = vmatpush1.bf16.msra.mxu0 %v13550_v20  ;;  %v13559_v34 = vld [vmem:[#allocation2 + $0x13b8] ss:$392 sps:$4 sm:$0xff]   ;;  %v13564_v7 = vld [vmem:[#allocation2 + $0x16c4] ss:$392 sps:$4 sm:$0xff]  }
 0x2e8   :  { %13796 = vrsqrt.f32 %v8572_v9  ;;  %v15641_v54 = vmul.f32 0.125, %v7090_v51  ;;  %v7888_v55 = vadd.f32 %v7887_v43, %v7499_v11  ;;  %v7098_v28 = vadd.f32 %v7097_v32, %v15600_v5  ;;  %6520 = vmatpush1.bf16.msra.mxu1 %v13553_v52  ;;  %6480 = vmatprep.subr.bf16.mxu0 %v13558_v44  ;;  %v13567_v36 = vld [vmem:[#allocation2 + $0x16cc] ss:$392 sps:$4 sm:$0xff]   ;;  %v13562_v3 = vld [vmem:[#allocation2 + $0x16c0] ss:$392 sps:$4 sm:$0xff]  }
 0x2e9   :  { %v7873_v37 = vrot.slane %v7872_v10, 1  ;;  %v7094_v27 = vadd.f32 %v7093_v19, %v7092_v15  ;;  %v7877_v31 = vrot.slane %v7876_v16, 2  ;;  %v7106_v42 = vadd.f32 %v7105_v41, %v7104_v18  ;;  %6521 = vmatprep.subr.bf16.mxu1 %v13561_v12  ;;  %v13565_v59 = vld [vmem:[#allocation2 + $0x16c8] ss:$392 sps:$4 sm:$0xff]   ;;  %v13570_v18 = vld [vmem:[#allocation2 + $0x164] ss:$392 sps:$4 sm:$0xff]  }
 0x2ea   :  { %v8280_v53 = vmul.f32 %v15641_v54, %v15641_v54  ;;  %v7889_v58 = vrot.slane %v7888_v55, 2  ;;  %v7099_v14 = vrot.slane %v7098_v28, 2  ;;  %v7498_v50 = vmul.f32 %v15600_v5, %v15600_v5  ;;  %v13573_v32 = vld [vmem:[#allocation2 + $0x16c] ss:$392 sps:$4 sm:$0xff]  }
 0x2eb   :  { %v7874_v60 = vadd.f32 %v7873_v37, %v7872_v10  ;;  %v7095_v33 = vrot.slane %v7094_v27, 1  ;;  %v7878_v20 = vadd.f32 %v7877_v31, %v7876_v16  ;;  %v7107_v6 = vrot.slane %v7106_v42, 1  ;;  %6481 = vmatpush1.bf16.msra.mxu0 %v13556_v39  ;;  %v13568_v37 = vld [vmem:[#allocation2 + $0x160] ss:$392 sps:$4 sm:$0xff]  }
 0x2ec   :  { %v15648_v11 = vpop.eup %13792  ;;  %v7890_v52 = vadd.f32 %v7889_v58, %v7888_v55  ;;  %v7100_v44 = vadd.f32 %v7099_v14, %v7098_v28  ;;  %v7881_v56 = vrot.slane %v7498_v50, 4  ;;  %v7109_v15 = vrot.slane %v15602_v35, 4  ;;  %6522 = vmatpush1.bf16.msra.mxu1 %v13559_v34  ;;  %6482 = vmatprep.subr.bf16.mxu0 %v13564_v7  ;;  %v13571_v58 = vld [vmem:[#allocation2 + $0x168] ss:$392 sps:$4 sm:$0xff]   ;;  %v13576_v14 = vld [vmem:[#allocation2 + $0x474] ss:$392 sps:$4 sm:$0xff]  }
 0x2ed   :  { %v8182_v12 = vmul.f32 0.125, %v7874_v60  ;;  %v7096_v9 = vadd.f32 %v7095_v33, %v7094_v27  ;;  %v7879_v51 = vrot.slane %v7878_v20, 1  ;;  %v7108_v43 = vadd.f32 %v7107_v6, %v7106_v42  ;;  %6523 = vmatprep.subr.bf16.mxu1 %v13567_v36 }
 0x2ee   :  { %v15651_v10 = vpop.eup %13794  ;;  %v7891_v19 = vrot.slane %v7890_v52, 1  ;;  %v7101_v16 = vrot.slane %v7100_v44, 1  ;;  %v7882_v41 = vadd.f32 %v7881_v56, %v7498_v50  ;;  %v7110_v39 = vadd.f32 %v7109_v15, %v15602_v35 }
 0x2ef   :  { %v8378_v55 = vsub.f32 %v8182_v12, %v8280_v53  ;;  %v15654_v28 = vmul.f32 0.125, %v7096_v9  ;;  %v7880_v34 = vadd.f32 %v7879_v51, %v7878_v20  ;;  %v15656_v7 = vmul.f32 0.125, %v7108_v43  ;;  %6483 = vmatpush1.bf16.msra.mxu0 %v13562_v3  ;;  %v13579_v20 = vld [vmem:[#allocation2 + $0x47c] ss:$392 sps:$4 sm:$0xff]   ;;  %v13574_v9 = vld [vmem:[#allocation2 + $0x470] ss:$392 sps:$4 sm:$0xff]  }
 0x2f0   :  { %v7892_v27 = vadd.f32 %v7891_v19, %v7890_v52  ;;  %v7102_v31 = vadd.f32 %v7101_v16, %v7100_v44  ;;  %v7883_v42 = vrot.slane %v7882_v41, 2  ;;  %v7111_v36 = vrot.slane %v7110_v39, 2  ;;  %6524 = vmatpush1.bf16.msra.mxu1 %v13565_v59  ;;  %6550 = vmatprep.subr.bf16.mxu0 %v13570_v18  ;;  %v13582_v19 = vld [vmem:[#allocation2 + $0x784] ss:$392 sps:$4 sm:$0xff]  }
 0x2f1   :  { %v8476_v60 = vmax.f32 %v8378_v55, 0.0  ;;  %v8183_v50 = vmul.f32 0.125, %v7880_v34  ;;  %v8281_v53 = vmul.f32 %v15654_v28, %v15654_v28  ;;  %v8283_v33 = vmul.f32 %v15656_v7, %v15656_v7  ;;  %6591 = vmatprep.subr.bf16.mxu1 %v13573_v32  ;;  %v13577_v32 = vld [vmem:[#allocation2 + $0x478] ss:$392 sps:$4 sm:$0xff]  }
 0x2f2   :  { %v15662_v6 = vpop.eup %13796  ;;  %v8185_v3 = vmul.f32 0.125, %v7892_v27  ;;  %v15664_v52 = vmul.f32 0.125, %v7102_v31  ;;  %v7884_v44 = vadd.f32 %v7883_v42, %v7882_v41  ;;  %v7112_v56 = vadd.f32 %v7111_v36, %v7110_v39  ;;  %6501 = vmatmul.mubr.bf16.vlgmr.msra.gmra.mrb[84].mxu0 %v15521_v21  ;;  %v13580_v31 = vld [vmem:[#allocation2 + $0x780] ss:$392 sps:$4 sm:$0xff]  }
 0x2f3   :  { %v9160_v15 = vcombine.low %v15648_v11, %v15662_v6  ;;  %v8574_v59 = vadd.f32 1e-05, %v8476_v60  ;;  %v8379_v18 = vsub.f32 %v8183_v50, %v8281_v53  ;;  %v7500_v12 = vmul.f32 %v15602_v35, %v15602_v35  ;;  %6542 = vmatmul.mubr.bf16.vlgmr.msra.gmra.mrb[84].mxu1 %v15521_v21  ;;  %6551 = vmatpush1.bf16.msra.mxu0 %v13568_v37  ;;  %v13585_v11 = vld [vmem:[#allocation2 + $0x78c] ss:$392 sps:$4 sm:$0xff]   ;;  %v13583_v36 = vld [vmem:[#allocation2 + $0x788] ss:$392 sps:$4 sm:$0xff]  }
 0x2f4   :  { %v7885_v51 = vrot.slane %v7884_v44, 1  ;;  %v7113_v43 = vrot.slane %v7112_v56, 1  ;;  %6592 = vmatpush1.bf16.msra.mxu1 %v13571_v58  ;;  %6552 = vmatprep.subr.bf16.mxu0 %v13576_v14  ;;  %v8381_v16 = vsub.f32 %v8185_v3, %v8283_v33  ;;  %v8282_v34 = vmul.f32 %v15664_v52, %v15664_v52  ;;  %v13588_v58 = vld [vmem:[#allocation2 + $0xa94] ss:$392 sps:$4 sm:$0xff]   ;;  %v13586_v3 = vld [vmem:[#allocation2 + $0xa90] ss:$392 sps:$4 sm:$0xff]  }
 0x2f5   :  { %13798 = vrsqrt.f32 %v8574_v59  ;;  %v7893_v41 = vrot.slane %v7500_v12, 4  ;;  %6593 = vmatprep.subr.bf16.mxu1 %v13579_v20  ;;  %6582 = vmatprep.mubr.bf16.mxu0 %v16700_v57  ;;  %v8477_v39 = vmax.f32 %v8379_v18, 0.0  ;;  %v13591_v50 = vld [vmem:[#allocation2 + $0xa9c] ss:$392 sps:$4 sm:$0xff]  }
 0x2f6   :  { %v7886_v55 = vadd.f32 %v7885_v51, %v7884_v44  ;;  %6623 = vmatprep.mubr.bf16.mxu1 %v16700_v57  ;;  %v7114_v37 = vadd.f32 %v7113_v43, %v7112_v56  ;;  %v8479_v14 = vmax.f32 %v8381_v16, 0.0  ;;  %v13589_v56 = vld [vmem:[#allocation2 + $0xa98] ss:$392 sps:$4 sm:$0xff]   ;;  %v13594_v59 = vld [vmem:[#allocation2 + $0xda4] ss:$392 sps:$4 sm:$0xff]  }
 0x2f7   :  { %v7894_v27 = vadd.f32 %v7893_v41, %v7500_v12  ;;  %6553 = vmatpush1.bf16.msra.mxu0 %v13574_v9  ;;  %v8575_v53 = vadd.f32 1e-05, %v8477_v39  ;;  %v13597_v9 = vld [vmem:[#allocation2 + $0xdac] ss:$392 sps:$4 sm:$0xff]   ;;  %v13592_v16 = vld [vmem:[#allocation2 + $0xda0] ss:$392 sps:$4 sm:$0xff]   ;;  %v16753_v41 = vcombine.low %v15534_v29, %v15555_v22  ;;  %v9182_v39 = vrot.slane %v9160_v15, %v14076_v4 }
 0x2f8   :  { %v8184_v42 = vmul.f32 0.125, %v7886_v55  ;;  %6594 = vmatpush1.bf16.msra.mxu1 %v13577_v32  ;;  %6554 = vmatprep.subr.bf16.mxu0 %v13582_v19  ;;  %v15676_v20 = vmul.f32 0.125, %v7114_v37  ;;  %v8577_v18 = vadd.f32 1e-05, %v8479_v14 }
 0x2f9   :  { %v7895_v60 = vrot.slane %v7894_v27, 2  ;;  %6595 = vmatprep.subr.bf16.mxu1 %v13585_v11  ;;  %13800 = vrsqrt.f32 %v8575_v53  ;;  %v15684_v11 = vrot.slane %v16753_v41, %v14076_v4 }
 0x2fa   :  { %v8380_v33 = vsub.f32 %v8184_v42, %v8282_v34  ;;  %v8284_v19 = vmul.f32 %v15676_v20, %v15676_v20  ;;  %v13595_v34 = vld [vmem:[#allocation2 + $0xda8] ss:$392 sps:$4 sm:$0xff]  }
 0x2fb   :  { %v7896_v6 = vadd.f32 %v7895_v60, %v7894_v27  ;;  %6555 = vmatpush1.bf16.msra.mxu0 %v13580_v31  ;;  %v13600_v27 = vld [vmem:[#allocation2 + $0x10b4] ss:$392 sps:$4 sm:$0xff]  }
 0x2fc   :  { %v8478_v44 = vmax.f32 %v8380_v33, 0.0  ;;  %6596 = vmatpush1.bf16.msra.mxu1 %v13583_v36  ;;  %6556 = vmatprep.subr.bf16.mxu0 %v13588_v58 }
 0x2fd   :  { %v7897_v12 = vrot.slane %v7896_v6, 1  ;;  %6597 = vmatprep.subr.bf16.mxu1 %v13591_v50 }
 0x2fe   :  { %v8576_v51 = vadd.f32 1e-05, %v8478_v44 }
 0x2ff   :  { %v13799_v43 = vpop.eup %13798  ;;  %v7898_v32 = vadd.f32 %v7897_v12, %v7896_v6  ;;  %6557 = vmatpush1.bf16.msra.mxu0 %v13586_v3  ;;  %v15688_v37 = vpop.f32.mrb[60].mxu0 }
 0x300   :  { %v9161_v55 = vcombine.low %v15651_v10, %v13799_v43  ;;  %13802 = vrsqrt.f32 %v8576_v51  ;;  %6598 = vmatpush1.bf16.msra.mxu1 %v13589_v56  ;;  %6558 = vmatprep.subr.bf16.mxu0 %v13594_v59  ;;  %16754 = vst [vmem:[#allocation14_spill] sm:$0xff] %v15688_v37  ;;  %v7115_v42 = vrot.slane %v15688_v37, 4  ;;  %v7501_v29 = vmul.f32 %v15688_v37, %v15688_v37  ;;  %v15693_v22 = vpop.f32.mrb[60].mxu1  ;;  %v15695_v15 = vpop.f32.mrb[61].mxu0  ;;  %v13603_v10 = vld [vmem:[#allocation2 + $0x10bc] ss:$392 sps:$4 sm:$0xff]  }
 0x301   :  { %13804 = vrsqrt.f32 %v8577_v18  ;;  %v8186_v31 = vmul.f32 0.125, %v7898_v32  ;;  %6599 = vmatprep.subr.bf16.mxu1 %v13597_v9  ;;  %16755 = vst [vmem:[#allocation12_spill] sm:$0xff] %v15693_v22  ;;  %16756 = vst [vmem:[#allocation15_spill] sm:$0xff] %v15695_v15  ;;  %v7127_v58 = vrot.slane %v15693_v22, 4  ;;  %v7503_v14 = vmul.f32 %v15693_v22, %v15693_v22  ;;  %v15702_v50 = vpop.f32.mrb[61].mxu1  ;;  %v6014_v53 = vpop.f32.mrb[62].mxu0 }
 0x302   :  { %v9189_v36 = vrot.slane %v9161_v55, %v14076_v4  ;;  %v7121_v60 = vrot.slane %v15695_v15, 4  ;;  %v7116_v6 = vadd.f32 %v7115_v42, %v15688_v37  ;;  %v7899_v3 = vrot.slane %v7501_v29, 4  ;;  %v13598_v56 = vld [vmem:[#allocation2 + $0x10b0] ss:$392 sps:$4 sm:$0xff]   ;;  %v6015_v59 = vpop.f32.mrb[63].mxu0  ;;  %v6055_v18 = vpop.f32.mrb[62].mxu1 }
 0x303   :  { %v8382_v33 = vsub.f32 %v8186_v31, %v8284_v19  ;;  %6559 = vmatpush1.bf16.msra.mxu0 %v13592_v16  ;;  %v7502_v44 = vmul.f32 %v15695_v15, %v15695_v15  ;;  %v7128_v9 = vadd.f32 %v7127_v58, %v15693_v22  ;;  %v7911_v51 = vrot.slane %v7503_v14, 4  ;;  %v13601_v32 = vld [vmem:[#allocation2 + $0x10b8] ss:$392 sps:$4 sm:$0xff]   ;;  %v13606_v19 = vld [vmem:[#allocation2 + $0x13c4] ss:$392 sps:$4 sm:$0xff]   ;;  %v6056_v16 = vpop.f32.mrb[63].mxu1 }
 0x304   :  { %v9191_v12 = vcombine.low %v9182_v39, %v9189_v36  ;;  %6600 = vmatpush1.bf16.msra.mxu1 %v13595_v34  ;;  %v7122_v43 = vadd.f32 %v7121_v60, %v15695_v15  ;;  %6560 = vmatprep.subr.bf16.mxu0 %v13600_v27  ;;  %v7117_v55 = vrot.slane %v7116_v6, 2  ;;  %v7900_v31 = vadd.f32 %v7899_v3, %v7501_v29  ;;  %v13609_v53 = vld [vmem:[#allocation2 + $0x13cc] ss:$392 sps:$4 sm:$0xff]   ;;  %v13604_v27 = vld [vmem:[#allocation2 + $0x13c0] ss:$392 sps:$4 sm:$0xff]   ;;  %v15710_v15 = vpop.eup %13800 }
 0x305   :  { %v8480_v41 = vmax.f32 %v8382_v33, 0.0  ;;  %v7905_v42 = vrot.slane %v7502_v44, 4  ;;  %6601 = vmatprep.subr.bf16.mxu1 %v13603_v10  ;;  %v8727_v37 = vld [vmem:[#allocation4 + $0x60] ss:$2 sm:$0xff]  ;;  %v7129_v39 = vrot.slane %v7128_v9, 2  ;;  %v7912_v34 = vadd.f32 %v7911_v51, %v7503_v14 }
 0x306   :  { %v9205_v59 = vrot.slane %v9191_v12, %v14076_v4  ;;  %v7123_v36 = vrot.slane %v7122_v43, 2  ;;  %v7118_v18 = vadd.f32 %v7117_v55, %v7116_v6  ;;  %v7901_v22 = vrot.slane %v7900_v31, 2  ;;  %v13607_v12 = vld [vmem:[#allocation2 + $0x13c8] ss:$392 sps:$4 sm:$0xff]  }
 0x307   :  { %v8578_v58 = vadd.f32 1e-05, %v8480_v41  ;;  %v7906_v60 = vadd.f32 %v7905_v42, %v7502_v44  ;;  %6561 = vmatpush1.bf16.msra.mxu0 %v13598_v56  ;;  %v15713_v29 = vadd.f32 %v7129_v39, %v7128_v9  ;;  %v7913_v10 = vrot.slane %v7912_v34, 2  ;;  %v13612_v44 = vld [vmem:[#allocation2 + $0x16d4] ss:$392 sps:$4 sm:$0xff]  }
 0x308   :  { %v9206_v33 = vcombine.low %v15684_v11, %v9205_v59  ;;  %v15715_v3 = vadd.f32 %v7123_v36, %v7122_v43  ;;  %6602 = vmatpush1.bf16.msra.mxu1 %v13601_v32  ;;  %6562 = vmatprep.subr.bf16.mxu0 %v13606_v19  ;;  %v7119_v14 = vrot.slane %v7118_v18, 1  ;;  %v15717_v51 = vadd.f32 %v7901_v22, %v7900_v31  ;;  %v13615_v41 = vld [vmem:[#allocation2 + $0x16dc] ss:$392 sps:$4 sm:$0xff]   ;;  %v13610_v42 = vld [vmem:[#allocation2 + $0x16d0] ss:$392 sps:$4 sm:$0xff]  }
 0x309   :  { %13806 = vrsqrt.f32 %v8578_v58  ;;  %v7907_v6 = vrot.slane %v7906_v60, 2  ;;  %6603 = vmatprep.subr.bf16.mxu1 %v13609_v53  ;;  %v15722_v9 = vadd.f32 %v7913_v10, %v7912_v34  ;;  %v13613_v34 = vld [vmem:[#allocation2 + $0x16d8] ss:$392 sps:$4 sm:$0xff]  }
 0x30a   :  { %v15719_v56 = vpop.eup %13802  ;;  %v9486_v16 = vmul.f32 %v9206_v33, %v8727_v37  ;;  %v7120_v22 = vadd.f32 %v7119_v14, %v7118_v18  ;;  %v7903_v55 = vrot.slane %v15717_v51, 1 }
 0x30b   :  { %v15725_v32 = vpop.eup %13804  ;;  %v9207_v19 = vcombine.low %v15710_v15, %v15719_v56  ;;  %v15730_v31 = vadd.f32 %v7907_v6, %v7906_v60  ;;  %6563 = vmatpush1.bf16.msra.mxu0 %v13604_v27  ;;  %v13618_v60 = vld [vmem:[#allocation2 + $0x174] ss:$392 sps:$4 sm:$0xff]  }
 0x30c   :  { %v9701_v37 = vrot.slane %v9486_v16, %v14140_v45  ;;  %v9705_v53 = vrot.slane %v9486_v16, %v14143_v46  ;;  %v9709_v59 = vrot.slane %v9486_v16, %v14146_v47  ;;  %v9713_v39 = vrot.slane %v9486_v16, %v14149_v48  ;;  %6604 = vmatpush1.bf16.msra.mxu1 %v13607_v12 }
 0x30d   :  { %v9717_v36 = vrot.slane %v9486_v16, %v14152_v49  ;;  %v9721_v15 = vrot.slane %v9486_v16, %v14191_v24  ;;  %v9725_v58 = vrot.slane %v9486_v16, %v14207_v8  ;;  %v9729_v18 = vrot.slane %v9486_v16, %v14213_v1  ;;  %6564 = vmatprep.subr.bf16.mxu0 %v13612_v44 }
 0x30e   :  { %v10044_v27 = vmul.f32 %v9701_v37, %v15402_v40  ;;  %v10045_v33 = vmul.f32 %v9705_v53, %v15415_v0  ;;  %v10046_v10 = vmul.f32 %v9709_v59, %v15404_v25  ;;  %v10047_v14 = vmul.f32 %v9713_v39, %v15424_v30  ;;  %6605 = vmatprep.subr.bf16.mxu1 %v13615_v41  ;;  %v13616_v25 = vld [vmem:[#allocation2 + $0x170] ss:$392 sps:$4 sm:$0xff]   ;;  %v13621_v30 = vld [vmem:[#allocation2 + $0x17c] ss:$392 sps:$4 sm:$0xff]  }
 0x30f   :  { %v10048_v12 = vmul.f32 %v9717_v36, %v15536_v13  ;;  %v10049_v6 = vmul.f32 %v9721_v15, %v15550_v62  ;;  %v10050_v56 = vmul.f32 %v9725_v58, %v15541_v23  ;;  %v10051_v43 = vmul.f32 %v9729_v18, %v15641_v54  ;;  %6565 = vmatpush1.bf16.msra.mxu0 %v13610_v42  ;;  %v16757_v23 = vld [vmem:[#allocation8_spill] sm:$0xff]  ;;  %v13619_v54 = vld [vmem:[#allocation2 + $0x178] ss:$392 sps:$4 sm:$0xff]  }
 0x310   :  { %v10486_v44 = vcombine.low %v10044_v27, %v10045_v33  ;;  %v10487_v16 = vcombine.low %v10046_v10, %v10047_v14  ;;  %v15749_v40 = vmul.f32 %v9701_v37, %v15339_v61  ;;  %v15752_v0 = vmul.f32 %v9705_v53, %v15347_v2  ;;  %6606 = vmatpush1.bf16.msra.mxu1 %v13613_v34  ;;  %v13624_v42 = vld [vmem:[#allocation2 + $0x484] ss:$392 sps:$4 sm:$0xff]  }
 0x311   :  { %v10488_v41 = vcombine.low %v10048_v12, %v10049_v6  ;;  %v10489_v13 = vcombine.low %v10050_v56, %v10051_v43  ;;  %v15755_v62 = vmul.f32 %v9709_v59, %v15345_v63  ;;  %v15758_v11 = vmul.f32 %v9713_v39, %v16757_v23  ;;  %6632 = vmatprep.subr.bf16.mxu0 %v13618_v60  ;;  %v16758_v2 = vld [vmem:[#allocation17_spill] sm:$0xff]  ;;  %v16760_v60 = vld [vmem:[#allocation11_spill] sm:$0xff] }
 0x312   :  { %v10496_v61 = vrot.slane %v10486_v44, %v14076_v4  ;;  %v10503_v37 = vrot.slane %v10487_v16, %v14076_v4  ;;  %v15763_v53 = vmul.f32 %v9717_v36, %v16758_v2  ;;  %v16759_v34 = vld [vmem:[#allocation13_spill] sm:$0xff]  ;;  %6583 = vmatmul.mubr.bf16.vlgmr.msra.gmra.mrb[88].mxu0 %v15521_v21  ;;  %v15772_v33 = vmul.f32 %v9725_v58, %v16760_v60  ;;  %v13622_v6 = vld [vmem:[#allocation2 + $0x480] ss:$392 sps:$4 sm:$0xff]   ;;  %v13630_v44 = vld [vmem:[#allocation2 + $0x794] ss:$392 sps:$4 sm:$0xff]  }
 0x313   :  { %v15766_v27 = vmul.f32 %v9721_v15, %v16759_v34  ;;  %v13627_v63 = vld [vmem:[#allocation2 + $0x48c] ss:$392 sps:$4 sm:$0xff]   ;;  %v13807_v43 = vpop.eup %13806  ;;  %v10510_v59 = vrot.slane %v10488_v41, %v14076_v4  ;;  %v10517_v39 = vrot.slane %v10489_v13, %v14076_v4  ;;  %v15775_v10 = vmul.f32 %v9729_v18, %v15454_v17  ;;  %6624 = vmatmul.mubr.bf16.vlgmr.msra.gmra.mrb[88].mxu1 %v15521_v21 }
 0x314   :  { %v10518_v36 = vcombine.low %v10496_v61, %v10503_v37  ;;  %v15779_v15 = vrot.slane %v9207_v19, %v14076_v4  ;;  %v9208_v14 = vcombine.low %v15725_v32, %v13807_v43  ;;  %v15782_v12 = vmul.f32 0.125, %v7120_v22  ;;  %6673 = vmatprep.subr.bf16.mxu1 %v13621_v30  ;;  %6633 = vmatpush1.bf16.msra.mxu0 %v13616_v25  ;;  %v13625_v19 = vld [vmem:[#allocation2 + $0x488] ss:$392 sps:$4 sm:$0xff]   ;;  %v13631_v43 = vld [vmem:[#allocation2 + $0x798] ss:$392 sps:$4 sm:$0xff]  }
 0x315   :  { %v10519_v56 = vcombine.low %v10510_v59, %v10517_v39  ;;  %v7904_v58 = vadd.f32 %v7903_v55, %v15717_v51  ;;  %v16761_v17 = vrot.slane %v15713_v29, 1  ;;  %v7915_v21 = vrot.slane %v15722_v9, 1  ;;  %6674 = vmatpush1.bf16.msra.mxu1 %v13619_v54  ;;  %6634 = vmatprep.subr.bf16.mxu0 %v13624_v42  ;;  %v8753_v25 = vld [vmem:[#allocation4 + $0x61] ss:$2 sm:$0xff]  ;;  %v13628_v37 = vld [vmem:[#allocation2 + $0x790] ss:$392 sps:$4 sm:$0xff]  }
 0x316   :  { %v10526_v32 = vrot.slane %v10518_v36, %v14076_v4  ;;  %v15791_v22 = vrot.slane %v9208_v14, %v14076_v4  ;;  %v8285_v16 = vmul.f32 %v15782_v12, %v15782_v12  ;;  %v16762_v51 = vrot.slane %v15715_v3, 1  ;;  %6675 = vmatprep.subr.bf16.mxu1 %v13627_v63  ;;  %6664 = vmatprep.mubr.bf16.mxu0 %v16700_v57  ;;  %v13636_v60 = vld [vmem:[#allocation2 + $0xaa4] ss:$392 sps:$4 sm:$0xff]  }
 0x317   :  { %v7132_v18 = vadd.f32 %v16761_v17, %v15713_v29  ;;  %v13633_v29 = vld [vmem:[#allocation2 + $0x79c] ss:$392 sps:$4 sm:$0xff]   ;;  %v10533_v30 = vrot.slane %v10519_v56, %v14076_v4  ;;  %v8187_v41 = vmul.f32 0.125, %v7904_v58  ;;  %v7916_v23 = vadd.f32 %v7915_v21, %v15722_v9  ;;  %6705 = vmatprep.mubr.bf16.mxu1 %v16700_v57  ;;  %v13639_v56 = vld [vmem:[#allocation2 + $0xaac] ss:$392 sps:$4 sm:$0xff]  }
 0x318   :  { %v7126_v55 = vadd.f32 %v16762_v51, %v15715_v3  ;;  %v7909_v3 = vrot.slane %v15730_v31, 1  ;;  %v7133_v61 = vrot.slane %v15702_v50, 4  ;;  %6635 = vmatpush1.bf16.msra.mxu0 %v13622_v6  ;;  %v13634_v21 = vld [vmem:[#allocation2 + $0xaa0] ss:$392 sps:$4 sm:$0xff]  }
 0x319   :  { %v15799_v13 = vmul.f32 0.125, %v7132_v18  ;;  %v10534_v2 = vcombine.low %v10526_v32, %v10533_v30  ;;  %v8383_v34 = vsub.f32 %v8187_v41, %v8285_v16  ;;  %v15810_v63 = vmul.f32 0.125, %v7916_v23  ;;  %6676 = vmatpush1.bf16.msra.mxu1 %v13625_v19  ;;  %6636 = vmatprep.subr.bf16.mxu0 %v13630_v44  ;;  %v13637_v51 = vld [vmem:[#allocation2 + $0xaa8] ss:$392 sps:$4 sm:$0xff]   ;;  %v13645_v23 = vld [vmem:[#allocation2 + $0xdbc] ss:$392 sps:$4 sm:$0xff]  }
 0x31a   :  { %v15806_v42 = vmul.f32 0.125, %v7126_v55  ;;  %v7910_v59 = vadd.f32 %v7909_v3, %v15730_v31  ;;  %v15818_v39 = vadd.f32 %v7133_v61, %v15702_v50  ;;  %6677 = vmatprep.subr.bf16.mxu1 %v13633_v29  ;;  %v15831_v31 = vmul.f32 %v15702_v50, %v15702_v50  ;;  %v13642_v55 = vld [vmem:[#allocation2 + $0xdb4] ss:$392 sps:$4 sm:$0xff]  }
 0x31b   :  { %v15814_v9 = vmul.f32 %v15799_v13, %v15799_v13  ;;  %v10814_v36 = vsub.f32 %v8753_v25, %v10534_v2  ;;  %v8481_v14 = vmax.f32 %v8383_v34, 0.0  ;;  %v13640_v34 = vld [vmem:[#allocation2 + $0xdb0] ss:$392 sps:$4 sm:$0xff]  }
 0x31c   :  { %v15822_v6 = vmul.f32 %v15806_v42, %v15806_v42  ;;  %v15826_v17 = vmul.f32 0.125, %v7910_v59  ;;  %v7135_v18 = vrot.slane %v15818_v39, 2  ;;  %6637 = vmatpush1.bf16.msra.mxu0 %v13628_v37 }
 0x31d   :  { %v8385_v58 = vsub.f32 %v15810_v63, %v15814_v9  ;;  %v11127_v19 = vrot.slane %v10814_v36, %v14140_v45  ;;  %v11131_v44 = vrot.slane %v10814_v36, %v14143_v46  ;;  %v11135_v32 = vrot.slane %v10814_v36, %v14146_v47  ;;  %6678 = vmatpush1.bf16.msra.mxu1 %v13631_v43  ;;  %v13643_v63 = vld [vmem:[#allocation2 + $0xdb8] ss:$392 sps:$4 sm:$0xff]  }
 0x31e   :  { %v11139_v16 = vrot.slane %v10814_v36, %v14149_v48  ;;  %v11143_v29 = vrot.slane %v10814_v36, %v14152_v49  ;;  %v11147_v25 = vrot.slane %v10814_v36, %v14191_v24  ;;  %v11151_v30 = vrot.slane %v10814_v36, %v14207_v8  ;;  %6638 = vmatprep.subr.bf16.mxu0 %v13636_v60 }
 0x31f   :  { %v11155_v41 = vrot.slane %v10814_v36, %v14213_v1  ;;  %v11470_v3 = vadd.f32 %v11127_v19, %v15749_v40  ;;  %v11471_v61 = vadd.f32 %v11131_v44, %v15752_v0  ;;  %v11472_v37 = vadd.f32 %v11135_v32, %v15755_v62  ;;  %6679 = vmatprep.subr.bf16.mxu1 %v13639_v56  ;;  %v15849_v36 = vpop.f32.mrb[64].mxu0  ;;  %v13648_v40 = vld [vmem:[#allocation2 + $0x10c4] ss:$392 sps:$4 sm:$0xff]  }
 0x320   :  { %v11473_v2 = vadd.f32 %v11139_v16, %v15758_v11  ;;  %v11474_v9 = vadd.f32 %v11143_v29, %v15763_v53  ;;  %v11475_v43 = vadd.f32 %v11147_v25, %v15766_v27  ;;  %v11476_v59 = vadd.f32 %v11151_v30, %v15772_v33  ;;  %6639 = vmatpush1.bf16.msra.mxu0 %v13634_v21  ;;  %v13651_v0 = vld [vmem:[#allocation2 + $0x10cc] ss:$392 sps:$4 sm:$0xff]   ;;  %v15851_v56 = vpop.f32.mrb[64].mxu1  ;;  %v15853_v53 = vpop.f32.mrb[65].mxu0 }
 0x321   :  { %v11477_v60 = vadd.f32 %v11155_v41, %v15775_v10  ;;  %v11568_v19 = vmax.f32 %v11470_v3, 0.0  ;;  %v11569_v62 = vmax.f32 %v11471_v61, 0.0  ;;  %v11570_v44 = vmax.f32 %v11472_v37, 0.0  ;;  %6680 = vmatpush1.bf16.msra.mxu1 %v13637_v51  ;;  %6640 = vmatprep.subr.bf16.mxu0 %v13642_v55  ;;  %v15855_v10 = vpop.f32.mrb[65].mxu1  ;;  %v6096_v21 = vpop.f32.mrb[66].mxu0 }
 0x322   :  { %v11571_v11 = vmax.f32 %v11473_v2, 0.0  ;;  %v11572_v27 = vmax.f32 %v11474_v9, 0.0  ;;  %v11573_v32 = vmax.f32 %v11475_v43, 0.0  ;;  %v11574_v33 = vmax.f32 %v11476_v59, 0.0  ;;  %6681 = vmatprep.subr.bf16.mxu1 %v13645_v23  ;;  %16763 = vst [vmem:[#allocation16_spill] sm:$0xff] %v15855_v10  ;;  %v6097_v30 = vpop.f32.mrb[67].mxu0 }
 0x323   :  { %v11575_v16 = vmax.f32 %v11477_v60, 0.0  ;;  %11666 = vst [vmem:[%s16652_s3 + $0x180] sm:$0xff] %v11568_v19  ;;  %11667 = vst [vmem:[%s16652_s3 + $0x188] sm:$0xff] %v11569_v62  ;;  %v8579_v51 = vadd.f32 1e-05, %v8481_v14  ;;  %v8483_v55 = vmax.f32 %v8385_v58, 0.0  ;;  %v8384_v29 = vsub.f32 %v15826_v17, %v15822_v6 }
 0x324   :  { %11668 = vst [vmem:[%s16652_s3 + $0x190] sm:$0xff] %v11570_v44  ;;  %11669 = vst [vmem:[%s16652_s3 + $0x198] sm:$0xff] %v11571_v11  ;;  %v7136_v25 = vadd.f32 %v7135_v18, %v15818_v39  ;;  %v6137_v41 = vpop.f32.mrb[66].mxu1  ;;  %v7917_v39 = vrot.slane %v15831_v31, 4  ;;  %6641 = vmatpush1.bf16.msra.mxu0 %v13640_v34  ;;  %v7139_v14 = vrot.slane %v15849_v36, 4  ;;  %v7505_v6 = vmul.f32 %v15849_v36, %v15849_v36 }
 0x325   :  { %11670 = vst [vmem:[%s16652_s3 + $0x1a0] sm:$0xff] %v11572_v27  ;;  %11671 = vst [vmem:[%s16652_s3 + $0x1a8] sm:$0xff] %v11573_v32  ;;  %v7151_v58 = vrot.slane %v15851_v56, 4  ;;  %v13646_v17 = vld [vmem:[#allocation2 + $0x10c0] ss:$392 sps:$4 sm:$0xff]   ;;  %v6138_v18 = vpop.f32.mrb[67].mxu1  ;;  %13808 = vrsqrt.f32 %v8579_v51  ;;  %6682 = vmatpush1.bf16.msra.mxu1 %v13643_v63  ;;  %6642 = vmatprep.subr.bf16.mxu0 %v13648_v40  ;;  %v7507_v44 = vmul.f32 %v15851_v56, %v15851_v56 }
 0x326   :  { %11672 = vst [vmem:[%s16652_s3 + $0x1b0] sm:$0xff] %v11574_v33  ;;  %11673 = vst [vmem:[%s16652_s3 + $0x1b8] sm:$0xff] %v11575_v16  ;;  %v8482_v23 = vmax.f32 %v8384_v29, 0.0  ;;  %v7137_v3 = vrot.slane %v7136_v25, 1  ;;  %v13649_v61 = vld [vmem:[#allocation2 + $0x10c8] ss:$392 sps:$4 sm:$0xff]   ;;  %v7918_v2 = vadd.f32 %v7917_v39, %v15831_v31  ;;  %v7140_v34 = vadd.f32 %v7139_v14, %v15849_v36  ;;  %6683 = vmatprep.subr.bf16.mxu1 %v13651_v0 }
 0x327   :  { %v13654_v37 = vld [vmem:[#allocation2 + $0x13d4] ss:$392 sps:$4 sm:$0xff]   ;;  %v7923_v9 = vrot.slane %v7505_v6, 4  ;;  %v7152_v43 = vadd.f32 %v7151_v58, %v15851_v56  ;;  %v15892_v60 = vadd.f32 1e-05, %v8483_v55  ;;  %v7935_v16 = vrot.slane %v7507_v44, 4 }
 0x328   :  { %v13657_v59 = vld [vmem:[#allocation2 + $0x13dc] ss:$392 sps:$4 sm:$0xff]   ;;  %v8580_v19 = vadd.f32 1e-05, %v8482_v23  ;;  %v7138_v62 = vadd.f32 %v7137_v3, %v7136_v25  ;;  %v13652_v63 = vld [vmem:[#allocation2 + $0x13d0] ss:$392 sps:$4 sm:$0xff]   ;;  %6643 = vmatpush1.bf16.msra.mxu0 %v13646_v17 }
 0x329   :  { %v7919_v40 = vrot.slane %v7918_v2, 2  ;;  %v7141_v11 = vrot.slane %v7140_v34, 2  ;;  %v7924_v27 = vadd.f32 %v7923_v9, %v7505_v6  ;;  %v7153_v32 = vrot.slane %v7152_v43, 2  ;;  %v13655_v31 = vld [vmem:[#allocation2 + $0x13d8] ss:$392 sps:$4 sm:$0xff]   ;;  %6684 = vmatpush1.bf16.msra.mxu1 %v13649_v61  ;;  %6644 = vmatprep.subr.bf16.mxu0 %v13654_v37 }
 0x32a   :  { %13810 = vrsqrt.f32 %v8580_v19  ;;  %v15896_v33 = vmul.f32 0.125, %v7138_v62  ;;  %v7145_v0 = vrot.slane %v15853_v53, 4  ;;  %v13660_v21 = vld [vmem:[#allocation2 + $0x16e4] ss:$392 sps:$4 sm:$0xff]   ;;  %6685 = vmatprep.subr.bf16.mxu1 %v13657_v59  ;;  %v7936_v39 = vadd.f32 %v7935_v16, %v7507_v44  ;;  %v13658_v58 = vld [vmem:[#allocation2 + $0x16e0] ss:$392 sps:$4 sm:$0xff]  }
 0x32b   :  { %v7920_v51 = vadd.f32 %v7919_v40, %v7918_v2  ;;  %v7142_v55 = vadd.f32 %v7141_v11, %v7140_v34  ;;  %v7925_v29 = vrot.slane %v7924_v27, 2  ;;  %v7154_v25 = vadd.f32 %v7153_v32, %v7152_v43  ;;  %v13663_v30 = vld [vmem:[#allocation2 + $0x16ec] ss:$392 sps:$4 sm:$0xff]   ;;  %v13661_v61 = vld [vmem:[#allocation2 + $0x16e8] ss:$392 sps:$4 sm:$0xff]  }
 0x32c   :  { %v8288_v41 = vmul.f32 %v15896_v33, %v15896_v33  ;;  %v7146_v14 = vadd.f32 %v7145_v0, %v15853_v53  ;;  %v7506_v6 = vmul.f32 %v15853_v53, %v15853_v53  ;;  %6645 = vmatpush1.bf16.msra.mxu0 %v13652_v63  ;;  %v7937_v37 = vrot.slane %v7936_v39, 2  ;;  %v13666_v43 = vld [vmem:[#allocation2 + $0x184] ss:$392 sps:$4 sm:$0xff]  }
 0x32d   :  { %v7921_v17 = vrot.slane %v7920_v51, 1  ;;  %v7143_v18 = vrot.slane %v7142_v55, 1  ;;  %v7926_v23 = vadd.f32 %v7925_v29, %v7924_v27  ;;  %v7155_v3 = vrot.slane %v7154_v25, 1  ;;  %6686 = vmatpush1.bf16.msra.mxu1 %v13655_v31  ;;  %6646 = vmatprep.subr.bf16.mxu0 %v13660_v21  ;;  %v13664_v31 = vld [vmem:[#allocation2 + $0x180] ss:$392 sps:$4 sm:$0xff]  }
 0x32e   :  { %v7147_v2 = vrot.slane %v7146_v14, 2  ;;  %v7929_v34 = vrot.slane %v7506_v6, 4  ;;  %v7157_v9 = vrot.slane %v15855_v10, 4  ;;  %6687 = vmatprep.subr.bf16.mxu1 %v13663_v30  ;;  %v7938_v11 = vadd.f32 %v7937_v37, %v7936_v39  ;;  %v13669_v30 = vld [vmem:[#allocation2 + $0x494] ss:$392 sps:$4 sm:$0xff]  }
 0x32f   :  { %v7922_v59 = vadd.f32 %v7921_v17, %v7920_v51  ;;  %v7144_v19 = vadd.f32 %v7143_v18, %v7142_v55  ;;  %v7927_v62 = vrot.slane %v7926_v23, 1  ;;  %v7156_v44 = vadd.f32 %v7155_v3, %v7154_v25  ;;  %v15905_v40 = vpop.eup %13808 }
 0x330   :  { %v7148_v27 = vadd.f32 %v7147_v2, %v7146_v14  ;;  %v7930_v32 = vadd.f32 %v7929_v34, %v7506_v6  ;;  %v7158_v63 = vadd.f32 %v7157_v9, %v15855_v10  ;;  %6647 = vmatpush1.bf16.msra.mxu0 %v13658_v58  ;;  %v7939_v21 = vrot.slane %v7938_v11, 1  ;;  %v15919_v2 = vld [vmem:[%s16649_s0] sm:$0xf] }
 0x331   :  { %v8190_v16 = vmul.f32 0.125, %v7922_v59  ;;  %v15908_v0 = vmul.f32 0.125, %v7144_v19  ;;  %v7928_v29 = vadd.f32 %v7927_v62, %v7926_v23  ;;  %v15910_v54 = vmul.f32 0.125, %v7156_v44  ;;  %6688 = vmatpush1.bf16.msra.mxu1 %v13661_v61  ;;  %6714 = vmatprep.subr.bf16.mxu0 %v13666_v43  ;;  %v13667_v43 = vld [vmem:[#allocation2 + $0x490] ss:$392 sps:$4 sm:$0xff]  }
 0x332   :  { %v7149_v51 = vrot.slane %v7148_v27, 1  ;;  %v7931_v55 = vrot.slane %v7930_v32, 2  ;;  %v7159_v25 = vrot.slane %v7158_v63, 2  ;;  %v7940_v23 = vadd.f32 %v7939_v21, %v7938_v11  ;;  %v13672_v11 = vld [vmem:[#allocation2 + $0x7a4] ss:$392 sps:$4 sm:$0xff]  }
 0x333   :  { %v8386_v39 = vsub.f32 %v8190_v16, %v8288_v41  ;;  %v8191_v14 = vmul.f32 0.125, %v7928_v29  ;;  %v8289_v6 = vmul.f32 %v15908_v0, %v15908_v0  ;;  %v8291_v17 = vmul.f32 %v15910_v54, %v15910_v54  ;;  %6665 = vmatmul.mubr.bf16.vlgmr.msra.gmra.mrb[92].mxu0 %v15919_v2 }
 0x334   :  { %v13811_v18 = vpop.eup %13810  ;;  %v7150_v3 = vadd.f32 %v7149_v51, %v7148_v27  ;;  %v7932_v58 = vadd.f32 %v7931_v55, %v7930_v32  ;;  %v7160_v37 = vadd.f32 %v7159_v25, %v7158_v63  ;;  %v7508_v9 = vmul.f32 %v15855_v10, %v15855_v10  ;;  %6706 = vmatmul.mubr.bf16.vlgmr.msra.gmra.mrb[92].mxu1 %v15919_v2  ;;  %v13670_v51 = vld [vmem:[#allocation2 + $0x7a0] ss:$392 sps:$4 sm:$0xff]   ;;  %v13675_v25 = vld [vmem:[#allocation2 + $0xab4] ss:$392 sps:$4 sm:$0xff]  }
 0x335   :  { %v9209_v41 = vcombine.low %v15905_v40, %v13811_v18  ;;  %v8484_v61 = vmax.f32 %v8386_v39, 0.0  ;;  %v8387_v34 = vsub.f32 %v8191_v14, %v8289_v6  ;;  %6715 = vmatpush1.bf16.msra.mxu0 %v13664_v31  ;;  %v8193_v59 = vmul.f32 0.125, %v7940_v23  ;;  %6746 = vmatprep.mubr.bf16.mxu0 %v16700_v57  ;;  %v13678_v23 = vld [vmem:[#allocation2 + $0xdc4] ss:$392 sps:$4 sm:$0xff]  }
 0x336   :  { %v15926_v19 = vmul.f32 0.125, %v7150_v3  ;;  %v7933_v62 = vrot.slane %v7932_v58, 1  ;;  %v7161_v44 = vrot.slane %v7160_v37, 1  ;;  %6716 = vmatprep.subr.bf16.mxu0 %v13669_v30  ;;  %13812 = vrsqrt.f32 %v15892_v60 }
 0x337   :  { %v8582_v40 = vadd.f32 1e-05, %v8484_v61  ;;  %v7941_v27 = vrot.slane %v7508_v9, 4  ;;  %v8485_v32 = vmax.f32 %v8387_v34, 0.0  ;;  %v8389_v63 = vsub.f32 %v8193_v59, %v8291_v17  ;;  %v13673_v17 = vld [vmem:[#allocation2 + $0xab0] ss:$392 sps:$4 sm:$0xff]  }
 0x338   :  { %v7934_v16 = vadd.f32 %v7933_v62, %v7932_v58  ;;  %v8290_v29 = vmul.f32 %v15926_v19, %v15926_v19  ;;  %v7162_v31 = vadd.f32 %v7161_v44, %v7160_v37  ;;  %v13681_v59 = vld [vmem:[#allocation2 + $0x10d4] ss:$392 sps:$4 sm:$0xff]   ;;  %v16764_v44 = vcombine.low %v15779_v15, %v15791_v22 }
 0x339   :  { %13814 = vrsqrt.f32 %v8582_v40  ;;  %v7942_v21 = vadd.f32 %v7941_v27, %v7508_v9  ;;  %6717 = vmatpush1.bf16.msra.mxu0 %v13667_v43  ;;  %v8583_v57 = vadd.f32 1e-05, %v8485_v32  ;;  %v8487_v39 = vmax.f32 %v8389_v63, 0.0  ;;  %v13676_v43 = vld [vmem:[#allocation2 + $0xdc0] ss:$392 sps:$4 sm:$0xff]  }
 0x33a   :  { %v8192_v55 = vmul.f32 0.125, %v7934_v16  ;;  %6718 = vmatprep.subr.bf16.mxu0 %v13672_v11  ;;  %v15932_v14 = vmul.f32 0.125, %v7162_v31  ;;  %v15940_v11 = vrot.slane %v16764_v44, %v14076_v4  ;;  %v9231_v40 = vrot.slane %v9209_v41, %v14076_v4 }
 0x33b   :  { %v7943_v30 = vrot.slane %v7942_v21, 2  ;;  %13816 = vrsqrt.f32 %v8583_v57  ;;  %v8585_v58 = vadd.f32 1e-05, %v8487_v39 }
 0x33c   :  { %v8388_v60 = vsub.f32 %v8192_v55, %v8290_v29  ;;  %v8292_v9 = vmul.f32 %v15932_v14, %v15932_v14 }
 0x33d   :  { %v7944_v6 = vadd.f32 %v7943_v30, %v7942_v21  ;;  %6719 = vmatpush1.bf16.msra.mxu0 %v13670_v51 }
 0x33e   :  { %v8486_v18 = vmax.f32 %v8388_v60, 0.0  ;;  %6720 = vmatprep.subr.bf16.mxu0 %v13675_v25  ;;  %v13679_v25 = vld [vmem:[#allocation2 + $0x10d0] ss:$392 sps:$4 sm:$0xff]  }
 0x33f   :  { %v7945_v3 = vrot.slane %v7944_v6, 1 }
 0x340   :  { %v8584_v37 = vadd.f32 1e-05, %v8486_v18  ;;  %v13813_v61 = vpop.eup %13812  ;;  %v13684_v18 = vld [vmem:[#allocation2 + $0x13e4] ss:$392 sps:$4 sm:$0xff]  }
 0x341   :  { %v7946_v34 = vadd.f32 %v7945_v3, %v7944_v6  ;;  %6721 = vmatpush1.bf16.msra.mxu0 %v13673_v17  ;;  %v15943_v32 = vpop.f32.mrb[68].mxu0 }
 0x342   :  { %13818 = vrsqrt.f32 %v8584_v37  ;;  %6722 = vmatprep.subr.bf16.mxu0 %v13678_v23  ;;  %16765 = vst [vmem:[#allocation9_spill] sm:$0xff] %v15943_v32  ;;  %v7163_v16 = vrot.slane %v15943_v32, 4  ;;  %v7509_v29 = vmul.f32 %v15943_v32, %v15943_v32  ;;  %v15948_v31 = vpop.f32.mrb[68].mxu1  ;;  %v15950_v21 = vpop.f32.mrb[69].mxu0 }
 0x343   :  { %v13815_v62 = vpop.eup %13814  ;;  %v8194_v27 = vmul.f32 0.125, %v7946_v34  ;;  %13820 = vrsqrt.f32 %v8585_v58  ;;  %16766 = vst [vmem:[#allocation10_spill] sm:$0xff] %v15948_v31  ;;  %16767 = vst [vmem:[#allocation8_spill] sm:$0xff] %v15950_v21  ;;  %v7175_v15 = vrot.slane %v15948_v31, 4  ;;  %v7511_v22 = vmul.f32 %v15948_v31, %v15948_v31  ;;  %v15956_v55 = vpop.f32.mrb[69].mxu1 }
 0x344   :  { %v9210_v63 = vcombine.low %v13813_v61, %v13815_v62  ;;  %v7169_v41 = vrot.slane %v15950_v21, 4  ;;  %v6178_v30 = vpop.f32.mrb[70].mxu0  ;;  %v7164_v39 = vadd.f32 %v7163_v16, %v15943_v32  ;;  %v7947_v60 = vrot.slane %v7509_v29, 4  ;;  %v6219_v23 = vpop.f32.mrb[70].mxu1 }
 0x345   :  { %v8390_v51 = vsub.f32 %v8194_v27, %v8292_v9  ;;  %6723 = vmatpush1.bf16.msra.mxu0 %v13676_v43  ;;  %v7510_v6 = vmul.f32 %v15950_v21, %v15950_v21  ;;  %v6179_v17 = vpop.f32.mrb[71].mxu0  ;;  %v7176_v58 = vadd.f32 %v7175_v15, %v15948_v31  ;;  %v7959_v37 = vrot.slane %v7511_v22, 4  ;;  %v6220_v34 = vpop.f32.mrb[71].mxu1  ;;  %v13687_v31 = vld [vmem:[#allocation2 + $0x16f4] ss:$392 sps:$4 sm:$0xff]  }
 0x346   :  { %v9238_v57 = vrot.slane %v9210_v63, %v14076_v4  ;;  %6724 = vmatprep.subr.bf16.mxu0 %v13681_v59  ;;  %v7170_v61 = vadd.f32 %v7169_v41, %v15950_v21  ;;  %v7165_v43 = vrot.slane %v7164_v39, 2  ;;  %v7948_v62 = vadd.f32 %v7947_v60, %v7509_v29  ;;  %v13682_v59 = vld [vmem:[#allocation2 + $0x13e0] ss:$392 sps:$4 sm:$0xff]   ;;  %v13817_v17 = vpop.eup %13816  ;;  %v8729_v41 = vld [vmem:[#allocation4 + $0x70] ss:$2 sm:$0xff] }
 0x347   :  { %v8488_v3 = vmax.f32 %v8390_v51, 0.0  ;;  %v7953_v44 = vrot.slane %v7510_v6, 4  ;;  %v7177_v63 = vrot.slane %v7176_v58, 2  ;;  %v7960_v16 = vadd.f32 %v7959_v37, %v7511_v22 }
 0x348   :  { %v9240_v9 = vcombine.low %v9231_v40, %v9238_v57  ;;  %v7171_v30 = vrot.slane %v7170_v61, 2  ;;  %v7166_v51 = vadd.f32 %v7165_v43, %v7164_v39  ;;  %v7949_v32 = vrot.slane %v7948_v62, 2  ;;  %v13685_v39 = vld [vmem:[#allocation2 + $0x16f0] ss:$392 sps:$4 sm:$0xff]  }
 0x349   :  { %v8586_v27 = vadd.f32 1e-05, %v8488_v3  ;;  %6725 = vmatpush1.bf16.msra.mxu0 %v13679_v25  ;;  %v7954_v15 = vadd.f32 %v7953_v44, %v7510_v6  ;;  %v7178_v40 = vadd.f32 %v7177_v63, %v7176_v58  ;;  %v7961_v57 = vrot.slane %v7960_v16, 2 }
 0x34a   :  { %v9254_v23 = vrot.slane %v9240_v9, %v14076_v4  ;;  %6726 = vmatprep.subr.bf16.mxu0 %v13684_v18  ;;  %v7172_v29 = vadd.f32 %v7171_v30, %v7170_v61  ;;  %v7167_v22 = vrot.slane %v7166_v51, 1  ;;  %v7950_v37 = vadd.f32 %v7949_v32, %v7948_v62 }
 0x34b   :  { %13822 = vrsqrt.f32 %v8586_v27  ;;  %v7955_v25 = vrot.slane %v7954_v15, 2  ;;  %v7179_v21 = vrot.slane %v7178_v40, 1  ;;  %v7962_v10 = vadd.f32 %v7961_v57, %v7960_v16 }
 0x34c   :  { %v13819_v60 = vpop.eup %13818  ;;  %v9255_v3 = vcombine.low %v15940_v11, %v9254_v23  ;;  %v7173_v9 = vrot.slane %v7172_v29, 1  ;;  %v7168_v43 = vadd.f32 %v7167_v22, %v7166_v51  ;;  %v7951_v44 = vrot.slane %v7950_v37, 1 }
 0x34d   :  { %v9256_v34 = vcombine.low %v13817_v17, %v13819_v60  ;;  %6727 = vmatpush1.bf16.msra.mxu0 %v13682_v59  ;;  %v13821_v6 = vpop.eup %13820  ;;  %v15966_v27 = vadd.f32 %v7955_v25, %v7954_v15  ;;  %v7180_v11 = vadd.f32 %v7179_v21, %v7178_v40  ;;  %v7963_v61 = vrot.slane %v7962_v10, 1 }
 0x34e   :  { %v9487_v18 = vmul.f32 %v9255_v3, %v8729_v41  ;;  %6728 = vmatprep.subr.bf16.mxu0 %v13687_v31  ;;  %v7174_v32 = vadd.f32 %v7173_v9, %v7172_v29 }
 0x34f   :  { %v15969_v58 = vrot.slane %v9256_v34, %v14076_v4 }
 0x350   :  { %v9733_v62 = vrot.slane %v9487_v18, %v14140_v45  ;;  %v9737_v63 = vrot.slane %v9487_v18, %v14143_v46  ;;  %v9741_v16 = vrot.slane %v9487_v18, %v14146_v47  ;;  %v9745_v30 = vrot.slane %v9487_v18, %v14149_v48 }
 0x351   :  { %v9749_v59 = vrot.slane %v9487_v18, %v14152_v49  ;;  %v9753_v17 = vrot.slane %v9487_v18, %v14191_v24  ;;  %v9757_v31 = vrot.slane %v9487_v18, %v14207_v8  ;;  %v9761_v23 = vrot.slane %v9487_v18, %v14213_v1  ;;  %6729 = vmatpush1.bf16.msra.mxu0 %v13685_v39  ;;  %v16769_v39 = vld [vmem:[#allocation15_spill] sm:$0xff] }
 0x352   :  { %v10052_v21 = vmul.f32 %v9733_v62, %v15654_v28  ;;  %v10053_v51 = vmul.f32 %v9737_v63, %v15664_v52  ;;  %v10054_v15 = vmul.f32 %v9741_v16, %v15656_v7  ;;  %v10055_v41 = vmul.f32 %v9745_v30, %v15676_v20 }
 0x353   :  { %v10056_v40 = vmul.f32 %v9749_v59, %v15782_v12  ;;  %v10057_v57 = vmul.f32 %v9753_v17, %v15806_v42  ;;  %v10058_v29 = vmul.f32 %v9757_v31, %v15799_v13  ;;  %v10059_v60 = vmul.f32 %v9761_v23, %v15896_v33  ;;  %v16768_v33 = vld [vmem:[#allocation14_spill] sm:$0xff] }
 0x354   :  { %v10535_v3 = vcombine.low %v10052_v21, %v10053_v51  ;;  %v10536_v22 = vcombine.low %v10054_v15, %v10055_v41  ;;  %v10877_v25 = vmul.f32 %v9733_v62, %v15592_v38  ;;  %v10878_v28 = vmul.f32 %v9737_v63, %v15600_v5  ;;  %6747 = vmatmul.mubr.bf16.vlgmr.msra.gmra.mrb[96].mxu0 %v15919_v2  ;;  %v16770_v2 = vld [vmem:[#allocation12_spill] sm:$0xff] }
 0x355   :  { %v13823_v52 = vpop.eup %13822  ;;  %v10537_v7 = vcombine.low %v10056_v40, %v10057_v57  ;;  %v10538_v34 = vcombine.low %v10058_v29, %v10059_v60  ;;  %v10879_v20 = vmul.f32 %v9741_v16, %v15598_v26  ;;  %v10880_v12 = vmul.f32 %v9745_v30, %v15602_v35 }
 0x356   :  { %v10545_v42 = vrot.slane %v10535_v3, %v14076_v4  ;;  %v10552_v13 = vrot.slane %v10536_v22, %v14076_v4  ;;  %v10881_v9 = vmul.f32 %v9749_v59, %v16768_v33  ;;  %v10882_v18 = vmul.f32 %v9753_v17, %v16769_v39 }
 0x357   :  { %v10559_v38 = vrot.slane %v10537_v7, %v14076_v4  ;;  %v10566_v5 = vrot.slane %v10538_v34, %v14076_v4  ;;  %v10883_v62 = vmul.f32 %v9757_v31, %v16770_v2  ;;  %v10884_v63 = vmul.f32 %v9761_v23, %v15702_v50 }
 0x358   :  { %v10567_v21 = vcombine.low %v10545_v42, %v10552_v13  ;;  %v9257_v26 = vcombine.low %v13821_v6, %v13823_v52  ;;  %v16000_v16 = vmul.f32 0.125, %v7168_v43  ;;  %v7952_v35 = vadd.f32 %v7951_v44, %v7950_v37 }
 0x359   :  { %v10568_v30 = vcombine.low %v10559_v38, %v10566_v5  ;;  %v16002_v51 = vmul.f32 0.125, %v7180_v11  ;;  %v7964_v15 = vadd.f32 %v7963_v61, %v7962_v10  ;;  %v16004_v59 = vmul.f32 0.125, %v7174_v32  ;;  %v8755_v10 = vld [vmem:[#allocation4 + $0x71] ss:$2 sm:$0xff] }
 0x35a   :  { %v10575_v17 = vrot.slane %v10567_v21, %v14076_v4  ;;  %v16008_v41 = vrot.slane %v9257_v26, %v14076_v4  ;;  %v8195_v40 = vmul.f32 0.125, %v7952_v35  ;;  %v8293_v50 = vmul.f32 %v16000_v16, %v16000_v16 }
 0x35b   :  { %v10582_v6 = vrot.slane %v10568_v30, %v14076_v4  ;;  %v8197_v43 = vmul.f32 0.125, %v7964_v15  ;;  %v8295_v37 = vmul.f32 %v16002_v51, %v16002_v51  ;;  %v7957_v44 = vrot.slane %v15966_v27, 1 }
 0x35c   :  { %v9288_v11 = vcombine.low %v15969_v58, %v16008_v41  ;;  %v8391_v61 = vsub.f32 %v8195_v40, %v8293_v50  ;;  %v7181_v32 = vrot.slane %v15956_v55, 4  ;;  %v7512_v29 = vmul.f32 %v15956_v55, %v15956_v55 }
 0x35d   :  { %v10583_v31 = vcombine.low %v10575_v17, %v10582_v6  ;;  %v8393_v23 = vsub.f32 %v8197_v43, %v8295_v37  ;;  %v7958_v57 = vadd.f32 %v7957_v44, %v15966_v27  ;;  %v8294_v7 = vmul.f32 %v16004_v59, %v16004_v59 }
 0x35e   :  { %v8489_v60 = vmax.f32 %v8391_v61, 0.0  ;;  %v7182_v3 = vadd.f32 %v7181_v32, %v15956_v55  ;;  %v7965_v33 = vrot.slane %v7512_v29, 4 }
 0x35f   :  { %v10815_v22 = vsub.f32 %v8755_v10, %v10583_v31  ;;  %v8491_v52 = vmax.f32 %v8393_v23, 0.0  ;;  %v8196_v42 = vmul.f32 0.125, %v7958_v57 }
 0x360   :  { %v8587_v34 = vadd.f32 1e-05, %v8489_v60  ;;  %v7183_v13 = vrot.slane %v7182_v3, 2 }
 0x361   :  { %v11159_v39 = vrot.slane %v10815_v22, %v14140_v45  ;;  %v11163_v38 = vrot.slane %v10815_v22, %v14143_v46  ;;  %v11167_v27 = vrot.slane %v10815_v22, %v14146_v47  ;;  %v11171_v5 = vrot.slane %v10815_v22, %v14149_v48  ;;  %v16033_v50 = vpop.f32.mrb[72].mxu0 }
 0x362   :  { %v11175_v2 = vrot.slane %v10815_v22, %v14152_v49  ;;  %v11179_v21 = vrot.slane %v10815_v22, %v14191_v24  ;;  %v11183_v26 = vrot.slane %v10815_v22, %v14207_v8  ;;  %v11187_v35 = vrot.slane %v10815_v22, %v14213_v1  ;;  %v16035_v10 = vpop.f32.mrb[72].mxu1  ;;  %v16037_v61 = vpop.f32.mrb[73].mxu0 }
 0x363   :  { %v11478_v30 = vadd.f32 %v11159_v39, %v10877_v25  ;;  %v11479_v15 = vadd.f32 %v11163_v38, %v10878_v28  ;;  %v11480_v17 = vadd.f32 %v11167_v27, %v10879_v20  ;;  %v11481_v40 = vadd.f32 %v11171_v5, %v10880_v12  ;;  %v16039_v60 = vpop.f32.mrb[73].mxu1  ;;  %v6260_v25 = vpop.f32.mrb[74].mxu0 }
 0x364   :  { %v11482_v6 = vadd.f32 %v11175_v2, %v10881_v9  ;;  %v11483_v43 = vadd.f32 %v11179_v21, %v10882_v18  ;;  %v11484_v37 = vadd.f32 %v11183_v26, %v10883_v62  ;;  %v11485_v44 = vadd.f32 %v11187_v35, %v10884_v63  ;;  %v6261_v39 = vpop.f32.mrb[75].mxu0  ;;  %v6301_v9 = vpop.f32.mrb[74].mxu1 }
 0x365   :  { %v11576_v32 = vmax.f32 %v11478_v30, 0.0  ;;  %v11577_v31 = vmax.f32 %v11479_v15, 0.0  ;;  %v11578_v23 = vmax.f32 %v11480_v17, 0.0  ;;  %v11579_v57 = vmax.f32 %v11481_v40, 0.0  ;;  %v6302_v38 = vpop.f32.mrb[75].mxu1 }
 0x366   :  { %v11580_v28 = vmax.f32 %v11482_v6, 0.0  ;;  %v11581_v20 = vmax.f32 %v11483_v43, 0.0  ;;  %v11582_v12 = vmax.f32 %v11484_v37, 0.0  ;;  %v11583_v22 = vmax.f32 %v11485_v44, 0.0 }
 0x367   :  { %11674 = vst [vmem:[%s16652_s3 + $0x1c0] sm:$0xff] %v11576_v32  ;;  %11675 = vst [vmem:[%s16652_s3 + $0x1c8] sm:$0xff] %v11577_v31  ;;  %13824 = vrsqrt.f32 %v8587_v34  ;;  %v8589_v18 = vadd.f32 1e-05, %v8491_v52  ;;  %v8392_v62 = vsub.f32 %v8196_v42, %v8294_v7  ;;  %v7184_v63 = vadd.f32 %v7183_v13, %v7182_v3 }
 0x368   :  { %11676 = vst [vmem:[%s16652_s3 + $0x1d0] sm:$0xff] %v11578_v23  ;;  %11677 = vst [vmem:[%s16652_s3 + $0x1d8] sm:$0xff] %v11579_v57  ;;  %v7966_v52 = vadd.f32 %v7965_v33, %v7512_v29  ;;  %v7187_v3 = vrot.slane %v16033_v50, 4  ;;  %v7513_v7 = vmul.f32 %v16033_v50, %v16033_v50  ;;  %v7199_v34 = vrot.slane %v16035_v10, 4 }
 0x369   :  { %11678 = vst [vmem:[%s16652_s3 + $0x1e0] sm:$0xff] %v11580_v28  ;;  %11679 = vst [vmem:[%s16652_s3 + $0x1e8] sm:$0xff] %v11581_v20  ;;  %13826 = vrsqrt.f32 %v8589_v18  ;;  %v8490_v42 = vmax.f32 %v8392_v62, 0.0  ;;  %v7185_v13 = vrot.slane %v7184_v63, 1  ;;  %v7515_v27 = vmul.f32 %v16035_v10, %v16035_v10 }
 0x36a   :  { %11680 = vst [vmem:[%s16652_s3 + $0x1f0] sm:$0xff] %v11582_v12  ;;  %11681 = vst [vmem:[%s16652_s3 + $0x1f8] sm:$0xff] %v11583_v22  ;;  %v7967_v5 = vrot.slane %v7966_v52, 2  ;;  %v7188_v2 = vadd.f32 %v7187_v3, %v16033_v50  ;;  %v7971_v21 = vrot.slane %v7513_v7, 4  ;;  %v7200_v26 = vadd.f32 %v7199_v34, %v16035_v10 }
 0x36b   :  { %v8588_v29 = vadd.f32 1e-05, %v8490_v42  ;;  %v7186_v33 = vadd.f32 %v7185_v13, %v7184_v63  ;;  %v7983_v35 = vrot.slane %v7515_v27, 4  ;;  %v7193_v30 = vrot.slane %v16037_v61, 4 }
 0x36c   :  { %v7968_v15 = vadd.f32 %v7967_v5, %v7966_v52  ;;  %v7189_v17 = vrot.slane %v7188_v2, 2  ;;  %v7972_v40 = vadd.f32 %v7971_v21, %v7513_v7  ;;  %v7201_v6 = vrot.slane %v7200_v26, 2 }
 0x36d   :  { %13828 = vrsqrt.f32 %v8588_v29  ;;  %v16074_v43 = vmul.f32 0.125, %v7186_v33  ;;  %v7984_v37 = vadd.f32 %v7983_v35, %v7515_v27  ;;  %v7194_v44 = vadd.f32 %v7193_v30, %v16037_v61 }
 0x36e   :  { %v7969_v32 = vrot.slane %v7968_v15, 1  ;;  %v7190_v31 = vadd.f32 %v7189_v17, %v7188_v2  ;;  %v7973_v23 = vrot.slane %v7972_v40, 2  ;;  %v7202_v57 = vadd.f32 %v7201_v6, %v7200_v26 }
 0x36f   :  { %v8296_v25 = vmul.f32 %v16074_v43, %v16074_v43  ;;  %v7985_v28 = vrot.slane %v7984_v37, 2  ;;  %v7195_v20 = vrot.slane %v7194_v44, 2  ;;  %v7514_v12 = vmul.f32 %v16037_v61, %v16037_v61 }
 0x370   :  { %v7970_v22 = vadd.f32 %v7969_v32, %v7968_v15  ;;  %v7191_v39 = vrot.slane %v7190_v31, 1  ;;  %v7974_v9 = vadd.f32 %v7973_v23, %v7972_v40  ;;  %v7203_v18 = vrot.slane %v7202_v57, 1 }
 0x371   :  { %v13825_v62 = vpop.eup %13824  ;;  %v7986_v63 = vadd.f32 %v7985_v28, %v7984_v37  ;;  %v7196_v38 = vadd.f32 %v7195_v20, %v7194_v44  ;;  %v7977_v52 = vrot.slane %v7514_v12, 4  ;;  %v7205_v3 = vrot.slane %v16039_v60, 4 }
 0x372   :  { %v8198_v7 = vmul.f32 0.125, %v7970_v22  ;;  %v7192_v34 = vadd.f32 %v7191_v39, %v7190_v31  ;;  %v7975_v42 = vrot.slane %v7974_v9, 1  ;;  %v7204_v13 = vadd.f32 %v7203_v18, %v7202_v57 }
 0x373   :  { %v16082_v27 = vpop.eup %13826  ;;  %v7987_v5 = vrot.slane %v7986_v63, 1  ;;  %v7197_v2 = vrot.slane %v7196_v38, 1  ;;  %v7978_v21 = vadd.f32 %v7977_v52, %v7514_v12  ;;  %v7206_v26 = vadd.f32 %v7205_v3, %v16039_v60 }
 0x374   :  { %v8394_v29 = vsub.f32 %v8198_v7, %v8296_v25  ;;  %v16085_v33 = vmul.f32 0.125, %v7192_v34  ;;  %v7976_v35 = vadd.f32 %v7975_v42, %v7974_v9  ;;  %v16087_v30 = vmul.f32 0.125, %v7204_v13 }
 0x375   :  { %v7988_v15 = vadd.f32 %v7987_v5, %v7986_v63  ;;  %v7198_v17 = vadd.f32 %v7197_v2, %v7196_v38  ;;  %v7979_v40 = vrot.slane %v7978_v21, 2  ;;  %v7207_v6 = vrot.slane %v7206_v26, 2 }
 0x376   :  { %v8492_v37 = vmax.f32 %v8394_v29, 0.0  ;;  %v8199_v44 = vmul.f32 0.125, %v7976_v35  ;;  %v8297_v32 = vmul.f32 %v16085_v33, %v16085_v33  ;;  %v8299_v31 = vmul.f32 %v16087_v30, %v16087_v30 }
 0x377   :  { %v13829_v23 = vpop.eup %13828  ;;  %v8201_v57 = vmul.f32 0.125, %v7988_v15  ;;  %v16093_v25 = vmul.f32 0.125, %v7198_v17  ;;  %v7980_v28 = vadd.f32 %v7979_v40, %v7978_v21  ;;  %v7208_v20 = vadd.f32 %v7207_v6, %v7206_v26 }
 0x378   :  { %v9258_v12 = vcombine.low %v13825_v62, %v13829_v23  ;;  %v8590_v22 = vadd.f32 1e-05, %v8492_v37  ;;  %v8395_v39 = vsub.f32 %v8199_v44, %v8297_v32  ;;  %v7516_v9 = vmul.f32 %v16039_v60, %v16039_v60 }
 0x379   :  { %v7981_v18 = vrot.slane %v7980_v28, 1  ;;  %v7209_v63 = vrot.slane %v7208_v20, 1  ;;  %v8397_v38 = vsub.f32 %v8201_v57, %v8299_v31  ;;  %v8298_v34 = vmul.f32 %v16093_v25, %v16093_v25 }
 0x37a   :  { %13830 = vrsqrt.f32 %v8590_v22  ;;  %v7989_v52 = vrot.slane %v7516_v9, 4  ;;  %v8493_v3 = vmax.f32 %v8395_v39, 0.0  ;;  %v9296_v31 = vrot.slane %v9288_v11, %v14076_v4 }
 0x37b   :  { %v7982_v7 = vadd.f32 %v7981_v18, %v7980_v28  ;;  %v7210_v42 = vadd.f32 %v7209_v63, %v7208_v20  ;;  %v8495_v2 = vmax.f32 %v8397_v38, 0.0  ;;  %v9280_v23 = vrot.slane %v9258_v12, %v14076_v4 }
 0x37c   :  { %v7990_v13 = vadd.f32 %v7989_v52, %v7516_v9  ;;  %v8591_v21 = vadd.f32 1e-05, %v8493_v3 }
 0x37d   :  { %v8200_v5 = vmul.f32 0.125, %v7982_v7  ;;  %v16099_v29 = vmul.f32 0.125, %v7210_v42  ;;  %v8593_v17 = vadd.f32 1e-05, %v8495_v2 }
 0x37e   :  { %v7991_v62 = vrot.slane %v7990_v13, 2  ;;  %13832 = vrsqrt.f32 %v8591_v21 }
 0x37f   :  { %v8396_v26 = vsub.f32 %v8200_v5, %v8298_v34  ;;  %v8300_v32 = vmul.f32 %v16099_v29, %v16099_v29 }
 0x380   :  { %v7992_v35 = vadd.f32 %v7991_v62, %v7990_v13 }
 0x381   :  { %v8494_v15 = vmax.f32 %v8396_v26, 0.0 }
 0x382   :  { %v7993_v40 = vrot.slane %v7992_v35, 1 }
 0x383   :  { %v8592_v6 = vadd.f32 1e-05, %v8494_v15  ;;  %v16109_v28 = vpop.f32.mrb[76].mxu0 }
 0x384   :  { %v13831_v37 = vpop.eup %13830  ;;  %v7994_v44 = vadd.f32 %v7993_v40, %v7992_v35  ;;  %16771 = vst [vmem:[#allocation17_spill] sm:$0xff] %v16109_v28  ;;  %v7211_v22 = vrot.slane %v16109_v28, 4  ;;  %v7517_v39 = vmul.f32 %v16109_v28, %v16109_v28  ;;  %v16114_v9 = vpop.f32.mrb[76].mxu1 }
 0x385   :  { %v9259_v57 = vcombine.low %v16082_v27, %v13831_v37  ;;  %13834 = vrsqrt.f32 %v8592_v6  ;;  %16772 = vst [vmem:[#allocation13_spill] sm:$0xff] %v16114_v9  ;;  %v16116_v18 = vpop.f32.mrb[77].mxu0  ;;  %v7223_v41 = vrot.slane %v16114_v9, 4  ;;  %v7519_v11 = vmul.f32 %v16114_v9, %v16114_v9  ;;  %v16123_v12 = vpop.f32.mrb[77].mxu1 }
 0x386   :  { %13836 = vrsqrt.f32 %v8593_v17  ;;  %v8202_v20 = vmul.f32 0.125, %v7994_v44  ;;  %16773 = vst [vmem:[#allocation11_spill] sm:$0xff] %v16116_v18  ;;  %v7217_v27 = vrot.slane %v16116_v18, 4  ;;  %v6342_v63 = vpop.f32.mrb[78].mxu0  ;;  %v7212_v52 = vadd.f32 %v7211_v22, %v16109_v28  ;;  %v6383_v42 = vpop.f32.mrb[78].mxu1  ;;  %v16776_v28 = vld [vmem:[#allocation8_spill] sm:$0xff] }
 0x387   :  { %v9287_v58 = vrot.slane %v9259_v57, %v14076_v4  ;;  %v7995_v3 = vrot.slane %v7517_v39, 4  ;;  %v7518_v7 = vmul.f32 %v16116_v18, %v16116_v18  ;;  %v6343_v34 = vpop.f32.mrb[79].mxu0  ;;  %v7224_v5 = vadd.f32 %v7223_v41, %v16114_v9  ;;  %v6384_v21 = vpop.f32.mrb[79].mxu1 }
 0x388   :  { %v8398_v38 = vsub.f32 %v8202_v20, %v8300_v32  ;;  %v8007_v2 = vrot.slane %v7519_v11, 4  ;;  %v7218_v62 = vadd.f32 %v7217_v27, %v16116_v18  ;;  %v7213_v35 = vrot.slane %v7212_v52, 2  ;;  %v8731_v32 = vld [vmem:[#allocation4 + $0x80] ss:$2 sm:$0xff] }
 0x389   :  { %v9289_v13 = vcombine.low %v9280_v23, %v9287_v58  ;;  %v7996_v15 = vadd.f32 %v7995_v3, %v7517_v39  ;;  %v8001_v17 = vrot.slane %v7518_v7, 4  ;;  %v7225_v6 = vrot.slane %v7224_v5, 2  ;;  %v13833_v58 = vpop.eup %13832 }
 0x38a   :  { %v8496_v26 = vmax.f32 %v8398_v38, 0.0  ;;  %v8008_v37 = vadd.f32 %v8007_v2, %v7519_v11  ;;  %v7219_v44 = vrot.slane %v7218_v62, 2  ;;  %v7214_v20 = vadd.f32 %v7213_v35, %v7212_v52 }
 0x38b   :  { %v9303_v40 = vrot.slane %v9289_v13, %v14076_v4  ;;  %v7997_v22 = vrot.slane %v7996_v15, 2  ;;  %v8002_v23 = vadd.f32 %v8001_v17, %v7518_v7  ;;  %v7226_v63 = vadd.f32 %v7225_v6, %v7224_v5 }
 0x38c   :  { %v8594_v57 = vadd.f32 1e-05, %v8496_v26  ;;  %v8009_v34 = vrot.slane %v8008_v37, 2  ;;  %v7220_v27 = vadd.f32 %v7219_v44, %v7218_v62  ;;  %v7215_v38 = vrot.slane %v7214_v20, 1 }
 0x38d   :  { %v9304_v41 = vcombine.low %v9296_v31, %v9303_v40  ;;  %v7998_v42 = vadd.f32 %v7997_v22, %v7996_v15  ;;  %v8003_v39 = vrot.slane %v8002_v23, 2  ;;  %v7227_v13 = vrot.slane %v7226_v63, 1 }
 0x38e   :  { %13838 = vrsqrt.f32 %v8594_v57  ;;  %v8010_v9 = vadd.f32 %v8009_v34, %v8008_v37  ;;  %v7221_v11 = vrot.slane %v7220_v27, 1  ;;  %v7216_v26 = vadd.f32 %v7215_v38, %v7214_v20 }
 0x38f   :  { %v13835_v3 = vpop.eup %13834  ;;  %v9488_v21 = vmul.f32 %v9304_v41, %v8731_v32  ;;  %v7999_v52 = vrot.slane %v7998_v42, 1  ;;  %v8004_v35 = vadd.f32 %v8003_v39, %v8002_v23 }
 0x390   :  { %v13837_v2 = vpop.eup %13836  ;;  %v9305_v18 = vcombine.low %v13833_v58, %v13835_v3  ;;  %v16774_v3 = vld [vmem:[#allocation16_spill] sm:$0xff] }
 0x391   :  { %v9765_v7 = vrot.slane %v9488_v21, %v14140_v45  ;;  %v9769_v31 = vrot.slane %v9488_v21, %v14143_v46  ;;  %v9773_v5 = vrot.slane %v9488_v21, %v14146_v47  ;;  %v9777_v62 = vrot.slane %v9488_v21, %v14149_v48 }
 0x392   :  { %v9781_v15 = vrot.slane %v9488_v21, %v14152_v49  ;;  %v9785_v17 = vrot.slane %v9488_v21, %v14191_v24  ;;  %v9789_v40 = vrot.slane %v9488_v21, %v14207_v8  ;;  %v9793_v6 = vrot.slane %v9488_v21, %v14213_v1  ;;  %v16775_v21 = vld [vmem:[#allocation9_spill] sm:$0xff] }
 0x393   :  { %v10060_v37 = vmul.f32 %v9765_v7, %v15908_v0  ;;  %v10061_v44 = vmul.f32 %v9769_v31, %v15926_v19  ;;  %v10062_v32 = vmul.f32 %v9773_v5, %v15910_v54  ;;  %v10063_v57 = vmul.f32 %v9777_v62, %v15932_v14 }
 0x394   :  { %v10064_v20 = vmul.f32 %v9781_v15, %v16000_v16  ;;  %v10065_v22 = vmul.f32 %v9785_v17, %v16004_v59  ;;  %v10066_v23 = vmul.f32 %v9789_v40, %v16002_v51  ;;  %v10067_v58 = vmul.f32 %v9793_v6, %v16074_v43 }
 0x395   :  { %v10584_v41 = vcombine.low %v10060_v37, %v10061_v44  ;;  %v10585_v34 = vcombine.low %v10062_v32, %v10063_v57  ;;  %v10885_v38 = vmul.f32 %v9765_v7, %v15849_v36  ;;  %v10886_v0 = vmul.f32 %v9769_v31, %v15853_v53  ;;  %v16777_v53 = vld [vmem:[#allocation10_spill] sm:$0xff] }
 0x396   :  { %v10586_v39 = vcombine.low %v10064_v20, %v10065_v22  ;;  %v10587_v19 = vcombine.low %v10066_v23, %v10067_v58  ;;  %v10887_v54 = vmul.f32 %v9773_v5, %v15851_v56  ;;  %v10888_v14 = vmul.f32 %v9777_v62, %v16774_v3 }
 0x397   :  { %v10594_v16 = vrot.slane %v10584_v41, %v14076_v4  ;;  %v10601_v59 = vrot.slane %v10585_v34, %v14076_v4  ;;  %v10889_v51 = vmul.f32 %v9781_v15, %v16775_v21  ;;  %v10890_v43 = vmul.f32 %v9785_v17, %v16776_v28 }
 0x398   :  { %v13839_v37 = vpop.eup %13838  ;;  %v10608_v44 = vrot.slane %v10586_v39, %v14076_v4  ;;  %v10615_v36 = vrot.slane %v10587_v19, %v14076_v4  ;;  %v10891_v7 = vmul.f32 %v9789_v40, %v16777_v53  ;;  %v10892_v31 = vmul.f32 %v9793_v6, %v15956_v55 }
 0x399   :  { %v10616_v56 = vcombine.low %v10594_v16, %v10601_v59  ;;  %v16160_v5 = vrot.slane %v9305_v18, %v14076_v4  ;;  %v9306_v62 = vcombine.low %v13837_v2, %v13839_v37  ;;  %v16162_v32 = vmul.f32 0.125, %v7216_v26  ;;  %v8757_v26 = vld [vmem:[#allocation4 + $0x81] ss:$2 sm:$0xff] }
 0x39a   :  { %v10617_v57 = vcombine.low %v10608_v44, %v10615_v36  ;;  %v8000_v15 = vadd.f32 %v7999_v52, %v7998_v42  ;;  %v7228_v20 = vadd.f32 %v7227_v13, %v7226_v63  ;;  %v8011_v28 = vrot.slane %v8010_v9, 1 }
 0x39b   :  { %v10624_v17 = vrot.slane %v10616_v56, %v14076_v4  ;;  %v16166_v22 = vrot.slane %v9306_v62, %v14076_v4  ;;  %v8301_v40 = vmul.f32 %v16162_v32, %v16162_v32  ;;  %v7222_v55 = vadd.f32 %v7221_v11, %v7220_v27 }
 0x39c   :  { %v10631_v6 = vrot.slane %v10617_v57, %v14076_v4  ;;  %v8203_v18 = vmul.f32 0.125, %v8000_v15  ;;  %v16171_v23 = vmul.f32 0.125, %v7228_v20  ;;  %v8012_v2 = vadd.f32 %v8011_v28, %v8010_v9 }
 0x39d   :  { %v9337_v63 = vcombine.low %v16160_v5, %v16166_v22  ;;  %v16175_v42 = vmul.f32 0.125, %v7222_v55  ;;  %v8005_v13 = vrot.slane %v8004_v35, 1  ;;  %v7229_v52 = vrot.slane %v16123_v12, 4 }
 0x39e   :  { %v10632_v58 = vcombine.low %v10624_v17, %v10631_v6  ;;  %v8399_v41 = vsub.f32 %v8203_v18, %v8301_v40  ;;  %v8205_v34 = vmul.f32 0.125, %v8012_v2  ;;  %v8303_v27 = vmul.f32 %v16171_v23, %v16171_v23 }
 0x39f   :  { %v8006_v11 = vadd.f32 %v8005_v13, %v8004_v35  ;;  %v7230_v39 = vadd.f32 %v7229_v52, %v16123_v12  ;;  %v8302_v3 = vmul.f32 %v16175_v42, %v16175_v42  ;;  %v7520_v37 = vmul.f32 %v16123_v12, %v16123_v12 }
 0x3a0   :  { %v10816_v19 = vsub.f32 %v8757_v26, %v10632_v58  ;;  %v8497_v9 = vmax.f32 %v8399_v41, 0.0  ;;  %v8401_v16 = vsub.f32 %v8205_v34, %v8303_v27 }
 0x3a1   :  { %v8204_v59 = vmul.f32 0.125, %v8006_v11  ;;  %v7231_v21 = vrot.slane %v7230_v39, 2 }
 0x3a2   :  { %v11191_v44 = vrot.slane %v10816_v19, %v14140_v45  ;;  %v11195_v36 = vrot.slane %v10816_v19, %v14143_v46  ;;  %v11199_v53 = vrot.slane %v10816_v19, %v14146_v47  ;;  %v11203_v35 = vrot.slane %v10816_v19, %v14149_v48 }
 0x3a3   :  { %v11207_v56 = vrot.slane %v10816_v19, %v14152_v49  ;;  %v11211_v62 = vrot.slane %v10816_v19, %v14191_v24  ;;  %v11215_v57 = vrot.slane %v10816_v19, %v14207_v8  ;;  %v11219_v15 = vrot.slane %v10816_v19, %v14213_v1 }
 0x3a4   :  { %v11486_v20 = vadd.f32 %v11191_v44, %v10885_v38  ;;  %v11487_v28 = vadd.f32 %v11195_v36, %v10886_v0  ;;  %v11488_v17 = vadd.f32 %v11199_v53, %v10887_v54  ;;  %v11489_v40 = vadd.f32 %v11203_v35, %v10888_v14  ;;  %v16193_v26 = vpop.f32.mrb[80].mxu0 }
 0x3a5   :  { %v11490_v55 = vadd.f32 %v11207_v56, %v10889_v51  ;;  %v11491_v6 = vadd.f32 %v11211_v62, %v10890_v43  ;;  %v11492_v18 = vadd.f32 %v11215_v57, %v10891_v7  ;;  %v11493_v2 = vadd.f32 %v11219_v15, %v10892_v31  ;;  %v16195_v34 = vpop.f32.mrb[80].mxu1  ;;  %v16197_v27 = vpop.f32.mrb[81].mxu0 }
 0x3a6   :  { %v11584_v13 = vmax.f32 %v11486_v20, 0.0  ;;  %v11585_v52 = vmax.f32 %v11487_v28, 0.0  ;;  %v11586_v58 = vmax.f32 %v11488_v17, 0.0  ;;  %v11587_v41 = vmax.f32 %v11489_v40, 0.0  ;;  %v16199_v54 = vpop.f32.mrb[81].mxu1  ;;  %v6424_v14 = vpop.f32.mrb[82].mxu0 }
 0x3a7   :  { %v11588_v11 = vmax.f32 %v11490_v55, 0.0  ;;  %v11589_v19 = vmax.f32 %v11491_v6, 0.0  ;;  %v11590_v38 = vmax.f32 %v11492_v18, 0.0  ;;  %v11591_v0 = vmax.f32 %v11493_v2, 0.0  ;;  %v6425_v44 = vpop.f32.mrb[83].mxu0  ;;  %v6465_v36 = vpop.f32.mrb[82].mxu1 }
 0x3a8   :  { %11682 = vst [vmem:[%s16652_s3 + $0x200] sm:$0xff] %v11584_v13  ;;  %11683 = vst [vmem:[%s16652_s3 + $0x208] sm:$0xff] %v11585_v52  ;;  %v8595_v51 = vadd.f32 1e-05, %v8497_v9  ;;  %v8499_v43 = vmax.f32 %v8401_v16, 0.0  ;;  %v8400_v7 = vsub.f32 %v8204_v59, %v8302_v3  ;;  %v7232_v31 = vadd.f32 %v7231_v21, %v7230_v39  ;;  %v6466_v59 = vpop.f32.mrb[83].mxu1 }
 0x3a9   :  { %11684 = vst [vmem:[%s16652_s3 + $0x210] sm:$0xff] %v11586_v58  ;;  %11685 = vst [vmem:[%s16652_s3 + $0x218] sm:$0xff] %v11587_v41  ;;  %v8013_v9 = vrot.slane %v7520_v37, 4  ;;  %v7235_v39 = vrot.slane %v16193_v26, 4  ;;  %v7521_v3 = vmul.f32 %v16193_v26, %v16193_v26  ;;  %v7247_v16 = vrot.slane %v16195_v34, 4 }
 0x3aa   :  { %11686 = vst [vmem:[%s16652_s3 + $0x220] sm:$0xff] %v11588_v11  ;;  %11687 = vst [vmem:[%s16652_s3 + $0x228] sm:$0xff] %v11589_v19  ;;  %13840 = vrsqrt.f32 %v8595_v51  ;;  %v8498_v21 = vmax.f32 %v8400_v7, 0.0  ;;  %v7233_v53 = vrot.slane %v7232_v31, 1  ;;  %v8597_v15 = vadd.f32 1e-05, %v8499_v43 }
 0x3ab   :  { %11688 = vst [vmem:[%s16652_s3 + $0x230] sm:$0xff] %v11590_v38  ;;  %11689 = vst [vmem:[%s16652_s3 + $0x238] sm:$0xff] %v11591_v0  ;;  %v8014_v35 = vadd.f32 %v8013_v9, %v7520_v37  ;;  %v7236_v56 = vadd.f32 %v7235_v39, %v16193_v26  ;;  %v8019_v62 = vrot.slane %v7521_v3, 4  ;;  %v7248_v57 = vadd.f32 %v7247_v16, %v16195_v34 }
 0x3ac   :  { %v8596_v20 = vadd.f32 1e-05, %v8498_v21  ;;  %v7234_v28 = vadd.f32 %v7233_v53, %v7232_v31  ;;  %v7523_v17 = vmul.f32 %v16195_v34, %v16195_v34  ;;  %v7241_v37 = vrot.slane %v16197_v27, 4 }
 0x3ad   :  { %v8015_v40 = vrot.slane %v8014_v35, 2  ;;  %v7237_v55 = vrot.slane %v7236_v56, 2  ;;  %v8020_v6 = vadd.f32 %v8019_v62, %v7521_v3  ;;  %v7249_v18 = vrot.slane %v7248_v57, 2 }
 0x3ae   :  { %13842 = vrsqrt.f32 %v8596_v20  ;;  %v16233_v2 = vmul.f32 0.125, %v7234_v28  ;;  %v8031_v13 = vrot.slane %v7523_v17, 4  ;;  %v7242_v0 = vadd.f32 %v7241_v37, %v16197_v27 }
 0x3af   :  { %v8016_v52 = vadd.f32 %v8015_v40, %v8014_v35  ;;  %v7238_v58 = vadd.f32 %v7237_v55, %v7236_v56  ;;  %v8021_v41 = vrot.slane %v8020_v6, 2  ;;  %v7250_v11 = vadd.f32 %v7249_v18, %v7248_v57 }
 0x3b0   :  { %v8304_v19 = vmul.f32 %v16233_v2, %v16233_v2  ;;  %v8032_v38 = vadd.f32 %v8031_v13, %v7523_v17  ;;  %v7522_v14 = vmul.f32 %v16197_v27, %v16197_v27  ;;  %v7243_v36 = vrot.slane %v7242_v0, 2 }
 0x3b1   :  { %v8017_v51 = vrot.slane %v8016_v52, 1  ;;  %v7239_v43 = vrot.slane %v7238_v58, 1  ;;  %v8022_v7 = vadd.f32 %v8021_v41, %v8020_v6  ;;  %v7251_v31 = vrot.slane %v7250_v11, 1 }
 0x3b2   :  { %v8033_v44 = vrot.slane %v8032_v38, 2  ;;  %v8025_v9 = vrot.slane %v7522_v14, 4  ;;  %v7253_v39 = vrot.slane %v16199_v54, 4  ;;  %v7244_v56 = vadd.f32 %v7243_v36, %v7242_v0 }
 0x3b3   :  { %v8018_v3 = vadd.f32 %v8017_v51, %v8016_v52  ;;  %v7240_v16 = vadd.f32 %v7239_v43, %v7238_v58  ;;  %v8023_v59 = vrot.slane %v8022_v7, 1  ;;  %v7252_v21 = vadd.f32 %v7251_v31, %v7250_v11 }
 0x3b4   :  { %v13841_v53 = vpop.eup %13840  ;;  %v8034_v35 = vadd.f32 %v8033_v44, %v8032_v38  ;;  %v8026_v62 = vadd.f32 %v8025_v9, %v7522_v14  ;;  %v7254_v57 = vadd.f32 %v7253_v39, %v16199_v54  ;;  %v7245_v6 = vrot.slane %v7244_v56, 1 }
 0x3b5   :  { %v8206_v20 = vmul.f32 0.125, %v8018_v3  ;;  %v16243_v28 = vmul.f32 0.125, %v7240_v16  ;;  %v8024_v17 = vadd.f32 %v8023_v59, %v8022_v7  ;;  %v16245_v40 = vmul.f32 0.125, %v7252_v21 }
 0x3b6   :  { %v8035_v55 = vrot.slane %v8034_v35, 1  ;;  %v8027_v18 = vrot.slane %v8026_v62, 2  ;;  %v7255_v13 = vrot.slane %v7254_v57, 2  ;;  %v7246_v0 = vadd.f32 %v7245_v6, %v7244_v56 }
 0x3b7   :  { %v8402_v37 = vsub.f32 %v8206_v20, %v8304_v19  ;;  %v8207_v52 = vmul.f32 0.125, %v8024_v17  ;;  %v8305_v58 = vmul.f32 %v16243_v28, %v16243_v28  ;;  %v8307_v41 = vmul.f32 %v16245_v40, %v16245_v40 }
 0x3b8   :  { %v13843_v11 = vpop.eup %13842  ;;  %v8036_v38 = vadd.f32 %v8035_v55, %v8034_v35  ;;  %v8028_v14 = vadd.f32 %v8027_v18, %v8026_v62  ;;  %v7256_v51 = vadd.f32 %v7255_v13, %v7254_v57  ;;  %v7524_v44 = vmul.f32 %v16199_v54, %v16199_v54 }
 0x3b9   :  { %v9307_v43 = vcombine.low %v13841_v53, %v13843_v11  ;;  %v8500_v7 = vmax.f32 %v8402_v37, 0.0  ;;  %v8403_v31 = vsub.f32 %v8207_v52, %v8305_v58  ;;  %v16253_v19 = vmul.f32 0.125, %v7246_v0 }
 0x3ba   :  { %v8209_v36 = vmul.f32 0.125, %v8036_v38  ;;  %v8029_v9 = vrot.slane %v8028_v14, 1  ;;  %v7257_v39 = vrot.slane %v7256_v51, 1  ;;  %13844 = vrsqrt.f32 %v8597_v15 }
 0x3bb   :  { %v8598_v3 = vadd.f32 1e-05, %v8500_v7  ;;  %v8037_v16 = vrot.slane %v7524_v44, 4  ;;  %v8501_v59 = vmax.f32 %v8403_v31, 0.0  ;;  %v8306_v56 = vmul.f32 %v16253_v19, %v16253_v19 }
 0x3bc   :  { %v8405_v21 = vsub.f32 %v8209_v36, %v8307_v41  ;;  %v8030_v35 = vadd.f32 %v8029_v9, %v8028_v14  ;;  %v7258_v53 = vadd.f32 %v7257_v39, %v7256_v51  ;;  %v9345_v0 = vrot.slane %v9337_v63, %v14076_v4 }
 0x3bd   :  { %13846 = vrsqrt.f32 %v8598_v3  ;;  %v8038_v62 = vadd.f32 %v8037_v16, %v7524_v44  ;;  %v8599_v55 = vadd.f32 1e-05, %v8501_v59  ;;  %v9329_v14 = vrot.slane %v9307_v43, %v14076_v4 }
 0x3be   :  { %v8208_v57 = vmul.f32 0.125, %v8030_v35  ;;  %v8503_v20 = vmax.f32 %v8405_v21, 0.0  ;;  %v16257_v18 = vmul.f32 0.125, %v7258_v53 }
 0x3bf   :  { %v8039_v17 = vrot.slane %v8038_v62, 2  ;;  %13848 = vrsqrt.f32 %v8599_v55 }
 0x3c0   :  { %v8404_v6 = vsub.f32 %v8208_v57, %v8306_v56  ;;  %v8601_v37 = vadd.f32 1e-05, %v8503_v20  ;;  %v8308_v38 = vmul.f32 %v16257_v18, %v16257_v18 }
 0x3c1   :  { %v8040_v13 = vadd.f32 %v8039_v17, %v8038_v62 }
 0x3c2   :  { %v8502_v15 = vmax.f32 %v8404_v6, 0.0 }
 0x3c3   :  { %v8041_v52 = vrot.slane %v8040_v13, 1 }
 0x3c4   :  { %v8600_v58 = vadd.f32 1e-05, %v8502_v15  ;;  %v13845_v41 = vpop.eup %13844 }
 0x3c5   :  { %v8042_v11 = vadd.f32 %v8041_v52, %v8040_v13  ;;  %v16266_v51 = vpop.f32.mrb[84].mxu0 }
 0x3c6   :  { %13850 = vrsqrt.f32 %v8600_v58  ;;  %v7259_v44 = vrot.slane %v16266_v51, 4  ;;  %v7525_v36 = vmul.f32 %v16266_v51, %v16266_v51  ;;  %v16271_v9 = vpop.f32.mrb[84].mxu1  ;;  %v16273_v39 = vpop.f32.mrb[85].mxu0 }
 0x3c7   :  { %v13847_v7 = vpop.eup %13846  ;;  %13852 = vrsqrt.f32 %v8601_v37  ;;  %v8210_v31 = vmul.f32 0.125, %v8042_v11  ;;  %16778 = vst [vmem:[#allocation14_spill] sm:$0xff] %v16271_v9  ;;  %16779 = vst [vmem:[#allocation15_spill] sm:$0xff] %v16273_v39  ;;  %v7271_v5 = vrot.slane %v16271_v9, 4  ;;  %v7527_v22 = vmul.f32 %v16271_v9, %v16271_v9  ;;  %v16279_v43 = vpop.f32.mrb[85].mxu1 }
 0x3c8   :  { %v9308_v3 = vcombine.low %v13845_v41, %v13847_v7  ;;  %v7265_v63 = vrot.slane %v16273_v39, 4  ;;  %16780 = vst [vmem:[#allocation12_spill] sm:$0xff] %v16279_v43  ;;  %v6506_v16 = vpop.f32.mrb[86].mxu0  ;;  %v7260_v21 = vadd.f32 %v7259_v44, %v16266_v51  ;;  %v8043_v35 = vrot.slane %v7525_v36, 4  ;;  %v6547_v62 = vpop.f32.mrb[86].mxu1 }
 0x3c9   :  { %v8406_v59 = vsub.f32 %v8210_v31, %v8308_v38  ;;  %v7526_v56 = vmul.f32 %v16273_v39, %v16273_v39  ;;  %v6507_v53 = vpop.f32.mrb[87].mxu0  ;;  %v7272_v20 = vadd.f32 %v7271_v5, %v16271_v9  ;;  %v8055_v17 = vrot.slane %v7527_v22, 4  ;;  %v6548_v6 = vpop.f32.mrb[87].mxu1 }
 0x3ca   :  { %v9336_v57 = vrot.slane %v9308_v3, %v14076_v4  ;;  %v7266_v55 = vadd.f32 %v7265_v63, %v16273_v39  ;;  %v7261_v15 = vrot.slane %v7260_v21, 2  ;;  %v8044_v37 = vadd.f32 %v8043_v35, %v7525_v36  ;;  %v13849_v53 = vpop.eup %13848  ;;  %v8733_v63 = vld [vmem:[#allocation4 + $0x90] ss:$2 sm:$0xff] }
 0x3cb   :  { %v8504_v13 = vmax.f32 %v8406_v59, 0.0  ;;  %v8049_v52 = vrot.slane %v7526_v56, 4  ;;  %v7273_v41 = vrot.slane %v7272_v20, 2  ;;  %v8056_v11 = vadd.f32 %v8055_v17, %v7527_v22 }
 0x3cc   :  { %v9338_v58 = vcombine.low %v9329_v14, %v9336_v57  ;;  %v7267_v38 = vrot.slane %v7266_v55, 2  ;;  %v7262_v31 = vadd.f32 %v7261_v15, %v7260_v21  ;;  %v8045_v44 = vrot.slane %v8044_v37, 2 }
 0x3cd   :  { %v8602_v7 = vadd.f32 1e-05, %v8504_v13  ;;  %v8050_v16 = vadd.f32 %v8049_v52, %v7526_v56  ;;  %v7274_v5 = vadd.f32 %v7273_v41, %v7272_v20  ;;  %v8057_v62 = vrot.slane %v8056_v11, 2 }
 0x3ce   :  { %v9352_v3 = vrot.slane %v9338_v58, %v14076_v4  ;;  %v7268_v9 = vadd.f32 %v7267_v38, %v7266_v55  ;;  %v7263_v59 = vrot.slane %v7262_v31, 1  ;;  %v8046_v6 = vadd.f32 %v8045_v44, %v8044_v37 }
 0x3cf   :  { %13854 = vrsqrt.f32 %v8602_v7  ;;  %v8051_v36 = vrot.slane %v8050_v16, 2  ;;  %v7275_v57 = vrot.slane %v7274_v5, 1  ;;  %v8058_v22 = vadd.f32 %v8057_v62, %v8056_v11 }
 0x3d0   :  { %v13851_v35 = vpop.eup %13850  ;;  %v9353_v14 = vcombine.low %v9345_v0, %v9352_v3  ;;  %v7269_v17 = vrot.slane %v7268_v9, 1  ;;  %v7264_v15 = vadd.f32 %v7263_v59, %v7262_v31  ;;  %v8047_v56 = vrot.slane %v8046_v6, 1 }
 0x3d1   :  { %v13853_v13 = vpop.eup %13852  ;;  %v9354_v21 = vcombine.low %v13849_v53, %v13851_v35  ;;  %v8052_v52 = vadd.f32 %v8051_v36, %v8050_v16  ;;  %v7276_v58 = vadd.f32 %v7275_v57, %v7274_v5  ;;  %v8059_v20 = vrot.slane %v8058_v22, 1 }
 0x3d2   :  { %v9489_v39 = vmul.f32 %v9353_v14, %v8733_v63  ;;  %v7270_v41 = vadd.f32 %v7269_v17, %v7268_v9  ;;  %v16291_v38 = vmul.f32 0.125, %v7264_v15  ;;  %v8048_v37 = vadd.f32 %v8047_v56, %v8046_v6 }
 0x3d3   :  { %v16289_v55 = vrot.slane %v9354_v21, %v14076_v4  ;;  %v8053_v7 = vrot.slane %v8052_v52, 1 }
 0x3d4   :  { %v9797_v0 = vrot.slane %v9489_v39, %v14140_v45  ;;  %v9801_v11 = vrot.slane %v9489_v39, %v14143_v46  ;;  %v9805_v44 = vrot.slane %v9489_v39, %v14146_v47  ;;  %v9809_v31 = vrot.slane %v9489_v39, %v14149_v48 }
 0x3d5   :  { %v9813_v16 = vrot.slane %v9489_v39, %v14152_v49  ;;  %v9817_v53 = vrot.slane %v9489_v39, %v14191_v24  ;;  %v9821_v9 = vrot.slane %v9489_v39, %v14207_v8  ;;  %v9825_v3 = vrot.slane %v9489_v39, %v14213_v1 }
 0x3d6   :  { %v10068_v5 = vmul.f32 %v9797_v0, %v16085_v33  ;;  %v10069_v62 = vmul.f32 %v9801_v11, %v16093_v25  ;;  %v10070_v63 = vmul.f32 %v9805_v44, %v16087_v30  ;;  %v10071_v59 = vmul.f32 %v9809_v31, %v16099_v29 }
 0x3d7   :  { %v10072_v6 = vmul.f32 %v9813_v16, %v16162_v32  ;;  %v10073_v36 = vmul.f32 %v9817_v53, %v16175_v42  ;;  %v10074_v35 = vmul.f32 %v9821_v9, %v16171_v23  ;;  %v10075_v14 = vmul.f32 %v9825_v3, %v16233_v2  ;;  %v16781_v23 = vld [vmem:[#allocation17_spill] sm:$0xff]  ;;  %v16782_v2 = vld [vmem:[#allocation11_spill] sm:$0xff] }
 0x3d8   :  { %v10633_v57 = vcombine.low %v10068_v5, %v10069_v62  ;;  %v10634_v17 = vcombine.low %v10070_v63, %v10071_v59  ;;  %v10893_v39 = vmul.f32 %v9797_v0, %v16033_v50  ;;  %v10894_v33 = vmul.f32 %v9801_v11, %v16037_v61  ;;  %v16783_v61 = vld [vmem:[#allocation13_spill] sm:$0xff] }
 0x3d9   :  { %v13855_v21 = vpop.eup %13854  ;;  %v10635_v25 = vcombine.low %v10072_v6, %v10073_v36  ;;  %v10636_v15 = vcombine.low %v10074_v35, %v10075_v14  ;;  %v10895_v30 = vmul.f32 %v9805_v44, %v16035_v10  ;;  %v10896_v29 = vmul.f32 %v9809_v31, %v16039_v60 }
 0x3da   :  { %v10643_v32 = vrot.slane %v10633_v57, %v14076_v4  ;;  %v10650_v42 = vrot.slane %v10634_v17, %v14076_v4  ;;  %v10897_v56 = vmul.f32 %v9813_v16, %v16781_v23  ;;  %v10898_v5 = vmul.f32 %v9817_v53, %v16782_v2 }
 0x3db   :  { %v10657_v62 = vrot.slane %v10635_v25, %v14076_v4  ;;  %v10664_v50 = vrot.slane %v10636_v15, %v14076_v4  ;;  %v10899_v0 = vmul.f32 %v9821_v9, %v16783_v61  ;;  %v10900_v11 = vmul.f32 %v9825_v3, %v16123_v12  ;;  %v8759_v3 = vld [vmem:[#allocation4 + $0x91] ss:$2 sm:$0xff] }
 0x3dc   :  { %v10665_v63 = vcombine.low %v10643_v32, %v10650_v42  ;;  %v9355_v10 = vcombine.low %v13853_v13, %v13855_v21  ;;  %v8211_v44 = vmul.f32 0.125, %v8048_v37  ;;  %v8309_v60 = vmul.f32 %v16291_v38, %v16291_v38 }
 0x3dd   :  { %v10666_v31 = vcombine.low %v10657_v62, %v10664_v50  ;;  %v16323_v59 = vmul.f32 0.125, %v7276_v58  ;;  %v8060_v16 = vadd.f32 %v8059_v20, %v8058_v22  ;;  %v16325_v6 = vmul.f32 0.125, %v7270_v41 }
 0x3de   :  { %v10673_v53 = vrot.slane %v10665_v63, %v14076_v4  ;;  %v16329_v36 = vrot.slane %v9355_v10, %v14076_v4  ;;  %v8407_v9 = vsub.f32 %v8211_v44, %v8309_v60  ;;  %v8054_v35 = vadd.f32 %v8053_v7, %v8052_v52 }
 0x3df   :  { %v10680_v12 = vrot.slane %v10666_v31, %v14076_v4  ;;  %v8213_v13 = vmul.f32 0.125, %v8060_v16  ;;  %v8311_v37 = vmul.f32 %v16323_v59, %v16323_v59  ;;  %v8310_v58 = vmul.f32 %v16325_v6, %v16325_v6 }
 0x3e0   :  { %v8505_v20 = vmax.f32 %v8407_v9, 0.0  ;;  %v8212_v41 = vmul.f32 0.125, %v8054_v35  ;;  %v7277_v14 = vrot.slane %v16279_v43, 4  ;;  %v7528_v52 = vmul.f32 %v16279_v43, %v16279_v43 }
 0x3e1   :  { %v10681_v57 = vcombine.low %v10673_v53, %v10680_v12  ;;  %v8409_v17 = vsub.f32 %v8213_v13, %v8311_v37 }
 0x3e2   :  { %v8408_v7 = vsub.f32 %v8212_v41, %v8310_v58  ;;  %v7278_v21 = vadd.f32 %v7277_v14, %v16279_v43  ;;  %v8603_v15 = vadd.f32 1e-05, %v8505_v20  ;;  %v8061_v2 = vrot.slane %v7528_v52, 4 }
 0x3e3   :  { %v10817_v25 = vsub.f32 %v8759_v3, %v10681_v57  ;;  %v8507_v32 = vmax.f32 %v8409_v17, 0.0 }
 0x3e4   :  { %v8506_v42 = vmax.f32 %v8408_v7, 0.0  ;;  %v7279_v23 = vrot.slane %v7278_v21, 2  ;;  %13856 = vrsqrt.f32 %v8603_v15 }
 0x3e5   :  { %v11223_v62 = vrot.slane %v10817_v25, %v14140_v45  ;;  %v11227_v50 = vrot.slane %v10817_v25, %v14143_v46  ;;  %v11231_v61 = vrot.slane %v10817_v25, %v14146_v47  ;;  %v11235_v63 = vrot.slane %v10817_v25, %v14149_v48  ;;  %v16350_v16 = vpop.f32.mrb[88].mxu0 }
 0x3e6   :  { %v11239_v10 = vrot.slane %v10817_v25, %v14152_v49  ;;  %v11243_v44 = vrot.slane %v10817_v25, %v14191_v24  ;;  %v11247_v60 = vrot.slane %v10817_v25, %v14207_v8  ;;  %v11251_v31 = vrot.slane %v10817_v25, %v14213_v1  ;;  %v16352_v13 = vpop.f32.mrb[88].mxu1  ;;  %v16354_v37 = vpop.f32.mrb[89].mxu0 }
 0x3e7   :  { %v11494_v53 = vadd.f32 %v11223_v62, %v10893_v39  ;;  %v11495_v9 = vadd.f32 %v11227_v50, %v10894_v33  ;;  %v11496_v35 = vadd.f32 %v11231_v61, %v10895_v30  ;;  %v11497_v12 = vadd.f32 %v11235_v63, %v10896_v29  ;;  %v16356_v14 = vpop.f32.mrb[89].mxu1  ;;  %v6588_v57 = vpop.f32.mrb[90].mxu0 }
 0x3e8   :  { %v11498_v58 = vadd.f32 %v11239_v10, %v10897_v56  ;;  %v11499_v3 = vadd.f32 %v11243_v44, %v10898_v5  ;;  %v11500_v20 = vadd.f32 %v11247_v60, %v10899_v0  ;;  %v11501_v41 = vadd.f32 %v11251_v31, %v10900_v11  ;;  %v6589_v43 = vpop.f32.mrb[91].mxu0  ;;  %v6629_v39 = vpop.f32.mrb[90].mxu1 }
 0x3e9   :  { %v11592_v17 = vmax.f32 %v11494_v53, 0.0  ;;  %v11593_v7 = vmax.f32 %v11495_v9, 0.0  ;;  %v11594_v25 = vmax.f32 %v11496_v35, 0.0  ;;  %v11595_v22 = vmax.f32 %v11497_v12, 0.0  ;;  %v6630_v50 = vpop.f32.mrb[91].mxu1 }
 0x3ea   :  { %v11596_v33 = vmax.f32 %v11498_v58, 0.0  ;;  %v11597_v30 = vmax.f32 %v11499_v3, 0.0  ;;  %v11598_v29 = vmax.f32 %v11500_v20, 0.0  ;;  %v11599_v62 = vmax.f32 %v11501_v41, 0.0 }
 0x3eb   :  { %11690 = vst [vmem:[%s16652_s3 + $0x240] sm:$0xff] %v11592_v17  ;;  %11691 = vst [vmem:[%s16652_s3 + $0x248] sm:$0xff] %v11593_v7  ;;  %v8604_v43 = vadd.f32 1e-05, %v8506_v42  ;;  %v7280_v56 = vadd.f32 %v7279_v23, %v7278_v21  ;;  %v8062_v5 = vadd.f32 %v8061_v2, %v7528_v52  ;;  %v7283_v0 = vrot.slane %v16350_v16, 4 }
 0x3ec   :  { %11692 = vst [vmem:[%s16652_s3 + $0x250] sm:$0xff] %v11594_v25  ;;  %11693 = vst [vmem:[%s16652_s3 + $0x258] sm:$0xff] %v11595_v22  ;;  %v7529_v11 = vmul.f32 %v16350_v16, %v16350_v16  ;;  %v7295_v22 = vrot.slane %v16352_v13, 4  ;;  %v7531_v52 = vmul.f32 %v16352_v13, %v16352_v13  ;;  %v8605_v21 = vadd.f32 1e-05, %v8507_v32 }
 0x3ed   :  { %11694 = vst [vmem:[%s16652_s3 + $0x260] sm:$0xff] %v11596_v33  ;;  %11695 = vst [vmem:[%s16652_s3 + $0x268] sm:$0xff] %v11597_v30  ;;  %v7281_v15 = vrot.slane %v7280_v56, 1  ;;  %v8063_v42 = vrot.slane %v8062_v5, 2  ;;  %v7289_v23 = vrot.slane %v16354_v37, 4  ;;  %13858 = vrsqrt.f32 %v8604_v43 }
 0x3ee   :  { %11696 = vst [vmem:[%s16652_s3 + $0x270] sm:$0xff] %v11598_v29  ;;  %11697 = vst [vmem:[%s16652_s3 + $0x278] sm:$0xff] %v11599_v62  ;;  %v7284_v2 = vadd.f32 %v7283_v0, %v16350_v16  ;;  %v8067_v61 = vrot.slane %v7529_v11, 4  ;;  %v7296_v63 = vadd.f32 %v7295_v22, %v16352_v13  ;;  %v8079_v60 = vrot.slane %v7531_v52, 4 }
 0x3ef   :  { %v7282_v10 = vadd.f32 %v7281_v15, %v7280_v56  ;;  %v8064_v44 = vadd.f32 %v8063_v42, %v8062_v5  ;;  %v7290_v31 = vadd.f32 %v7289_v23, %v16354_v37  ;;  %v7530_v32 = vmul.f32 %v16354_v37, %v16354_v37  ;;  %v13857_v56 = vpop.eup %13856 }
 0x3f0   :  { %v7285_v53 = vrot.slane %v7284_v2, 2  ;;  %v8068_v9 = vadd.f32 %v8067_v61, %v7529_v11  ;;  %v7297_v35 = vrot.slane %v7296_v63, 2  ;;  %v8080_v3 = vadd.f32 %v8079_v60, %v7531_v52 }
 0x3f1   :  { %v16394_v12 = vmul.f32 0.125, %v7282_v10  ;;  %v8065_v58 = vrot.slane %v8064_v44, 1  ;;  %v7291_v20 = vrot.slane %v7290_v31, 2  ;;  %v8073_v7 = vrot.slane %v7530_v32, 4 }
 0x3f2   :  { %v7286_v41 = vadd.f32 %v7285_v53, %v7284_v2  ;;  %v8069_v57 = vrot.slane %v8068_v9, 2  ;;  %v7298_v17 = vadd.f32 %v7297_v35, %v7296_v63  ;;  %v8081_v33 = vrot.slane %v8080_v3, 2 }
 0x3f3   :  { %v8066_v25 = vadd.f32 %v8065_v58, %v8064_v44  ;;  %v8312_v39 = vmul.f32 %v16394_v12, %v16394_v12  ;;  %v7292_v30 = vadd.f32 %v7291_v20, %v7290_v31  ;;  %v8074_v43 = vadd.f32 %v8073_v7, %v7530_v32 }
 0x3f4   :  { %v7287_v29 = vrot.slane %v7286_v41, 1  ;;  %v8070_v62 = vadd.f32 %v8069_v57, %v8068_v9  ;;  %v7299_v50 = vrot.slane %v7298_v17, 1  ;;  %v8082_v0 = vadd.f32 %v8081_v33, %v8080_v3 }
 0x3f5   :  { %v8214_v5 = vmul.f32 0.125, %v8066_v25  ;;  %v7293_v11 = vrot.slane %v7292_v30, 1  ;;  %v7301_v22 = vrot.slane %v16356_v14, 4  ;;  %v8075_v23 = vrot.slane %v8074_v43, 2 }
 0x3f6   :  { %v7288_v52 = vadd.f32 %v7287_v29, %v7286_v41  ;;  %v8071_v15 = vrot.slane %v8070_v62, 1  ;;  %v7300_v42 = vadd.f32 %v7299_v50, %v7298_v17  ;;  %v8083_v61 = vrot.slane %v8082_v0, 1 }
 0x3f7   :  { %v8410_v2 = vsub.f32 %v8214_v5, %v8312_v39  ;;  %v7294_v63 = vadd.f32 %v7293_v11, %v7292_v30  ;;  %v7302_v10 = vadd.f32 %v7301_v22, %v16356_v14  ;;  %v13859_v44 = vpop.eup %13858  ;;  %v8076_v9 = vadd.f32 %v8075_v23, %v8074_v43 }
 0x3f8   :  { %v16400_v60 = vmul.f32 0.125, %v7288_v52  ;;  %v8072_v31 = vadd.f32 %v8071_v15, %v8070_v62  ;;  %v16402_v53 = vmul.f32 0.125, %v7300_v42  ;;  %v9356_v35 = vcombine.low %v13857_v56, %v13859_v44 }
 0x3f9   :  { %v8508_v32 = vmax.f32 %v8410_v2, 0.0  ;;  %v8084_v58 = vadd.f32 %v8083_v61, %v8082_v0  ;;  %v16404_v3 = vmul.f32 0.125, %v7294_v63  ;;  %13860 = vrsqrt.f32 %v8605_v21 }
 0x3fa   :  { %v8215_v20 = vmul.f32 0.125, %v8072_v31  ;;  %v8313_v41 = vmul.f32 %v16400_v60, %v16400_v60  ;;  %v8077_v57 = vrot.slane %v8076_v9, 1  ;;  %v8315_v25 = vmul.f32 %v16402_v53, %v16402_v53 }
 0x3fb   :  { %v8606_v17 = vadd.f32 1e-05, %v8508_v32  ;;  %v8217_v7 = vmul.f32 0.125, %v8084_v58  ;;  %v8314_v39 = vmul.f32 %v16404_v3, %v16404_v3  ;;  %v7303_v29 = vrot.slane %v7302_v10, 2 }
 0x3fc   :  { %v8411_v33 = vsub.f32 %v8215_v20, %v8313_v41  ;;  %v8078_v30 = vadd.f32 %v8077_v57, %v8076_v9  ;;  %v7532_v62 = vmul.f32 %v16356_v14, %v16356_v14  ;;  %v9378_v20 = vrot.slane %v9356_v35, %v14076_v4 }
 0x3fd   :  { %13862 = vrsqrt.f32 %v8606_v17  ;;  %v7304_v43 = vadd.f32 %v7303_v29, %v7302_v10  ;;  %v8413_v5 = vsub.f32 %v8217_v7, %v8315_v25  ;;  %v16784_v10 = vcombine.low %v16289_v55, %v16329_v36 }
 0x3fe   :  { %v8509_v21 = vmax.f32 %v8411_v33, 0.0  ;;  %v8216_v50 = vmul.f32 0.125, %v8078_v30  ;;  %v8085_v56 = vrot.slane %v7532_v62, 4 }
 0x3ff   :  { %v7305_v22 = vrot.slane %v7304_v43, 1  ;;  %v8511_v2 = vmax.f32 %v8413_v5, 0.0  ;;  %v9394_v58 = vrot.slane %v16784_v10, %v14076_v4 }
 0x400   :  { %v8607_v0 = vadd.f32 1e-05, %v8509_v21  ;;  %v8412_v11 = vsub.f32 %v8216_v50, %v8314_v39  ;;  %v8086_v52 = vadd.f32 %v8085_v56, %v7532_v62 }
 0x401   :  { %v7306_v42 = vadd.f32 %v7305_v22, %v7304_v43  ;;  %v8609_v41 = vadd.f32 1e-05, %v8511_v2 }
 0x402   :  { %v8510_v15 = vmax.f32 %v8412_v11, 0.0  ;;  %v8087_v23 = vrot.slane %v8086_v52, 2  ;;  %13864 = vrsqrt.f32 %v8607_v0 }
 0x403   :  { %v13861_v61 = vpop.eup %13860  ;;  %v16414_v44 = vmul.f32 0.125, %v7306_v42 }
 0x404   :  { %v8608_v63 = vadd.f32 1e-05, %v8510_v15  ;;  %v8088_v31 = vadd.f32 %v8087_v23, %v8086_v52 }
 0x405   :  { %v8316_v57 = vmul.f32 %v16414_v44, %v16414_v44 }
 0x406   :  { %13866 = vrsqrt.f32 %v8608_v63  ;;  %v8089_v9 = vrot.slane %v8088_v31, 1  ;;  %v16423_v17 = vpop.f32.mrb[92].mxu0 }
 0x407   :  { %v13863_v32 = vpop.eup %13862  ;;  %16785 = vst [vmem:[#allocation16_spill] sm:$0xff] %v16423_v17  ;;  %v7307_v39 = vrot.slane %v16423_v17, 4  ;;  %v7533_v33 = vmul.f32 %v16423_v17, %v16423_v17  ;;  %v16428_v30 = vpop.f32.mrb[92].mxu1  ;;  %13868 = vrsqrt.f32 %v8609_v41 }
 0x408   :  { %v9357_v7 = vcombine.low %v13861_v61, %v13863_v32  ;;  %v8090_v25 = vadd.f32 %v8089_v9, %v8088_v31  ;;  %16786 = vst [vmem:[#allocation9_spill] sm:$0xff] %v16428_v30  ;;  %v16430_v29 = vpop.f32.mrb[93].mxu0  ;;  %v7319_v55 = vrot.slane %v16428_v30, 4  ;;  %v7535_v36 = vmul.f32 %v16428_v30, %v16428_v30  ;;  %v16438_v21 = vpop.f32.mrb[93].mxu1 }
 0x409   :  { %16787 = vst [vmem:[#allocation8_spill] sm:$0xff] %v16430_v29  ;;  %v7313_v35 = vrot.slane %v16430_v29, 4  ;;  %v7534_v62 = vmul.f32 %v16430_v29, %v16430_v29  ;;  %16788 = vst [vmem:[#allocation10_spill] sm:$0xff] %v16438_v21  ;;  %v6670_v50 = vpop.f32.mrb[94].mxu0  ;;  %v7308_v5 = vadd.f32 %v7307_v39, %v16423_v17  ;;  %v8091_v0 = vrot.slane %v7533_v33, 4  ;;  %v6711_v22 = vpop.f32.mrb[94].mxu1 }
 0x40a   :  { %v9385_v43 = vrot.slane %v9357_v7, %v14076_v4  ;;  %v8218_v56 = vmul.f32 0.125, %v8090_v25  ;;  %v6671_v11 = vpop.f32.mrb[95].mxu0  ;;  %v7320_v52 = vadd.f32 %v7319_v55, %v16428_v30  ;;  %v8103_v15 = vrot.slane %v7535_v36, 4  ;;  %v6712_v2 = vpop.f32.mrb[95].mxu1  ;;  %v8735_v30 = vld [vmem:[#allocation4 + $0xa0] ss:$2 sm:$0xff] }
 0x40b   :  { %v7314_v42 = vadd.f32 %v7313_v35, %v16430_v29  ;;  %v8097_v23 = vrot.slane %v7534_v62, 4  ;;  %v7309_v31 = vrot.slane %v7308_v5, 2  ;;  %v8092_v9 = vadd.f32 %v8091_v0, %v7533_v33 }
 0x40c   :  { %v9387_v61 = vcombine.low %v9378_v20, %v9385_v43  ;;  %v8414_v63 = vsub.f32 %v8218_v56, %v8316_v57  ;;  %v7321_v32 = vrot.slane %v7320_v52, 2  ;;  %v8104_v10 = vadd.f32 %v8103_v15, %v7535_v36  ;;  %v16446_v39 = vpop.eup %13864 }
 0x40d   :  { %v7315_v7 = vrot.slane %v7314_v42, 2  ;;  %v16444_v25 = vadd.f32 %v8097_v23, %v7534_v62  ;;  %v7310_v55 = vadd.f32 %v7309_v31, %v7308_v5  ;;  %v8093_v22 = vrot.slane %v8092_v9, 2 }
 0x40e   :  { %v9401_v50 = vrot.slane %v9387_v61, %v14076_v4  ;;  %v8512_v11 = vmax.f32 %v8414_v63, 0.0  ;;  %v7322_v35 = vadd.f32 %v7321_v32, %v7320_v52  ;;  %v8105_v2 = vrot.slane %v8104_v10, 2 }
 0x40f   :  { %v7316_v20 = vadd.f32 %v7315_v7, %v7314_v42  ;;  %v7311_v56 = vrot.slane %v7310_v55, 1  ;;  %v8094_v36 = vadd.f32 %v8093_v22, %v8092_v9  ;;  %v8099_v5 = vrot.slane %v16444_v25, 2 }
 0x410   :  { %v13867_v57 = vpop.eup %13866  ;;  %v9402_v43 = vcombine.low %v9394_v58, %v9401_v50  ;;  %v8610_v33 = vadd.f32 1e-05, %v8512_v11  ;;  %v7323_v0 = vrot.slane %v7322_v35, 1  ;;  %v8106_v15 = vadd.f32 %v8105_v2, %v8104_v10 }
 0x411   :  { %v9403_v62 = vcombine.low %v16446_v39, %v13867_v57  ;;  %v7317_v23 = vrot.slane %v7316_v20, 1  ;;  %v7312_v61 = vadd.f32 %v7311_v56, %v7310_v55  ;;  %v8095_v63 = vrot.slane %v8094_v36, 1  ;;  %v13869_v56 = vpop.eup %13868 }
 0x412   :  { %v9490_v29 = vmul.f32 %v9402_v43, %v8735_v30  ;;  %13870 = vrsqrt.f32 %v8610_v33  ;;  %v7324_v41 = vadd.f32 %v7323_v0, %v7322_v35  ;;  %v8107_v52 = vrot.slane %v8106_v15, 1 }
 0x413   :  { %v7318_v31 = vadd.f32 %v7317_v23, %v7316_v20 }
 0x414   :  { %v9829_v42 = vrot.slane %v9490_v29, %v14140_v45  ;;  %v9833_v58 = vrot.slane %v9490_v29, %v14143_v46  ;;  %v9837_v9 = vrot.slane %v9490_v29, %v14146_v47  ;;  %v9841_v32 = vrot.slane %v9490_v29, %v14149_v48 }
 0x415   :  { %v9845_v10 = vrot.slane %v9490_v29, %v14152_v49  ;;  %v9849_v30 = vrot.slane %v9490_v29, %v14191_v24  ;;  %v9853_v7 = vrot.slane %v9490_v29, %v14207_v8  ;;  %v9857_v39 = vrot.slane %v9490_v29, %v14213_v1 }
 0x416   :  { %v10076_v50 = vmul.f32 %v9829_v42, %v16243_v28  ;;  %v10077_v11 = vmul.f32 %v9833_v58, %v16253_v19  ;;  %v10078_v55 = vmul.f32 %v9837_v9, %v16245_v40  ;;  %v10079_v22 = vmul.f32 %v9841_v32, %v16257_v18 }
 0x417   :  { %v10080_v35 = vmul.f32 %v9845_v10, %v16291_v38  ;;  %v10081_v2 = vmul.f32 %v9849_v30, %v16325_v6  ;;  %v10082_v20 = vmul.f32 %v9853_v7, %v16323_v59  ;;  %v10083_v57 = vmul.f32 %v9857_v39, %v16394_v12  ;;  %v16789_v12 = vld [vmem:[#allocation15_spill] sm:$0xff] }
 0x418   :  { %v10682_v43 = vcombine.low %v10076_v50, %v10077_v11  ;;  %v10683_v33 = vcombine.low %v10078_v55, %v10079_v22  ;;  %v10901_v29 = vmul.f32 %v9829_v42, %v16193_v26  ;;  %v10902_v28 = vmul.f32 %v9833_v58, %v16197_v27  ;;  %v16790_v27 = vld [vmem:[#allocation14_spill] sm:$0xff]  ;;  %v16791_v58 = vld [vmem:[#allocation12_spill] sm:$0xff] }
 0x419   :  { %v10684_v19 = vcombine.low %v10080_v35, %v10081_v2  ;;  %v10685_v0 = vcombine.low %v10082_v20, %v10083_v57  ;;  %v10903_v40 = vmul.f32 %v9837_v9, %v16195_v34  ;;  %v10904_v18 = vmul.f32 %v9841_v32, %v16199_v54 }
 0x41a   :  { %v10692_v38 = vrot.slane %v10682_v43, %v14076_v4  ;;  %v10699_v6 = vrot.slane %v10683_v33, %v14076_v4  ;;  %v10905_v59 = vmul.f32 %v9845_v10, %v16266_v51  ;;  %v10906_v23 = vmul.f32 %v9849_v30, %v16789_v12 }
 0x41b   :  { %v10706_v50 = vrot.slane %v10684_v19, %v14076_v4  ;;  %v10713_v26 = vrot.slane %v10685_v0, %v14076_v4  ;;  %v10907_v42 = vmul.f32 %v9853_v7, %v16790_v27  ;;  %v10908_v11 = vmul.f32 %v9857_v39, %v16791_v58 }
 0x41c   :  { %v13871_v55 = vpop.eup %13870  ;;  %v10714_v34 = vcombine.low %v10692_v38, %v10699_v6  ;;  %v16479_v9 = vmul.f32 0.125, %v7312_v61  ;;  %v8096_v54 = vadd.f32 %v8095_v63, %v8094_v36  ;;  %v16482_v22 = vrot.slane %v9403_v62, %v14076_v4  ;;  %v8761_v63 = vld [vmem:[#allocation4 + $0xa1] ss:$2 sm:$0xff] }
 0x41d   :  { %v10715_v32 = vcombine.low %v10706_v50, %v10713_v26  ;;  %v9404_v51 = vcombine.low %v13869_v56, %v13871_v55  ;;  %v16484_v10 = vmul.f32 0.125, %v7324_v41  ;;  %v8108_v2 = vadd.f32 %v8107_v52, %v8106_v15 }
 0x41e   :  { %v10722_v30 = vrot.slane %v10714_v34, %v14076_v4  ;;  %v8219_v35 = vmul.f32 0.125, %v8096_v54  ;;  %v8317_v7 = vmul.f32 %v16479_v9, %v16479_v9  ;;  %v16493_v36 = vmul.f32 0.125, %v7318_v31 }
 0x41f   :  { %v10729_v39 = vrot.slane %v10715_v32, %v14076_v4  ;;  %v16491_v61 = vrot.slane %v9404_v51, %v14076_v4  ;;  %v8100_v62 = vadd.f32 %v8099_v5, %v16444_v25  ;;  %v7325_v41 = vrot.slane %v16438_v21, 4 }
 0x420   :  { %v8415_v20 = vsub.f32 %v8219_v35, %v8317_v7  ;;  %v7536_v57 = vmul.f32 %v16438_v21, %v16438_v21  ;;  %v8221_v31 = vmul.f32 0.125, %v8108_v2  ;;  %v8319_v25 = vmul.f32 %v16484_v10, %v16484_v10 }
 0x421   :  { %v10730_v43 = vcombine.low %v10722_v30, %v10729_v39  ;;  %v8101_v52 = vrot.slane %v8100_v62, 1  ;;  %v7326_v33 = vadd.f32 %v7325_v41, %v16438_v21  ;;  %v8318_v5 = vmul.f32 %v16493_v36, %v16493_v36 }
 0x422   :  { %v8109_v56 = vrot.slane %v7536_v57, 4  ;;  %v8513_v0 = vmax.f32 %v8415_v20, 0.0 }
 0x423   :  { %v10818_v19 = vsub.f32 %v8761_v63, %v10730_v43  ;;  %v8102_v38 = vadd.f32 %v8101_v52, %v8100_v62  ;;  %v7327_v6 = vrot.slane %v7326_v33, 2 }
 0x424   :  { %v8110_v12 = vadd.f32 %v8109_v56, %v7536_v57 }
 0x425   :  { %v11255_v50 = vrot.slane %v10818_v19, %v14140_v45  ;;  %v11259_v26 = vrot.slane %v10818_v19, %v14143_v46  ;;  %v11263_v27 = vrot.slane %v10818_v19, %v14146_v47  ;;  %v11267_v58 = vrot.slane %v10818_v19, %v14149_v48 }
 0x426   :  { %v11271_v55 = vrot.slane %v10818_v19, %v14152_v49  ;;  %v11275_v34 = vrot.slane %v10818_v19, %v14191_v24  ;;  %v11279_v54 = vrot.slane %v10818_v19, %v14207_v8  ;;  %v11283_v32 = vrot.slane %v10818_v19, %v14213_v1 }
 0x427   :  { %v11502_v51 = vadd.f32 %v11255_v50, %v10901_v29  ;;  %v11503_v30 = vadd.f32 %v11259_v26, %v10902_v28  ;;  %v11504_v35 = vadd.f32 %v11263_v27, %v10903_v40  ;;  %v11505_v7 = vadd.f32 %v11267_v58, %v10904_v18  ;;  %v16514_v2 = vpop.f32.mrb[96].mxu0 }
 0x428   :  { %v11506_v39 = vadd.f32 %v11271_v55, %v10905_v59  ;;  %v11507_v62 = vadd.f32 %v11275_v34, %v10906_v23  ;;  %v11508_v63 = vadd.f32 %v11279_v54, %v10907_v42  ;;  %v11509_v20 = vadd.f32 %v11283_v32, %v10908_v11  ;;  %v16516_v41 = vpop.f32.mrb[97].mxu0 }
 0x429   :  { %v11600_v57 = vmax.f32 %v11502_v51, 0.0  ;;  %v11601_v43 = vmax.f32 %v11503_v30, 0.0  ;;  %v11602_v52 = vmax.f32 %v11504_v35, 0.0  ;;  %v11603_v56 = vmax.f32 %v11505_v7, 0.0  ;;  %v6752_v15 = vpop.f32.mrb[98].mxu0 }
 0x42a   :  { %v11604_v21 = vmax.f32 %v11506_v39, 0.0  ;;  %v11605_v17 = vmax.f32 %v11507_v62, 0.0  ;;  %v11606_v19 = vmax.f32 %v11508_v63, 0.0  ;;  %v11607_v29 = vmax.f32 %v11509_v20, 0.0  ;;  %v6753_v28 = vpop.f32.mrb[99].mxu0 }
 0x42b   :  { %11698 = vst [vmem:[%s16652_s3 + $0x280] sm:$0xff] %v11600_v57  ;;  %11699 = vst [vmem:[%s16652_s3 + $0x288] sm:$0xff] %v11601_v43  ;;  %v8417_v40 = vsub.f32 %v8221_v31, %v8319_v25  ;;  %v8220_v18 = vmul.f32 0.125, %v8102_v38  ;;  %v7328_v59 = vadd.f32 %v7327_v6, %v7326_v33  ;;  %v8111_v23 = vrot.slane %v8110_v12, 2 }
 0x42c   :  { %11700 = vst [vmem:[%s16652_s3 + $0x290] sm:$0xff] %v11602_v52  ;;  %11701 = vst [vmem:[%s16652_s3 + $0x298] sm:$0xff] %v11603_v56  ;;  %v7331_v42 = vrot.slane %v16514_v2, 4  ;;  %v7537_v11 = vmul.f32 %v16514_v2, %v16514_v2  ;;  %v8611_v15 = vadd.f32 1e-05, %v8513_v0 }
 0x42d   :  { %11702 = vst [vmem:[%s16652_s3 + $0x2a0] sm:$0xff] %v11604_v21  ;;  %11703 = vst [vmem:[%s16652_s3 + $0x2a8] sm:$0xff] %v11605_v17  ;;  %v7337_v21 = vrot.slane %v16516_v41, 4  ;;  %v8416_v33 = vsub.f32 %v8220_v18, %v8318_v5  ;;  %v7329_v31 = vrot.slane %v7328_v59, 1  ;;  %v7538_v17 = vmul.f32 %v16516_v41, %v16516_v41 }
 0x42e   :  { %11704 = vst [vmem:[%s16652_s3 + $0x2b0] sm:$0xff] %v11606_v19  ;;  %11705 = vst [vmem:[%s16652_s3 + $0x2b8] sm:$0xff] %v11607_v29  ;;  %v8112_v25 = vadd.f32 %v8111_v23, %v8110_v12  ;;  %v7332_v38 = vadd.f32 %v7331_v42, %v16514_v2  ;;  %v8115_v6 = vrot.slane %v7537_v11, 4  ;;  %v8515_v26 = vmax.f32 %v8417_v40, 0.0 }
 0x42f   :  { %v7338_v50 = vadd.f32 %v7337_v21, %v16516_v41  ;;  %v8514_v27 = vmax.f32 %v8416_v33, 0.0  ;;  %v7330_v58 = vadd.f32 %v7329_v31, %v7328_v59  ;;  %v8121_v55 = vrot.slane %v7538_v17, 4 }
 0x430   :  { %v8113_v34 = vrot.slane %v8112_v25, 1  ;;  %v7333_v54 = vrot.slane %v7332_v38, 2  ;;  %v8116_v32 = vadd.f32 %v8115_v6, %v7537_v11  ;;  %13872 = vrsqrt.f32 %v8611_v15 }
 0x431   :  { %v7339_v51 = vrot.slane %v7338_v50, 2  ;;  %v8612_v5 = vadd.f32 1e-05, %v8514_v27  ;;  %v16550_v0 = vmul.f32 0.125, %v7330_v58  ;;  %v8122_v30 = vadd.f32 %v8121_v55, %v7538_v17 }
 0x432   :  { %v8114_v35 = vadd.f32 %v8113_v34, %v8112_v25  ;;  %v7334_v12 = vadd.f32 %v7333_v54, %v7332_v38  ;;  %v8117_v7 = vrot.slane %v8116_v32, 2  ;;  %v8613_v56 = vadd.f32 1e-05, %v8515_v26 }
 0x433   :  { %v7340_v39 = vadd.f32 %v7339_v51, %v7338_v50  ;;  %13874 = vrsqrt.f32 %v8612_v5  ;;  %v8320_v62 = vmul.f32 %v16550_v0, %v16550_v0  ;;  %v8123_v63 = vrot.slane %v8122_v30, 2 }
 0x434   :  { %v8222_v20 = vmul.f32 0.125, %v8114_v35  ;;  %v7335_v57 = vrot.slane %v7334_v12, 1  ;;  %v8118_v43 = vadd.f32 %v8117_v7, %v8116_v32  ;;  %13876 = vrsqrt.f32 %v8613_v56 }
 0x435   :  { %v7341_v52 = vrot.slane %v7340_v39, 1  ;;  %v8124_v19 = vadd.f32 %v8123_v63, %v8122_v30  ;;  %v16792_v63 = vcombine.low %v16482_v22, %v16491_v61 }
 0x436   :  { %v8418_v29 = vsub.f32 %v8222_v20, %v8320_v62  ;;  %v7336_v28 = vadd.f32 %v7335_v57, %v7334_v12  ;;  %v8119_v40 = vrot.slane %v8118_v43, 1 }
 0x437   :  { %v7342_v18 = vadd.f32 %v7341_v52, %v7340_v39  ;;  %v8125_v59 = vrot.slane %v8124_v19, 1  ;;  %v9443_v20 = vrot.slane %v16792_v63, %v14076_v4 }
 0x438   :  { %v8516_v23 = vmax.f32 %v8418_v29, 0.0  ;;  %v16554_v42 = vmul.f32 0.125, %v7336_v28  ;;  %v8120_v11 = vadd.f32 %v8119_v40, %v8118_v43  ;;  %v8737_v43 = vld [vmem:[#allocation4 + $0xb0] ss:$2 sm:$0xff] }
 0x439   :  { %v16556_v21 = vmul.f32 0.125, %v7342_v18  ;;  %v8126_v15 = vadd.f32 %v8125_v59, %v8124_v19 }
 0x43a   :  { %v8614_v33 = vadd.f32 1e-05, %v8516_v23  ;;  %v8223_v31 = vmul.f32 0.125, %v8120_v11  ;;  %v8321_v17 = vmul.f32 %v16554_v42, %v16554_v42  ;;  %v13873_v38 = vpop.eup %13872 }
 0x43b   :  { %v8322_v25 = vmul.f32 %v16556_v21, %v16556_v21  ;;  %v8224_v6 = vmul.f32 0.125, %v8126_v15 }
 0x43c   :  { %13878 = vrsqrt.f32 %v8614_v33  ;;  %v8419_v50 = vsub.f32 %v8223_v31, %v8321_v17 }
 0x43d   :  { %v13875_v26 = vpop.eup %13874  ;;  %v8420_v27 = vsub.f32 %v8224_v6, %v8322_v25 }
 0x43e   :  { %v9405_v58 = vcombine.low %v13873_v38, %v13875_v26  ;;  %v8517_v55 = vmax.f32 %v8419_v50, 0.0  ;;  %v13877_v51 = vpop.eup %13876 }
 0x43f   :  { %v8518_v34 = vmax.f32 %v8420_v27, 0.0 }
 0x440   :  { %v8615_v54 = vadd.f32 1e-05, %v8517_v55  ;;  %v9427_v30 = vrot.slane %v9405_v58, %v14076_v4 }
 0x441   :  { %v8616_v32 = vadd.f32 1e-05, %v8518_v34 }
 0x442   :  { %13880 = vrsqrt.f32 %v8615_v54  ;;  %v8739_v54 = vld [vmem:[#allocation4 + $0xc0] ss:$2 sm:$0x3] }
 0x443   :  { %13882 = vrsqrt.f32 %v8616_v32 }
 0x446   :  { %v13879_v5 = vpop.eup %13878 }
 0x447   :  { %v9406_v35 = vcombine.low %v13877_v51, %v13879_v5 }
 0x449   :  { %v9434_v12 = vrot.slane %v9406_v35, %v14076_v4  ;;  %v16796_v35 = vld [vmem:[#allocation10_spill] sm:$0xff] }
 0x44b   :  { %v9436_v7 = vcombine.low %v9427_v30, %v9434_v12 }
 0x44c   :  { %v13881_v39 = vpop.eup %13880 }
 0x44d   :  { %v13883_v62 = vpop.eup %13882  ;;  %v9450_v57 = vrot.slane %v9436_v7, %v14076_v4 }
 0x44e   :  { %v9452_v52 = vcombine.low %v13881_v39, %v13883_v62 }
 0x44f   :  { %v9451_v56 = vcombine.low %v9443_v20, %v9450_v57  ;;  %v8763_v57 = vld [vmem:[#allocation4 + $0xb1] ss:$2 sm:$0xff] }
 0x450   :  { %v9459_v19 = vrot.slane %v9452_v52, %v14076_v4 }
 0x451   :  { %v9491_v29 = vmul.f32 %v9451_v56, %v8737_v43 }
 0x452   :  { %v9466_v28 = vrot.slane %v9459_v19, %v14076_v4 }
 0x453   :  { %v9861_v40 = vrot.slane %v9491_v29, %v14140_v45  ;;  %v9865_v18 = vrot.slane %v9491_v29, %v14143_v46  ;;  %v9869_v59 = vrot.slane %v9491_v29, %v14146_v47  ;;  %v9873_v23 = vrot.slane %v9491_v29, %v14149_v48 }
 0x454   :  { %v9877_v22 = vrot.slane %v9491_v29, %v14152_v49  ;;  %v9881_v61 = vrot.slane %v9491_v29, %v14191_v24  ;;  %v9885_v11 = vrot.slane %v9491_v29, %v14207_v8  ;;  %v9889_v15 = vrot.slane %v9491_v29, %v14213_v1 }
 0x455   :  { %v10084_v33 = vmul.f32 %v9861_v40, %v16400_v60  ;;  %v10085_v31 = vmul.f32 %v9865_v18, %v16404_v3  ;;  %v10086_v17 = vmul.f32 %v9869_v59, %v16402_v53  ;;  %v10087_v25 = vmul.f32 %v9873_v23, %v16414_v44 }
 0x456   :  { %v10088_v38 = vmul.f32 %v9877_v22, %v16479_v9  ;;  %v10089_v6 = vmul.f32 %v9881_v61, %v16493_v36  ;;  %v10090_v50 = vmul.f32 %v9885_v11, %v16484_v10  ;;  %v10091_v26 = vmul.f32 %v9889_v15, %v16550_v0  ;;  %v16793_v10 = vld [vmem:[#allocation16_spill] sm:$0xff] }
 0x457   :  { %v10731_v27 = vcombine.low %v10084_v33, %v10085_v31  ;;  %v10732_v58 = vcombine.low %v10086_v17, %v10087_v25  ;;  %v10909_v55 = vmul.f32 %v9861_v40, %v16350_v16  ;;  %v10910_v60 = vmul.f32 %v9865_v18, %v16354_v37  ;;  %v16794_v0 = vld [vmem:[#allocation8_spill] sm:$0xff]  ;;  %v16795_v37 = vld [vmem:[#allocation9_spill] sm:$0xff] }
 0x458   :  { %v10733_v34 = vcombine.low %v10088_v38, %v10089_v6  ;;  %v10734_v3 = vcombine.low %v10090_v50, %v10091_v26  ;;  %v10911_v53 = vmul.f32 %v9869_v59, %v16352_v13  ;;  %v10912_v44 = vmul.f32 %v9873_v23, %v16356_v14  ;;  %v8765_v50 = vld [vmem:[#allocation4 + $0xc1] ss:$2 sm:$0x3] }
 0x459   :  { %v10741_v9 = vrot.slane %v10731_v27, %v14076_v4  ;;  %v10748_v36 = vrot.slane %v10732_v58, %v14076_v4  ;;  %v10913_v32 = vmul.f32 %v9877_v22, %v16793_v10  ;;  %v10914_v51 = vmul.f32 %v9881_v61, %v16794_v0 }
 0x45a   :  { %v10755_v5 = vrot.slane %v10733_v34, %v14076_v4  ;;  %v10762_v16 = vrot.slane %v10734_v3, %v14076_v4  ;;  %v10915_v30 = vmul.f32 %v9885_v11, %v16795_v37  ;;  %v10916_v12 = vmul.f32 %v9889_v15, %v16796_v35 }
 0x45b   :  { %v10763_v13 = vcombine.low %v10741_v9, %v10748_v36  ;;  %v9492_v7 = vmul.f32 %v9466_v28, %v8739_v54 }
 0x45c   :  { %v10764_v14 = vcombine.low %v10755_v5, %v10762_v16 }
 0x45d   :  { %v10771_v39 = vrot.slane %v10763_v13, %v14076_v4  ;;  %v9893_v62 = vrot.slane %v9492_v7, %v14140_v45  ;;  %v9897_v63 = vrot.slane %v9492_v7, %v14143_v46 }
 0x45e   :  { %v10778_v20 = vrot.slane %v10764_v14, %v14076_v4 }
 0x45f   :  { %v10092_v43 = vmul.f32 %v9893_v62, %v16554_v42  ;;  %v10093_v52 = vmul.f32 %v9897_v63, %v16556_v21  ;;  %v10917_v56 = vmul.f32 %v9893_v62, %v16514_v2  ;;  %v10918_v19 = vmul.f32 %v9897_v63, %v16516_v41 }
 0x460   :  { %v10779_v29 = vcombine.low %v10771_v39, %v10778_v20 }
 0x461   :  { %v10780_v28 = vcombine.low %v10092_v43, %v10093_v52 }
 0x462   :  { %v10819_v40 = vsub.f32 %v8763_v57, %v10779_v29 }
 0x463   :  { %v10787_v18 = vrot.slane %v10780_v28, %v14076_v4 }
 0x464   :  { %v11287_v59 = vrot.slane %v10819_v40, %v14140_v45  ;;  %v11291_v23 = vrot.slane %v10819_v40, %v14143_v46  ;;  %v11295_v22 = vrot.slane %v10819_v40, %v14146_v47  ;;  %v11299_v61 = vrot.slane %v10819_v40, %v14149_v48 }
 0x465   :  { %v11303_v42 = vrot.slane %v10819_v40, %v14152_v49  ;;  %v11307_v21 = vrot.slane %v10819_v40, %v14191_v24  ;;  %v11311_v2 = vrot.slane %v10819_v40, %v14207_v8  ;;  %v11315_v41 = vrot.slane %v10819_v40, %v14213_v1 }
 0x466   :  { %v11510_v11 = vadd.f32 %v11287_v59, %v10909_v55  ;;  %v11511_v15 = vadd.f32 %v11291_v23, %v10910_v60  ;;  %v11512_v33 = vadd.f32 %v11295_v22, %v10911_v53  ;;  %v11513_v31 = vadd.f32 %v11299_v61, %v10912_v44 }
 0x467   :  { %v11514_v17 = vadd.f32 %v11303_v42, %v10913_v32  ;;  %v11515_v25 = vadd.f32 %v11307_v21, %v10914_v51  ;;  %v11516_v38 = vadd.f32 %v11311_v2, %v10915_v30  ;;  %v11517_v6 = vadd.f32 %v11315_v41, %v10916_v12 }
 0x468   :  { %v11608_v47 = vmax.f32 %v11510_v11, 0.0  ;;  %v11609_v26 = vmax.f32 %v11511_v15, 0.0  ;;  %v11610_v48 = vmax.f32 %v11512_v33, 0.0  ;;  %v11611_v27 = vmax.f32 %v11513_v31, 0.0 }
 0x469   :  { %v11612_v49 = vmax.f32 %v11514_v17, 0.0  ;;  %v11613_v58 = vmax.f32 %v11515_v25, 0.0  ;;  %v11614_v24 = vmax.f32 %v11516_v38, 0.0  ;;  %v11615_v34 = vmax.f32 %v11517_v6, 0.0 }
 0x46a   :  { %11706 = vst [vmem:[%s16652_s3 + $0x2c0] sm:$0xff] %v11608_v47  ;;  %11707 = vst [vmem:[%s16652_s3 + $0x2c8] sm:$0xff] %v11609_v26  ;;  %v10794_v8 = vrot.slane %v10787_v18, %v14076_v4 }
 0x46b   :  { %11708 = vst [vmem:[%s16652_s3 + $0x2d0] sm:$0xff] %v11610_v48  ;;  %11709 = vst [vmem:[%s16652_s3 + $0x2d8] sm:$0xff] %v11611_v27 }
 0x46c   :  { %11710 = vst [vmem:[%s16652_s3 + $0x2e0] sm:$0xff] %v11612_v49  ;;  %11711 = vst [vmem:[%s16652_s3 + $0x2e8] sm:$0xff] %v11613_v58  ;;  %v10820_v1 = vsub.f32 %v8765_v50, %v10794_v8 }
 0x46d   :  { %11712 = vst [vmem:[%s16652_s3 + $0x2f0] sm:$0xff] %v11614_v24  ;;  %11713 = vst [vmem:[%s16652_s3 + $0x2f8] sm:$0xff] %v11615_v34 }
 0x46e   :  { %v11319_v55 = vrot.slane %v10820_v1, %v14140_v45  ;;  %v11323_v4 = vrot.slane %v10820_v1, %v14143_v46 }
 0x470   :  { %v11518_v60 = vadd.f32 %v11319_v55, %v10917_v56  ;;  %v11519_v3 = vadd.f32 %v11323_v4, %v10918_v19 }
 0x472   :  { %v11616_v53 = vmax.f32 %v11518_v60, 0.0  ;;  %v11617_v44 = vmax.f32 %v11519_v3, 0.0 }
 0x474   :  { %11714 = vst [vmem:[%s16652_s3 + $0x300] sm:$0xff] %v11616_v53  ;;  %11715 = vst [vmem:[%s16652_s3 + $0x308] sm:$0xff] %v11617_v44 }
 0x475   :  { %11720 = vsyncpa [#allocation3], 1 }
 0x476   :  { %11721 = vsyncpa [#allocation5], 1 }

</bundles_post_ra>
